<compile_context>
chip_gen: v6e
topology: v6e:2x2x1
jax: 0.10.0
libtpu: 0.0.40
codegen_flags: <defaults>
</compile_context>

<pallas_src>
import functools
import math

import jax
import jax.numpy as jnp
from jax.experimental import pallas as pl
from jax.experimental.pallas import tpu as pltpu


# --------------------------- model configuration ---------------------------

CFG = dict(
    image_size=16,
    patch_size=8,
    in_channels=3,
    width=32,       # ViT hidden size
    layers=2,       # transformer depth
    heads=4,
    output_dim=16,  # model.visual.output_dim
    num_classes=10,
)


def _round_up(x, m):
    return (x + m - 1) // m * m


# ------------------------------ fused kernel -------------------------------


def _masked_layer_norm(x, g, b, mask, n_real, eps=1e-5):
    """LayerNorm over the (lane-padded) last dim; stats use only real columns.

    `mask` is 1.0 on the first `n_real` columns, 0.0 on the padding; gamma/beta
    are zero-padded, so padded output columns stay exactly zero.
    """
    inv_n = 1.0 / n_real
    xm = x * mask
    mean = jnp.sum(xm, axis=-1, keepdims=True) * inv_n
    xc = (x - mean) * mask
    var = jnp.sum(xc * xc, axis=-1, keepdims=True) * inv_n
    return xc * jax.lax.rsqrt(var + eps) * g + b


def _mm3(x3, w2):
    """[BT, S, K] x [K, N] -> [BT, S, N] via one flattened 2-D MXU matmul."""
    bt, s, k = x3.shape
    n = w2.shape[1]
    y = jnp.dot(x3.reshape(bt * s, k), w2, preferred_element_type=jnp.float32)
    return y.reshape(bt, s, n)


def _clip_forward_kernel(
    # per-batch-tile input (grid over batch tiles)
    patches_ref,                       # [BT, S_PAD, CPP_PAD]   bf16
    # visual-transformer parameters (full blocks, resident in VMEM)
    conv1_w_ref,                       # [CPP_PAD, W_PAD]       bf16
    cls_pos_ref,                       # [S_PAD, W_PAD]         f32 (cls emb folded in row 0)
    ln_pre_g_ref, ln_pre_b_ref,        # [1, W_PAD]             f32
    ln1_g_ref, ln1_b_ref,              # [L, 1, W_PAD]          f32
    wq_ref, wk_ref, wv_ref,            # [L*H, W_PAD, DH]       bf16
    bq_ref, bk_ref, bv_ref,            # [L*H, 1, DH]           f32
    ow_ref,                            # [L*H, DH, W_PAD]       bf16
    ob_ref,                            # [L, 1, W_PAD]          f32
    ln2_g_ref, ln2_b_ref,              # [L, 1, W_PAD]          f32
    fc_w_ref,                          # [L, W_PAD, FF_PAD]     bf16
    fc_b_ref,                          # [L, 1, FF_PAD]         f32
    pj_w_ref,                          # [L, FF_PAD, W_PAD]     bf16
    pj_b_ref,                          # [L, 1, W_PAD]          f32
    ln_post_g_ref, ln_post_b_ref,      # [1, W_PAD]             f32
    vproj_ref,                         # [W_PAD, OD_PAD]        bf16
    cls_w_ref,                         # [OD_PAD, NC_PAD]       bf16
    cls_b_ref,                         # [1, NC_PAD]            f32
    # output
    o_ref,                             # [BT, NC_PAD]           f32
    *, layers, heads, width, seq, w_pad, seq_pad, scale,
):
    f32 = jnp.float32
    bf16 = jnp.bfloat16

    # Masks: padded width columns (LayerNorm stats) and padded key positions.
    col = jax.lax.broadcasted_iota(jnp.int32, (1, w_pad), 1)
    wmask = (col < width).astype(f32)                      # [1, W_PAD]
    kcol = jax.lax.broadcasted_iota(jnp.int32, (1, 1, seq_pad), 2)
    kvalid = kcol < seq                                    # [1, 1, S_PAD]

    # ---- self.model.encode_image(x) (no_grad == inference) for the tile ----
    # conv1 (kernel == stride == patch, no bias) as one flattened im2col matmul.
    # Row 0 of each image's patch slab is a zero "class-token slot"; cls_pos
    # carries class_embedding + positional embedding.
    tok = _mm3(patches_ref[...], conv1_w_ref[...])         # [BT, S_PAD, W_PAD]
    h = tok + cls_pos_ref[...]
    h = _masked_layer_norm(h, ln_pre_g_ref[...], ln_pre_b_ref[...], wmask, width)

    for l in range(layers):
        # ---------------- residual attention sub-block ----------------
        y = _masked_layer_norm(h, ln1_g_ref[l], ln1_b_ref[l], wmask, width)
        y16 = y.astype(bf16)
        attn = jnp.zeros_like(h)                           # out-proj accumulator
        for hh in range(heads):
            i = l * heads + hh
            q = _mm3(y16, wq_ref[i]) + bq_ref[i]           # [BT, S_PAD, DH] f32
            k = _mm3(y16, wk_ref[i]) + bk_ref[i]
            v = _mm3(y16, wv_ref[i]) + bv_ref[i]
            s = jnp.einsum('bqd,bkd->bqk', q.astype(bf16), k.astype(bf16),
                           preferred_element_type=f32) * scale
            s = jnp.where(kvalid, s, -1e30)                # mask padded key rows
            m = jnp.max(s, axis=-1, keepdims=True)
            p = jnp.exp(s - m)
            # NOTE: approx reciprocal (EUP) - inference-grade, not bit-exact.
            p = p * pl.reciprocal(jnp.sum(p, axis=-1, keepdims=True), approx=True)
            ho = jnp.einsum('bqk,bkd->bqd', p.astype(bf16), v.astype(bf16),
                            preferred_element_type=f32)    # [BT, S_PAD, DH]
            # Head-merge fused into the out-projection: accumulate partials.
            attn = attn + _mm3(ho.astype(bf16), ow_ref[i])
        h = h + attn + ob_ref[l]

        # ---------------- residual MLP sub-block ----------------
        y = _masked_layer_norm(h, ln2_g_ref[l], ln2_b_ref[l], wmask, width)
        y = _mm3(y.astype(bf16), fc_w_ref[l]) + fc_b_ref[l]
        y = y * jax.nn.sigmoid(1.702 * y)                  # QuickGELU
        y = _mm3(y.astype(bf16), pj_w_ref[l]) + pj_b_ref[l]
        h = h + y

    # ln_post on the class token, visual projection (no bias), classifier.
    cls_tok = _masked_layer_norm(h[:, 0, :], ln_post_g_ref[...], ln_post_b_ref[...],
                                 wmask, width)             # [BT, W_PAD]
    feats = jnp.dot(cls_tok.astype(bf16), vproj_ref[...],
                    preferred_element_type=f32)            # [BT, OD_PAD]
    # features.float() is identity (accumulated in f32).
    logits = jnp.dot(feats.astype(bf16), cls_w_ref[...],
                     preferred_element_type=f32) + cls_b_ref[...]
    o_ref[...] = logits                                    # lane-dense [BT, 128]


# ------------------------------- parameters --------------------------------


def init_params(key, cfg):
    """Deterministic synthetic parameters (NOT a checkpoint load)."""
    w, od, nc = cfg["width"], cfg["output_dim"], cfg["num_classes"]
    p, c = cfg["patch_size"], cfg["in_channels"]
    grid = cfg["image_size"] // p
    seq = grid * grid + 1
    keys = iter(jax.random.split(key, 64))

    def nrm(shape, scale=0.02):
        return scale * jax.random.normal(next(keys), shape, dtype=jnp.float32)

    params = {
        "conv1_w": nrm((c * p * p, w)),        # CLIP conv1 (no bias), as patch-matmul
        "class_embedding": nrm((w,)),
        "pos_embedding": nrm((seq, w)),
        "ln_pre_g": jnp.ones((1, w), jnp.float32),
        "ln_pre_b": jnp.zeros((1, w), jnp.float32),
        "ln_post_g": jnp.ones((1, w), jnp.float32),
        "ln_post_b": jnp.zeros((1, w), jnp.float32),
        "visual_proj": nrm((w, od)),           # x @ proj (no bias)
        "cls_w": nrm((od, nc)),                # torch Linear, stored [in, out]
        "cls_b": jnp.zeros((1, nc), jnp.float32),
        "blocks": [],
    }
    for _ in range(cfg["layers"]):
        params["blocks"].append({
            "ln1_g": jnp.ones((1, w), jnp.float32),
            "ln1_b": jnp.zeros((1, w), jnp.float32),
            "qkv_w": nrm((w, 3 * w)),          # in_proj (q|k|v), stored [in, out]
            "qkv_b": jnp.zeros((1, 3 * w), jnp.float32),
            "out_w": nrm((w, w)),
            "out_b": jnp.zeros((1, w), jnp.float32),
            "ln2_g": jnp.ones((1, w), jnp.float32),
            "ln2_b": jnp.zeros((1, w), jnp.float32),
            "fc_w": nrm((w, 4 * w)),
            "fc_b": jnp.zeros((1, 4 * w), jnp.float32),
            "proj_w": nrm((4 * w, w)),
            "proj_b": jnp.zeros((1, w), jnp.float32),
        })
    return params


# ------------------------------- forward pass -------------------------------


def clip_finetuner_forward(params, x, cfg, batch_tile=8):
    """x: [B, C, H, W] NCHW float32 -> logits [B, num_classes] float32."""
    B, C, H, _ = x.shape
    p = cfg["patch_size"]
    w = cfg["width"]
    heads = cfg["heads"]
    nc = cfg["num_classes"]
    L = cfg["layers"]
    od = cfg["output_dim"]
    g = H // p
    n_tok = g * g
    seq = n_tok + 1
    dh = w // heads
    cpp = C * p * p
    ff = 4 * w

    SEQ_PAD = _round_up(seq, 8)
    CPP_PAD = _round_up(cpp, 128)
    W_PAD = _round_up(w, 128)
    FF_PAD = _round_up(ff, 128)
    OD_PAD = _round_up(od, 128)
    NC_PAD = _round_up(nc, 128)
    BT = batch_tile
    B_PAD = _round_up(B, BT)

    bf16 = jnp.bfloat16

    # ---- im2col for conv1 (kernel == stride == patch): layout glue in JAX ----
    patches = (x.reshape(B, C, g, p, g, p)
                .transpose(0, 2, 4, 1, 3, 5)
                .reshape(B, n_tok, cpp))
    pat = jnp.zeros((B_PAD, SEQ_PAD, CPP_PAD), jnp.float32)
    pat = pat.at[:B, 1:seq, :cpp].set(patches)       # row 0 = class-token slot
    pat = pat.astype(bf16)

    def padw(a, shape):
        return jnp.pad(a, [(0, t - s) for s, t in zip(a.shape, shape)])

    # class embedding folded into row 0 of the positional table (padded, f32).
    cls_pos = jnp.zeros((SEQ_PAD, W_PAD), jnp.float32)
    cls_pos = cls_pos.at[0, :w].set(params["class_embedding"] + params["pos_embedding"][0])
    cls_pos = cls_pos.at[1:seq, :w].set(params["pos_embedding"][1:])

    conv1_w = padw(params["conv1_w"], (CPP_PAD, W_PAD)).astype(bf16)

    blocks = params["blocks"]

    def stack(fn):
        return jnp.stack([fn(b) for b in blocks], axis=0)

    # Per-(layer, head) projection weights with a merged leading dim [L*H, ...].
    def qkv_slice(blk, which):                       # which: 0=q, 1=k, 2=v
        wm = blk["qkv_w"][:, which * w:(which + 1) * w]        # [w, w] ([in, out])
        wm = wm.reshape(w, heads, dh).transpose(1, 0, 2)       # [H, w, DH]
        return jnp.pad(wm, ((0, 0), (0, W_PAD - w), (0, 0)))   # [H, W_PAD, DH]

    def qkv_bias(blk, which):
        return blk["qkv_b"][0, which * w:(which + 1) * w].reshape(heads, 1, dh)

    def out_slice(blk):
        om = blk["out_w"].reshape(heads, dh, w)                # [H, DH, w]
        return jnp.pad(om, ((0, 0), (0, 0), (0, W_PAD - w)))   # [H, DH, W_PAD]

    wq = jnp.concatenate([qkv_slice(b, 0) for b in blocks], axis=0).astype(bf16)
    wk = jnp.concatenate([qkv_slice(b, 1) for b in blocks], axis=0).astype(bf16)
    wv = jnp.concatenate([qkv_slice(b, 2) for b in blocks], axis=0).astype(bf16)
    bq = jnp.concatenate([qkv_bias(b, 0) for b in blocks], axis=0)
    bk = jnp.concatenate([qkv_bias(b, 1) for b in blocks], axis=0)
    bv = jnp.concatenate([qkv_bias(b, 2) for b in blocks], axis=0)
    ow = jnp.concatenate([out_slice(b) for b in blocks], axis=0).astype(bf16)

    ln1_g = stack(lambda b: padw(b["ln1_g"], (1, W_PAD)))
    ln1_b = stack(lambda b: padw(b["ln1_b"], (1, W_PAD)))
    ob = stack(lambda b: padw(b["out_b"], (1, W_PAD)))
    ln2_g = stack(lambda b: padw(b["ln2_g"], (1, W_PAD)))
    ln2_b = stack(lambda b: padw(b["ln2_b"], (1, W_PAD)))
    fc_w = stack(lambda b: padw(b["fc_w"], (W_PAD, FF_PAD))).astype(bf16)
    fc_b = stack(lambda b: padw(b["fc_b"], (1, FF_PAD)))
    pj_w = stack(lambda b: padw(b["proj_w"], (FF_PAD, W_PAD))).astype(bf16)
    pj_b = stack(lambda b: padw(b["proj_b"], (1, W_PAD)))

    ln_pre_g = padw(params["ln_pre_g"], (1, W_PAD))
    ln_pre_b = padw(params["ln_pre_b"], (1, W_PAD))
    ln_post_g = padw(params["ln_post_g"], (1, W_PAD))
    ln_post_b = padw(params["ln_post_b"], (1, W_PAD))
    vproj = padw(params["visual_proj"], (W_PAD, OD_PAD)).astype(bf16)
    cls_w = padw(params["cls_w"], (OD_PAD, NC_PAD)).astype(bf16)
    cls_b = padw(params["cls_b"], (1, NC_PAD))

    args = (pat, conv1_w, cls_pos, ln_pre_g, ln_pre_b,
            ln1_g, ln1_b, wq, wk, wv, bq, bk, bv, ow, ob,
            ln2_g, ln2_b, fc_w, fc_b, pj_w, pj_b,
            ln_post_g, ln_post_b, vproj, cls_w, cls_b)

    # All weights are full blocks resident in VMEM (index never changes across
    # the batch grid).  TODO(synk): at real CLIP sizes, stream per-layer weights
    # over an extra "arbitrary" grid axis and single-buffer constants
    # (pipeline_mode=pl.Buffered(1)) - required on v7x's 64 MiB VMEM.
    def full_spec(a):
        nd = a.ndim
        return pl.BlockSpec(a.shape, lambda b, _nd=nd: (0,) * _nd)

    in_specs = [pl.BlockSpec((BT, SEQ_PAD, CPP_PAD), lambda b: (b, 0, 0))]
    in_specs += [full_spec(a) for a in args[1:]]

    kernel = functools.partial(
        _clip_forward_kernel,
        layers=L, heads=heads, width=w, seq=seq,
        w_pad=W_PAD, seq_pad=SEQ_PAD, scale=1.0 / math.sqrt(dh))

    arg_bytes = sum(int(a.size) * a.dtype.itemsize for a in args)
    out_bytes = B_PAD * NC_PAD * 4
    flops = 2 * B_PAD * (
        SEQ_PAD * CPP_PAD * W_PAD
        + L * (3 * heads * SEQ_PAD * W_PAD * dh
               + 2 * heads * SEQ_PAD * SEQ_PAD * dh
               + heads * SEQ_PAD * dh * W_PAD
               + 2 * SEQ_PAD * W_PAD * FF_PAD)
        + W_PAD * OD_PAD + OD_PAD * NC_PAD)
    transcendentals = B_PAD * L * (heads * SEQ_PAD * SEQ_PAD + SEQ_PAD * FF_PAD)

    out = pl.pallas_call(
        kernel,
        out_shape=jax.ShapeDtypeStruct((B_PAD, NC_PAD), jnp.float32),
        grid=(B_PAD // BT,),
        in_specs=in_specs,
        out_specs=pl.BlockSpec((BT, NC_PAD), lambda b: (b, 0)),
        compiler_params=pltpu.CompilerParams(
            dimension_semantics=("parallel",),   # 2 TCs on v7x split batch tiles
            vmem_limit_bytes=32 * 1024 * 1024),
        cost_estimate=pl.CostEstimate(
            flops=flops, transcendentals=transcendentals,
            bytes_accessed=arg_bytes + out_bytes),
    )(*args)
    return out[:B, :nc]


if __name__ == "__main__":
    key = jax.random.PRNGKey(0)
    pkey, xkey = jax.random.split(key)
    params = init_params(pkey, CFG)
    # Batch of 16 -> two batch tiles of 8 (even split across v7x's 2 TCs).
    x = jax.random.normal(
        xkey,
        (16, CFG["in_channels"], CFG["image_size"], CFG["image_size"]),
        dtype=jnp.float32,
    )
    logits = clip_finetuner_forward(params, x, CFG, batch_tile=8)
    jax.block_until_ready(logits)
    assert logits.shape == (16, CFG["num_classes"])
    assert logits.dtype == jnp.float32
    assert bool(jnp.all(jnp.isfinite(logits)))
    print("KERNEL_OK")
</pallas_src>

<mosaic_0001>
module attributes {stable_mosaic.version = 11 : i64} {
  func.func @_clip_forward_kernel(%arg0: i32, %arg1: memref<8x8x256xbf16, #tpu.memory_space<vmem>>, %arg2: memref<256x128xbf16, #tpu.memory_space<vmem>>, %arg3: memref<8x128xf32, #tpu.memory_space<vmem>>, %arg4: memref<1x128xf32, #tpu.memory_space<vmem>>, %arg5: memref<1x128xf32, #tpu.memory_space<vmem>>, %arg6: memref<2x1x128xf32, #tpu.memory_space<vmem>>, %arg7: memref<2x1x128xf32, #tpu.memory_space<vmem>>, %arg8: memref<8x128x8xbf16, #tpu.memory_space<vmem>>, %arg9: memref<8x128x8xbf16, #tpu.memory_space<vmem>>, %arg10: memref<8x128x8xbf16, #tpu.memory_space<vmem>>, %arg11: memref<8x1x8xf32, #tpu.memory_space<vmem>>, %arg12: memref<8x1x8xf32, #tpu.memory_space<vmem>>, %arg13: memref<8x1x8xf32, #tpu.memory_space<vmem>>, %arg14: memref<8x8x128xbf16, #tpu.memory_space<vmem>>, %arg15: memref<2x1x128xf32, #tpu.memory_space<vmem>>, %arg16: memref<2x1x128xf32, #tpu.memory_space<vmem>>, %arg17: memref<2x1x128xf32, #tpu.memory_space<vmem>>, %arg18: memref<2x128x128xbf16, #tpu.memory_space<vmem>>, %arg19: memref<2x1x128xf32, #tpu.memory_space<vmem>>, %arg20: memref<2x128x128xbf16, #tpu.memory_space<vmem>>, %arg21: memref<2x1x128xf32, #tpu.memory_space<vmem>>, %arg22: memref<1x128xf32, #tpu.memory_space<vmem>>, %arg23: memref<1x128xf32, #tpu.memory_space<vmem>>, %arg24: memref<128x128xbf16, #tpu.memory_space<vmem>>, %arg25: memref<128x128xbf16, #tpu.memory_space<vmem>>, %arg26: memref<1x128xf32, #tpu.memory_space<vmem>>, %arg27: memref<8x128xf32, #tpu.memory_space<vmem>>) attributes {dimension_semantics = [#tpu.dimension_semantics<parallel>], iteration_bounds = array<i64: 2>, scalar_prefetch = 0 : i64, scratch_operands = 0 : i64, tpu.core_type = #tpu.core_type<tc>, window_params = [{transform_indices = @transform_0, window_bounds = array<i64: 8, 8, 256>}, {pipeline_mode = #tpu.pipeline_mode<synchronous>, transform_indices = @transform_1, window_bounds = array<i64: 256, 128>}, {pipeline_mode = #tpu.pipeline_mode<synchronous>, transform_indices = @transform_2, window_bounds = array<i64: 8, 128>}, {pipeline_mode = #tpu.pipeline_mode<synchronous>, transform_indices = @transform_3, window_bounds = array<i64: 1, 128>}, {pipeline_mode = #tpu.pipeline_mode<synchronous>, transform_indices = @transform_4, window_bounds = array<i64: 1, 128>}, {pipeline_mode = #tpu.pipeline_mode<synchronous>, transform_indices = @transform_5, window_bounds = array<i64: 2, 1, 128>}, {pipeline_mode = #tpu.pipeline_mode<synchronous>, transform_indices = @transform_6, window_bounds = array<i64: 2, 1, 128>}, {pipeline_mode = #tpu.pipeline_mode<synchronous>, transform_indices = @transform_7, window_bounds = array<i64: 8, 128, 8>}, {pipeline_mode = #tpu.pipeline_mode<synchronous>, transform_indices = @transform_8, window_bounds = array<i64: 8, 128, 8>}, {pipeline_mode = #tpu.pipeline_mode<synchronous>, transform_indices = @transform_9, window_bounds = array<i64: 8, 128, 8>}, {pipeline_mode = #tpu.pipeline_mode<synchronous>, transform_indices = @transform_10, window_bounds = array<i64: 8, 1, 8>}, {pipeline_mode = #tpu.pipeline_mode<synchronous>, transform_indices = @transform_11, window_bounds = array<i64: 8, 1, 8>}, {pipeline_mode = #tpu.pipeline_mode<synchronous>, transform_indices = @transform_12, window_bounds = array<i64: 8, 1, 8>}, {pipeline_mode = #tpu.pipeline_mode<synchronous>, transform_indices = @transform_13, window_bounds = array<i64: 8, 8, 128>}, {pipeline_mode = #tpu.pipeline_mode<synchronous>, transform_indices = @transform_14, window_bounds = array<i64: 2, 1, 128>}, {pipeline_mode = #tpu.pipeline_mode<synchronous>, transform_indices = @transform_15, window_bounds = array<i64: 2, 1, 128>}, {pipeline_mode = #tpu.pipeline_mode<synchronous>, transform_indices = @transform_16, window_bounds = array<i64: 2, 1, 128>}, {pipeline_mode = #tpu.pipeline_mode<synchronous>, transform_indices = @transform_17, window_bounds = array<i64: 2, 128, 128>}, {pipeline_mode = #tpu.pipeline_mode<synchronous>, transform_indices = @transform_18, window_bounds = array<i64: 2, 1, 128>}, {pipeline_mode = #tpu.pipeline_mode<synchronous>, transform_indices = @transform_19, window_bounds = array<i64: 2, 128, 128>}, {pipeline_mode = #tpu.pipeline_mode<synchronous>, transform_indices = @transform_20, window_bounds = array<i64: 2, 1, 128>}, {pipeline_mode = #tpu.pipeline_mode<synchronous>, transform_indices = @transform_21, window_bounds = array<i64: 1, 128>}, {pipeline_mode = #tpu.pipeline_mode<synchronous>, transform_indices = @transform_22, window_bounds = array<i64: 1, 128>}, {pipeline_mode = #tpu.pipeline_mode<synchronous>, transform_indices = @transform_23, window_bounds = array<i64: 128, 128>}, {pipeline_mode = #tpu.pipeline_mode<synchronous>, transform_indices = @transform_24, window_bounds = array<i64: 128, 128>}, {pipeline_mode = #tpu.pipeline_mode<synchronous>, transform_indices = @transform_25, window_bounds = array<i64: 1, 128>}, {transform_indices = @transform_26, window_bounds = array<i64: 8, 128>}]} {
    %0 = tpu.iota {dimensions = array<i32: 1>} : vector<1x128xi32>
    %c32_i32 = arith.constant 32 : i32
    %1 = vector.broadcast %c32_i32 : i32 to vector<1x128xi32>
    %2 = arith.cmpi slt, %0, %1 : vector<1x128xi32>
    %3 = arith.extui %2 : vector<1x128xi1> to vector<1x128xi32>
    %4 = arith.sitofp %3 : vector<1x128xi32> to vector<1x128xf32>
    %5 = tpu.iota {dimensions = array<i32: 2>} : vector<1x1x8xi32>
    %c5_i32 = arith.constant 5 : i32
    %6 = vector.broadcast %c5_i32 : i32 to vector<1x1x8xi32>
    %7 = arith.cmpi slt, %5, %6 : vector<1x1x8xi32>
    %c0 = arith.constant 0 : index
    %c0_0 = arith.constant 0 : index
    %c0_1 = arith.constant 0 : index
    %8 = vector.load %arg1[%c0, %c0_0, %c0_1] : memref<8x8x256xbf16, #tpu.memory_space<vmem>>, vector<8x8x256xbf16>
    %c0_2 = arith.constant 0 : index
    %c0_3 = arith.constant 0 : index
    %9 = vector.load %arg2[%c0_2, %c0_3] : memref<256x128xbf16, #tpu.memory_space<vmem>>, vector<256x128xbf16>
    %10 = vector.shape_cast %8 : vector<8x8x256xbf16> to vector<64x256xbf16>
    %cst = arith.constant dense<0.000000e+00> : vector<64x128xf32>
    %11 = tpu.matmul %10, %9, %cst {dimension_numbers = #tpu.dot_dimension_numbers<[1], [0], [0], [1], [0, 0, 1, 1], [], []>} : vector<64x256xbf16>, vector<256x128xbf16>, vector<64x128xf32> -> vector<64x128xf32>
    %12 = vector.shape_cast %11 : vector<64x128xf32> to vector<8x8x128xf32>
    %c0_4 = arith.constant 0 : index
    %c0_5 = arith.constant 0 : index
    %13 = vector.load %arg3[%c0_4, %c0_5] : memref<8x128xf32, #tpu.memory_space<vmem>>, vector<8x128xf32>
    %14 = vector.shape_cast %13 : vector<8x128xf32> to vector<1x8x128xf32>
    %15 = vector.broadcast %14 : vector<1x8x128xf32> to vector<8x8x128xf32>
    %16 = arith.addf %12, %15 : vector<8x8x128xf32>
    %c0_6 = arith.constant 0 : index
    %c0_7 = arith.constant 0 : index
    %17 = vector.load %arg4[%c0_6, %c0_7] : memref<1x128xf32, #tpu.memory_space<vmem>>, vector<1x128xf32>
    %c0_8 = arith.constant 0 : index
    %c0_9 = arith.constant 0 : index
    %18 = vector.load %arg5[%c0_8, %c0_9] : memref<1x128xf32, #tpu.memory_space<vmem>>, vector<1x128xf32>
    %19 = vector.shape_cast %4 : vector<1x128xf32> to vector<1x1x128xf32>
    %20 = vector.broadcast %19 : vector<1x1x128xf32> to vector<8x8x128xf32>
    %21 = arith.mulf %16, %20 : vector<8x8x128xf32>
    %cst_10 = arith.constant dense<0.000000e+00> : vector<8x8xf32>
    %22 = vector.multi_reduction <add>, %21, %cst_10 [2] : vector<8x8x128xf32> to vector<8x8xf32>
    %23 = vector.shape_cast %22 : vector<8x8xf32> to vector<8x8x1xf32>
    %cst_11 = arith.constant 3.125000e-02 : f32
    %24 = vector.broadcast %cst_11 : f32 to vector<8x8x1xf32>
    %25 = arith.mulf %23, %24 : vector<8x8x1xf32>
    %26 = vector.broadcast %25 : vector<8x8x1xf32> to vector<8x8x128xf32>
    %27 = arith.subf %16, %26 : vector<8x8x128xf32>
    %28 = vector.shape_cast %4 : vector<1x128xf32> to vector<1x1x128xf32>
    %29 = vector.broadcast %28 : vector<1x1x128xf32> to vector<8x8x128xf32>
    %30 = arith.mulf %27, %29 : vector<8x8x128xf32>
    %31 = arith.mulf %30, %30 : vector<8x8x128xf32>
    %cst_12 = arith.constant dense<0.000000e+00> : vector<8x8xf32>
    %32 = vector.multi_reduction <add>, %31, %cst_12 [2] : vector<8x8x128xf32> to vector<8x8xf32>
    %33 = vector.shape_cast %32 : vector<8x8xf32> to vector<8x8x1xf32>
    %cst_13 = arith.constant 3.125000e-02 : f32
    %34 = vector.broadcast %cst_13 : f32 to vector<8x8x1xf32>
    %35 = arith.mulf %33, %34 : vector<8x8x1xf32>
    %cst_14 = arith.constant 9.99999974E-6 : f32
    %36 = vector.broadcast %cst_14 : f32 to vector<8x8x1xf32>
    %37 = arith.addf %35, %36 : vector<8x8x1xf32>
    %38 = math.rsqrt %37 : vector<8x8x1xf32>
    %39 = vector.broadcast %38 : vector<8x8x1xf32> to vector<8x8x128xf32>
    %40 = arith.mulf %30, %39 : vector<8x8x128xf32>
    %41 = vector.shape_cast %17 : vector<1x128xf32> to vector<1x1x128xf32>
    %42 = vector.broadcast %41 : vector<1x1x128xf32> to vector<8x8x128xf32>
    %43 = arith.mulf %40, %42 : vector<8x8x128xf32>
    %44 = vector.shape_cast %18 : vector<1x128xf32> to vector<1x1x128xf32>
    %45 = vector.broadcast %44 : vector<1x1x128xf32> to vector<8x8x128xf32>
    %46 = arith.addf %43, %45 : vector<8x8x128xf32>
    %c0_15 = arith.constant 0 : index
    %c0_16 = arith.constant 0 : index
    %c0_17 = arith.constant 0 : index
    %47 = vector.load %arg6[%c0_15, %c0_16, %c0_17] : memref<2x1x128xf32, #tpu.memory_space<vmem>>, vector<1x1x128xf32>
    %48 = vector.shape_cast %47 : vector<1x1x128xf32> to vector<1x128xf32>
    %c0_18 = arith.constant 0 : index
    %c0_19 = arith.constant 0 : index
    %c0_20 = arith.constant 0 : index
    %49 = vector.load %arg7[%c0_18, %c0_19, %c0_20] : memref<2x1x128xf32, #tpu.memory_space<vmem>>, vector<1x1x128xf32>
    %50 = vector.shape_cast %49 : vector<1x1x128xf32> to vector<1x128xf32>
    %51 = vector.shape_cast %4 : vector<1x128xf32> to vector<1x1x128xf32>
    %52 = vector.broadcast %51 : vector<1x1x128xf32> to vector<8x8x128xf32>
    %53 = arith.mulf %46, %52 : vector<8x8x128xf32>
    %cst_21 = arith.constant dense<0.000000e+00> : vector<8x8xf32>
    %54 = vector.multi_reduction <add>, %53, %cst_21 [2] : vector<8x8x128xf32> to vector<8x8xf32>
    %55 = vector.shape_cast %54 : vector<8x8xf32> to vector<8x8x1xf32>
    %cst_22 = arith.constant 3.125000e-02 : f32
    %56 = vector.broadcast %cst_22 : f32 to vector<8x8x1xf32>
    %57 = arith.mulf %55, %56 : vector<8x8x1xf32>
    %58 = vector.broadcast %57 : vector<8x8x1xf32> to vector<8x8x128xf32>
    %59 = arith.subf %46, %58 : vector<8x8x128xf32>
    %60 = vector.shape_cast %4 : vector<1x128xf32> to vector<1x1x128xf32>
    %61 = vector.broadcast %60 : vector<1x1x128xf32> to vector<8x8x128xf32>
    %62 = arith.mulf %59, %61 : vector<8x8x128xf32>
    %63 = arith.mulf %62, %62 : vector<8x8x128xf32>
    %cst_23 = arith.constant dense<0.000000e+00> : vector<8x8xf32>
    %64 = vector.multi_reduction <add>, %63, %cst_23 [2] : vector<8x8x128xf32> to vector<8x8xf32>
    %65 = vector.shape_cast %64 : vector<8x8xf32> to vector<8x8x1xf32>
    %cst_24 = arith.constant 3.125000e-02 : f32
    %66 = vector.broadcast %cst_24 : f32 to vector<8x8x1xf32>
    %67 = arith.mulf %65, %66 : vector<8x8x1xf32>
    %cst_25 = arith.constant 9.99999974E-6 : f32
    %68 = vector.broadcast %cst_25 : f32 to vector<8x8x1xf32>
    %69 = arith.addf %67, %68 : vector<8x8x1xf32>
    %70 = math.rsqrt %69 : vector<8x8x1xf32>
    %71 = vector.broadcast %70 : vector<8x8x1xf32> to vector<8x8x128xf32>
    %72 = arith.mulf %62, %71 : vector<8x8x128xf32>
    %73 = vector.shape_cast %48 : vector<1x128xf32> to vector<1x1x128xf32>
    %74 = vector.broadcast %73 : vector<1x1x128xf32> to vector<8x8x128xf32>
    %75 = arith.mulf %72, %74 : vector<8x8x128xf32>
    %76 = vector.shape_cast %50 : vector<1x128xf32> to vector<1x1x128xf32>
    %77 = vector.broadcast %76 : vector<1x1x128xf32> to vector<8x8x128xf32>
    %78 = arith.addf %75, %77 : vector<8x8x128xf32>
    %79 = arith.truncf %78 : vector<8x8x128xf32> to vector<8x8x128xbf16>
    %cst_26 = arith.constant 0.000000e+00 : f32
    %80 = vector.broadcast %cst_26 : f32 to vector<8x8x128xf32>
    %c0_27 = arith.constant 0 : index
    %c0_28 = arith.constant 0 : index
    %c0_29 = arith.constant 0 : index
    %81 = vector.load %arg8[%c0_27, %c0_28, %c0_29] : memref<8x128x8xbf16, #tpu.memory_space<vmem>>, vector<1x128x8xbf16>
    %82 = vector.shape_cast %81 : vector<1x128x8xbf16> to vector<128x8xbf16>
    %83 = vector.shape_cast %79 : vector<8x8x128xbf16> to vector<64x128xbf16>
    %cst_30 = arith.constant dense<0.000000e+00> : vector<64x8xf32>
    %84 = tpu.matmul %83, %82, %cst_30 {dimension_numbers = #tpu.dot_dimension_numbers<[1], [0], [0], [1], [0, 0, 1, 1], [], []>} : vector<64x128xbf16>, vector<128x8xbf16>, vector<64x8xf32> -> vector<64x8xf32>
    %85 = vector.shape_cast %84 : vector<64x8xf32> to vector<8x8x8xf32>
    %c0_31 = arith.constant 0 : index
    %c0_32 = arith.constant 0 : index
    %c0_33 = arith.constant 0 : index
    %86 = vector.load %arg11[%c0_31, %c0_32, %c0_33] : memref<8x1x8xf32, #tpu.memory_space<vmem>>, vector<1x1x8xf32>
    %87 = vector.shape_cast %86 : vector<1x1x8xf32> to vector<1x8xf32>
    %88 = vector.shape_cast %87 : vector<1x8xf32> to vector<1x1x8xf32>
    %89 = vector.broadcast %88 : vector<1x1x8xf32> to vector<8x8x8xf32>
    %90 = arith.addf %85, %89 : vector<8x8x8xf32>
    %c0_34 = arith.constant 0 : index
    %c0_35 = arith.constant 0 : index
    %c0_36 = arith.constant 0 : index
    %91 = vector.load %arg9[%c0_34, %c0_35, %c0_36] : memref<8x128x8xbf16, #tpu.memory_space<vmem>>, vector<1x128x8xbf16>
    %92 = vector.shape_cast %91 : vector<1x128x8xbf16> to vector<128x8xbf16>
    %93 = vector.shape_cast %79 : vector<8x8x128xbf16> to vector<64x128xbf16>
    %cst_37 = arith.constant dense<0.000000e+00> : vector<64x8xf32>
    %94 = tpu.matmul %93, %92, %cst_37 {dimension_numbers = #tpu.dot_dimension_numbers<[1], [0], [0], [1], [0, 0, 1, 1], [], []>} : vector<64x128xbf16>, vector<128x8xbf16>, vector<64x8xf32> -> vector<64x8xf32>
    %95 = vector.shape_cast %94 : vector<64x8xf32> to vector<8x8x8xf32>
    %c0_38 = arith.constant 0 : index
    %c0_39 = arith.constant 0 : index
    %c0_40 = arith.constant 0 : index
    %96 = vector.load %arg12[%c0_38, %c0_39, %c0_40] : memref<8x1x8xf32, #tpu.memory_space<vmem>>, vector<1x1x8xf32>
    %97 = vector.shape_cast %96 : vector<1x1x8xf32> to vector<1x8xf32>
    %98 = vector.shape_cast %97 : vector<1x8xf32> to vector<1x1x8xf32>
    %99 = vector.broadcast %98 : vector<1x1x8xf32> to vector<8x8x8xf32>
    %100 = arith.addf %95, %99 : vector<8x8x8xf32>
    %c0_41 = arith.constant 0 : index
    %c0_42 = arith.constant 0 : index
    %c0_43 = arith.constant 0 : index
    %101 = vector.load %arg10[%c0_41, %c0_42, %c0_43] : memref<8x128x8xbf16, #tpu.memory_space<vmem>>, vector<1x128x8xbf16>
    %102 = vector.shape_cast %101 : vector<1x128x8xbf16> to vector<128x8xbf16>
    %103 = vector.shape_cast %79 : vector<8x8x128xbf16> to vector<64x128xbf16>
    %cst_44 = arith.constant dense<0.000000e+00> : vector<64x8xf32>
    %104 = tpu.matmul %103, %102, %cst_44 {dimension_numbers = #tpu.dot_dimension_numbers<[1], [0], [0], [1], [0, 0, 1, 1], [], []>} : vector<64x128xbf16>, vector<128x8xbf16>, vector<64x8xf32> -> vector<64x8xf32>
    %105 = vector.shape_cast %104 : vector<64x8xf32> to vector<8x8x8xf32>
    %c0_45 = arith.constant 0 : index
    %c0_46 = arith.constant 0 : index
    %c0_47 = arith.constant 0 : index
    %106 = vector.load %arg13[%c0_45, %c0_46, %c0_47] : memref<8x1x8xf32, #tpu.memory_space<vmem>>, vector<1x1x8xf32>
    %107 = vector.shape_cast %106 : vector<1x1x8xf32> to vector<1x8xf32>
    %108 = vector.shape_cast %107 : vector<1x8xf32> to vector<1x1x8xf32>
    %109 = vector.broadcast %108 : vector<1x1x8xf32> to vector<8x8x8xf32>
    %110 = arith.addf %105, %109 : vector<8x8x8xf32>
    %111 = arith.truncf %90 : vector<8x8x8xf32> to vector<8x8x8xbf16>
    %112 = arith.truncf %100 : vector<8x8x8xf32> to vector<8x8x8xbf16>
    "tpu.trace_start"() <{level = 10 : i32, message = "bqd,bkd->bqk"}> : () -> ()
    %cst_48 = arith.constant dense<0.000000e+00> : vector<8x8x8xf32>
    %113 = tpu.matmul %111, %112, %cst_48 {dimension_numbers = #tpu.dot_dimension_numbers<[2], [2], [1], [1], [0, 0, 0, 1, 1, 1], [0], [0]>} : vector<8x8x8xbf16>, vector<8x8x8xbf16>, vector<8x8x8xf32> -> vector<8x8x8xf32>
    "tpu.trace_stop"() : () -> ()
    %cst_49 = arith.constant 0.353553385 : f32
    %114 = vector.broadcast %cst_49 : f32 to vector<8x8x8xf32>
    %115 = arith.mulf %113, %114 : vector<8x8x8xf32>
    %cst_50 = arith.constant -1.000000e+30 : f32
    %116 = vector.shape_cast %7 : vector<1x1x8xi1> to vector<1x1x8xi1>
    %117 = vector.broadcast %116 : vector<1x1x8xi1> to vector<8x8x8xi1>
    %118 = vector.broadcast %cst_50 : f32 to vector<8x8x8xf32>
    %119 = arith.select %117, %115, %118 : vector<8x8x8xi1>, vector<8x8x8xf32>
    %cst_51 = arith.constant dense<0xFF800000> : vector<8x8xf32>
    %120 = vector.multi_reduction <maximumf>, %119, %cst_51 [2] : vector<8x8x8xf32> to vector<8x8xf32>
    %121 = vector.shape_cast %120 : vector<8x8xf32> to vector<8x8x1xf32>
    %122 = vector.broadcast %121 : vector<8x8x1xf32> to vector<8x8x8xf32>
    %123 = arith.subf %119, %122 : vector<8x8x8xf32>
    %124 = math.exp %123 : vector<8x8x8xf32>
    %cst_52 = arith.constant dense<0.000000e+00> : vector<8x8xf32>
    %125 = vector.multi_reduction <add>, %124, %cst_52 [2] : vector<8x8x8xf32> to vector<8x8xf32>
    %126 = vector.shape_cast %125 : vector<8x8xf32> to vector<8x8x1xf32>
    %127 = tpu.reciprocal %126 {approx = true} : vector<8x8x1xf32> -> vector<8x8x1xf32>
    %128 = vector.broadcast %127 : vector<8x8x1xf32> to vector<8x8x8xf32>
    %129 = arith.mulf %124, %128 : vector<8x8x8xf32>
    %130 = arith.truncf %129 : vector<8x8x8xf32> to vector<8x8x8xbf16>
    %131 = arith.truncf %110 : vector<8x8x8xf32> to vector<8x8x8xbf16>
    "tpu.trace_start"() <{level = 10 : i32, message = "bqk,bkd->bqd"}> : () -> ()
    %cst_53 = arith.constant dense<0.000000e+00> : vector<8x8x8xf32>
    %132 = tpu.matmul %130, %131, %cst_53 {dimension_numbers = #tpu.dot_dimension_numbers<[2], [1], [1], [2], [0, 0, 0, 1, 1, 2], [0], [0]>} : vector<8x8x8xbf16>, vector<8x8x8xbf16>, vector<8x8x8xf32> -> vector<8x8x8xf32>
    "tpu.trace_stop"() : () -> ()
    %133 = arith.truncf %132 : vector<8x8x8xf32> to vector<8x8x8xbf16>
    %c0_54 = arith.constant 0 : index
    %c0_55 = arith.constant 0 : index
    %c0_56 = arith.constant 0 : index
    %134 = vector.load %arg14[%c0_54, %c0_55, %c0_56] : memref<8x8x128xbf16, #tpu.memory_space<vmem>>, vector<1x8x128xbf16>
    %135 = vector.shape_cast %134 : vector<1x8x128xbf16> to vector<8x128xbf16>
    %136 = vector.shape_cast %133 : vector<8x8x8xbf16> to vector<64x8xbf16>
    %cst_57 = arith.constant dense<0.000000e+00> : vector<64x128xf32>
    %137 = tpu.matmul %136, %135, %cst_57 {dimension_numbers = #tpu.dot_dimension_numbers<[1], [0], [0], [1], [0, 0, 1, 1], [], []>} : vector<64x8xbf16>, vector<8x128xbf16>, vector<64x128xf32> -> vector<64x128xf32>
    %138 = vector.shape_cast %137 : vector<64x128xf32> to vector<8x8x128xf32>
    %139 = arith.addf %80, %138 : vector<8x8x128xf32>
    %c1 = arith.constant 1 : index
    %c0_58 = arith.constant 0 : index
    %c0_59 = arith.constant 0 : index
    %140 = vector.load %arg8[%c1, %c0_58, %c0_59] : memref<8x128x8xbf16, #tpu.memory_space<vmem>>, vector<1x128x8xbf16>
    %141 = vector.shape_cast %140 : vector<1x128x8xbf16> to vector<128x8xbf16>
    %142 = vector.shape_cast %79 : vector<8x8x128xbf16> to vector<64x128xbf16>
    %cst_60 = arith.constant dense<0.000000e+00> : vector<64x8xf32>
    %143 = tpu.matmul %142, %141, %cst_60 {dimension_numbers = #tpu.dot_dimension_numbers<[1], [0], [0], [1], [0, 0, 1, 1], [], []>} : vector<64x128xbf16>, vector<128x8xbf16>, vector<64x8xf32> -> vector<64x8xf32>
    %144 = vector.shape_cast %143 : vector<64x8xf32> to vector<8x8x8xf32>
    %c1_61 = arith.constant 1 : index
    %c0_62 = arith.constant 0 : index
    %c0_63 = arith.constant 0 : index
    %145 = vector.load %arg11[%c1_61, %c0_62, %c0_63] : memref<8x1x8xf32, #tpu.memory_space<vmem>>, vector<1x1x8xf32>
    %146 = vector.shape_cast %145 : vector<1x1x8xf32> to vector<1x8xf32>
    %147 = vector.shape_cast %146 : vector<1x8xf32> to vector<1x1x8xf32>
    %148 = vector.broadcast %147 : vector<1x1x8xf32> to vector<8x8x8xf32>
    %149 = arith.addf %144, %148 : vector<8x8x8xf32>
    %c1_64 = arith.constant 1 : index
    %c0_65 = arith.constant 0 : index
    %c0_66 = arith.constant 0 : index
    %150 = vector.load %arg9[%c1_64, %c0_65, %c0_66] : memref<8x128x8xbf16, #tpu.memory_space<vmem>>, vector<1x128x8xbf16>
    %151 = vector.shape_cast %150 : vector<1x128x8xbf16> to vector<128x8xbf16>
    %152 = vector.shape_cast %79 : vector<8x8x128xbf16> to vector<64x128xbf16>
    %cst_67 = arith.constant dense<0.000000e+00> : vector<64x8xf32>
    %153 = tpu.matmul %152, %151, %cst_67 {dimension_numbers = #tpu.dot_dimension_numbers<[1], [0], [0], [1], [0, 0, 1, 1], [], []>} : vector<64x128xbf16>, vector<128x8xbf16>, vector<64x8xf32> -> vector<64x8xf32>
    %154 = vector.shape_cast %153 : vector<64x8xf32> to vector<8x8x8xf32>
    %c1_68 = arith.constant 1 : index
    %c0_69 = arith.constant 0 : index
    %c0_70 = arith.constant 0 : index
    %155 = vector.load %arg12[%c1_68, %c0_69, %c0_70] : memref<8x1x8xf32, #tpu.memory_space<vmem>>, vector<1x1x8xf32>
    %156 = vector.shape_cast %155 : vector<1x1x8xf32> to vector<1x8xf32>
    %157 = vector.shape_cast %156 : vector<1x8xf32> to vector<1x1x8xf32>
    %158 = vector.broadcast %157 : vector<1x1x8xf32> to vector<8x8x8xf32>
    %159 = arith.addf %154, %158 : vector<8x8x8xf32>
    %c1_71 = arith.constant 1 : index
    %c0_72 = arith.constant 0 : index
    %c0_73 = arith.constant 0 : index
    %160 = vector.load %arg10[%c1_71, %c0_72, %c0_73] : memref<8x128x8xbf16, #tpu.memory_space<vmem>>, vector<1x128x8xbf16>
    %161 = vector.shape_cast %160 : vector<1x128x8xbf16> to vector<128x8xbf16>
    %162 = vector.shape_cast %79 : vector<8x8x128xbf16> to vector<64x128xbf16>
    %cst_74 = arith.constant dense<0.000000e+00> : vector<64x8xf32>
    %163 = tpu.matmul %162, %161, %cst_74 {dimension_numbers = #tpu.dot_dimension_numbers<[1], [0], [0], [1], [0, 0, 1, 1], [], []>} : vector<64x128xbf16>, vector<128x8xbf16>, vector<64x8xf32> -> vector<64x8xf32>
    %164 = vector.shape_cast %163 : vector<64x8xf32> to vector<8x8x8xf32>
    %c1_75 = arith.constant 1 : index
    %c0_76 = arith.constant 0 : index
    %c0_77 = arith.constant 0 : index
    %165 = vector.load %arg13[%c1_75, %c0_76, %c0_77] : memref<8x1x8xf32, #tpu.memory_space<vmem>>, vector<1x1x8xf32>
    %166 = vector.shape_cast %165 : vector<1x1x8xf32> to vector<1x8xf32>
    %167 = vector.shape_cast %166 : vector<1x8xf32> to vector<1x1x8xf32>
    %168 = vector.broadcast %167 : vector<1x1x8xf32> to vector<8x8x8xf32>
    %169 = arith.addf %164, %168 : vector<8x8x8xf32>
    %170 = arith.truncf %149 : vector<8x8x8xf32> to vector<8x8x8xbf16>
    %171 = arith.truncf %159 : vector<8x8x8xf32> to vector<8x8x8xbf16>
    "tpu.trace_start"() <{level = 10 : i32, message = "bqd,bkd->bqk"}> : () -> ()
    %cst_78 = arith.constant dense<0.000000e+00> : vector<8x8x8xf32>
    %172 = tpu.matmul %170, %171, %cst_78 {dimension_numbers = #tpu.dot_dimension_numbers<[2], [2], [1], [1], [0, 0, 0, 1, 1, 1], [0], [0]>} : vector<8x8x8xbf16>, vector<8x8x8xbf16>, vector<8x8x8xf32> -> vector<8x8x8xf32>
    "tpu.trace_stop"() : () -> ()
    %cst_79 = arith.constant 0.353553385 : f32
    %173 = vector.broadcast %cst_79 : f32 to vector<8x8x8xf32>
    %174 = arith.mulf %172, %173 : vector<8x8x8xf32>
    %cst_80 = arith.constant -1.000000e+30 : f32
    %175 = vector.shape_cast %7 : vector<1x1x8xi1> to vector<1x1x8xi1>
    %176 = vector.broadcast %175 : vector<1x1x8xi1> to vector<8x8x8xi1>
    %177 = vector.broadcast %cst_80 : f32 to vector<8x8x8xf32>
    %178 = arith.select %176, %174, %177 : vector<8x8x8xi1>, vector<8x8x8xf32>
    %cst_81 = arith.constant dense<0xFF800000> : vector<8x8xf32>
    %179 = vector.multi_reduction <maximumf>, %178, %cst_81 [2] : vector<8x8x8xf32> to vector<8x8xf32>
    %180 = vector.shape_cast %179 : vector<8x8xf32> to vector<8x8x1xf32>
    %181 = vector.broadcast %180 : vector<8x8x1xf32> to vector<8x8x8xf32>
    %182 = arith.subf %178, %181 : vector<8x8x8xf32>
    %183 = math.exp %182 : vector<8x8x8xf32>
    %cst_82 = arith.constant dense<0.000000e+00> : vector<8x8xf32>
    %184 = vector.multi_reduction <add>, %183, %cst_82 [2] : vector<8x8x8xf32> to vector<8x8xf32>
    %185 = vector.shape_cast %184 : vector<8x8xf32> to vector<8x8x1xf32>
    %186 = tpu.reciprocal %185 {approx = true} : vector<8x8x1xf32> -> vector<8x8x1xf32>
    %187 = vector.broadcast %186 : vector<8x8x1xf32> to vector<8x8x8xf32>
    %188 = arith.mulf %183, %187 : vector<8x8x8xf32>
    %189 = arith.truncf %188 : vector<8x8x8xf32> to vector<8x8x8xbf16>
    %190 = arith.truncf %169 : vector<8x8x8xf32> to vector<8x8x8xbf16>
    "tpu.trace_start"() <{level = 10 : i32, message = "bqk,bkd->bqd"}> : () -> ()
    %cst_83 = arith.constant dense<0.000000e+00> : vector<8x8x8xf32>
    %191 = tpu.matmul %189, %190, %cst_83 {dimension_numbers = #tpu.dot_dimension_numbers<[2], [1], [1], [2], [0, 0, 0, 1, 1, 2], [0], [0]>} : vector<8x8x8xbf16>, vector<8x8x8xbf16>, vector<8x8x8xf32> -> vector<8x8x8xf32>
    "tpu.trace_stop"() : () -> ()
    %192 = arith.truncf %191 : vector<8x8x8xf32> to vector<8x8x8xbf16>
    %c1_84 = arith.constant 1 : index
    %c0_85 = arith.constant 0 : index
    %c0_86 = arith.constant 0 : index
    %193 = vector.load %arg14[%c1_84, %c0_85, %c0_86] : memref<8x8x128xbf16, #tpu.memory_space<vmem>>, vector<1x8x128xbf16>
    %194 = vector.shape_cast %193 : vector<1x8x128xbf16> to vector<8x128xbf16>
    %195 = vector.shape_cast %192 : vector<8x8x8xbf16> to vector<64x8xbf16>
    %cst_87 = arith.constant dense<0.000000e+00> : vector<64x128xf32>
    %196 = tpu.matmul %195, %194, %cst_87 {dimension_numbers = #tpu.dot_dimension_numbers<[1], [0], [0], [1], [0, 0, 1, 1], [], []>} : vector<64x8xbf16>, vector<8x128xbf16>, vector<64x128xf32> -> vector<64x128xf32>
    %197 = vector.shape_cast %196 : vector<64x128xf32> to vector<8x8x128xf32>
    %198 = arith.addf %139, %197 : vector<8x8x128xf32>
    %c2 = arith.constant 2 : index
    %c0_88 = arith.constant 0 : index
    %c0_89 = arith.constant 0 : index
    %199 = vector.load %arg8[%c2, %c0_88, %c0_89] : memref<8x128x8xbf16, #tpu.memory_space<vmem>>, vector<1x128x8xbf16>
    %200 = vector.shape_cast %199 : vector<1x128x8xbf16> to vector<128x8xbf16>
    %201 = vector.shape_cast %79 : vector<8x8x128xbf16> to vector<64x128xbf16>
    %cst_90 = arith.constant dense<0.000000e+00> : vector<64x8xf32>
    %202 = tpu.matmul %201, %200, %cst_90 {dimension_numbers = #tpu.dot_dimension_numbers<[1], [0], [0], [1], [0, 0, 1, 1], [], []>} : vector<64x128xbf16>, vector<128x8xbf16>, vector<64x8xf32> -> vector<64x8xf32>
    %203 = vector.shape_cast %202 : vector<64x8xf32> to vector<8x8x8xf32>
    %c2_91 = arith.constant 2 : index
    %c0_92 = arith.constant 0 : index
    %c0_93 = arith.constant 0 : index
    %204 = vector.load %arg11[%c2_91, %c0_92, %c0_93] : memref<8x1x8xf32, #tpu.memory_space<vmem>>, vector<1x1x8xf32>
    %205 = vector.shape_cast %204 : vector<1x1x8xf32> to vector<1x8xf32>
    %206 = vector.shape_cast %205 : vector<1x8xf32> to vector<1x1x8xf32>
    %207 = vector.broadcast %206 : vector<1x1x8xf32> to vector<8x8x8xf32>
    %208 = arith.addf %203, %207 : vector<8x8x8xf32>
    %c2_94 = arith.constant 2 : index
    %c0_95 = arith.constant 0 : index
    %c0_96 = arith.constant 0 : index
    %209 = vector.load %arg9[%c2_94, %c0_95, %c0_96] : memref<8x128x8xbf16, #tpu.memory_space<vmem>>, vector<1x128x8xbf16>
    %210 = vector.shape_cast %209 : vector<1x128x8xbf16> to vector<128x8xbf16>
    %211 = vector.shape_cast %79 : vector<8x8x128xbf16> to vector<64x128xbf16>
    %cst_97 = arith.constant dense<0.000000e+00> : vector<64x8xf32>
    %212 = tpu.matmul %211, %210, %cst_97 {dimension_numbers = #tpu.dot_dimension_numbers<[1], [0], [0], [1], [0, 0, 1, 1], [], []>} : vector<64x128xbf16>, vector<128x8xbf16>, vector<64x8xf32> -> vector<64x8xf32>
    %213 = vector.shape_cast %212 : vector<64x8xf32> to vector<8x8x8xf32>
    %c2_98 = arith.constant 2 : index
    %c0_99 = arith.constant 0 : index
    %c0_100 = arith.constant 0 : index
    %214 = vector.load %arg12[%c2_98, %c0_99, %c0_100] : memref<8x1x8xf32, #tpu.memory_space<vmem>>, vector<1x1x8xf32>
    %215 = vector.shape_cast %214 : vector<1x1x8xf32> to vector<1x8xf32>
    %216 = vector.shape_cast %215 : vector<1x8xf32> to vector<1x1x8xf32>
    %217 = vector.broadcast %216 : vector<1x1x8xf32> to vector<8x8x8xf32>
    %218 = arith.addf %213, %217 : vector<8x8x8xf32>
    %c2_101 = arith.constant 2 : index
    %c0_102 = arith.constant 0 : index
    %c0_103 = arith.constant 0 : index
    %219 = vector.load %arg10[%c2_101, %c0_102, %c0_103] : memref<8x128x8xbf16, #tpu.memory_space<vmem>>, vector<1x128x8xbf16>
    %220 = vector.shape_cast %219 : vector<1x128x8xbf16> to vector<128x8xbf16>
    %221 = vector.shape_cast %79 : vector<8x8x128xbf16> to vector<64x128xbf16>
    %cst_104 = arith.constant dense<0.000000e+00> : vector<64x8xf32>
    %222 = tpu.matmul %221, %220, %cst_104 {dimension_numbers = #tpu.dot_dimension_numbers<[1], [0], [0], [1], [0, 0, 1, 1], [], []>} : vector<64x128xbf16>, vector<128x8xbf16>, vector<64x8xf32> -> vector<64x8xf32>
    %223 = vector.shape_cast %222 : vector<64x8xf32> to vector<8x8x8xf32>
    %c2_105 = arith.constant 2 : index
    %c0_106 = arith.constant 0 : index
    %c0_107 = arith.constant 0 : index
    %224 = vector.load %arg13[%c2_105, %c0_106, %c0_107] : memref<8x1x8xf32, #tpu.memory_space<vmem>>, vector<1x1x8xf32>
    %225 = vector.shape_cast %224 : vector<1x1x8xf32> to vector<1x8xf32>
    %226 = vector.shape_cast %225 : vector<1x8xf32> to vector<1x1x8xf32>
    %227 = vector.broadcast %226 : vector<1x1x8xf32> to vector<8x8x8xf32>
    %228 = arith.addf %223, %227 : vector<8x8x8xf32>
    %229 = arith.truncf %208 : vector<8x8x8xf32> to vector<8x8x8xbf16>
    %230 = arith.truncf %218 : vector<8x8x8xf32> to vector<8x8x8xbf16>
    "tpu.trace_start"() <{level = 10 : i32, message = "bqd,bkd->bqk"}> : () -> ()
    %cst_108 = arith.constant dense<0.000000e+00> : vector<8x8x8xf32>
    %231 = tpu.matmul %229, %230, %cst_108 {dimension_numbers = #tpu.dot_dimension_numbers<[2], [2], [1], [1], [0, 0, 0, 1, 1, 1], [0], [0]>} : vector<8x8x8xbf16>, vector<8x8x8xbf16>, vector<8x8x8xf32> -> vector<8x8x8xf32>
    "tpu.trace_stop"() : () -> ()
    %cst_109 = arith.constant 0.353553385 : f32
    %232 = vector.broadcast %cst_109 : f32 to vector<8x8x8xf32>
    %233 = arith.mulf %231, %232 : vector<8x8x8xf32>
    %cst_110 = arith.constant -1.000000e+30 : f32
    %234 = vector.shape_cast %7 : vector<1x1x8xi1> to vector<1x1x8xi1>
    %235 = vector.broadcast %234 : vector<1x1x8xi1> to vector<8x8x8xi1>
    %236 = vector.broadcast %cst_110 : f32 to vector<8x8x8xf32>
    %237 = arith.select %235, %233, %236 : vector<8x8x8xi1>, vector<8x8x8xf32>
    %cst_111 = arith.constant dense<0xFF800000> : vector<8x8xf32>
    %238 = vector.multi_reduction <maximumf>, %237, %cst_111 [2] : vector<8x8x8xf32> to vector<8x8xf32>
    %239 = vector.shape_cast %238 : vector<8x8xf32> to vector<8x8x1xf32>
    %240 = vector.broadcast %239 : vector<8x8x1xf32> to vector<8x8x8xf32>
    %241 = arith.subf %237, %240 : vector<8x8x8xf32>
    %242 = math.exp %241 : vector<8x8x8xf32>
    %cst_112 = arith.constant dense<0.000000e+00> : vector<8x8xf32>
    %243 = vector.multi_reduction <add>, %242, %cst_112 [2] : vector<8x8x8xf32> to vector<8x8xf32>
    %244 = vector.shape_cast %243 : vector<8x8xf32> to vector<8x8x1xf32>
    %245 = tpu.reciprocal %244 {approx = true} : vector<8x8x1xf32> -> vector<8x8x1xf32>
    %246 = vector.broadcast %245 : vector<8x8x1xf32> to vector<8x8x8xf32>
    %247 = arith.mulf %242, %246 : vector<8x8x8xf32>
    %248 = arith.truncf %247 : vector<8x8x8xf32> to vector<8x8x8xbf16>
    %249 = arith.truncf %228 : vector<8x8x8xf32> to vector<8x8x8xbf16>
    "tpu.trace_start"() <{level = 10 : i32, message = "bqk,bkd->bqd"}> : () -> ()
    %cst_113 = arith.constant dense<0.000000e+00> : vector<8x8x8xf32>
    %250 = tpu.matmul %248, %249, %cst_113 {dimension_numbers = #tpu.dot_dimension_numbers<[2], [1], [1], [2], [0, 0, 0, 1, 1, 2], [0], [0]>} : vector<8x8x8xbf16>, vector<8x8x8xbf16>, vector<8x8x8xf32> -> vector<8x8x8xf32>
    "tpu.trace_stop"() : () -> ()
    %251 = arith.truncf %250 : vector<8x8x8xf32> to vector<8x8x8xbf16>
    %c2_114 = arith.constant 2 : index
    %c0_115 = arith.constant 0 : index
    %c0_116 = arith.constant 0 : index
    %252 = vector.load %arg14[%c2_114, %c0_115, %c0_116] : memref<8x8x128xbf16, #tpu.memory_space<vmem>>, vector<1x8x128xbf16>
    %253 = vector.shape_cast %252 : vector<1x8x128xbf16> to vector<8x128xbf16>
    %254 = vector.shape_cast %251 : vector<8x8x8xbf16> to vector<64x8xbf16>
    %cst_117 = arith.constant dense<0.000000e+00> : vector<64x128xf32>
    %255 = tpu.matmul %254, %253, %cst_117 {dimension_numbers = #tpu.dot_dimension_numbers<[1], [0], [0], [1], [0, 0, 1, 1], [], []>} : vector<64x8xbf16>, vector<8x128xbf16>, vector<64x128xf32> -> vector<64x128xf32>
    %256 = vector.shape_cast %255 : vector<64x128xf32> to vector<8x8x128xf32>
    %257 = arith.addf %198, %256 : vector<8x8x128xf32>
    %c3 = arith.constant 3 : index
    %c0_118 = arith.constant 0 : index
    %c0_119 = arith.constant 0 : index
    %258 = vector.load %arg8[%c3, %c0_118, %c0_119] : memref<8x128x8xbf16, #tpu.memory_space<vmem>>, vector<1x128x8xbf16>
    %259 = vector.shape_cast %258 : vector<1x128x8xbf16> to vector<128x8xbf16>
    %260 = vector.shape_cast %79 : vector<8x8x128xbf16> to vector<64x128xbf16>
    %cst_120 = arith.constant dense<0.000000e+00> : vector<64x8xf32>
    %261 = tpu.matmul %260, %259, %cst_120 {dimension_numbers = #tpu.dot_dimension_numbers<[1], [0], [0], [1], [0, 0, 1, 1], [], []>} : vector<64x128xbf16>, vector<128x8xbf16>, vector<64x8xf32> -> vector<64x8xf32>
    %262 = vector.shape_cast %261 : vector<64x8xf32> to vector<8x8x8xf32>
    %c3_121 = arith.constant 3 : index
    %c0_122 = arith.constant 0 : index
    %c0_123 = arith.constant 0 : index
    %263 = vector.load %arg11[%c3_121, %c0_122, %c0_123] : memref<8x1x8xf32, #tpu.memory_space<vmem>>, vector<1x1x8xf32>
    %264 = vector.shape_cast %263 : vector<1x1x8xf32> to vector<1x8xf32>
    %265 = vector.shape_cast %264 : vector<1x8xf32> to vector<1x1x8xf32>
    %266 = vector.broadcast %265 : vector<1x1x8xf32> to vector<8x8x8xf32>
    %267 = arith.addf %262, %266 : vector<8x8x8xf32>
    %c3_124 = arith.constant 3 : index
    %c0_125 = arith.constant 0 : index
    %c0_126 = arith.constant 0 : index
    %268 = vector.load %arg9[%c3_124, %c0_125, %c0_126] : memref<8x128x8xbf16, #tpu.memory_space<vmem>>, vector<1x128x8xbf16>
    %269 = vector.shape_cast %268 : vector<1x128x8xbf16> to vector<128x8xbf16>
    %270 = vector.shape_cast %79 : vector<8x8x128xbf16> to vector<64x128xbf16>
    %cst_127 = arith.constant dense<0.000000e+00> : vector<64x8xf32>
    %271 = tpu.matmul %270, %269, %cst_127 {dimension_numbers = #tpu.dot_dimension_numbers<[1], [0], [0], [1], [0, 0, 1, 1], [], []>} : vector<64x128xbf16>, vector<128x8xbf16>, vector<64x8xf32> -> vector<64x8xf32>
    %272 = vector.shape_cast %271 : vector<64x8xf32> to vector<8x8x8xf32>
    %c3_128 = arith.constant 3 : index
    %c0_129 = arith.constant 0 : index
    %c0_130 = arith.constant 0 : index
    %273 = vector.load %arg12[%c3_128, %c0_129, %c0_130] : memref<8x1x8xf32, #tpu.memory_space<vmem>>, vector<1x1x8xf32>
    %274 = vector.shape_cast %273 : vector<1x1x8xf32> to vector<1x8xf32>
    %275 = vector.shape_cast %274 : vector<1x8xf32> to vector<1x1x8xf32>
    %276 = vector.broadcast %275 : vector<1x1x8xf32> to vector<8x8x8xf32>
    %277 = arith.addf %272, %276 : vector<8x8x8xf32>
    %c3_131 = arith.constant 3 : index
    %c0_132 = arith.constant 0 : index
    %c0_133 = arith.constant 0 : index
    %278 = vector.load %arg10[%c3_131, %c0_132, %c0_133] : memref<8x128x8xbf16, #tpu.memory_space<vmem>>, vector<1x128x8xbf16>
    %279 = vector.shape_cast %278 : vector<1x128x8xbf16> to vector<128x8xbf16>
    %280 = vector.shape_cast %79 : vector<8x8x128xbf16> to vector<64x128xbf16>
    %cst_134 = arith.constant dense<0.000000e+00> : vector<64x8xf32>
    %281 = tpu.matmul %280, %279, %cst_134 {dimension_numbers = #tpu.dot_dimension_numbers<[1], [0], [0], [1], [0, 0, 1, 1], [], []>} : vector<64x128xbf16>, vector<128x8xbf16>, vector<64x8xf32> -> vector<64x8xf32>
    %282 = vector.shape_cast %281 : vector<64x8xf32> to vector<8x8x8xf32>
    %c3_135 = arith.constant 3 : index
    %c0_136 = arith.constant 0 : index
    %c0_137 = arith.constant 0 : index
    %283 = vector.load %arg13[%c3_135, %c0_136, %c0_137] : memref<8x1x8xf32, #tpu.memory_space<vmem>>, vector<1x1x8xf32>
    %284 = vector.shape_cast %283 : vector<1x1x8xf32> to vector<1x8xf32>
    %285 = vector.shape_cast %284 : vector<1x8xf32> to vector<1x1x8xf32>
    %286 = vector.broadcast %285 : vector<1x1x8xf32> to vector<8x8x8xf32>
    %287 = arith.addf %282, %286 : vector<8x8x8xf32>
    %288 = arith.truncf %267 : vector<8x8x8xf32> to vector<8x8x8xbf16>
    %289 = arith.truncf %277 : vector<8x8x8xf32> to vector<8x8x8xbf16>
    "tpu.trace_start"() <{level = 10 : i32, message = "bqd,bkd->bqk"}> : () -> ()
    %cst_138 = arith.constant dense<0.000000e+00> : vector<8x8x8xf32>
    %290 = tpu.matmul %288, %289, %cst_138 {dimension_numbers = #tpu.dot_dimension_numbers<[2], [2], [1], [1], [0, 0, 0, 1, 1, 1], [0], [0]>} : vector<8x8x8xbf16>, vector<8x8x8xbf16>, vector<8x8x8xf32> -> vector<8x8x8xf32>
    "tpu.trace_stop"() : () -> ()
    %cst_139 = arith.constant 0.353553385 : f32
    %291 = vector.broadcast %cst_139 : f32 to vector<8x8x8xf32>
    %292 = arith.mulf %290, %291 : vector<8x8x8xf32>
    %cst_140 = arith.constant -1.000000e+30 : f32
    %293 = vector.shape_cast %7 : vector<1x1x8xi1> to vector<1x1x8xi1>
    %294 = vector.broadcast %293 : vector<1x1x8xi1> to vector<8x8x8xi1>
    %295 = vector.broadcast %cst_140 : f32 to vector<8x8x8xf32>
    %296 = arith.select %294, %292, %295 : vector<8x8x8xi1>, vector<8x8x8xf32>
    %cst_141 = arith.constant dense<0xFF800000> : vector<8x8xf32>
    %297 = vector.multi_reduction <maximumf>, %296, %cst_141 [2] : vector<8x8x8xf32> to vector<8x8xf32>
    %298 = vector.shape_cast %297 : vector<8x8xf32> to vector<8x8x1xf32>
    %299 = vector.broadcast %298 : vector<8x8x1xf32> to vector<8x8x8xf32>
    %300 = arith.subf %296, %299 : vector<8x8x8xf32>
    %301 = math.exp %300 : vector<8x8x8xf32>
    %cst_142 = arith.constant dense<0.000000e+00> : vector<8x8xf32>
    %302 = vector.multi_reduction <add>, %301, %cst_142 [2] : vector<8x8x8xf32> to vector<8x8xf32>
    %303 = vector.shape_cast %302 : vector<8x8xf32> to vector<8x8x1xf32>
    %304 = tpu.reciprocal %303 {approx = true} : vector<8x8x1xf32> -> vector<8x8x1xf32>
    %305 = vector.broadcast %304 : vector<8x8x1xf32> to vector<8x8x8xf32>
    %306 = arith.mulf %301, %305 : vector<8x8x8xf32>
    %307 = arith.truncf %306 : vector<8x8x8xf32> to vector<8x8x8xbf16>
    %308 = arith.truncf %287 : vector<8x8x8xf32> to vector<8x8x8xbf16>
    "tpu.trace_start"() <{level = 10 : i32, message = "bqk,bkd->bqd"}> : () -> ()
    %cst_143 = arith.constant dense<0.000000e+00> : vector<8x8x8xf32>
    %309 = tpu.matmul %307, %308, %cst_143 {dimension_numbers = #tpu.dot_dimension_numbers<[2], [1], [1], [2], [0, 0, 0, 1, 1, 2], [0], [0]>} : vector<8x8x8xbf16>, vector<8x8x8xbf16>, vector<8x8x8xf32> -> vector<8x8x8xf32>
    "tpu.trace_stop"() : () -> ()
    %310 = arith.truncf %309 : vector<8x8x8xf32> to vector<8x8x8xbf16>
    %c3_144 = arith.constant 3 : index
    %c0_145 = arith.constant 0 : index
    %c0_146 = arith.constant 0 : index
    %311 = vector.load %arg14[%c3_144, %c0_145, %c0_146] : memref<8x8x128xbf16, #tpu.memory_space<vmem>>, vector<1x8x128xbf16>
    %312 = vector.shape_cast %311 : vector<1x8x128xbf16> to vector<8x128xbf16>
    %313 = vector.shape_cast %310 : vector<8x8x8xbf16> to vector<64x8xbf16>
    %cst_147 = arith.constant dense<0.000000e+00> : vector<64x128xf32>
    %314 = tpu.matmul %313, %312, %cst_147 {dimension_numbers = #tpu.dot_dimension_numbers<[1], [0], [0], [1], [0, 0, 1, 1], [], []>} : vector<64x8xbf16>, vector<8x128xbf16>, vector<64x128xf32> -> vector<64x128xf32>
    %315 = vector.shape_cast %314 : vector<64x128xf32> to vector<8x8x128xf32>
    %316 = arith.addf %257, %315 : vector<8x8x128xf32>
    %317 = arith.addf %46, %316 : vector<8x8x128xf32>
    %c0_148 = arith.constant 0 : index
    %c0_149 = arith.constant 0 : index
    %c0_150 = arith.constant 0 : index
    %318 = vector.load %arg15[%c0_148, %c0_149, %c0_150] : memref<2x1x128xf32, #tpu.memory_space<vmem>>, vector<1x1x128xf32>
    %319 = vector.shape_cast %318 : vector<1x1x128xf32> to vector<1x128xf32>
    %320 = vector.shape_cast %319 : vector<1x128xf32> to vector<1x1x128xf32>
    %321 = vector.broadcast %320 : vector<1x1x128xf32> to vector<8x8x128xf32>
    %322 = arith.addf %317, %321 : vector<8x8x128xf32>
    %c0_151 = arith.constant 0 : index
    %c0_152 = arith.constant 0 : index
    %c0_153 = arith.constant 0 : index
    %323 = vector.load %arg16[%c0_151, %c0_152, %c0_153] : memref<2x1x128xf32, #tpu.memory_space<vmem>>, vector<1x1x128xf32>
    %324 = vector.shape_cast %323 : vector<1x1x128xf32> to vector<1x128xf32>
    %c0_154 = arith.constant 0 : index
    %c0_155 = arith.constant 0 : index
    %c0_156 = arith.constant 0 : index
    %325 = vector.load %arg17[%c0_154, %c0_155, %c0_156] : memref<2x1x128xf32, #tpu.memory_space<vmem>>, vector<1x1x128xf32>
    %326 = vector.shape_cast %325 : vector<1x1x128xf32> to vector<1x128xf32>
    %327 = vector.shape_cast %4 : vector<1x128xf32> to vector<1x1x128xf32>
    %328 = vector.broadcast %327 : vector<1x1x128xf32> to vector<8x8x128xf32>
    %329 = arith.mulf %322, %328 : vector<8x8x128xf32>
    %cst_157 = arith.constant dense<0.000000e+00> : vector<8x8xf32>
    %330 = vector.multi_reduction <add>, %329, %cst_157 [2] : vector<8x8x128xf32> to vector<8x8xf32>
    %331 = vector.shape_cast %330 : vector<8x8xf32> to vector<8x8x1xf32>
    %cst_158 = arith.constant 3.125000e-02 : f32
    %332 = vector.broadcast %cst_158 : f32 to vector<8x8x1xf32>
    %333 = arith.mulf %331, %332 : vector<8x8x1xf32>
    %334 = vector.broadcast %333 : vector<8x8x1xf32> to vector<8x8x128xf32>
    %335 = arith.subf %322, %334 : vector<8x8x128xf32>
    %336 = vector.shape_cast %4 : vector<1x128xf32> to vector<1x1x128xf32>
    %337 = vector.broadcast %336 : vector<1x1x128xf32> to vector<8x8x128xf32>
    %338 = arith.mulf %335, %337 : vector<8x8x128xf32>
    %339 = arith.mulf %338, %338 : vector<8x8x128xf32>
    %cst_159 = arith.constant dense<0.000000e+00> : vector<8x8xf32>
    %340 = vector.multi_reduction <add>, %339, %cst_159 [2] : vector<8x8x128xf32> to vector<8x8xf32>
    %341 = vector.shape_cast %340 : vector<8x8xf32> to vector<8x8x1xf32>
    %cst_160 = arith.constant 3.125000e-02 : f32
    %342 = vector.broadcast %cst_160 : f32 to vector<8x8x1xf32>
    %343 = arith.mulf %341, %342 : vector<8x8x1xf32>
    %cst_161 = arith.constant 9.99999974E-6 : f32
    %344 = vector.broadcast %cst_161 : f32 to vector<8x8x1xf32>
    %345 = arith.addf %343, %344 : vector<8x8x1xf32>
    %346 = math.rsqrt %345 : vector<8x8x1xf32>
    %347 = vector.broadcast %346 : vector<8x8x1xf32> to vector<8x8x128xf32>
    %348 = arith.mulf %338, %347 : vector<8x8x128xf32>
    %349 = vector.shape_cast %324 : vector<1x128xf32> to vector<1x1x128xf32>
    %350 = vector.broadcast %349 : vector<1x1x128xf32> to vector<8x8x128xf32>
    %351 = arith.mulf %348, %350 : vector<8x8x128xf32>
    %352 = vector.shape_cast %326 : vector<1x128xf32> to vector<1x1x128xf32>
    %353 = vector.broadcast %352 : vector<1x1x128xf32> to vector<8x8x128xf32>
    %354 = arith.addf %351, %353 : vector<8x8x128xf32>
    %355 = arith.truncf %354 : vector<8x8x128xf32> to vector<8x8x128xbf16>
    %c0_162 = arith.constant 0 : index
    %c0_163 = arith.constant 0 : index
    %c0_164 = arith.constant 0 : index
    %356 = vector.load %arg18[%c0_162, %c0_163, %c0_164] : memref<2x128x128xbf16, #tpu.memory_space<vmem>>, vector<1x128x128xbf16>
    %357 = vector.shape_cast %356 : vector<1x128x128xbf16> to vector<128x128xbf16>
    %358 = vector.shape_cast %355 : vector<8x8x128xbf16> to vector<64x128xbf16>
    %cst_165 = arith.constant dense<0.000000e+00> : vector<64x128xf32>
    %359 = tpu.matmul %358, %357, %cst_165 {dimension_numbers = #tpu.dot_dimension_numbers<[1], [0], [0], [1], [0, 0, 1, 1], [], []>} : vector<64x128xbf16>, vector<128x128xbf16>, vector<64x128xf32> -> vector<64x128xf32>
    %360 = vector.shape_cast %359 : vector<64x128xf32> to vector<8x8x128xf32>
    %c0_166 = arith.constant 0 : index
    %c0_167 = arith.constant 0 : index
    %c0_168 = arith.constant 0 : index
    %361 = vector.load %arg19[%c0_166, %c0_167, %c0_168] : memref<2x1x128xf32, #tpu.memory_space<vmem>>, vector<1x1x128xf32>
    %362 = vector.shape_cast %361 : vector<1x1x128xf32> to vector<1x128xf32>
    %363 = vector.shape_cast %362 : vector<1x128xf32> to vector<1x1x128xf32>
    %364 = vector.broadcast %363 : vector<1x1x128xf32> to vector<8x8x128xf32>
    %365 = arith.addf %360, %364 : vector<8x8x128xf32>
    %cst_169 = arith.constant 1.702000e+00 : f32
    %366 = vector.broadcast %cst_169 : f32 to vector<8x8x128xf32>
    %367 = arith.mulf %366, %365 : vector<8x8x128xf32>
    %368 = arith.negf %367 : vector<8x8x128xf32>
    %369 = math.exp %368 : vector<8x8x128xf32>
    %cst_170 = arith.constant 1.000000e+00 : f32
    %370 = vector.broadcast %cst_170 : f32 to vector<8x8x128xf32>
    %371 = arith.addf %370, %369 : vector<8x8x128xf32>
    %372 = arith.divf %370, %371 : vector<8x8x128xf32>
    %373 = arith.mulf %365, %372 : vector<8x8x128xf32>
    %374 = arith.truncf %373 : vector<8x8x128xf32> to vector<8x8x128xbf16>
    %c0_171 = arith.constant 0 : index
    %c0_172 = arith.constant 0 : index
    %c0_173 = arith.constant 0 : index
    %375 = vector.load %arg20[%c0_171, %c0_172, %c0_173] : memref<2x128x128xbf16, #tpu.memory_space<vmem>>, vector<1x128x128xbf16>
    %376 = vector.shape_cast %375 : vector<1x128x128xbf16> to vector<128x128xbf16>
    %377 = vector.shape_cast %374 : vector<8x8x128xbf16> to vector<64x128xbf16>
    %cst_174 = arith.constant dense<0.000000e+00> : vector<64x128xf32>
    %378 = tpu.matmul %377, %376, %cst_174 {dimension_numbers = #tpu.dot_dimension_numbers<[1], [0], [0], [1], [0, 0, 1, 1], [], []>} : vector<64x128xbf16>, vector<128x128xbf16>, vector<64x128xf32> -> vector<64x128xf32>
    %379 = vector.shape_cast %378 : vector<64x128xf32> to vector<8x8x128xf32>
    %c0_175 = arith.constant 0 : index
    %c0_176 = arith.constant 0 : index
    %c0_177 = arith.constant 0 : index
    %380 = vector.load %arg21[%c0_175, %c0_176, %c0_177] : memref<2x1x128xf32, #tpu.memory_space<vmem>>, vector<1x1x128xf32>
    %381 = vector.shape_cast %380 : vector<1x1x128xf32> to vector<1x128xf32>
    %382 = vector.shape_cast %381 : vector<1x128xf32> to vector<1x1x128xf32>
    %383 = vector.broadcast %382 : vector<1x1x128xf32> to vector<8x8x128xf32>
    %384 = arith.addf %379, %383 : vector<8x8x128xf32>
    %385 = arith.addf %322, %384 : vector<8x8x128xf32>
    %c1_178 = arith.constant 1 : index
    %c0_179 = arith.constant 0 : index
    %c0_180 = arith.constant 0 : index
    %386 = vector.load %arg6[%c1_178, %c0_179, %c0_180] : memref<2x1x128xf32, #tpu.memory_space<vmem>>, vector<1x1x128xf32>
    %387 = vector.shape_cast %386 : vector<1x1x128xf32> to vector<1x128xf32>
    %c1_181 = arith.constant 1 : index
    %c0_182 = arith.constant 0 : index
    %c0_183 = arith.constant 0 : index
    %388 = vector.load %arg7[%c1_181, %c0_182, %c0_183] : memref<2x1x128xf32, #tpu.memory_space<vmem>>, vector<1x1x128xf32>
    %389 = vector.shape_cast %388 : vector<1x1x128xf32> to vector<1x128xf32>
    %390 = vector.shape_cast %4 : vector<1x128xf32> to vector<1x1x128xf32>
    %391 = vector.broadcast %390 : vector<1x1x128xf32> to vector<8x8x128xf32>
    %392 = arith.mulf %385, %391 : vector<8x8x128xf32>
    %cst_184 = arith.constant dense<0.000000e+00> : vector<8x8xf32>
    %393 = vector.multi_reduction <add>, %392, %cst_184 [2] : vector<8x8x128xf32> to vector<8x8xf32>
    %394 = vector.shape_cast %393 : vector<8x8xf32> to vector<8x8x1xf32>
    %cst_185 = arith.constant 3.125000e-02 : f32
    %395 = vector.broadcast %cst_185 : f32 to vector<8x8x1xf32>
    %396 = arith.mulf %394, %395 : vector<8x8x1xf32>
    %397 = vector.broadcast %396 : vector<8x8x1xf32> to vector<8x8x128xf32>
    %398 = arith.subf %385, %397 : vector<8x8x128xf32>
    %399 = vector.shape_cast %4 : vector<1x128xf32> to vector<1x1x128xf32>
    %400 = vector.broadcast %399 : vector<1x1x128xf32> to vector<8x8x128xf32>
    %401 = arith.mulf %398, %400 : vector<8x8x128xf32>
    %402 = arith.mulf %401, %401 : vector<8x8x128xf32>
    %cst_186 = arith.constant dense<0.000000e+00> : vector<8x8xf32>
    %403 = vector.multi_reduction <add>, %402, %cst_186 [2] : vector<8x8x128xf32> to vector<8x8xf32>
    %404 = vector.shape_cast %403 : vector<8x8xf32> to vector<8x8x1xf32>
    %cst_187 = arith.constant 3.125000e-02 : f32
    %405 = vector.broadcast %cst_187 : f32 to vector<8x8x1xf32>
    %406 = arith.mulf %404, %405 : vector<8x8x1xf32>
    %cst_188 = arith.constant 9.99999974E-6 : f32
    %407 = vector.broadcast %cst_188 : f32 to vector<8x8x1xf32>
    %408 = arith.addf %406, %407 : vector<8x8x1xf32>
    %409 = math.rsqrt %408 : vector<8x8x1xf32>
    %410 = vector.broadcast %409 : vector<8x8x1xf32> to vector<8x8x128xf32>
    %411 = arith.mulf %401, %410 : vector<8x8x128xf32>
    %412 = vector.shape_cast %387 : vector<1x128xf32> to vector<1x1x128xf32>
    %413 = vector.broadcast %412 : vector<1x1x128xf32> to vector<8x8x128xf32>
    %414 = arith.mulf %411, %413 : vector<8x8x128xf32>
    %415 = vector.shape_cast %389 : vector<1x128xf32> to vector<1x1x128xf32>
    %416 = vector.broadcast %415 : vector<1x1x128xf32> to vector<8x8x128xf32>
    %417 = arith.addf %414, %416 : vector<8x8x128xf32>
    %418 = arith.truncf %417 : vector<8x8x128xf32> to vector<8x8x128xbf16>
    %cst_189 = arith.constant 0.000000e+00 : f32
    %419 = vector.broadcast %cst_189 : f32 to vector<8x8x128xf32>
    %c4 = arith.constant 4 : index
    %c0_190 = arith.constant 0 : index
    %c0_191 = arith.constant 0 : index
    %420 = vector.load %arg8[%c4, %c0_190, %c0_191] : memref<8x128x8xbf16, #tpu.memory_space<vmem>>, vector<1x128x8xbf16>
    %421 = vector.shape_cast %420 : vector<1x128x8xbf16> to vector<128x8xbf16>
    %422 = vector.shape_cast %418 : vector<8x8x128xbf16> to vector<64x128xbf16>
    %cst_192 = arith.constant dense<0.000000e+00> : vector<64x8xf32>
    %423 = tpu.matmul %422, %421, %cst_192 {dimension_numbers = #tpu.dot_dimension_numbers<[1], [0], [0], [1], [0, 0, 1, 1], [], []>} : vector<64x128xbf16>, vector<128x8xbf16>, vector<64x8xf32> -> vector<64x8xf32>
    %424 = vector.shape_cast %423 : vector<64x8xf32> to vector<8x8x8xf32>
    %c4_193 = arith.constant 4 : index
    %c0_194 = arith.constant 0 : index
    %c0_195 = arith.constant 0 : index
    %425 = vector.load %arg11[%c4_193, %c0_194, %c0_195] : memref<8x1x8xf32, #tpu.memory_space<vmem>>, vector<1x1x8xf32>
    %426 = vector.shape_cast %425 : vector<1x1x8xf32> to vector<1x8xf32>
    %427 = vector.shape_cast %426 : vector<1x8xf32> to vector<1x1x8xf32>
    %428 = vector.broadcast %427 : vector<1x1x8xf32> to vector<8x8x8xf32>
    %429 = arith.addf %424, %428 : vector<8x8x8xf32>
    %c4_196 = arith.constant 4 : index
    %c0_197 = arith.constant 0 : index
    %c0_198 = arith.constant 0 : index
    %430 = vector.load %arg9[%c4_196, %c0_197, %c0_198] : memref<8x128x8xbf16, #tpu.memory_space<vmem>>, vector<1x128x8xbf16>
    %431 = vector.shape_cast %430 : vector<1x128x8xbf16> to vector<128x8xbf16>
    %432 = vector.shape_cast %418 : vector<8x8x128xbf16> to vector<64x128xbf16>
    %cst_199 = arith.constant dense<0.000000e+00> : vector<64x8xf32>
    %433 = tpu.matmul %432, %431, %cst_199 {dimension_numbers = #tpu.dot_dimension_numbers<[1], [0], [0], [1], [0, 0, 1, 1], [], []>} : vector<64x128xbf16>, vector<128x8xbf16>, vector<64x8xf32> -> vector<64x8xf32>
    %434 = vector.shape_cast %433 : vector<64x8xf32> to vector<8x8x8xf32>
    %c4_200 = arith.constant 4 : index
    %c0_201 = arith.constant 0 : index
    %c0_202 = arith.constant 0 : index
    %435 = vector.load %arg12[%c4_200, %c0_201, %c0_202] : memref<8x1x8xf32, #tpu.memory_space<vmem>>, vector<1x1x8xf32>
    %436 = vector.shape_cast %435 : vector<1x1x8xf32> to vector<1x8xf32>
    %437 = vector.shape_cast %436 : vector<1x8xf32> to vector<1x1x8xf32>
    %438 = vector.broadcast %437 : vector<1x1x8xf32> to vector<8x8x8xf32>
    %439 = arith.addf %434, %438 : vector<8x8x8xf32>
    %c4_203 = arith.constant 4 : index
    %c0_204 = arith.constant 0 : index
    %c0_205 = arith.constant 0 : index
    %440 = vector.load %arg10[%c4_203, %c0_204, %c0_205] : memref<8x128x8xbf16, #tpu.memory_space<vmem>>, vector<1x128x8xbf16>
    %441 = vector.shape_cast %440 : vector<1x128x8xbf16> to vector<128x8xbf16>
    %442 = vector.shape_cast %418 : vector<8x8x128xbf16> to vector<64x128xbf16>
    %cst_206 = arith.constant dense<0.000000e+00> : vector<64x8xf32>
    %443 = tpu.matmul %442, %441, %cst_206 {dimension_numbers = #tpu.dot_dimension_numbers<[1], [0], [0], [1], [0, 0, 1, 1], [], []>} : vector<64x128xbf16>, vector<128x8xbf16>, vector<64x8xf32> -> vector<64x8xf32>
    %444 = vector.shape_cast %443 : vector<64x8xf32> to vector<8x8x8xf32>
    %c4_207 = arith.constant 4 : index
    %c0_208 = arith.constant 0 : index
    %c0_209 = arith.constant 0 : index
    %445 = vector.load %arg13[%c4_207, %c0_208, %c0_209] : memref<8x1x8xf32, #tpu.memory_space<vmem>>, vector<1x1x8xf32>
    %446 = vector.shape_cast %445 : vector<1x1x8xf32> to vector<1x8xf32>
    %447 = vector.shape_cast %446 : vector<1x8xf32> to vector<1x1x8xf32>
    %448 = vector.broadcast %447 : vector<1x1x8xf32> to vector<8x8x8xf32>
    %449 = arith.addf %444, %448 : vector<8x8x8xf32>
    %450 = arith.truncf %429 : vector<8x8x8xf32> to vector<8x8x8xbf16>
    %451 = arith.truncf %439 : vector<8x8x8xf32> to vector<8x8x8xbf16>
    "tpu.trace_start"() <{level = 10 : i32, message = "bqd,bkd->bqk"}> : () -> ()
    %cst_210 = arith.constant dense<0.000000e+00> : vector<8x8x8xf32>
    %452 = tpu.matmul %450, %451, %cst_210 {dimension_numbers = #tpu.dot_dimension_numbers<[2], [2], [1], [1], [0, 0, 0, 1, 1, 1], [0], [0]>} : vector<8x8x8xbf16>, vector<8x8x8xbf16>, vector<8x8x8xf32> -> vector<8x8x8xf32>
    "tpu.trace_stop"() : () -> ()
    %cst_211 = arith.constant 0.353553385 : f32
    %453 = vector.broadcast %cst_211 : f32 to vector<8x8x8xf32>
    %454 = arith.mulf %452, %453 : vector<8x8x8xf32>
    %cst_212 = arith.constant -1.000000e+30 : f32
    %455 = vector.shape_cast %7 : vector<1x1x8xi1> to vector<1x1x8xi1>
    %456 = vector.broadcast %455 : vector<1x1x8xi1> to vector<8x8x8xi1>
    %457 = vector.broadcast %cst_212 : f32 to vector<8x8x8xf32>
    %458 = arith.select %456, %454, %457 : vector<8x8x8xi1>, vector<8x8x8xf32>
    %cst_213 = arith.constant dense<0xFF800000> : vector<8x8xf32>
    %459 = vector.multi_reduction <maximumf>, %458, %cst_213 [2] : vector<8x8x8xf32> to vector<8x8xf32>
    %460 = vector.shape_cast %459 : vector<8x8xf32> to vector<8x8x1xf32>
    %461 = vector.broadcast %460 : vector<8x8x1xf32> to vector<8x8x8xf32>
    %462 = arith.subf %458, %461 : vector<8x8x8xf32>
    %463 = math.exp %462 : vector<8x8x8xf32>
    %cst_214 = arith.constant dense<0.000000e+00> : vector<8x8xf32>
    %464 = vector.multi_reduction <add>, %463, %cst_214 [2] : vector<8x8x8xf32> to vector<8x8xf32>
    %465 = vector.shape_cast %464 : vector<8x8xf32> to vector<8x8x1xf32>
    %466 = tpu.reciprocal %465 {approx = true} : vector<8x8x1xf32> -> vector<8x8x1xf32>
    %467 = vector.broadcast %466 : vector<8x8x1xf32> to vector<8x8x8xf32>
    %468 = arith.mulf %463, %467 : vector<8x8x8xf32>
    %469 = arith.truncf %468 : vector<8x8x8xf32> to vector<8x8x8xbf16>
    %470 = arith.truncf %449 : vector<8x8x8xf32> to vector<8x8x8xbf16>
    "tpu.trace_start"() <{level = 10 : i32, message = "bqk,bkd->bqd"}> : () -> ()
    %cst_215 = arith.constant dense<0.000000e+00> : vector<8x8x8xf32>
    %471 = tpu.matmul %469, %470, %cst_215 {dimension_numbers = #tpu.dot_dimension_numbers<[2], [1], [1], [2], [0, 0, 0, 1, 1, 2], [0], [0]>} : vector<8x8x8xbf16>, vector<8x8x8xbf16>, vector<8x8x8xf32> -> vector<8x8x8xf32>
    "tpu.trace_stop"() : () -> ()
    %472 = arith.truncf %471 : vector<8x8x8xf32> to vector<8x8x8xbf16>
    %c4_216 = arith.constant 4 : index
    %c0_217 = arith.constant 0 : index
    %c0_218 = arith.constant 0 : index
    %473 = vector.load %arg14[%c4_216, %c0_217, %c0_218] : memref<8x8x128xbf16, #tpu.memory_space<vmem>>, vector<1x8x128xbf16>
    %474 = vector.shape_cast %473 : vector<1x8x128xbf16> to vector<8x128xbf16>
    %475 = vector.shape_cast %472 : vector<8x8x8xbf16> to vector<64x8xbf16>
    %cst_219 = arith.constant dense<0.000000e+00> : vector<64x128xf32>
    %476 = tpu.matmul %475, %474, %cst_219 {dimension_numbers = #tpu.dot_dimension_numbers<[1], [0], [0], [1], [0, 0, 1, 1], [], []>} : vector<64x8xbf16>, vector<8x128xbf16>, vector<64x128xf32> -> vector<64x128xf32>
    %477 = vector.shape_cast %476 : vector<64x128xf32> to vector<8x8x128xf32>
    %478 = arith.addf %419, %477 : vector<8x8x128xf32>
    %c5 = arith.constant 5 : index
    %c0_220 = arith.constant 0 : index
    %c0_221 = arith.constant 0 : index
    %479 = vector.load %arg8[%c5, %c0_220, %c0_221] : memref<8x128x8xbf16, #tpu.memory_space<vmem>>, vector<1x128x8xbf16>
    %480 = vector.shape_cast %479 : vector<1x128x8xbf16> to vector<128x8xbf16>
    %481 = vector.shape_cast %418 : vector<8x8x128xbf16> to vector<64x128xbf16>
    %cst_222 = arith.constant dense<0.000000e+00> : vector<64x8xf32>
    %482 = tpu.matmul %481, %480, %cst_222 {dimension_numbers = #tpu.dot_dimension_numbers<[1], [0], [0], [1], [0, 0, 1, 1], [], []>} : vector<64x128xbf16>, vector<128x8xbf16>, vector<64x8xf32> -> vector<64x8xf32>
    %483 = vector.shape_cast %482 : vector<64x8xf32> to vector<8x8x8xf32>
    %c5_223 = arith.constant 5 : index
    %c0_224 = arith.constant 0 : index
    %c0_225 = arith.constant 0 : index
    %484 = vector.load %arg11[%c5_223, %c0_224, %c0_225] : memref<8x1x8xf32, #tpu.memory_space<vmem>>, vector<1x1x8xf32>
    %485 = vector.shape_cast %484 : vector<1x1x8xf32> to vector<1x8xf32>
    %486 = vector.shape_cast %485 : vector<1x8xf32> to vector<1x1x8xf32>
    %487 = vector.broadcast %486 : vector<1x1x8xf32> to vector<8x8x8xf32>
    %488 = arith.addf %483, %487 : vector<8x8x8xf32>
    %c5_226 = arith.constant 5 : index
    %c0_227 = arith.constant 0 : index
    %c0_228 = arith.constant 0 : index
    %489 = vector.load %arg9[%c5_226, %c0_227, %c0_228] : memref<8x128x8xbf16, #tpu.memory_space<vmem>>, vector<1x128x8xbf16>
    %490 = vector.shape_cast %489 : vector<1x128x8xbf16> to vector<128x8xbf16>
    %491 = vector.shape_cast %418 : vector<8x8x128xbf16> to vector<64x128xbf16>
    %cst_229 = arith.constant dense<0.000000e+00> : vector<64x8xf32>
    %492 = tpu.matmul %491, %490, %cst_229 {dimension_numbers = #tpu.dot_dimension_numbers<[1], [0], [0], [1], [0, 0, 1, 1], [], []>} : vector<64x128xbf16>, vector<128x8xbf16>, vector<64x8xf32> -> vector<64x8xf32>
    %493 = vector.shape_cast %492 : vector<64x8xf32> to vector<8x8x8xf32>
    %c5_230 = arith.constant 5 : index
    %c0_231 = arith.constant 0 : index
    %c0_232 = arith.constant 0 : index
    %494 = vector.load %arg12[%c5_230, %c0_231, %c0_232] : memref<8x1x8xf32, #tpu.memory_space<vmem>>, vector<1x1x8xf32>
    %495 = vector.shape_cast %494 : vector<1x1x8xf32> to vector<1x8xf32>
    %496 = vector.shape_cast %495 : vector<1x8xf32> to vector<1x1x8xf32>
    %497 = vector.broadcast %496 : vector<1x1x8xf32> to vector<8x8x8xf32>
    %498 = arith.addf %493, %497 : vector<8x8x8xf32>
    %c5_233 = arith.constant 5 : index
    %c0_234 = arith.constant 0 : index
    %c0_235 = arith.constant 0 : index
    %499 = vector.load %arg10[%c5_233, %c0_234, %c0_235] : memref<8x128x8xbf16, #tpu.memory_space<vmem>>, vector<1x128x8xbf16>
    %500 = vector.shape_cast %499 : vector<1x128x8xbf16> to vector<128x8xbf16>
    %501 = vector.shape_cast %418 : vector<8x8x128xbf16> to vector<64x128xbf16>
    %cst_236 = arith.constant dense<0.000000e+00> : vector<64x8xf32>
    %502 = tpu.matmul %501, %500, %cst_236 {dimension_numbers = #tpu.dot_dimension_numbers<[1], [0], [0], [1], [0, 0, 1, 1], [], []>} : vector<64x128xbf16>, vector<128x8xbf16>, vector<64x8xf32> -> vector<64x8xf32>
    %503 = vector.shape_cast %502 : vector<64x8xf32> to vector<8x8x8xf32>
    %c5_237 = arith.constant 5 : index
    %c0_238 = arith.constant 0 : index
    %c0_239 = arith.constant 0 : index
    %504 = vector.load %arg13[%c5_237, %c0_238, %c0_239] : memref<8x1x8xf32, #tpu.memory_space<vmem>>, vector<1x1x8xf32>
    %505 = vector.shape_cast %504 : vector<1x1x8xf32> to vector<1x8xf32>
    %506 = vector.shape_cast %505 : vector<1x8xf32> to vector<1x1x8xf32>
    %507 = vector.broadcast %506 : vector<1x1x8xf32> to vector<8x8x8xf32>
    %508 = arith.addf %503, %507 : vector<8x8x8xf32>
    %509 = arith.truncf %488 : vector<8x8x8xf32> to vector<8x8x8xbf16>
    %510 = arith.truncf %498 : vector<8x8x8xf32> to vector<8x8x8xbf16>
    "tpu.trace_start"() <{level = 10 : i32, message = "bqd,bkd->bqk"}> : () -> ()
    %cst_240 = arith.constant dense<0.000000e+00> : vector<8x8x8xf32>
    %511 = tpu.matmul %509, %510, %cst_240 {dimension_numbers = #tpu.dot_dimension_numbers<[2], [2], [1], [1], [0, 0, 0, 1, 1, 1], [0], [0]>} : vector<8x8x8xbf16>, vector<8x8x8xbf16>, vector<8x8x8xf32> -> vector<8x8x8xf32>
    "tpu.trace_stop"() : () -> ()
    %cst_241 = arith.constant 0.353553385 : f32
    %512 = vector.broadcast %cst_241 : f32 to vector<8x8x8xf32>
    %513 = arith.mulf %511, %512 : vector<8x8x8xf32>
    %cst_242 = arith.constant -1.000000e+30 : f32
    %514 = vector.shape_cast %7 : vector<1x1x8xi1> to vector<1x1x8xi1>
    %515 = vector.broadcast %514 : vector<1x1x8xi1> to vector<8x8x8xi1>
    %516 = vector.broadcast %cst_242 : f32 to vector<8x8x8xf32>
    %517 = arith.select %515, %513, %516 : vector<8x8x8xi1>, vector<8x8x8xf32>
    %cst_243 = arith.constant dense<0xFF800000> : vector<8x8xf32>
    %518 = vector.multi_reduction <maximumf>, %517, %cst_243 [2] : vector<8x8x8xf32> to vector<8x8xf32>
    %519 = vector.shape_cast %518 : vector<8x8xf32> to vector<8x8x1xf32>
    %520 = vector.broadcast %519 : vector<8x8x1xf32> to vector<8x8x8xf32>
    %521 = arith.subf %517, %520 : vector<8x8x8xf32>
    %522 = math.exp %521 : vector<8x8x8xf32>
    %cst_244 = arith.constant dense<0.000000e+00> : vector<8x8xf32>
    %523 = vector.multi_reduction <add>, %522, %cst_244 [2] : vector<8x8x8xf32> to vector<8x8xf32>
    %524 = vector.shape_cast %523 : vector<8x8xf32> to vector<8x8x1xf32>
    %525 = tpu.reciprocal %524 {approx = true} : vector<8x8x1xf32> -> vector<8x8x1xf32>
    %526 = vector.broadcast %525 : vector<8x8x1xf32> to vector<8x8x8xf32>
    %527 = arith.mulf %522, %526 : vector<8x8x8xf32>
    %528 = arith.truncf %527 : vector<8x8x8xf32> to vector<8x8x8xbf16>
    %529 = arith.truncf %508 : vector<8x8x8xf32> to vector<8x8x8xbf16>
    "tpu.trace_start"() <{level = 10 : i32, message = "bqk,bkd->bqd"}> : () -> ()
    %cst_245 = arith.constant dense<0.000000e+00> : vector<8x8x8xf32>
    %530 = tpu.matmul %528, %529, %cst_245 {dimension_numbers = #tpu.dot_dimension_numbers<[2], [1], [1], [2], [0, 0, 0, 1, 1, 2], [0], [0]>} : vector<8x8x8xbf16>, vector<8x8x8xbf16>, vector<8x8x8xf32> -> vector<8x8x8xf32>
    "tpu.trace_stop"() : () -> ()
    %531 = arith.truncf %530 : vector<8x8x8xf32> to vector<8x8x8xbf16>
    %c5_246 = arith.constant 5 : index
    %c0_247 = arith.constant 0 : index
    %c0_248 = arith.constant 0 : index
    %532 = vector.load %arg14[%c5_246, %c0_247, %c0_248] : memref<8x8x128xbf16, #tpu.memory_space<vmem>>, vector<1x8x128xbf16>
    %533 = vector.shape_cast %532 : vector<1x8x128xbf16> to vector<8x128xbf16>
    %534 = vector.shape_cast %531 : vector<8x8x8xbf16> to vector<64x8xbf16>
    %cst_249 = arith.constant dense<0.000000e+00> : vector<64x128xf32>
    %535 = tpu.matmul %534, %533, %cst_249 {dimension_numbers = #tpu.dot_dimension_numbers<[1], [0], [0], [1], [0, 0, 1, 1], [], []>} : vector<64x8xbf16>, vector<8x128xbf16>, vector<64x128xf32> -> vector<64x128xf32>
    %536 = vector.shape_cast %535 : vector<64x128xf32> to vector<8x8x128xf32>
    %537 = arith.addf %478, %536 : vector<8x8x128xf32>
    %c6 = arith.constant 6 : index
    %c0_250 = arith.constant 0 : index
    %c0_251 = arith.constant 0 : index
    %538 = vector.load %arg8[%c6, %c0_250, %c0_251] : memref<8x128x8xbf16, #tpu.memory_space<vmem>>, vector<1x128x8xbf16>
    %539 = vector.shape_cast %538 : vector<1x128x8xbf16> to vector<128x8xbf16>
    %540 = vector.shape_cast %418 : vector<8x8x128xbf16> to vector<64x128xbf16>
    %cst_252 = arith.constant dense<0.000000e+00> : vector<64x8xf32>
    %541 = tpu.matmul %540, %539, %cst_252 {dimension_numbers = #tpu.dot_dimension_numbers<[1], [0], [0], [1], [0, 0, 1, 1], [], []>} : vector<64x128xbf16>, vector<128x8xbf16>, vector<64x8xf32> -> vector<64x8xf32>
    %542 = vector.shape_cast %541 : vector<64x8xf32> to vector<8x8x8xf32>
    %c6_253 = arith.constant 6 : index
    %c0_254 = arith.constant 0 : index
    %c0_255 = arith.constant 0 : index
    %543 = vector.load %arg11[%c6_253, %c0_254, %c0_255] : memref<8x1x8xf32, #tpu.memory_space<vmem>>, vector<1x1x8xf32>
    %544 = vector.shape_cast %543 : vector<1x1x8xf32> to vector<1x8xf32>
    %545 = vector.shape_cast %544 : vector<1x8xf32> to vector<1x1x8xf32>
    %546 = vector.broadcast %545 : vector<1x1x8xf32> to vector<8x8x8xf32>
    %547 = arith.addf %542, %546 : vector<8x8x8xf32>
    %c6_256 = arith.constant 6 : index
    %c0_257 = arith.constant 0 : index
    %c0_258 = arith.constant 0 : index
    %548 = vector.load %arg9[%c6_256, %c0_257, %c0_258] : memref<8x128x8xbf16, #tpu.memory_space<vmem>>, vector<1x128x8xbf16>
    %549 = vector.shape_cast %548 : vector<1x128x8xbf16> to vector<128x8xbf16>
    %550 = vector.shape_cast %418 : vector<8x8x128xbf16> to vector<64x128xbf16>
    %cst_259 = arith.constant dense<0.000000e+00> : vector<64x8xf32>
    %551 = tpu.matmul %550, %549, %cst_259 {dimension_numbers = #tpu.dot_dimension_numbers<[1], [0], [0], [1], [0, 0, 1, 1], [], []>} : vector<64x128xbf16>, vector<128x8xbf16>, vector<64x8xf32> -> vector<64x8xf32>
    %552 = vector.shape_cast %551 : vector<64x8xf32> to vector<8x8x8xf32>
    %c6_260 = arith.constant 6 : index
    %c0_261 = arith.constant 0 : index
    %c0_262 = arith.constant 0 : index
    %553 = vector.load %arg12[%c6_260, %c0_261, %c0_262] : memref<8x1x8xf32, #tpu.memory_space<vmem>>, vector<1x1x8xf32>
    %554 = vector.shape_cast %553 : vector<1x1x8xf32> to vector<1x8xf32>
    %555 = vector.shape_cast %554 : vector<1x8xf32> to vector<1x1x8xf32>
    %556 = vector.broadcast %555 : vector<1x1x8xf32> to vector<8x8x8xf32>
    %557 = arith.addf %552, %556 : vector<8x8x8xf32>
    %c6_263 = arith.constant 6 : index
    %c0_264 = arith.constant 0 : index
    %c0_265 = arith.constant 0 : index
    %558 = vector.load %arg10[%c6_263, %c0_264, %c0_265] : memref<8x128x8xbf16, #tpu.memory_space<vmem>>, vector<1x128x8xbf16>
    %559 = vector.shape_cast %558 : vector<1x128x8xbf16> to vector<128x8xbf16>
    %560 = vector.shape_cast %418 : vector<8x8x128xbf16> to vector<64x128xbf16>
    %cst_266 = arith.constant dense<0.000000e+00> : vector<64x8xf32>
    %561 = tpu.matmul %560, %559, %cst_266 {dimension_numbers = #tpu.dot_dimension_numbers<[1], [0], [0], [1], [0, 0, 1, 1], [], []>} : vector<64x128xbf16>, vector<128x8xbf16>, vector<64x8xf32> -> vector<64x8xf32>
    %562 = vector.shape_cast %561 : vector<64x8xf32> to vector<8x8x8xf32>
    %c6_267 = arith.constant 6 : index
    %c0_268 = arith.constant 0 : index
    %c0_269 = arith.constant 0 : index
    %563 = vector.load %arg13[%c6_267, %c0_268, %c0_269] : memref<8x1x8xf32, #tpu.memory_space<vmem>>, vector<1x1x8xf32>
    %564 = vector.shape_cast %563 : vector<1x1x8xf32> to vector<1x8xf32>
    %565 = vector.shape_cast %564 : vector<1x8xf32> to vector<1x1x8xf32>
    %566 = vector.broadcast %565 : vector<1x1x8xf32> to vector<8x8x8xf32>
    %567 = arith.addf %562, %566 : vector<8x8x8xf32>
    %568 = arith.truncf %547 : vector<8x8x8xf32> to vector<8x8x8xbf16>
    %569 = arith.truncf %557 : vector<8x8x8xf32> to vector<8x8x8xbf16>
    "tpu.trace_start"() <{level = 10 : i32, message = "bqd,bkd->bqk"}> : () -> ()
    %cst_270 = arith.constant dense<0.000000e+00> : vector<8x8x8xf32>
    %570 = tpu.matmul %568, %569, %cst_270 {dimension_numbers = #tpu.dot_dimension_numbers<[2], [2], [1], [1], [0, 0, 0, 1, 1, 1], [0], [0]>} : vector<8x8x8xbf16>, vector<8x8x8xbf16>, vector<8x8x8xf32> -> vector<8x8x8xf32>
    "tpu.trace_stop"() : () -> ()
    %cst_271 = arith.constant 0.353553385 : f32
    %571 = vector.broadcast %cst_271 : f32 to vector<8x8x8xf32>
    %572 = arith.mulf %570, %571 : vector<8x8x8xf32>
    %cst_272 = arith.constant -1.000000e+30 : f32
    %573 = vector.shape_cast %7 : vector<1x1x8xi1> to vector<1x1x8xi1>
    %574 = vector.broadcast %573 : vector<1x1x8xi1> to vector<8x8x8xi1>
    %575 = vector.broadcast %cst_272 : f32 to vector<8x8x8xf32>
    %576 = arith.select %574, %572, %575 : vector<8x8x8xi1>, vector<8x8x8xf32>
    %cst_273 = arith.constant dense<0xFF800000> : vector<8x8xf32>
    %577 = vector.multi_reduction <maximumf>, %576, %cst_273 [2] : vector<8x8x8xf32> to vector<8x8xf32>
    %578 = vector.shape_cast %577 : vector<8x8xf32> to vector<8x8x1xf32>
    %579 = vector.broadcast %578 : vector<8x8x1xf32> to vector<8x8x8xf32>
    %580 = arith.subf %576, %579 : vector<8x8x8xf32>
    %581 = math.exp %580 : vector<8x8x8xf32>
    %cst_274 = arith.constant dense<0.000000e+00> : vector<8x8xf32>
    %582 = vector.multi_reduction <add>, %581, %cst_274 [2] : vector<8x8x8xf32> to vector<8x8xf32>
    %583 = vector.shape_cast %582 : vector<8x8xf32> to vector<8x8x1xf32>
    %584 = tpu.reciprocal %583 {approx = true} : vector<8x8x1xf32> -> vector<8x8x1xf32>
    %585 = vector.broadcast %584 : vector<8x8x1xf32> to vector<8x8x8xf32>
    %586 = arith.mulf %581, %585 : vector<8x8x8xf32>
    %587 = arith.truncf %586 : vector<8x8x8xf32> to vector<8x8x8xbf16>
    %588 = arith.truncf %567 : vector<8x8x8xf32> to vector<8x8x8xbf16>
    "tpu.trace_start"() <{level = 10 : i32, message = "bqk,bkd->bqd"}> : () -> ()
    %cst_275 = arith.constant dense<0.000000e+00> : vector<8x8x8xf32>
    %589 = tpu.matmul %587, %588, %cst_275 {dimension_numbers = #tpu.dot_dimension_numbers<[2], [1], [1], [2], [0, 0, 0, 1, 1, 2], [0], [0]>} : vector<8x8x8xbf16>, vector<8x8x8xbf16>, vector<8x8x8xf32> -> vector<8x8x8xf32>
    "tpu.trace_stop"() : () -> ()
    %590 = arith.truncf %589 : vector<8x8x8xf32> to vector<8x8x8xbf16>
    %c6_276 = arith.constant 6 : index
    %c0_277 = arith.constant 0 : index
    %c0_278 = arith.constant 0 : index
    %591 = vector.load %arg14[%c6_276, %c0_277, %c0_278] : memref<8x8x128xbf16, #tpu.memory_space<vmem>>, vector<1x8x128xbf16>
    %592 = vector.shape_cast %591 : vector<1x8x128xbf16> to vector<8x128xbf16>
    %593 = vector.shape_cast %590 : vector<8x8x8xbf16> to vector<64x8xbf16>
    %cst_279 = arith.constant dense<0.000000e+00> : vector<64x128xf32>
    %594 = tpu.matmul %593, %592, %cst_279 {dimension_numbers = #tpu.dot_dimension_numbers<[1], [0], [0], [1], [0, 0, 1, 1], [], []>} : vector<64x8xbf16>, vector<8x128xbf16>, vector<64x128xf32> -> vector<64x128xf32>
    %595 = vector.shape_cast %594 : vector<64x128xf32> to vector<8x8x128xf32>
    %596 = arith.addf %537, %595 : vector<8x8x128xf32>
    %c7 = arith.constant 7 : index
    %c0_280 = arith.constant 0 : index
    %c0_281 = arith.constant 0 : index
    %597 = vector.load %arg8[%c7, %c0_280, %c0_281] : memref<8x128x8xbf16, #tpu.memory_space<vmem>>, vector<1x128x8xbf16>
    %598 = vector.shape_cast %597 : vector<1x128x8xbf16> to vector<128x8xbf16>
    %599 = vector.shape_cast %418 : vector<8x8x128xbf16> to vector<64x128xbf16>
    %cst_282 = arith.constant dense<0.000000e+00> : vector<64x8xf32>
    %600 = tpu.matmul %599, %598, %cst_282 {dimension_numbers = #tpu.dot_dimension_numbers<[1], [0], [0], [1], [0, 0, 1, 1], [], []>} : vector<64x128xbf16>, vector<128x8xbf16>, vector<64x8xf32> -> vector<64x8xf32>
    %601 = vector.shape_cast %600 : vector<64x8xf32> to vector<8x8x8xf32>
    %c7_283 = arith.constant 7 : index
    %c0_284 = arith.constant 0 : index
    %c0_285 = arith.constant 0 : index
    %602 = vector.load %arg11[%c7_283, %c0_284, %c0_285] : memref<8x1x8xf32, #tpu.memory_space<vmem>>, vector<1x1x8xf32>
    %603 = vector.shape_cast %602 : vector<1x1x8xf32> to vector<1x8xf32>
    %604 = vector.shape_cast %603 : vector<1x8xf32> to vector<1x1x8xf32>
    %605 = vector.broadcast %604 : vector<1x1x8xf32> to vector<8x8x8xf32>
    %606 = arith.addf %601, %605 : vector<8x8x8xf32>
    %c7_286 = arith.constant 7 : index
    %c0_287 = arith.constant 0 : index
    %c0_288 = arith.constant 0 : index
    %607 = vector.load %arg9[%c7_286, %c0_287, %c0_288] : memref<8x128x8xbf16, #tpu.memory_space<vmem>>, vector<1x128x8xbf16>
    %608 = vector.shape_cast %607 : vector<1x128x8xbf16> to vector<128x8xbf16>
    %609 = vector.shape_cast %418 : vector<8x8x128xbf16> to vector<64x128xbf16>
    %cst_289 = arith.constant dense<0.000000e+00> : vector<64x8xf32>
    %610 = tpu.matmul %609, %608, %cst_289 {dimension_numbers = #tpu.dot_dimension_numbers<[1], [0], [0], [1], [0, 0, 1, 1], [], []>} : vector<64x128xbf16>, vector<128x8xbf16>, vector<64x8xf32> -> vector<64x8xf32>
    %611 = vector.shape_cast %610 : vector<64x8xf32> to vector<8x8x8xf32>
    %c7_290 = arith.constant 7 : index
    %c0_291 = arith.constant 0 : index
    %c0_292 = arith.constant 0 : index
    %612 = vector.load %arg12[%c7_290, %c0_291, %c0_292] : memref<8x1x8xf32, #tpu.memory_space<vmem>>, vector<1x1x8xf32>
    %613 = vector.shape_cast %612 : vector<1x1x8xf32> to vector<1x8xf32>
    %614 = vector.shape_cast %613 : vector<1x8xf32> to vector<1x1x8xf32>
    %615 = vector.broadcast %614 : vector<1x1x8xf32> to vector<8x8x8xf32>
    %616 = arith.addf %611, %615 : vector<8x8x8xf32>
    %c7_293 = arith.constant 7 : index
    %c0_294 = arith.constant 0 : index
    %c0_295 = arith.constant 0 : index
    %617 = vector.load %arg10[%c7_293, %c0_294, %c0_295] : memref<8x128x8xbf16, #tpu.memory_space<vmem>>, vector<1x128x8xbf16>
    %618 = vector.shape_cast %617 : vector<1x128x8xbf16> to vector<128x8xbf16>
    %619 = vector.shape_cast %418 : vector<8x8x128xbf16> to vector<64x128xbf16>
    %cst_296 = arith.constant dense<0.000000e+00> : vector<64x8xf32>
    %620 = tpu.matmul %619, %618, %cst_296 {dimension_numbers = #tpu.dot_dimension_numbers<[1], [0], [0], [1], [0, 0, 1, 1], [], []>} : vector<64x128xbf16>, vector<128x8xbf16>, vector<64x8xf32> -> vector<64x8xf32>
    %621 = vector.shape_cast %620 : vector<64x8xf32> to vector<8x8x8xf32>
    %c7_297 = arith.constant 7 : index
    %c0_298 = arith.constant 0 : index
    %c0_299 = arith.constant 0 : index
    %622 = vector.load %arg13[%c7_297, %c0_298, %c0_299] : memref<8x1x8xf32, #tpu.memory_space<vmem>>, vector<1x1x8xf32>
    %623 = vector.shape_cast %622 : vector<1x1x8xf32> to vector<1x8xf32>
    %624 = vector.shape_cast %623 : vector<1x8xf32> to vector<1x1x8xf32>
    %625 = vector.broadcast %624 : vector<1x1x8xf32> to vector<8x8x8xf32>
    %626 = arith.addf %621, %625 : vector<8x8x8xf32>
    %627 = arith.truncf %606 : vector<8x8x8xf32> to vector<8x8x8xbf16>
    %628 = arith.truncf %616 : vector<8x8x8xf32> to vector<8x8x8xbf16>
    "tpu.trace_start"() <{level = 10 : i32, message = "bqd,bkd->bqk"}> : () -> ()
    %cst_300 = arith.constant dense<0.000000e+00> : vector<8x8x8xf32>
    %629 = tpu.matmul %627, %628, %cst_300 {dimension_numbers = #tpu.dot_dimension_numbers<[2], [2], [1], [1], [0, 0, 0, 1, 1, 1], [0], [0]>} : vector<8x8x8xbf16>, vector<8x8x8xbf16>, vector<8x8x8xf32> -> vector<8x8x8xf32>
    "tpu.trace_stop"() : () -> ()
    %cst_301 = arith.constant 0.353553385 : f32
    %630 = vector.broadcast %cst_301 : f32 to vector<8x8x8xf32>
    %631 = arith.mulf %629, %630 : vector<8x8x8xf32>
    %cst_302 = arith.constant -1.000000e+30 : f32
    %632 = vector.shape_cast %7 : vector<1x1x8xi1> to vector<1x1x8xi1>
    %633 = vector.broadcast %632 : vector<1x1x8xi1> to vector<8x8x8xi1>
    %634 = vector.broadcast %cst_302 : f32 to vector<8x8x8xf32>
    %635 = arith.select %633, %631, %634 : vector<8x8x8xi1>, vector<8x8x8xf32>
    %cst_303 = arith.constant dense<0xFF800000> : vector<8x8xf32>
    %636 = vector.multi_reduction <maximumf>, %635, %cst_303 [2] : vector<8x8x8xf32> to vector<8x8xf32>
    %637 = vector.shape_cast %636 : vector<8x8xf32> to vector<8x8x1xf32>
    %638 = vector.broadcast %637 : vector<8x8x1xf32> to vector<8x8x8xf32>
    %639 = arith.subf %635, %638 : vector<8x8x8xf32>
    %640 = math.exp %639 : vector<8x8x8xf32>
    %cst_304 = arith.constant dense<0.000000e+00> : vector<8x8xf32>
    %641 = vector.multi_reduction <add>, %640, %cst_304 [2] : vector<8x8x8xf32> to vector<8x8xf32>
    %642 = vector.shape_cast %641 : vector<8x8xf32> to vector<8x8x1xf32>
    %643 = tpu.reciprocal %642 {approx = true} : vector<8x8x1xf32> -> vector<8x8x1xf32>
    %644 = vector.broadcast %643 : vector<8x8x1xf32> to vector<8x8x8xf32>
    %645 = arith.mulf %640, %644 : vector<8x8x8xf32>
    %646 = arith.truncf %645 : vector<8x8x8xf32> to vector<8x8x8xbf16>
    %647 = arith.truncf %626 : vector<8x8x8xf32> to vector<8x8x8xbf16>
    "tpu.trace_start"() <{level = 10 : i32, message = "bqk,bkd->bqd"}> : () -> ()
    %cst_305 = arith.constant dense<0.000000e+00> : vector<8x8x8xf32>
    %648 = tpu.matmul %646, %647, %cst_305 {dimension_numbers = #tpu.dot_dimension_numbers<[2], [1], [1], [2], [0, 0, 0, 1, 1, 2], [0], [0]>} : vector<8x8x8xbf16>, vector<8x8x8xbf16>, vector<8x8x8xf32> -> vector<8x8x8xf32>
    "tpu.trace_stop"() : () -> ()
    %649 = arith.truncf %648 : vector<8x8x8xf32> to vector<8x8x8xbf16>
    %c7_306 = arith.constant 7 : index
    %c0_307 = arith.constant 0 : index
    %c0_308 = arith.constant 0 : index
    %650 = vector.load %arg14[%c7_306, %c0_307, %c0_308] : memref<8x8x128xbf16, #tpu.memory_space<vmem>>, vector<1x8x128xbf16>
    %651 = vector.shape_cast %650 : vector<1x8x128xbf16> to vector<8x128xbf16>
    %652 = vector.shape_cast %649 : vector<8x8x8xbf16> to vector<64x8xbf16>
    %cst_309 = arith.constant dense<0.000000e+00> : vector<64x128xf32>
    %653 = tpu.matmul %652, %651, %cst_309 {dimension_numbers = #tpu.dot_dimension_numbers<[1], [0], [0], [1], [0, 0, 1, 1], [], []>} : vector<64x8xbf16>, vector<8x128xbf16>, vector<64x128xf32> -> vector<64x128xf32>
    %654 = vector.shape_cast %653 : vector<64x128xf32> to vector<8x8x128xf32>
    %655 = arith.addf %596, %654 : vector<8x8x128xf32>
    %656 = arith.addf %385, %655 : vector<8x8x128xf32>
    %c1_310 = arith.constant 1 : index
    %c0_311 = arith.constant 0 : index
    %c0_312 = arith.constant 0 : index
    %657 = vector.load %arg15[%c1_310, %c0_311, %c0_312] : memref<2x1x128xf32, #tpu.memory_space<vmem>>, vector<1x1x128xf32>
    %658 = vector.shape_cast %657 : vector<1x1x128xf32> to vector<1x128xf32>
    %659 = vector.shape_cast %658 : vector<1x128xf32> to vector<1x1x128xf32>
    %660 = vector.broadcast %659 : vector<1x1x128xf32> to vector<8x8x128xf32>
    %661 = arith.addf %656, %660 : vector<8x8x128xf32>
    %c1_313 = arith.constant 1 : index
    %c0_314 = arith.constant 0 : index
    %c0_315 = arith.constant 0 : index
    %662 = vector.load %arg16[%c1_313, %c0_314, %c0_315] : memref<2x1x128xf32, #tpu.memory_space<vmem>>, vector<1x1x128xf32>
    %663 = vector.shape_cast %662 : vector<1x1x128xf32> to vector<1x128xf32>
    %c1_316 = arith.constant 1 : index
    %c0_317 = arith.constant 0 : index
    %c0_318 = arith.constant 0 : index
    %664 = vector.load %arg17[%c1_316, %c0_317, %c0_318] : memref<2x1x128xf32, #tpu.memory_space<vmem>>, vector<1x1x128xf32>
    %665 = vector.shape_cast %664 : vector<1x1x128xf32> to vector<1x128xf32>
    %666 = vector.shape_cast %4 : vector<1x128xf32> to vector<1x1x128xf32>
    %667 = vector.broadcast %666 : vector<1x1x128xf32> to vector<8x8x128xf32>
    %668 = arith.mulf %661, %667 : vector<8x8x128xf32>
    %cst_319 = arith.constant dense<0.000000e+00> : vector<8x8xf32>
    %669 = vector.multi_reduction <add>, %668, %cst_319 [2] : vector<8x8x128xf32> to vector<8x8xf32>
    %670 = vector.shape_cast %669 : vector<8x8xf32> to vector<8x8x1xf32>
    %cst_320 = arith.constant 3.125000e-02 : f32
    %671 = vector.broadcast %cst_320 : f32 to vector<8x8x1xf32>
    %672 = arith.mulf %670, %671 : vector<8x8x1xf32>
    %673 = vector.broadcast %672 : vector<8x8x1xf32> to vector<8x8x128xf32>
    %674 = arith.subf %661, %673 : vector<8x8x128xf32>
    %675 = vector.shape_cast %4 : vector<1x128xf32> to vector<1x1x128xf32>
    %676 = vector.broadcast %675 : vector<1x1x128xf32> to vector<8x8x128xf32>
    %677 = arith.mulf %674, %676 : vector<8x8x128xf32>
    %678 = arith.mulf %677, %677 : vector<8x8x128xf32>
    %cst_321 = arith.constant dense<0.000000e+00> : vector<8x8xf32>
    %679 = vector.multi_reduction <add>, %678, %cst_321 [2] : vector<8x8x128xf32> to vector<8x8xf32>
    %680 = vector.shape_cast %679 : vector<8x8xf32> to vector<8x8x1xf32>
    %cst_322 = arith.constant 3.125000e-02 : f32
    %681 = vector.broadcast %cst_322 : f32 to vector<8x8x1xf32>
    %682 = arith.mulf %680, %681 : vector<8x8x1xf32>
    %cst_323 = arith.constant 9.99999974E-6 : f32
    %683 = vector.broadcast %cst_323 : f32 to vector<8x8x1xf32>
    %684 = arith.addf %682, %683 : vector<8x8x1xf32>
    %685 = math.rsqrt %684 : vector<8x8x1xf32>
    %686 = vector.broadcast %685 : vector<8x8x1xf32> to vector<8x8x128xf32>
    %687 = arith.mulf %677, %686 : vector<8x8x128xf32>
    %688 = vector.shape_cast %663 : vector<1x128xf32> to vector<1x1x128xf32>
    %689 = vector.broadcast %688 : vector<1x1x128xf32> to vector<8x8x128xf32>
    %690 = arith.mulf %687, %689 : vector<8x8x128xf32>
    %691 = vector.shape_cast %665 : vector<1x128xf32> to vector<1x1x128xf32>
    %692 = vector.broadcast %691 : vector<1x1x128xf32> to vector<8x8x128xf32>
    %693 = arith.addf %690, %692 : vector<8x8x128xf32>
    %694 = arith.truncf %693 : vector<8x8x128xf32> to vector<8x8x128xbf16>
    %c1_324 = arith.constant 1 : index
    %c0_325 = arith.constant 0 : index
    %c0_326 = arith.constant 0 : index
    %695 = vector.load %arg18[%c1_324, %c0_325, %c0_326] : memref<2x128x128xbf16, #tpu.memory_space<vmem>>, vector<1x128x128xbf16>
    %696 = vector.shape_cast %695 : vector<1x128x128xbf16> to vector<128x128xbf16>
    %697 = vector.shape_cast %694 : vector<8x8x128xbf16> to vector<64x128xbf16>
    %cst_327 = arith.constant dense<0.000000e+00> : vector<64x128xf32>
    %698 = tpu.matmul %697, %696, %cst_327 {dimension_numbers = #tpu.dot_dimension_numbers<[1], [0], [0], [1], [0, 0, 1, 1], [], []>} : vector<64x128xbf16>, vector<128x128xbf16>, vector<64x128xf32> -> vector<64x128xf32>
    %699 = vector.shape_cast %698 : vector<64x128xf32> to vector<8x8x128xf32>
    %c1_328 = arith.constant 1 : index
    %c0_329 = arith.constant 0 : index
    %c0_330 = arith.constant 0 : index
    %700 = vector.load %arg19[%c1_328, %c0_329, %c0_330] : memref<2x1x128xf32, #tpu.memory_space<vmem>>, vector<1x1x128xf32>
    %701 = vector.shape_cast %700 : vector<1x1x128xf32> to vector<1x128xf32>
    %702 = vector.shape_cast %701 : vector<1x128xf32> to vector<1x1x128xf32>
    %703 = vector.broadcast %702 : vector<1x1x128xf32> to vector<8x8x128xf32>
    %704 = arith.addf %699, %703 : vector<8x8x128xf32>
    %cst_331 = arith.constant 1.702000e+00 : f32
    %705 = vector.broadcast %cst_331 : f32 to vector<8x8x128xf32>
    %706 = arith.mulf %705, %704 : vector<8x8x128xf32>
    %707 = arith.negf %706 : vector<8x8x128xf32>
    %708 = math.exp %707 : vector<8x8x128xf32>
    %cst_332 = arith.constant 1.000000e+00 : f32
    %709 = vector.broadcast %cst_332 : f32 to vector<8x8x128xf32>
    %710 = arith.addf %709, %708 : vector<8x8x128xf32>
    %711 = arith.divf %709, %710 : vector<8x8x128xf32>
    %712 = arith.mulf %704, %711 : vector<8x8x128xf32>
    %713 = arith.truncf %712 : vector<8x8x128xf32> to vector<8x8x128xbf16>
    %c1_333 = arith.constant 1 : index
    %c0_334 = arith.constant 0 : index
    %c0_335 = arith.constant 0 : index
    %714 = vector.load %arg20[%c1_333, %c0_334, %c0_335] : memref<2x128x128xbf16, #tpu.memory_space<vmem>>, vector<1x128x128xbf16>
    %715 = vector.shape_cast %714 : vector<1x128x128xbf16> to vector<128x128xbf16>
    %716 = vector.shape_cast %713 : vector<8x8x128xbf16> to vector<64x128xbf16>
    %cst_336 = arith.constant dense<0.000000e+00> : vector<64x128xf32>
    %717 = tpu.matmul %716, %715, %cst_336 {dimension_numbers = #tpu.dot_dimension_numbers<[1], [0], [0], [1], [0, 0, 1, 1], [], []>} : vector<64x128xbf16>, vector<128x128xbf16>, vector<64x128xf32> -> vector<64x128xf32>
    %718 = vector.shape_cast %717 : vector<64x128xf32> to vector<8x8x128xf32>
    %c1_337 = arith.constant 1 : index
    %c0_338 = arith.constant 0 : index
    %c0_339 = arith.constant 0 : index
    %719 = vector.load %arg21[%c1_337, %c0_338, %c0_339] : memref<2x1x128xf32, #tpu.memory_space<vmem>>, vector<1x1x128xf32>
    %720 = vector.shape_cast %719 : vector<1x1x128xf32> to vector<1x128xf32>
    %721 = vector.shape_cast %720 : vector<1x128xf32> to vector<1x1x128xf32>
    %722 = vector.broadcast %721 : vector<1x1x128xf32> to vector<8x8x128xf32>
    %723 = arith.addf %718, %722 : vector<8x8x128xf32>
    %724 = arith.addf %661, %723 : vector<8x8x128xf32>
    %725 = vector.extract_strided_slice %724 {offsets = [0, 0, 0], sizes = [8, 1, 128], strides = [1, 1, 1]} : vector<8x8x128xf32> to vector<8x1x128xf32>
    %726 = vector.shape_cast %725 : vector<8x1x128xf32> to vector<8x128xf32>
    %c0_340 = arith.constant 0 : index
    %c0_341 = arith.constant 0 : index
    %727 = vector.load %arg22[%c0_340, %c0_341] : memref<1x128xf32, #tpu.memory_space<vmem>>, vector<1x128xf32>
    %c0_342 = arith.constant 0 : index
    %c0_343 = arith.constant 0 : index
    %728 = vector.load %arg23[%c0_342, %c0_343] : memref<1x128xf32, #tpu.memory_space<vmem>>, vector<1x128xf32>
    %729 = vector.broadcast %4 : vector<1x128xf32> to vector<8x128xf32>
    %730 = arith.mulf %726, %729 : vector<8x128xf32>
    %cst_344 = arith.constant dense<0.000000e+00> : vector<8xf32>
    %731 = vector.multi_reduction <add>, %730, %cst_344 [1] : vector<8x128xf32> to vector<8xf32>
    %732 = vector.shape_cast %731 : vector<8xf32> to vector<8x1xf32>
    %cst_345 = arith.constant 3.125000e-02 : f32
    %733 = vector.broadcast %cst_345 : f32 to vector<8x1xf32>
    %734 = arith.mulf %732, %733 : vector<8x1xf32>
    %735 = vector.broadcast %734 : vector<8x1xf32> to vector<8x128xf32>
    %736 = arith.subf %726, %735 : vector<8x128xf32>
    %737 = vector.broadcast %4 : vector<1x128xf32> to vector<8x128xf32>
    %738 = arith.mulf %736, %737 : vector<8x128xf32>
    %739 = arith.mulf %738, %738 : vector<8x128xf32>
    %cst_346 = arith.constant dense<0.000000e+00> : vector<8xf32>
    %740 = vector.multi_reduction <add>, %739, %cst_346 [1] : vector<8x128xf32> to vector<8xf32>
    %741 = vector.shape_cast %740 : vector<8xf32> to vector<8x1xf32>
    %cst_347 = arith.constant 3.125000e-02 : f32
    %742 = vector.broadcast %cst_347 : f32 to vector<8x1xf32>
    %743 = arith.mulf %741, %742 : vector<8x1xf32>
    %cst_348 = arith.constant 9.99999974E-6 : f32
    %744 = vector.broadcast %cst_348 : f32 to vector<8x1xf32>
    %745 = arith.addf %743, %744 : vector<8x1xf32>
    %746 = math.rsqrt %745 : vector<8x1xf32>
    %747 = vector.broadcast %746 : vector<8x1xf32> to vector<8x128xf32>
    %748 = arith.mulf %738, %747 : vector<8x128xf32>
    %749 = vector.broadcast %727 : vector<1x128xf32> to vector<8x128xf32>
    %750 = arith.mulf %748, %749 : vector<8x128xf32>
    %751 = vector.broadcast %728 : vector<1x128xf32> to vector<8x128xf32>
    %752 = arith.addf %750, %751 : vector<8x128xf32>
    %753 = arith.truncf %752 : vector<8x128xf32> to vector<8x128xbf16>
    %c0_349 = arith.constant 0 : index
    %c0_350 = arith.constant 0 : index
    %754 = vector.load %arg24[%c0_349, %c0_350] : memref<128x128xbf16, #tpu.memory_space<vmem>>, vector<128x128xbf16>
    %cst_351 = arith.constant dense<0.000000e+00> : vector<8x128xf32>
    %755 = tpu.matmul %753, %754, %cst_351 {dimension_numbers = #tpu.dot_dimension_numbers<[1], [0], [0], [1], [0, 0, 1, 1], [], []>} : vector<8x128xbf16>, vector<128x128xbf16>, vector<8x128xf32> -> vector<8x128xf32>
    %756 = arith.truncf %755 : vector<8x128xf32> to vector<8x128xbf16>
    %c0_352 = arith.constant 0 : index
    %c0_353 = arith.constant 0 : index
    %757 = vector.load %arg25[%c0_352, %c0_353] : memref<128x128xbf16, #tpu.memory_space<vmem>>, vector<128x128xbf16>
    %cst_354 = arith.constant dense<0.000000e+00> : vector<8x128xf32>
    %758 = tpu.matmul %756, %757, %cst_354 {dimension_numbers = #tpu.dot_dimension_numbers<[1], [0], [0], [1], [0, 0, 1, 1], [], []>} : vector<8x128xbf16>, vector<128x128xbf16>, vector<8x128xf32> -> vector<8x128xf32>
    %c0_355 = arith.constant 0 : index
    %c0_356 = arith.constant 0 : index
    %759 = vector.load %arg26[%c0_355, %c0_356] : memref<1x128xf32, #tpu.memory_space<vmem>>, vector<1x128xf32>
    %760 = vector.broadcast %759 : vector<1x128xf32> to vector<8x128xf32>
    %761 = arith.addf %758, %760 : vector<8x128xf32>
    %c0_357 = arith.constant 0 : index
    %c0_358 = arith.constant 0 : index
    %762 = vector.load %arg27[%c0_357, %c0_358] : memref<8x128xf32, #tpu.memory_space<vmem>>, vector<8x128xf32>
    tpu.vector_store %arg27[%c0_357, %c0_358], %761 {strides = array<i32>} : memref<8x128xf32, #tpu.memory_space<vmem>>, vector<8x128xf32>,
    return
  }
  func.func @transform_0(%arg0: i32) -> (i32, i32, i32) {
    %c0_i32 = arith.constant 0 : i32
    %c0_i32_0 = arith.constant 0 : i32
    %c0_i32_1 = arith.constant 0 : i32
    return %arg0, %c0_i32, %c0_i32_0 : i32, i32, i32
  }
  func.func @transform_1(%arg0: i32) -> (i32, i32) {
    %c0_i32 = arith.constant 0 : i32
    %c0_i32_0 = arith.constant 0 : i32
    %c0_i32_1 = arith.constant 0 : i32
    return %c0_i32, %c0_i32_0 : i32, i32
  }
  func.func @transform_2(%arg0: i32) -> (i32, i32) {
    %c0_i32 = arith.constant 0 : i32
    %c0_i32_0 = arith.constant 0 : i32
    %c0_i32_1 = arith.constant 0 : i32
    return %c0_i32, %c0_i32_0 : i32, i32
  }
  func.func @transform_3(%arg0: i32) -> (i32, i32) {
    %c0_i32 = arith.constant 0 : i32
    %c0_i32_0 = arith.constant 0 : i32
    %c0_i32_1 = arith.constant 0 : i32
    return %c0_i32, %c0_i32_0 : i32, i32
  }
  func.func @transform_4(%arg0: i32) -> (i32, i32) {
    %c0_i32 = arith.constant 0 : i32
    %c0_i32_0 = arith.constant 0 : i32
    %c0_i32_1 = arith.constant 0 : i32
    return %c0_i32, %c0_i32_0 : i32, i32
  }
  func.func @transform_5(%arg0: i32) -> (i32, i32, i32) {
    %c0_i32 = arith.constant 0 : i32
    %c0_i32_0 = arith.constant 0 : i32
    %c0_i32_1 = arith.constant 0 : i32
    %c0_i32_2 = arith.constant 0 : i32
    return %c0_i32, %c0_i32_0, %c0_i32_1 : i32, i32, i32
  }
  func.func @transform_6(%arg0: i32) -> (i32, i32, i32) {
    %c0_i32 = arith.constant 0 : i32
    %c0_i32_0 = arith.constant 0 : i32
    %c0_i32_1 = arith.constant 0 : i32
    %c0_i32_2 = arith.constant 0 : i32
    return %c0_i32, %c0_i32_0, %c0_i32_1 : i32, i32, i32
  }
  func.func @transform_7(%arg0: i32) -> (i32, i32, i32) {
    %c0_i32 = arith.constant 0 : i32
    %c0_i32_0 = arith.constant 0 : i32
    %c0_i32_1 = arith.constant 0 : i32
    %c0_i32_2 = arith.constant 0 : i32
    return %c0_i32, %c0_i32_0, %c0_i32_1 : i32, i32, i32
  }
  func.func @transform_8(%arg0: i32) -> (i32, i32, i32) {
    %c0_i32 = arith.constant 0 : i32
    %c0_i32_0 = arith.constant 0 : i32
    %c0_i32_1 = arith.constant 0 : i32
    %c0_i32_2 = arith.constant 0 : i32
    return %c0_i32, %c0_i32_0, %c0_i32_1 : i32, i32, i32
  }
  func.func @transform_9(%arg0: i32) -> (i32, i32, i32) {
    %c0_i32 = arith.constant 0 : i32
    %c0_i32_0 = arith.constant 0 : i32
    %c0_i32_1 = arith.constant 0 : i32
    %c0_i32_2 = arith.constant 0 : i32
    return %c0_i32, %c0_i32_0, %c0_i32_1 : i32, i32, i32
  }
  func.func @transform_10(%arg0: i32) -> (i32, i32, i32) {
    %c0_i32 = arith.constant 0 : i32
    %c0_i32_0 = arith.constant 0 : i32
    %c0_i32_1 = arith.constant 0 : i32
    %c0_i32_2 = arith.constant 0 : i32
    return %c0_i32, %c0_i32_0, %c0_i32_1 : i32, i32, i32
  }
  func.func @transform_11(%arg0: i32) -> (i32, i32, i32) {
    %c0_i32 = arith.constant 0 : i32
    %c0_i32_0 = arith.constant 0 : i32
    %c0_i32_1 = arith.constant 0 : i32
    %c0_i32_2 = arith.constant 0 : i32
    return %c0_i32, %c0_i32_0, %c0_i32_1 : i32, i32, i32
  }
  func.func @transform_12(%arg0: i32) -> (i32, i32, i32) {
    %c0_i32 = arith.constant 0 : i32
    %c0_i32_0 = arith.constant 0 : i32
    %c0_i32_1 = arith.constant 0 : i32
    %c0_i32_2 = arith.constant 0 : i32
    return %c0_i32, %c0_i32_0, %c0_i32_1 : i32, i32, i32
  }
  func.func @transform_13(%arg0: i32) -> (i32, i32, i32) {
    %c0_i32 = arith.constant 0 : i32
    %c0_i32_0 = arith.constant 0 : i32
    %c0_i32_1 = arith.constant 0 : i32
    %c0_i32_2 = arith.constant 0 : i32
    return %c0_i32, %c0_i32_0, %c0_i32_1 : i32, i32, i32
  }
  func.func @transform_14(%arg0: i32) -> (i32, i32, i32) {
    %c0_i32 = arith.constant 0 : i32
    %c0_i32_0 = arith.constant 0 : i32
    %c0_i32_1 = arith.constant 0 : i32
    %c0_i32_2 = arith.constant 0 : i32
    return %c0_i32, %c0_i32_0, %c0_i32_1 : i32, i32, i32
  }
  func.func @transform_15(%arg0: i32) -> (i32, i32, i32) {
    %c0_i32 = arith.constant 0 : i32
    %c0_i32_0 = arith.constant 0 : i32
    %c0_i32_1 = arith.constant 0 : i32
    %c0_i32_2 = arith.constant 0 : i32
    return %c0_i32, %c0_i32_0, %c0_i32_1 : i32, i32, i32
  }
  func.func @transform_16(%arg0: i32) -> (i32, i32, i32) {
    %c0_i32 = arith.constant 0 : i32
    %c0_i32_0 = arith.constant 0 : i32
    %c0_i32_1 = arith.constant 0 : i32
    %c0_i32_2 = arith.constant 0 : i32
    return %c0_i32, %c0_i32_0, %c0_i32_1 : i32, i32, i32
  }
  func.func @transform_17(%arg0: i32) -> (i32, i32, i32) {
    %c0_i32 = arith.constant 0 : i32
    %c0_i32_0 = arith.constant 0 : i32
    %c0_i32_1 = arith.constant 0 : i32
    %c0_i32_2 = arith.constant 0 : i32
    return %c0_i32, %c0_i32_0, %c0_i32_1 : i32, i32, i32
  }
  func.func @transform_18(%arg0: i32) -> (i32, i32, i32) {
    %c0_i32 = arith.constant 0 : i32
    %c0_i32_0 = arith.constant 0 : i32
    %c0_i32_1 = arith.constant 0 : i32
    %c0_i32_2 = arith.constant 0 : i32
    return %c0_i32, %c0_i32_0, %c0_i32_1 : i32, i32, i32
  }
  func.func @transform_19(%arg0: i32) -> (i32, i32, i32) {
    %c0_i32 = arith.constant 0 : i32
    %c0_i32_0 = arith.constant 0 : i32
    %c0_i32_1 = arith.constant 0 : i32
    %c0_i32_2 = arith.constant 0 : i32
    return %c0_i32, %c0_i32_0, %c0_i32_1 : i32, i32, i32
  }
  func.func @transform_20(%arg0: i32) -> (i32, i32, i32) {
    %c0_i32 = arith.constant 0 : i32
    %c0_i32_0 = arith.constant 0 : i32
    %c0_i32_1 = arith.constant 0 : i32
    %c0_i32_2 = arith.constant 0 : i32
    return %c0_i32, %c0_i32_0, %c0_i32_1 : i32, i32, i32
  }
  func.func @transform_21(%arg0: i32) -> (i32, i32) {
    %c0_i32 = arith.constant 0 : i32
    %c0_i32_0 = arith.constant 0 : i32
    %c0_i32_1 = arith.constant 0 : i32
    return %c0_i32, %c0_i32_0 : i32, i32
  }
  func.func @transform_22(%arg0: i32) -> (i32, i32) {
    %c0_i32 = arith.constant 0 : i32
    %c0_i32_0 = arith.constant 0 : i32
    %c0_i32_1 = arith.constant 0 : i32
    return %c0_i32, %c0_i32_0 : i32, i32
  }
  func.func @transform_23(%arg0: i32) -> (i32, i32) {
    %c0_i32 = arith.constant 0 : i32
    %c0_i32_0 = arith.constant 0 : i32
    %c0_i32_1 = arith.constant 0 : i32
    return %c0_i32, %c0_i32_0 : i32, i32
  }
  func.func @transform_24(%arg0: i32) -> (i32, i32) {
    %c0_i32 = arith.constant 0 : i32
    %c0_i32_0 = arith.constant 0 : i32
    %c0_i32_1 = arith.constant 0 : i32
    return %c0_i32, %c0_i32_0 : i32, i32
  }
  func.func @transform_25(%arg0: i32) -> (i32, i32) {
    %c0_i32 = arith.constant 0 : i32
    %c0_i32_0 = arith.constant 0 : i32
    %c0_i32_1 = arith.constant 0 : i32
    return %c0_i32, %c0_i32_0 : i32, i32
  }
  func.func @transform_26(%arg0: i32) -> (i32, i32) {
    %c0_i32 = arith.constant 0 : i32
    %c0_i32_0 = arith.constant 0 : i32
    return %arg0, %c0_i32 : i32, i32
  }
}

</mosaic_0001>

<bundles_post_ra>
// kernel: tpu_custom_call.1
= control target key start
LH: loop header
LB: loop body
LE: loop exit
PB: predicated region body
PF: predicated region fallthrough
CT: control target
= control target key end

     0   :  { %s22244_s0 = inlined_call_operand.vmem [shape: bf16[16,8,256], index: 0, kind: input, shape index: {}]   ;;  %s22245_s1 = inlined_call_operand.vmem [shape: bf16[256,128], index: 1, kind: input, shape index: {}]   ;;  %s22246_s2 = inlined_call_operand.vmem [shape: f32[8,128], index: 2, kind: input, shape index: {}]   ;;  %s22247_s3 = inlined_call_operand.vmem [shape: f32[1,128], index: 3, kind: input, shape index: {}]   ;;  %s22248_s4 = inlined_call_operand.vmem [shape: f32[1,128], index: 4, kind: input, shape index: {}]   ;;  %s22249_s5 = inlined_call_operand.vmem [shape: f32[2,1,128], index: 5, kind: input, shape index: {}]   ;;  %s22250_s6 = inlined_call_operand.vmem [shape: f32[2,1,128], index: 6, kind: input, shape index: {}]   ;;  %s22251_s7 = inlined_call_operand.vmem [shape: bf16[8,128,8], index: 7, kind: input, shape index: {}]   ;;  %s22252_s8 = inlined_call_operand.vmem [shape: bf16[8,128,8], index: 8, kind: input, shape index: {}]   ;;  %s22253_s9 = inlined_call_operand.vmem [shape: bf16[8,128,8], index: 9, kind: input, shape index: {}]   ;;  %s22254_s10 = inlined_call_operand.vmem [shape: f32[8,1,8], index: 10, kind: input, shape index: {}]   ;;  %s22255_s11 = inlined_call_operand.vmem [shape: f32[8,1,8], index: 11, kind: input, shape index: {}]   ;;  %s22256_s12 = inlined_call_operand.vmem [shape: f32[8,1,8], index: 12, kind: input, shape index: {}]   ;;  %s22257_s13 = inlined_call_operand.vmem [shape: bf16[8,8,128], index: 13, kind: input, shape index: {}]   ;;  %s22258_s14 = inlined_call_operand.vmem [shape: f32[2,1,128], index: 14, kind: input, shape index: {}]   ;;  %s22259_s15 = inlined_call_operand.vmem [shape: f32[2,1,128], index: 15, kind: input, shape index: {}]   ;;  %s22260_s16 = inlined_call_operand.vmem [shape: f32[2,1,128], index: 16, kind: input, shape index: {}]   ;;  %s22261_s17 = inlined_call_operand.vmem [shape: bf16[2,128,128], index: 17, kind: input, shape index: {}]   ;;  %s22262_s18 = inlined_call_operand.vmem [shape: f32[2,1,128], index: 18, kind: input, shape index: {}]   ;;  %s22263_s19 = inlined_call_operand.vmem [shape: bf16[2,128,128], index: 19, kind: input, shape index: {}]   ;;  %s22264_s20 = inlined_call_operand.vmem [shape: f32[2,1,128], index: 20, kind: input, shape index: {}]   ;;  %s22265_s21 = inlined_call_operand.vmem [shape: f32[1,128], index: 21, kind: input, shape index: {}]   ;;  %s22266_s22 = inlined_call_operand.vmem [shape: f32[1,128], index: 22, kind: input, shape index: {}]   ;;  %s22267_s23 = inlined_call_operand.vmem [shape: bf16[128,128], index: 23, kind: input, shape index: {}]   ;;  %s22268_s24 = inlined_call_operand.vmem [shape: bf16[128,128], index: 24, kind: input, shape index: {}]   ;;  %s22269_s25 = inlined_call_operand.vmem [shape: f32[1,128], index: 25, kind: input, shape index: {}]   ;;  %s22270_s26 = inlined_call_operand.hbm [shape: f32[16,128], index: 26, kind: output, shape index: {}]  }
   0x1   :  { %22289 = sst [smem:[#allocation11_spill]] %s22244_s0 }
   0x2   :  { %22290 = sst [smem:[#allocation12_spill]] %s22245_s1 }
   0x3   :  { %22291 = sst [smem:[#allocation13_spill]] %s22246_s2 }
   0x4   :  { %22292 = sst [smem:[#allocation14_spill]] %s22247_s3 }
   0x5   :  { %22293 = sst [smem:[#allocation15_spill]] %s22248_s4 }
   0x6   :  { %22294 = sst [smem:[#allocation16_spill]] %s22249_s5 }
   0x7   :  { %22295 = sst [smem:[#allocation17_spill]] %s22250_s6 }
   0x8   :  { %22296 = sst [smem:[#allocation18_spill]] %s22251_s7 }
   0x9   :  { %22297 = sst [smem:[#allocation19_spill]] %s22252_s8 }
   0xa   :  { %22298 = sst [smem:[#allocation20_spill]] %s22253_s9 }
   0xb   :  { %22299 = sst [smem:[#allocation21_spill]] %s22254_s10 }
   0xc   :  { %22300 = sst [smem:[#allocation22_spill]] %s22255_s11 }
   0xd   :  { %22301 = sst [smem:[#allocation23_spill]] %s22269_s25 }
   0xe   :  { %22302 = sst [smem:[#allocation24_spill]] %s22270_s26 }
   0xf   :  { %31 = vsyncpa [#allocation3], 0 }
  0x10   :  { %33 = vsyncpa [#allocation3 + $0x1], 0  ;;  %s18784_s27 = smov 0   ;;  %s18786_s3 = smov 0  }
  0x11   :  { %s18788_s7 = smov 0   ;;  %s18790_s28 = smov 0  }
  0x12 LB: > { %22303 = sst [smem:[#allocation5_spill]] %s18632_s27  ;;  %s18805_s8 = sadd.s32 4294967295, %s18644_s28   ;;  %s18644_s28 = sphi %s18790_s28, %s22330_s28   ;;  %s18640_s7 = sphi %s18788_s7, %s22332_s7   ;;  %s18636_s3 = sphi %s18786_s3, %s22334_s3   ;;  %s18632_s27 = sphi %s18784_s27, %s22333_s27  }
  0x13   : > { %22304 = sst [smem:[#allocation6_spill]] %s18640_s7  ;;  %s14603_s4 = sadd.s32 4294967294, %s18644_s28  }
  0x14   : > { %22305 = sst [smem:[#allocation7_spill]] %s18644_s28  ;;  %s18809_s29 = sadd.s32 1, %s18644_s28  }
  0x15   : > { %22306 = sst [smem:[#allocation8_spill]] %s18809_s29  ;;  %s597_s0 = sadd.s32 1, %s18640_s7 }
  0x16   : > { %s594_s9 = ssub.s32 %s18644_s28, %s18809_s29  ;;  %p607_p0 = scmp.ne.s32.totalorder %s18640_s7, %s18636_s3 }
  0x17   : > { %p595_p1 = scmp.eq.s32.totalorder %s594_s9, 0  ;;  %p608_p2 = scmp.eq.s32.totalorder %s18805_s8, 1 }
  0x18   : > { %p613_p3 = scmp.ne.s32.totalorder %s18636_s3, %s18632_s27  ;;  %p614_p4 = scmp.eq.s32.totalorder %s14603_s4, 1 }
  0x19   : > { %s18820_s30 = scalar_select %p595_p1, %s18640_s7, %s597_s0  }
  0x1a   : > { %p18822_p5 = por %p608_p2, %p607_p0  ;;  %p18826_p6 = por %p614_p4, %p613_p3 }
  0x1b   : > { %22307 = sst [smem:[#allocation9_spill]] %s18820_s30  ;;  %p14606_p7 = scmp.ge.s32.totalorder %s18644_s28, 1 }
  0x1c   : > { %s22309_s5 = scalar_select %p18826_p6, 1, 0 }
  0x1d   : > { %p717_p8 = scmp.lt.s32.totalorder %s18644_s28, 3 }
  0x1e   : > { %22310 = sst [smem:[#allocation10_spill]] %s22309_s5 }
  0x1f   : > { %p718_p9 = pnand %p14606_p7, %p717_p8 }
  0x20   : > { %s22311_s1 = sld [smem:[#allocation12_spill]] (!%p718_p9)  ;;  %s14608_s4 = sshll.u32 (!%p718_p9), %s18805_s8, 3 }
  0x21   : > { %721 = sbr.rel (%p718_p9) target bundleno = 11580 (0x2d3c), region = 124  ;;  %p789_p10 = scmp.lt.s32.totalorder (!%p718_p9), %s14608_s4, 15 }
  0x22   : > { %s22312_s0 = sld [smem:[#allocation11_spill]] (!%p718_p9)  ;;  %s785_s5 = sand.u32 (!%p718_p9), 1, %s18636_s3  }
  0x23   : > { %s22313_s10 = sld [smem:[#allocation13_spill]] (!%p718_p9)  ;;  %s14607_s28 = sshll.u32 (!%p718_p9), %s785_s5, 3 }
  0x24   : > { %s22316_s29 = sld [smem:[#allocation18_spill]] (!%p718_p9) }
  0x25   : > { %s22319_s6 = sld [smem:[#allocation16_spill]] (!%p718_p9) }
  0x26   : > { %v17914_v0 = vld [vmem:[%s22311_s1 + $0x78] sm:$0xff]   ;;  %v17916_v2 = vld [vmem:[%s22311_s1 + $0x70] sm:$0xff]   ;;  %v17918_v4 = vld [vmem:[%s22311_s1 + $0x68] sm:$0xff]   ;;  %s22336_s4 = smov (!%p789_p10, %s14608_s4), 15  ;;  %v796_v24 = vlaneseq  ;;  %v18646_v31 = vmov 0.0   ;;  %s22320_s7 = sld [smem:[#allocation17_spill]] }
  0x27   : > { %v17915_v1 = vld [vmem:[%s22311_s1 + $0x38] sm:$0xff]   ;;  %15615 = vmatprep.subr.bf16.mxu0 %v17914_v0  ;;  %v17917_v3 = vld [vmem:[%s22311_s1 + $0x30] sm:$0xff]   ;;  %v17919_v5 = vld [vmem:[%s22311_s1 + $0x28] sm:$0xff]   ;;  %s15558_s9 = sshll.u32 %s22336_s4, 3  ;;  %vm18647_vm1 = vmmov 0   ;;  %s22322_s11 = sld [smem:[#allocation22_spill]] }
  0x28   : > { %15616 = vmatpush3.bf16.msra.mxu0 %v17915_v1  ;;  %v17920_v6 = vld [vmem:[%s22311_s1 + $0x60] sm:$0xff]   ;;  %v17922_v8 = vld [vmem:[%s22311_s1 + $0x58] sm:$0xff]   ;;  %s18863_s26 = scalar_lea.vmem %s22312_s0, %s15558_s9  ;;  %v17924_v10 = vld [vmem:[%s22311_s1 + $0x50] sm:$0xff]   ;;  %v18894_v25 = vand.u32 127, %v796_v24  ;;  %s22314_s9 = sld [smem:[#allocation14_spill]]  ;;  %vm1800_vm2 = vcmask 64512  }
  0x29   : > { %15617 = vmatprep.subr.bf16.mxu0 %v17916_v2  ;;  %v17921_v7 = vld [vmem:[%s22311_s1 + $0x20] sm:$0xff]   ;;  %v17923_v9 = vld [vmem:[%s22311_s1 + $0x18] sm:$0xff]   ;;  %v17925_v12 = vld [vmem:[%s22311_s1 + $0x10] sm:$0xff]   ;;  %s22315_s0 = sld [smem:[#allocation15_spill]]  ;;  %vm2294_vm3 = vcmask 1043456   ;;  %vm14129_vm5 = vcmask 1041409  }
  0x2a   : > { %v17932_v11 = vld [vmem:[%s18863_s26 + $0x4] ss:$8 sps:$4 sm:$0xff]   ;;  %v17930_v17 = vld [vmem:[%s18863_s26] ss:$8 sps:$4 sm:$0xff]   ;;  %v17933_v18 = vld [vmem:[%s18863_s26 + $0x14] ss:$8 sps:$4 sm:$0xff]  }
  0x2b   : > { %1010 = vmatprep.mubr.bf16.mxu0 %v17932_v11  ;;  %v17926_v13 = vld [vmem:[%s22311_s1 + $0x48] sm:$0xff]   ;;  %v17928_v15 = vld [vmem:[%s22311_s1 + $0x40] sm:$0xff]   ;;  %v17935_v19 = vld [vmem:[%s18863_s26 + $0x10] ss:$8 sps:$4 sm:$0xff]   ;;  %vm798_vm0 = vcmp.lt.s32.totalorder %v18894_v25, 32  ;;  %s22323_s27 = sld [smem:[#allocation21_spill]] }
  0x2c   : > { %15618 = vmatpush3.bf16.msra.mxu0 %v17917_v3  ;;  %v17927_v14 = vld [vmem:[%s22311_s1 + $0x8] sm:$0xff]   ;;  %v17929_v16 = vld [vmem:[%s22311_s1] sm:$0xff]   ;;  %v17939_v22 = vld [vmem:[%s18863_s26 + $0x34] ss:$8 sps:$4 sm:$0xff]   ;;  %v18901_v32 = vsel %vm798_vm0, 1.0, %v18646_v31  ;;  %s22321_s30 = smov %s22320_s7  ;;  %vm801_vm4 = vcmp.lt.s32.totalorder %v18894_v25, 5 }
  0x2d   : > { %15619 = vmatprep.subr.bf16.mxu0 %v17918_v4  ;;  %v17936_v20 = vld [vmem:[%s18863_s26 + $0x24] ss:$8 sps:$4 sm:$0xff]   ;;  %v17938_v21 = vld [vmem:[%s18863_s26 + $0x20] ss:$8 sps:$4 sm:$0xff]   ;;  %v17941_v23 = vld [vmem:[%s18863_s26 + $0x30] ss:$8 sps:$4 sm:$0xff]  }
  0x2e   : > { %v1043_v28 = vld [vmem:[%s22313_s10] sm:$0xff]  ;;  %s22317_s10 = sld [smem:[#allocation19_spill]]  ;;  %vm14132_vm6 = vcmask 1042434   ;;  %vm14135_vm7 = vcmask 1043459   ;;  %vm14138_vm8 = vcmask 1044484   ;;  %vm14141_vm9 = vcmask 1045509  }
  0x2f   : > { %s22318_s26 = sld [smem:[#allocation20_spill]]  ;;  %vm14144_vm10 = vcmask 1046534   ;;  %vm14147_vm11 = vcmask 1047559   ;;  %s15555_s1 = sshll.u32 %s18805_s8, 7 }
  0x30   : > { %15620 = vmatpush3.bf16.msra.mxu0 %v17919_v5  ;;  %s22325_s25 = sld [smem:[#allocation23_spill]]  ;;  %s18648_s8 = smov [#allocation2]  }
  0x31   : > { %15621 = vmatprep.subr.bf16.mxu0 %v17920_v6 }
  0x34   : > { %15622 = vmatpush3.bf16.msra.mxu0 %v17921_v7 }
  0x35   : > { %15623 = vmatprep.subr.bf16.mxu0 %v17922_v8 }
  0x38   : > { %15624 = vmatpush3.bf16.msra.mxu0 %v17923_v9 }
  0x39   : > { %15625 = vmatprep.subr.bf16.mxu0 %v17924_v10 }
  0x3c   : > { %15626 = vmatpush3.bf16.msra.mxu0 %v17925_v12 }
  0x3d   : > { %15627 = vmatprep.subr.bf16.mxu0 %v17926_v13 }
  0x40   : > { %15628 = vmatpush3.bf16.msra.mxu0 %v17927_v14 }
  0x41   : > { %15629 = vmatprep.subr.bf16.mxu0 %v17928_v15 }
  0x44   : > { %15630 = vmatpush3.bf16.msra.mxu0 %v17929_v16 }
  0x47   : > { %1011 = vmatmul.mubr.bf16.vlgmr.msra.gmra.mxu0 %v17930_v17 }
  0x48   : > { %1018 = vmatprep.mubr.bf16.mxu0 %v17933_v18 }
  0x4f   : > { %1019 = vmatmul.mubr.bf16.gmra.mxu0 %v17935_v19 }
  0x50   : > { %1026 = vmatprep.mubr.bf16.mxu0 %v17936_v20 }
  0x57   : > { %1027 = vmatmul.mubr.bf16.gmra.mxu0 %v17938_v21 }
  0x58   : > { %1034 = vmatprep.mubr.bf16.mxu0 %v17939_v22 }
  0x5f   : > { %1035 = vmatmul.mubr.bf16.gmra.mxu0 %v17941_v23 }
 0x107   : > { %v15631_v26 = vpop.f32.mrf.mxu0 }
 0x109   : > { %v15632_v27 = vpop.f32.mrf.mxu0 }
 0x10a   : > { %v15633_v29 = vadd.f32 %v15632_v27, %v15631_v26 }
 0x10b   : > { %v15634_v30 = vpop.f32.mrf.mxu0 }
 0x10c   : > { %v1044_v33 = vadd.f32 %v15633_v29, %v1043_v28 }
 0x10d   : > { %v15635_v34 = vpop.f32.mrf.mxu0 }
 0x10e   : > { %v15636_v35 = vadd.f32 %v15635_v34, %v15634_v30  ;;  %v1054_v36 = vmul.f32 %v18901_v32, %v1044_v33 }
 0x10f   : > { %v15637_v37 = vpop.f32.mrf.mxu0 }
 0x110   : > { %1062 = vadd.xlane.f32.xlu0 %v1054_v36  ;;  %v1045_v38 = vadd.f32 %v15636_v35, %v1043_v28 }
 0x111   : > { %v15638_v39 = vpop.f32.mrf.mxu0 }
 0x112   : > { %v15639_v40 = vadd.f32 %v15638_v39, %v15637_v37  ;;  %v1055_v41 = vmul.f32 %v18901_v32, %v1045_v38 }
 0x113   : > { %v15640_v42 = vpop.f32.mrf.mxu0 }
 0x114   : > { %1064 = vadd.xlane.f32.xlu0 %v1055_v41  ;;  %v1046_v43 = vadd.f32 %v15639_v40, %v1043_v28 }
 0x115   : > { %v15641_v44 = vpop.f32.mrf.mxu0 }
 0x116   : > { %v15642_v45 = vadd.f32 %v15641_v44, %v15640_v42  ;;  %v1056_v46 = vmul.f32 %v18901_v32, %v1046_v43 }
 0x117   : > { %v15643_v47 = vpop.f32.mrf.mxu0 }
 0x118   : > { %1066 = vadd.xlane.f32.xlu1 %v1056_v46  ;;  %v1047_v48 = vadd.f32 %v15642_v45, %v1043_v28 }
 0x119   : > { %v15644_v49 = vpop.f32.mrf.mxu0 }
 0x11a   : > { %v15645_v50 = vadd.f32 %v15644_v49, %v15643_v47  ;;  %v1057_v51 = vmul.f32 %v18901_v32, %v1047_v48 }
 0x11b   : > { %v15646_v52 = vpop.f32.mrf.mxu0 }
 0x11c   : > { %v1048_v53 = vadd.f32 %v15645_v50, %v1043_v28  ;;  %1068 = vadd.xlane.f32.xlu1 %v1057_v51 }
 0x11d   : > { %v15647_v54 = vpop.f32.mrf.mxu0 }
 0x11e   : > { %v15648_v55 = vadd.f32 %v15647_v54, %v15646_v52  ;;  %v1058_v56 = vmul.f32 %v18901_v32, %v1048_v53 }
 0x11f   : > { %v15649_v57 = vpop.f32.mrf.mxu0 }
 0x120   : > { %1070 = vadd.xlane.f32.xlu0 %v1058_v56  ;;  %v1049_v58 = vadd.f32 %v15648_v55, %v1043_v28 }
 0x121   : > { %v15650_v59 = vpop.f32.mrf.mxu0 }
 0x122   : > { %v15651_v60 = vadd.f32 %v15650_v59, %v15649_v57  ;;  %v1059_v61 = vmul.f32 %v18901_v32, %v1049_v58 }
 0x123   : > { %v15652_v62 = vpop.f32.mrf.mxu0 }
 0x124   : > { %v1050_v63 = vadd.f32 %v15651_v60, %v1043_v28  ;;  %1072 = vadd.xlane.f32.xlu1 %v1059_v61 }
 0x125   : > { %v15653_v0 = vpop.f32.mrf.mxu0 }
 0x126   : > { %v15654_v1 = vadd.f32 %v15653_v0, %v15652_v62  ;;  %v1060_v2 = vmul.f32 %v18901_v32, %v1050_v63 }
 0x128   : > { %1074 = vadd.xlane.f32.xlu0 %v1060_v2  ;;  %v1051_v3 = vadd.f32 %v15654_v1, %v1043_v28 }
 0x12a   : > { %v1061_v4 = vmul.f32 %v18901_v32, %v1051_v3 }
 0x12c   : > { %1076 = vadd.xlane.f32.xlu1 %v1061_v4 }
 0x199   : > { %v1063_v5 = vpop.xlane.xlu0 %1062 }
 0x19a   : > { %v1078_v6 = vmul.f32 0.03125, %v1063_v5 }
 0x19c   : > { %v1086_v7 = vsub.f32 %v1044_v33, %v1078_v6 }
 0x19d   : > { %v1065_v8 = vpop.xlane.xlu0 %1064 }
 0x19e   : > { %v1079_v9 = vmul.f32 0.03125, %v1065_v8  ;;  %v18912_v10 = vmul.f32 %v18901_v32, %v1086_v7 }
 0x1a0   : > { %v1087_v11 = vsub.f32 %v1045_v38, %v1079_v9  ;;  %v1102_v12 = vmul.f32 %v18912_v10, %v18912_v10 }
 0x1a1   : > { %v1067_v13 = vpop.xlane.xlu1 %1066 }
 0x1a2   : > { %v1080_v14 = vmul.f32 0.03125, %v1067_v13  ;;  %1110 = vadd.xlane.f32.xlu0 %v1102_v12  ;;  %v18917_v15 = vmul.f32 %v18901_v32, %v1087_v11 }
 0x1a4   : > { %v1088_v16 = vsub.f32 %v1046_v43, %v1080_v14  ;;  %v1103_v17 = vmul.f32 %v18917_v15, %v18917_v15 }
 0x1a5   : > { %v1069_v18 = vpop.xlane.xlu1 %1068 }
 0x1a6   : > { %v1081_v19 = vmul.f32 0.03125, %v1069_v18  ;;  %1112 = vadd.xlane.f32.xlu1 %v1103_v17  ;;  %v18922_v20 = vmul.f32 %v18901_v32, %v1088_v16 }
 0x1a8   : > { %v1089_v21 = vsub.f32 %v1047_v48, %v1081_v19  ;;  %v1104_v22 = vmul.f32 %v18922_v20, %v18922_v20 }
 0x1a9   : > { %v1071_v23 = vpop.xlane.xlu0 %1070 }
 0x1aa   : > { %v1082_v24 = vmul.f32 0.03125, %v1071_v23  ;;  %1114 = vadd.xlane.f32.xlu0 %v1104_v22  ;;  %v18927_v26 = vmul.f32 %v18901_v32, %v1089_v21 }
 0x1ac   : > { %v1090_v27 = vsub.f32 %v1048_v53, %v1082_v24  ;;  %v1105_v28 = vmul.f32 %v18927_v26, %v18927_v26 }
 0x1ad   : > { %v1073_v29 = vpop.xlane.xlu1 %1072 }
 0x1ae   : > { %v1083_v30 = vmul.f32 0.03125, %v1073_v29  ;;  %1116 = vadd.xlane.f32.xlu1 %v1105_v28  ;;  %v18932_v33 = vmul.f32 %v18901_v32, %v1090_v27 }
 0x1b0   : > { %v1091_v34 = vsub.f32 %v1049_v58, %v1083_v30  ;;  %v1106_v35 = vmul.f32 %v18932_v33, %v18932_v33 }
 0x1b1   : > { %v1075_v36 = vpop.xlane.xlu0 %1074 }
 0x1b2   : > { %v1084_v37 = vmul.f32 0.03125, %v1075_v36  ;;  %1118 = vadd.xlane.f32.xlu0 %v1106_v35  ;;  %v18937_v38 = vmul.f32 %v18901_v32, %v1091_v34 }
 0x1b4   : > { %v1092_v39 = vsub.f32 %v1050_v63, %v1084_v37  ;;  %v1107_v40 = vmul.f32 %v18937_v38, %v18937_v38  ;;  %v14636_v63 = vld [vmem:[%s22314_s9] ss:$0 sm:$0xff]  ;;  %s14531_s9 = scalar_lea.sflag [#allocation3], %s785_s5 }
 0x1b5   : > { %v1077_v41 = vpop.xlane.xlu1 %1076 }
 0x1b6   : > { %v1085_v42 = vmul.f32 0.03125, %v1077_v41  ;;  %1120 = vadd.xlane.f32.xlu1 %v1107_v40  ;;  %v18942_v43 = vmul.f32 %v18901_v32, %v1092_v39 }
 0x1b8   : > { %v1093_v44 = vsub.f32 %v1051_v3, %v1085_v42  ;;  %v1108_v45 = vmul.f32 %v18942_v43, %v18942_v43  ;;  %v14637_v3 = vld [vmem:[%s22315_s0] ss:$0 sm:$0xff]  ;;  %s22324_s0 = smov %s22323_s27 }
 0x1ba   : > { %1122 = vadd.xlane.f32.xlu0 %v1108_v45  ;;  %v18947_v46 = vmul.f32 %v18901_v32, %v1093_v44 }
 0x1bc   : > { %v1109_v47 = vmul.f32 %v18947_v46, %v18947_v46 }
 0x1be   : > { %1124 = vadd.xlane.f32.xlu1 %v1109_v47 }
 0x22b   : > { %v1111_v48 = vpop.xlane.xlu0 %1110 }
 0x22c   : > { %v1126_v49 = vmul.f32 0.03125, %v1111_v48 }
 0x22e   : > { %v1134_v50 = vadd.f32 1e-05, %v1126_v49 }
 0x22f   : > { %v1113_v51 = vpop.xlane.xlu1 %1112 }
 0x230   : > { %18182 = vrsqrt.f32 %v1134_v50  ;;  %v1127_v52 = vmul.f32 0.03125, %v1113_v51 }
 0x232   : > { %v1135_v53 = vadd.f32 1e-05, %v1127_v52 }
 0x233   : > { %v1115_v54 = vpop.xlane.xlu0 %1114 }
 0x234   : > { %18184 = vrsqrt.f32 %v1135_v53  ;;  %v1128_v55 = vmul.f32 0.03125, %v1115_v54 }
 0x236   : > { %v1136_v56 = vadd.f32 1e-05, %v1128_v55 }
 0x237   : > { %v1117_v57 = vpop.xlane.xlu1 %1116 }
 0x238   : > { %18186 = vrsqrt.f32 %v1136_v56  ;;  %v1129_v58 = vmul.f32 0.03125, %v1117_v57 }
 0x23a   : > { %v1137_v59 = vadd.f32 1e-05, %v1129_v58 }
 0x23b   : > { %v1119_v60 = vpop.xlane.xlu0 %1118 }
 0x23c   : > { %18188 = vrsqrt.f32 %v1137_v59  ;;  %v1130_v61 = vmul.f32 0.03125, %v1119_v60 }
 0x23d   : > { %v18183_v62 = vpop.eup %18182 }
 0x23e   : > { %v1138_v0 = vadd.f32 1e-05, %v1130_v61  ;;  %v1150_v1 = vmul.f32 %v18183_v62, %v18912_v10 }
 0x23f   : > { %v1121_v2 = vpop.xlane.xlu1 %1120 }
 0x240   : > { %18190 = vrsqrt.f32 %v1138_v0  ;;  %v1131_v4 = vmul.f32 0.03125, %v1121_v2  ;;  %v1164_v5 = vmul.f32 %v14636_v63, %v1150_v1 }
 0x241   : > { %v18185_v6 = vpop.eup %18184 }
 0x242   : > { %v1139_v7 = vadd.f32 1e-05, %v1131_v4  ;;  %v18958_v8 = vadd.f32 %v14637_v3, %v1164_v5  ;;  %v1151_v9 = vmul.f32 %v18185_v6, %v18917_v15 }
 0x243   : > { %v1123_v11 = vpop.xlane.xlu0 %1122 }
 0x244   : > { %18192 = vrsqrt.f32 %v1139_v7  ;;  %v1132_v12 = vmul.f32 0.03125, %v1123_v11  ;;  %v1188_v10 = vmul.f32 %v18901_v32, %v18958_v8  ;;  %v1165_v13 = vmul.f32 %v14636_v63, %v1151_v9 }
 0x245   : > { %v18187_v14 = vpop.eup %18186 }
 0x246   : > { %v1140_v16 = vadd.f32 1e-05, %v1132_v12  ;;  %1196 = vadd.xlane.f32.xlu0 %v1188_v10  ;;  %v18963_v17 = vadd.f32 %v14637_v3, %v1165_v13  ;;  %v1152_v18 = vmul.f32 %v18187_v14, %v18922_v20 }
 0x247   : > { %v1125_v19 = vpop.xlane.xlu1 %1124 }
 0x248   : > { %18194 = vrsqrt.f32 %v1140_v16  ;;  %v1133_v21 = vmul.f32 0.03125, %v1125_v19  ;;  %v1189_v15 = vmul.f32 %v18901_v32, %v18963_v17  ;;  %v1166_v22 = vmul.f32 %v14636_v63, %v1152_v18  ;;  %v17942_v18 = vld [vmem:[%s22316_s29 + $0x38] sm:$0xff]  }
 0x249   : > { %v18189_v23 = vpop.eup %18188  ;;  %16305 = vmatprep.subr.bf16.mxu1 %v17942_v18 }
 0x24a   : > { %v1141_v24 = vadd.f32 1e-05, %v1133_v21  ;;  %1198 = vadd.xlane.f32.xlu1 %v1189_v15  ;;  %v18968_v27 = vadd.f32 %v14637_v3, %v1166_v22  ;;  %v1153_v28 = vmul.f32 %v18189_v23, %v18927_v26  ;;  %v17943_v15 = vld [vmem:[%s22317_s10 + $0x38] sm:$0xff]   ;;  %16306 = vmatpush3.bf16.msra.mxu1 %v17942_v18  ;;  %v14638_v18 = vld [vmem:[%s22319_s6] ss:$0 sm:$0xff] }
 0x24b   : > { %16329 = vmatprep.subr.bf16.mxu0 %v17943_v15 }
 0x24c   : > { %18196 = vrsqrt.f32 %v1141_v24  ;;  %v1190_v29 = vmul.f32 %v18901_v32, %v18968_v27  ;;  %v1167_v30 = vmul.f32 %v14636_v63, %v1153_v28  ;;  %v17944_v28 = vld [vmem:[%s22316_s29 + $0x30] sm:$0xff]   ;;  %16330 = vmatpush3.bf16.msra.mxu0 %v17943_v15 }
 0x24d   : > { %v18191_v20 = vpop.eup %18190  ;;  %16307 = vmatprep.subr.bf16.mxu1 %v17944_v28 }
 0x24e   : > { %1200 = vadd.xlane.f32.xlu0 %v1190_v29  ;;  %v18973_v34 = vadd.f32 %v14637_v3, %v1167_v30  ;;  %v1154_v35 = vmul.f32 %v18191_v20, %v18932_v33  ;;  %v17945_v20 = vld [vmem:[%s22317_s10 + $0x30] sm:$0xff]   ;;  %16308 = vmatpush3.bf16.msra.mxu1 %v17944_v28 }
 0x24f   : > { %16331 = vmatprep.subr.bf16.mxu0 %v17945_v20 }
 0x250   : > { %v1191_v36 = vmul.f32 %v18901_v32, %v18973_v34  ;;  %v1168_v37 = vmul.f32 %v14636_v63, %v1154_v35  ;;  %16332 = vmatpush3.bf16.msra.mxu0 %v17945_v20 }
 0x251   : > { %v18193_v39 = vpop.eup %18192 }
 0x252   : > { %1202 = vadd.xlane.f32.xlu1 %v1191_v36  ;;  %v18978_v40 = vadd.f32 %v14637_v3, %v1168_v37  ;;  %v1155_v26 = vmul.f32 %v18193_v39, %v18937_v38  ;;  %v17946_v39 = vld [vmem:[%s22316_s29 + $0x28] sm:$0xff]  }
 0x253   : > { %16309 = vmatprep.subr.bf16.mxu1 %v17946_v39 }
 0x254   : > { %v1192_v41 = vmul.f32 %v18901_v32, %v18978_v40  ;;  %v1169_v42 = vmul.f32 %v14636_v63, %v1155_v26  ;;  %16310 = vmatpush3.bf16.msra.mxu1 %v17946_v39 }
 0x255   : > { %v18195_v44 = vpop.eup %18194 }
 0x256   : > { %1204 = vadd.xlane.f32.xlu0 %v1192_v41  ;;  %v18983_v45 = vadd.f32 %v14637_v3, %v1169_v42  ;;  %v1156_v33 = vmul.f32 %v18195_v44, %v18942_v43  ;;  %v17947_v42 = vld [vmem:[%s22317_s10 + $0x28] sm:$0xff]  }
 0x257   : > { %16333 = vmatprep.subr.bf16.mxu0 %v17947_v42 }
 0x258   : > { %v1193_v47 = vmul.f32 %v18901_v32, %v18983_v45  ;;  %v1170_v48 = vmul.f32 %v14636_v63, %v1156_v33  ;;  %v17948_v33 = vld [vmem:[%s22316_s29 + $0x20] sm:$0xff]   ;;  %16334 = vmatpush3.bf16.msra.mxu0 %v17947_v42 }
 0x259   : > { %v18197_v49 = vpop.eup %18196  ;;  %16311 = vmatprep.subr.bf16.mxu1 %v17948_v33 }
 0x25a   : > { %1206 = vadd.xlane.f32.xlu1 %v1193_v47  ;;  %v18988_v50 = vadd.f32 %v14637_v3, %v1170_v48  ;;  %v1157_v38 = vmul.f32 %v18197_v49, %v18947_v46  ;;  %v17949_v48 = vld [vmem:[%s22317_s10 + $0x20] sm:$0xff]   ;;  %16312 = vmatpush3.bf16.msra.mxu1 %v17948_v33  ;;  %v17950_v49 = vld [vmem:[%s22316_s29 + $0x18] sm:$0xff]  }
 0x25b   : > { %16335 = vmatprep.subr.bf16.mxu0 %v17949_v48  ;;  %16313 = vmatprep.subr.bf16.mxu1 %v17950_v49 }
 0x25c   : > { %v1194_v51 = vmul.f32 %v18901_v32, %v18988_v50  ;;  %v1171_v52 = vmul.f32 %v14636_v63, %v1157_v38  ;;  %16336 = vmatpush3.bf16.msra.mxu0 %v17949_v48  ;;  %v17951_v38 = vld [vmem:[%s22317_s10 + $0x18] sm:$0xff]  }
 0x25d   : > { %16337 = vmatprep.subr.bf16.mxu0 %v17951_v38 }
 0x25e   : > { %1208 = vadd.xlane.f32.xlu0 %v1194_v51  ;;  %v18993_v53 = vadd.f32 %v14637_v3, %v1171_v52  ;;  %16314 = vmatpush3.bf16.msra.mxu1 %v17950_v49  ;;  %v17952_v51 = vld [vmem:[%s22316_s29 + $0x10] sm:$0xff]  }
 0x25f   : > { %v17953_v52 = vld [vmem:[%s22317_s10 + $0x10] sm:$0xff]   ;;  %16315 = vmatprep.subr.bf16.mxu1 %v17952_v51 }
 0x260   : > { %v1195_v43 = vmul.f32 %v18901_v32, %v18993_v53  ;;  %16338 = vmatpush3.bf16.msra.mxu0 %v17951_v38 }
 0x261   : > { %16339 = vmatprep.subr.bf16.mxu0 %v17953_v52 }
 0x262   : > { %1210 = vadd.xlane.f32.xlu1 %v1195_v43  ;;  %16316 = vmatpush3.bf16.msra.mxu1 %v17952_v51  ;;  %v17954_v43 = vld [vmem:[%s22316_s29 + $0x8] sm:$0xff]  }
 0x263   : > { %16317 = vmatprep.subr.bf16.mxu1 %v17954_v43 }
 0x264   : > { %16340 = vmatpush3.bf16.msra.mxu0 %v17953_v52 }
 0x266   : > { %16318 = vmatpush3.bf16.msra.mxu1 %v17954_v43 }
 0x2cf   : > { %v1197_v54 = vpop.xlane.xlu0 %1196 }
 0x2d0   : > { %v1212_v55 = vmul.f32 0.03125, %v1197_v54  ;;  %v17955_v54 = vld [vmem:[%s22317_s10 + $0x8] sm:$0xff]  }
 0x2d1   : > { %16341 = vmatprep.subr.bf16.mxu0 %v17955_v54 }
 0x2d2   : > { %v1220_v56 = vsub.f32 %v18958_v8, %v1212_v55  ;;  %v17956_v55 = vld [vmem:[%s22316_s29] sm:$0xff]   ;;  %16342 = vmatpush3.bf16.msra.mxu0 %v17955_v54 }
 0x2d3   : > { %v1199_v57 = vpop.xlane.xlu1 %1198  ;;  %16319 = vmatprep.subr.bf16.mxu1 %v17956_v55 }
 0x2d4   : > { %v1213_v58 = vmul.f32 0.03125, %v1199_v57  ;;  %v18999_v59 = vmul.f32 %v18901_v32, %v1220_v56  ;;  %v17957_v56 = vld [vmem:[%s22317_s10] sm:$0xff]   ;;  %16320 = vmatpush3.bf16.msra.mxu1 %v17956_v55  ;;  %v19096_v57 = vld [vmem:[%s22318_s26 + $0x38] sm:$0xff]  }
 0x2d5   : > { %16343 = vmatprep.subr.bf16.mxu0 %v17957_v56  ;;  %16353 = vmatprep.subr.bf16.mxu1 %v19096_v57 }
 0x2d6   : > { %v1221_v46 = vsub.f32 %v18963_v17, %v1213_v58  ;;  %v1236_v60 = vmul.f32 %v18999_v59, %v18999_v59  ;;  %16344 = vmatpush3.bf16.msra.mxu0 %v17957_v56  ;;  %v17959_v56 = vld [vmem:[%s22318_s26 + $0x30] sm:$0xff]  }
 0x2d7   : > { %v1201_v61 = vpop.xlane.xlu0 %1200  ;;  %16377 = vmatprep.subr.bf16.mxu0 %v18646_v31 }
 0x2d8   : > { %v1214_v62 = vmul.f32 0.03125, %v1201_v61  ;;  %1244 = vadd.xlane.f32.xlu0 %v1236_v60  ;;  %v19005_v63 = vmul.f32 %v18901_v32, %v1221_v46 }
 0x2da   : > { %v1222_v0 = vsub.f32 %v18968_v27, %v1214_v62  ;;  %v1237_v1 = vmul.f32 %v19005_v63, %v19005_v63 }
 0x2db   : > { %v1203_v2 = vpop.xlane.xlu1 %1202 }
 0x2dc   : > { %v1215_v3 = vmul.f32 0.03125, %v1203_v2  ;;  %1246 = vadd.xlane.f32.xlu1 %v1237_v1  ;;  %v19011_v4 = vmul.f32 %v18901_v32, %v1222_v0 }
 0x2de   : > { %v1223_v5 = vsub.f32 %v18973_v34, %v1215_v3  ;;  %v1238_v6 = vmul.f32 %v19011_v4, %v19011_v4 }
 0x2df   : > { %v1205_v7 = vpop.xlane.xlu0 %1204 }
 0x2e0   : > { %v1216_v9 = vmul.f32 0.03125, %v1205_v7  ;;  %1248 = vadd.xlane.f32.xlu0 %v1238_v6  ;;  %v19017_v11 = vmul.f32 %v18901_v32, %v1223_v5 }
 0x2e2   : > { %v1224_v12 = vsub.f32 %v18978_v40, %v1216_v9  ;;  %v1239_v10 = vmul.f32 %v19017_v11, %v19017_v11 }
 0x2e3   : > { %v1207_v13 = vpop.xlane.xlu1 %1206 }
 0x2e4   : > { %v1217_v14 = vmul.f32 0.03125, %v1207_v13  ;;  %1250 = vadd.xlane.f32.xlu1 %v1239_v10  ;;  %v19023_v16 = vmul.f32 %v18901_v32, %v1224_v12 }
 0x2e6   : > { %v1225_v19 = vsub.f32 %v18983_v45, %v1217_v14  ;;  %v1240_v21 = vmul.f32 %v19023_v16, %v19023_v16 }
 0x2e7   : > { %v1209_v22 = vpop.xlane.xlu0 %1208 }
 0x2e8   : > { %v1218_v23 = vmul.f32 0.03125, %v1209_v22  ;;  %1252 = vadd.xlane.f32.xlu0 %v1240_v21  ;;  %v19035_v24 = vmul.f32 %v18901_v32, %v1225_v19 }
 0x2ea   : > { %v1226_v29 = vsub.f32 %v18988_v50, %v1218_v23  ;;  %v1241_v30 = vmul.f32 %v19035_v24, %v19035_v24 }
 0x2eb   : > { %v1211_v35 = vpop.xlane.xlu1 %1210 }
 0x2ec   : > { %v1219_v36 = vmul.f32 0.03125, %v1211_v35  ;;  %1254 = vadd.xlane.f32.xlu1 %v1241_v30  ;;  %v19047_v37 = vmul.f32 %v18901_v32, %v1226_v29  ;;  %v14639_v29 = vld [vmem:[%s22320_s7] ss:$0 sm:$0xff] }
 0x2ee   : > { %v1227_v26 = vsub.f32 %v18993_v53, %v1219_v36  ;;  %v1242_v41 = vmul.f32 %v19047_v37, %v19047_v37 }
 0x2f0   : > { %1256 = vadd.xlane.f32.xlu0 %v1242_v41  ;;  %v19059_v44 = vmul.f32 %v18901_v32, %v1227_v26 }
 0x2f2   : > { %v1243_v47 = vmul.f32 %v19059_v44, %v19059_v44 }
 0x2f4   : > { %1258 = vadd.xlane.f32.xlu1 %v1243_v47 }
 0x361   : > { %v1245_v58 = vpop.xlane.xlu0 %1244 }
 0x362   : > { %v1260_v46 = vmul.f32 0.03125, %v1245_v58 }
 0x364   : > { %v1268_v60 = vadd.f32 1e-05, %v1260_v46 }
 0x365   : > { %v1247_v61 = vpop.xlane.xlu1 %1246 }
 0x366   : > { %18198 = vrsqrt.f32 %v1268_v60  ;;  %v1261_v62 = vmul.f32 0.03125, %v1247_v61 }
 0x368   : > { %v1269_v0 = vadd.f32 1e-05, %v1261_v62 }
 0x369   : > { %v1249_v1 = vpop.xlane.xlu0 %1248 }
 0x36a   : > { %18200 = vrsqrt.f32 %v1269_v0  ;;  %v1262_v2 = vmul.f32 0.03125, %v1249_v1 }
 0x36c   : > { %v1270_v3 = vadd.f32 1e-05, %v1262_v2 }
 0x36d   : > { %v1251_v5 = vpop.xlane.xlu1 %1250 }
 0x36e   : > { %18202 = vrsqrt.f32 %v1270_v3  ;;  %v1263_v6 = vmul.f32 0.03125, %v1251_v5 }
 0x370   : > { %v1271_v7 = vadd.f32 1e-05, %v1263_v6 }
 0x371   : > { %v1253_v9 = vpop.xlane.xlu0 %1252 }
 0x372   : > { %18204 = vrsqrt.f32 %v1271_v7  ;;  %v1264_v12 = vmul.f32 0.03125, %v1253_v9 }
 0x373   : > { %v18199_v10 = vpop.eup %18198 }
 0x374   : > { %v1284_v13 = vmul.f32 %v18199_v10, %v18999_v59  ;;  %v1272_v14 = vadd.f32 1e-05, %v1264_v12  ;;  %v17964_v10 = vld [vmem:[%s22318_s26 + $0x8] sm:$0xff]  }
 0x375   : > { %v1255_v19 = vpop.xlane.xlu1 %1254 }
 0x376   : > { %18206 = vrsqrt.f32 %v1272_v14  ;;  %v1265_v21 = vmul.f32 0.03125, %v1255_v19  ;;  %v1298_v22 = vmul.f32 %v14638_v18, %v1284_v13  ;;  %v17965_v13 = vld [vmem:[%s22318_s26] sm:$0xff]  }
 0x377   : > { %v18201_v15 = vpop.eup %18200  ;;  %v14661_v19 = vld [vmem:[%s22322_s11] ss:$0 sm:$0xff] }
 0x378   : > { %v1285_v23 = vmul.f32 %v18201_v15, %v19005_v63  ;;  %v1273_v28 = vadd.f32 1e-05, %v1265_v21  ;;  %v1312_v36 = vadd.f32 %v14639_v29, %v1298_v22 }
 0x379   : > { %v1257_v30 = vpop.xlane.xlu0 %1256 }
 0x37a   : > { %v1299_v20 = vmul.f32 %v14638_v18, %v1285_v23  ;;  %18208 = vrsqrt.f32 %v1273_v28  ;;  %v1266_v59 = vmul.f32 0.03125, %v1257_v30 }
 0x37b   : > { %v18203_v35 = vpop.eup %18202 }
 0x37c   : > { %v1313_v39 = vadd.f32 %v14639_v29, %v1299_v20  ;;  %v1286_v26 = vmul.f32 %v18203_v35, %v19011_v4  ;;  %v1274_v41 = vadd.f32 1e-05, %v1266_v59 }
 0x37d   : > { %v1259_v42 = vpop.xlane.xlu1 %1258 }
 0x37e   : > { %v19109_v33 = vpack.c.bf16 %v1313_v39, %v1312_v36  ;;  %18210 = vrsqrt.f32 %v1274_v41  ;;  %v1267_v63 = vmul.f32 0.03125, %v1259_v42  ;;  %v1300_v48 = vmul.f32 %v14638_v18, %v1286_v26  ;;  %v19168_v36 = vld [vmem:[%s22323_s27] ss:$0 sm:$0xff] }
 0x37f   : > { %v18205_v47 = vpop.eup %18204 }
 0x380   : > { %v1287_v49 = vmul.f32 %v18205_v47, %v19017_v11  ;;  %v1275_v38 = vadd.f32 1e-05, %v1267_v63  ;;  %16321 = vmatprep.mubr.bf16.mxu1 %v19109_v33  ;;  %16345 = vmatprep.mubr.bf16.mxu0 %v19109_v33  ;;  %v1314_v43 = vadd.f32 %v14639_v29, %v1300_v48 }
 0x382   : > { %v1301_v51 = vmul.f32 %v14638_v18, %v1287_v49  ;;  %18212 = vrsqrt.f32 %v1275_v38 }
 0x383   : > { %v18207_v52 = vpop.eup %18206 }
 0x384   : > { %v1315_v4 = vadd.f32 %v14639_v29, %v1301_v51  ;;  %v1288_v54 = vmul.f32 %v18207_v52, %v19023_v16  ;;  %v17960_v16 = vld [vmem:[%s22318_s26 + $0x28] sm:$0xff]  }
 0x386   : > { %v19115_v55 = vpack.c.bf16 %v1315_v4, %v1314_v43  ;;  %v1302_v11 = vmul.f32 %v14638_v18, %v1288_v54 }
 0x387   : > { %v18209_v58 = vpop.eup %18208 }
 0x388   : > { %v1289_v46 = vmul.f32 %v18209_v58, %v19035_v24  ;;  %16322 = vmatmul.mubr.bf16.vlgmr.msra.gmra.mxu1 %v19115_v55  ;;  %16346 = vmatmul.mubr.bf16.vlgmr.msra.gmra.mxu0 %v19115_v55  ;;  %v1316_v62 = vadd.f32 %v14639_v29, %v1302_v11  ;;  %v17961_v24 = vld [vmem:[%s22318_s26 + $0x20] sm:$0xff]  }
 0x389   : > { %16354 = vmatpush3.bf16.msra.mxu1 %v19096_v57 }
 0x38a   : > { %v1303_v60 = vmul.f32 %v14638_v18, %v1289_v46  ;;  %16355 = vmatprep.subr.bf16.mxu1 %v17959_v56 }
 0x38b   : > { %v18211_v61 = vpop.eup %18210 }
 0x38c   : > { %v1317_v0 = vadd.f32 %v14639_v29, %v1303_v60  ;;  %v1290_v1 = vmul.f32 %v18211_v61, %v19047_v37  ;;  %v17962_v37 = vld [vmem:[%s22318_s26 + $0x18] sm:$0xff]  }
 0x38d   : > { %16356 = vmatpush3.bf16.msra.mxu1 %v17959_v56 }
 0x38e   : > { %v19128_v2 = vpack.c.bf16 %v1317_v0, %v1316_v62  ;;  %16357 = vmatprep.subr.bf16.mxu1 %v17960_v16  ;;  %v1304_v3 = vmul.f32 %v14638_v18, %v1290_v1 }
 0x38f   : > { %v18213_v57 = vpop.eup %18212 }
 0x390   : > { %v1291_v5 = vmul.f32 %v18213_v57, %v19059_v44  ;;  %16325 = vmatprep.mubr.bf16.mxu1 %v19128_v2  ;;  %16349 = vmatprep.mubr.bf16.mxu0 %v19128_v2  ;;  %v1318_v7 = vadd.f32 %v14639_v29, %v1304_v3  ;;  %v17963_v44 = vld [vmem:[%s22318_s26 + $0x10] sm:$0xff]  }
 0x391   : > { %16358 = vmatpush3.bf16.msra.mxu1 %v17960_v16 }
 0x392   : > { %v1305_v6 = vmul.f32 %v14638_v18, %v1291_v5  ;;  %16359 = vmatprep.subr.bf16.mxu1 %v17961_v24 }
 0x394   : > { %v1319_v9 = vadd.f32 %v14639_v29, %v1305_v6 }
 0x395   : > { %16360 = vmatpush3.bf16.msra.mxu1 %v17961_v24 }
 0x396   : > { %v19139_v12 = vpack.c.bf16 %v1319_v9, %v1318_v7  ;;  %16361 = vmatprep.subr.bf16.mxu1 %v17962_v37 }
 0x398   : > { %16326 = vmatmul.mubr.bf16.gmra.mxu1 %v19139_v12  ;;  %16350 = vmatmul.mubr.bf16.gmra.mxu0 %v19139_v12 }
 0x399   : > { %16362 = vmatpush3.bf16.msra.mxu1 %v17962_v37  ;;  %16369 = vmatprep.mubr.bf16.mxu1 %v19109_v33 }
 0x39a   : > { %16363 = vmatprep.subr.bf16.mxu1 %v17963_v44  ;;  %16379 = vmatprep.mubr.msk.bf16.mxu0 %vm18647_vm1, %v18646_v31 }
 0x39d   : > { %16364 = vmatpush3.bf16.msra.mxu1 %v17963_v44 }
 0x39e   : > { %16365 = vmatprep.subr.bf16.mxu1 %v17964_v10 }
 0x3a1   : > { %16366 = vmatpush3.bf16.msra.mxu1 %v17964_v10 }
 0x3a2   : > { %16367 = vmatprep.subr.bf16.mxu1 %v17965_v13 }
 0x3a5   : > { %16368 = vmatpush3.bf16.msra.mxu1 %v17965_v13 }
 0x3a6   : > { %16383 = vmatprep.subr.bf16.mxu1 %v18646_v31 }
 0x3a8   : > { %16370 = vmatmul.mubr.bf16.vlgmr.msra.gmra.mxu1 %v19115_v55 }
 0x3a9   : > { %16373 = vmatprep.mubr.bf16.mxu1 %v19128_v2 }
 0x3b0   : > { %16374 = vmatmul.mubr.bf16.gmra.mxu1 %v19139_v12 }
 0x3b1   : > { %16385 = vmatprep.mubr.msk.bf16.mxu1 %vm18647_vm1, %v18646_v31 }
 0x448   : > { %v16323_v14 = vpop.f32.mrf.mxu1  ;;  %v16347_v18 = vpop.f32.mrf.mxu0 }
 0x449   : > { %v1634_v20 = vadd.f32 %v16347_v18, %v14661_v19  ;;  %v1490_v4 = vadd.f32 %v16323_v14, %v19168_v36  ;;  %v19202_v18 = vld [vmem:[%s22256_s12] ss:$0 sm:$0xff] }
 0x44a   : > { %v1450_v21 = vpop.f32.mrf.mxu1  ;;  %v1594_v15 = vpop.f32.mrf.mxu0 }
 0x44b   : > { %v1632_v22 = vadd.f32 %v14661_v19, %v1594_v15  ;;  %v1488_v39 = vadd.f32 %v19168_v36, %v1450_v21  ;;  %v1794_v42 = vpack.c.bf16 %v1634_v20, %v1634_v20  ;;  %v1786_v16 = vpack.c.bf16 %v1490_v4, %v1490_v4 }
 0x44c   : > { %v16348_v23 = vpop.f32.mrf.mxu0  ;;  %v16324_v29 = vpop.f32.mrf.mxu1 }
 0x44d   : > { %v1792_v28 = vpack.c.bf16 %v1632_v22, %v1632_v22  ;;  %v1635_v63 = vadd.f32 %v16348_v23, %v14661_v19  ;;  %v1784_v48 = vpack.c.bf16 %v1488_v39, %v1488_v39  ;;  %v1897_v38 = vsel %vm1800_vm2, %v1794_v42, 0 }
 0x44e   : > { %v1597_v30 = vpop.f32.mrf.mxu0  ;;  %v1453_v41 = vpop.f32.mrf.mxu1  ;;  %v1491_v61 = vadd.f32 %v16324_v29, %v19168_v36 }
 0x44f   : > { %v1805_v59 = vsel %vm1800_vm2, %v1792_v28, 0  ;;  %v1633_v35 = vadd.f32 %v14661_v19, %v1597_v30  ;;  %v1489_v49 = vadd.f32 %v19168_v36, %v1453_v41  ;;  %v1795_v51 = vpack.c.bf16 %v1635_v63, %v1635_v63 }
 0x450   : > { %16378 = vmatpush3.bf16.xpose.msra.mxu0 %v1805_v59  ;;  %v1787_v5 = vpack.c.bf16 %v1491_v61, %v1491_v61 }
 0x451   : > { %v1793_v26 = vpack.c.bf16 %v1633_v35, %v1633_v35  ;;  %16389 = vmatprep.subr.bf16.mxu0 %v18646_v31  ;;  %v1785_v54 = vpack.c.bf16 %v1489_v49, %v1489_v49  ;;  %v1943_v11 = vsel %vm1800_vm2, %v1795_v51, 0 }
 0x453   : > { %v1851_v47 = vsel %vm1800_vm2, %v1793_v26, 0 }
 0x454   : > { %16384 = vmatpush3.bf16.xpose.msra.mxu1 %v1851_v47 }
 0x455   : > { %16395 = vmatprep.subr.bf16.mxu1 %v18646_v31 }
 0x457   : > { %16380 = vmatmul.mubr.msk.bf16.vlgmr.msra.gmra.mxu0 %vm1800_vm2, %v1784_v48 }
 0x458   : > { %v16327_v52 = vpop.f32.mrf.mxu1  ;;  %v16351_v43 = vpop.f32.mrf.mxu0  ;;  %16390 = vmatpush3.bf16.xpose.msra.mxu0 %v1897_v38  ;;  %16391 = vmatprep.mubr.msk.bf16.mxu0 %vm18647_vm1, %v18646_v31 }
 0x459   : > { %16401 = vmatprep.subr.bf16.mxu0 %v18646_v31  ;;  %v1638_v24 = vadd.f32 %v16351_v43, %v14661_v19  ;;  %v1494_v22 = vadd.f32 %v16327_v52, %v19168_v36 }
 0x45a   : > { %v1466_v56 = vpop.f32.mrf.mxu1  ;;  %v1610_v58 = vpop.f32.mrf.mxu0 }
 0x45b   : > { %v1636_v46 = vadd.f32 %v14661_v19, %v1610_v58  ;;  %16386 = vmatmul.mubr.msk.bf16.vlgmr.msra.gmra.mxu1 %vm1800_vm2, %v1785_v54  ;;  %v1492_v6 = vadd.f32 %v19168_v36, %v1466_v56  ;;  %v1798_v9 = vpack.c.bf16 %v1638_v24, %v1638_v24  ;;  %v1790_v35 = vpack.c.bf16 %v1494_v22, %v1494_v22 }
 0x45c   : > { %v16352_v60 = vpop.f32.mrf.mxu0  ;;  %16396 = vmatpush3.bf16.xpose.msra.mxu1 %v1943_v11  ;;  %16397 = vmatprep.mubr.msk.bf16.mxu1 %vm18647_vm1, %v18646_v31  ;;  %v16328_v0 = vpop.f32.mrf.mxu1 }
 0x45d   : > { %v1796_v62 = vpack.c.bf16 %v1636_v46, %v1636_v46  ;;  %16407 = vmatprep.subr.bf16.mxu1 %v18646_v31  ;;  %v1639_v44 = vadd.f32 %v16352_v60, %v14661_v19  ;;  %v1788_v13 = vpack.c.bf16 %v1492_v6, %v1492_v6  ;;  %v1495_v39 = vadd.f32 %v16328_v0, %v19168_v36 }
 0x45e   : > { %v1613_v1 = vpop.f32.mrf.mxu0  ;;  %v1469_v7 = vpop.f32.mrf.mxu1 }
 0x45f   : > { %v1989_v57 = vsel %vm1800_vm2, %v1796_v62, 0  ;;  %v1637_v3 = vadd.f32 %v14661_v19, %v1613_v1  ;;  %16392 = vmatmul.mubr.msk.bf16.vlgmr.msra.gmra.mxu0 %vm1800_vm2, %v1786_v16  ;;  %v1493_v14 = vadd.f32 %v19168_v36, %v1469_v7  ;;  %v2081_v19 = vsel %vm1800_vm2, %v1798_v9, 0 }
 0x460   : > { %16402 = vmatpush3.bf16.xpose.msra.mxu0 %v1989_v57  ;;  %16403 = vmatprep.mubr.msk.bf16.mxu0 %vm18647_vm1, %v18646_v31  ;;  %v1799_v21 = vpack.c.bf16 %v1639_v44, %v1639_v44  ;;  %v1791_v36 = vpack.c.bf16 %v1495_v39, %v1495_v39 }
 0x461   : > { %v1797_v37 = vpack.c.bf16 %v1637_v3, %v1637_v3  ;;  %16413 = vmatprep.subr.bf16.mxu0 %v18646_v31  ;;  %v1789_v23 = vpack.c.bf16 %v1493_v14, %v1493_v14 }
 0x462   : > { %v2127_v30 = vsel %vm1800_vm2, %v1799_v21, 0 }
 0x463   : > { %16398 = vmatmul.mubr.msk.bf16.vlgmr.msra.gmra.mxu1 %vm1800_vm2, %v1787_v5  ;;  %v2035_v10 = vsel %vm1800_vm2, %v1797_v37, 0 }
 0x464   : > { %16408 = vmatpush3.bf16.xpose.msra.mxu1 %v2035_v10  ;;  %16409 = vmatprep.mubr.msk.bf16.mxu1 %vm18647_vm1, %v18646_v31 }
 0x465   : > { %16419 = vmatprep.subr.bf16.mxu1 %v18646_v31 }
 0x467   : > { %16404 = vmatmul.mubr.msk.bf16.vlgmr.msra.gmra.mxu0 %vm1800_vm2, %v1788_v13 }
 0x468   : > { %v16371_v15 = vpop.f32.mrf.mxu1  ;;  %16414 = vmatpush3.bf16.xpose.msra.mxu0 %v2081_v19  ;;  %16415 = vmatprep.mubr.msk.bf16.mxu0 %vm18647_vm1, %v18646_v31 }
 0x469   : > { %v19210_v28 = vadd.f32 %v16371_v15, %v19202_v18  ;;  %16425 = vmatprep.subr.bf16.mxu0 %v18646_v31 }
 0x46a   : > { %v1738_v29 = vpop.f32.mrf.mxu1 }
 0x46b   : > { %v1776_v20 = vadd.f32 %v19202_v18, %v1738_v29  ;;  %16410 = vmatmul.mubr.msk.bf16.vlgmr.msra.gmra.mxu1 %vm1800_vm2, %v1789_v23 }
 0x46c   : > { %v16372_v59 = vpop.f32.mrf.mxu1  ;;  %16420 = vmatpush3.bf16.xpose.msra.mxu1 %v2127_v30  ;;  %16421 = vmatprep.mubr.msk.bf16.mxu1 %vm18647_vm1, %v18646_v31 }
 0x46d   : > { %v2283_v26 = vpack.c.bf16 %v1776_v20, %v1776_v20  ;;  %v19220_v41 = vadd.f32 %v16372_v59, %v19202_v18  ;;  %16431 = vmatprep.subr.bf16.mxu1 %v18646_v31 }
 0x46e   : > { %v1741_v42 = vpop.f32.mrf.mxu1 }
 0x46f   : > { %v2296_v63 = vsel %vm2294_vm3, %v2283_v26, 0  ;;  %v1777_v47 = vadd.f32 %v19202_v18, %v1741_v42  ;;  %16416 = vmatmul.mubr.msk.bf16.vlgmr.msra.gmra.mxu0 %vm1800_vm2, %v1790_v35 }
 0x470   : > { %v16375_v48 = vpop.f32.mrf.mxu1  ;;  %16426 = vmatpush3.bf16.msra.mxu0 %v2296_v63  ;;  %16427 = vmatprep.mubr.msk.bf16.mxu0 %vm18647_vm1, %v18646_v31 }
 0x471   : > { %v2284_v49 = vpack.c.bf16 %v1777_v47, %v1777_v47  ;;  %v19229_v38 = vadd.f32 %v16375_v48, %v19202_v18  ;;  %16437 = vmatprep.subr.bf16.mxu0 %v18646_v31 }
 0x472   : > { %v1754_v51 = vpop.f32.mrf.mxu1 }
 0x473   : > { %v19233_v52 = vadd.f32 %v19202_v18, %v1754_v51  ;;  %16422 = vmatmul.mubr.msk.bf16.vlgmr.msra.gmra.mxu1 %vm1800_vm2, %v1791_v36  ;;  %v2342_v43 = vsel %vm2294_vm3, %v2284_v49, 0 }
 0x474   : > { %v16376_v4 = vpop.f32.mrf.mxu1  ;;  %16432 = vmatpush3.bf16.msra.mxu1 %v2342_v43  ;;  %16433 = vmatprep.mubr.msk.bf16.mxu1 %vm18647_vm1, %v18646_v31 }
 0x475   : > { %v19240_v54 = vadd.f32 %v16376_v4, %v19202_v18  ;;  %16443 = vmatprep.subr.bf16.mxu1 %v18646_v31 }
 0x476   : > { %v19244_v11 = vpop.f32.mrf.mxu1 }
 0x517   : > { %v1841_v56 = vpop.f32.mrf.mxu0 }
 0x518   : > { %v2169_v58 = vmul.f32 0.35355338, %v1841_v56 }
 0x519   : > { %v16381_v46 = vpop.f32.mrf.mxu0 }
 0x51a   : > { %v19248_v60 = vsel %vm801_vm4, %v2169_v58, -1e+30 }
 0x51b   : > { %v1844_v16 = vpop.f32.mrf.mxu0  ;;  %v1887_v61 = vpop.f32.mrf.mxu1  ;;  %v2187_v62 = vsel %vm1800_vm2, %v19248_v60, -inf }
 0x51c   : > { %v2170_v0 = vmul.f32 0.35355338, %v1887_v61  ;;  %2188 = vmax.xlane.f32.xlu0 %v2187_v62 }
 0x51d   : > { %v16382_v1 = vpop.f32.mrf.mxu0  ;;  %v16387_v24 = vpop.f32.mrf.mxu1 }
 0x51e   : > { %v2180_v57 = vsel %vm801_vm4, %v2170_v0, -1e+30 }
 0x51f   : > { %v1890_v3 = vpop.f32.mrf.mxu1  ;;  %v1933_v5 = vpop.f32.mrf.mxu0  ;;  %v2190_v6 = vsel %vm1800_vm2, %v2180_v57, -inf }
 0x520   : > { %v2171_v37 = vmul.f32 0.35355338, %v1933_v5  ;;  %2191 = vmax.xlane.f32.xlu1 %v2190_v6 }
 0x521   : > { %v16388_v7 = vpop.f32.mrf.mxu1  ;;  %v16393_v9 = vpop.f32.mrf.mxu0 }
 0x522   : > { %v2181_v44 = vsel %vm801_vm4, %v2171_v37, -1e+30 }
 0x523   : > { %v1936_v10 = vpop.f32.mrf.mxu0  ;;  %v1979_v13 = vpop.f32.mrf.mxu1  ;;  %v2193_v14 = vsel %vm1800_vm2, %v2181_v44, -inf }
 0x524   : > { %v2172_v19 = vmul.f32 0.35355338, %v1979_v13  ;;  %2194 = vmax.xlane.f32.xlu0 %v2193_v14 }
 0x525   : > { %v16394_v21 = vpop.f32.mrf.mxu0  ;;  %v16399_v15 = vpop.f32.mrf.mxu1 }
 0x526   : > { %v2182_v22 = vsel %vm801_vm4, %v2172_v19, -1e+30 }
 0x527   : > { %v1982_v23 = vpop.f32.mrf.mxu1  ;;  %v2025_v29 = vpop.f32.mrf.mxu0  ;;  %v2196_v30 = vsel %vm1800_vm2, %v2182_v22, -inf }
 0x528   : > { %v2173_v20 = vmul.f32 0.35355338, %v2025_v29  ;;  %2197 = vmax.xlane.f32.xlu1 %v2196_v30 }
 0x529   : > { %v16400_v59 = vpop.f32.mrf.mxu1  ;;  %v16405_v35 = vpop.f32.mrf.mxu0 }
 0x52a   : > { %v2183_v39 = vsel %vm801_vm4, %v2173_v20, -1e+30 }
 0x52b   : > { %v2028_v26 = vpop.f32.mrf.mxu0  ;;  %v2071_v42 = vpop.f32.mrf.mxu1  ;;  %v2199_v63 = vsel %vm1800_vm2, %v2183_v39, -inf }
 0x52c   : > { %v2174_v47 = vmul.f32 0.35355338, %v2071_v42  ;;  %2200 = vmax.xlane.f32.xlu0 %v2199_v63 }
 0x52d   : > { %v16406_v48 = vpop.f32.mrf.mxu0  ;;  %v16411_v36 = vpop.f32.mrf.mxu1 }
 0x52e   : > { %v2184_v49 = vsel %vm801_vm4, %v2174_v47, -1e+30 }
 0x52f   : > { %v2074_v51 = vpop.f32.mrf.mxu1  ;;  %v2117_v43 = vpop.f32.mrf.mxu0  ;;  %v2202_v4 = vsel %vm1800_vm2, %v2184_v49, -inf }
 0x530   : > { %v2175_v56 = vmul.f32 0.35355338, %v2117_v43  ;;  %2203 = vmax.xlane.f32.xlu1 %v2202_v4 }
 0x531   : > { %v16412_v58 = vpop.f32.mrf.mxu1  ;;  %v16417_v46 = vpop.f32.mrf.mxu0 }
 0x532   : > { %v2185_v16 = vsel %vm801_vm4, %v2175_v56, -1e+30 }
 0x533   : > { %v2120_v61 = vpop.f32.mrf.mxu0  ;;  %v2163_v62 = vpop.f32.mrf.mxu1  ;;  %v2205_v0 = vsel %vm1800_vm2, %v2185_v16, -inf }
 0x534   : > { %v2176_v1 = vmul.f32 0.35355338, %v2163_v62  ;;  %2206 = vmax.xlane.f32.xlu0 %v2205_v0 }
 0x535   : > { %v16418_v24 = vpop.f32.mrf.mxu0  ;;  %v16423_v3 = vpop.f32.mrf.mxu1 }
 0x536   : > { %v2186_v5 = vsel %vm801_vm4, %v2176_v1, -1e+30 }
 0x537   : > { %v2166_v6 = vpop.f32.mrf.mxu1  ;;  %v2208_v37 = vsel %vm1800_vm2, %v2186_v5, -inf }
 0x538   : > { %2209 = vmax.xlane.f32.xlu1 %v2208_v37 }
 0x539   : > { %v16424_v7 = vpop.f32.mrf.mxu1 }
 0x5a5   : > { %v2189_v9 = vpop.xlane.xlu0 %2188 }
 0x5a6   : > { %v2211_v10 = vsub.f32 %v19248_v60, %v2189_v9 }
 0x5a8   : > { %v2219_v13 = vmul.f32 1.442695, %v2211_v10 }
 0x5a9   : > { %v2192_v14 = vpop.xlane.xlu1 %2191 }
 0x5aa   : > { %18214 = vpow2.f32 %v2219_v13  ;;  %v2212_v19 = vsub.f32 %v2180_v57, %v2192_v14  ;;  %v2285_v14 = vpack.c.bf16 %v19210_v28, %v19210_v28 }
 0x5ac   : > { %v2221_v21 = vmul.f32 1.442695, %v2212_v19 }
 0x5ad   : > { %v2195_v15 = vpop.xlane.xlu0 %2194 }
 0x5ae   : > { %18216 = vpow2.f32 %v2221_v21  ;;  %v2213_v23 = vsub.f32 %v2181_v44, %v2195_v15 }
 0x5b0   : > { %v2223_v29 = vmul.f32 1.442695, %v2213_v23 }
 0x5b1   : > { %v2198_v30 = vpop.xlane.xlu1 %2197 }
 0x5b2   : > { %18218 = vpow2.f32 %v2223_v29  ;;  %v2214_v20 = vsub.f32 %v2182_v22, %v2198_v30  ;;  %v2388_v29 = vsel %vm2294_vm3, %v2285_v14, 0  ;;  %v2286_v30 = vpack.c.bf16 %v19220_v41, %v19220_v41  ;;  %v17975_v14 = vld [vmem:[%s22318_s26 + $0x70] sm:$0xff]  }
 0x5b3   : > { %v1781_v41 = vadd.f32 %v19202_v18, %v19244_v11 }
 0x5b4   : > { %v2225_v59 = vmul.f32 1.442695, %v2214_v20 }
 0x5b5   : > { %v2201_v35 = vpop.xlane.xlu0 %2200 }
 0x5b6   : > { %18220 = vpow2.f32 %v2225_v59  ;;  %v2215_v26 = vsub.f32 %v2183_v39, %v2201_v35 }
 0x5b7   : > { %v18215_v42 = vpop.eup %18214 }
 0x5b8   : > { %v2227_v63 = vmul.f32 1.442695, %v2215_v26  ;;  %v2235_v60 = vsel %vm1800_vm2, %v18215_v42, 0.0  ;;  %v2434_v26 = vsel %vm2294_vm3, %v2286_v30, 0 }
 0x5b9   : > { %2236 = vadd.xlane.f32.xlu0 %v2235_v60  ;;  %v2204_v47 = vpop.xlane.xlu1 %2203 }
 0x5ba   : > { %18222 = vpow2.f32 %v2227_v63  ;;  %v2216_v57 = vsub.f32 %v2184_v49, %v2204_v47 }
 0x5bb   : > { %v18217_v48 = vpop.eup %18216 }
 0x5bc   : > { %v2229_v36 = vmul.f32 1.442695, %v2216_v57  ;;  %v2238_v44 = vsel %vm1800_vm2, %v18217_v48, 0.0 }
 0x5bd   : > { %v2207_v51 = vpop.xlane.xlu0 %2206  ;;  %2239 = vadd.xlane.f32.xlu1 %v2238_v44 }
 0x5be   : > { %18224 = vpow2.f32 %v2229_v36  ;;  %v2217_v22 = vsub.f32 %v2185_v16, %v2207_v51  ;;  %v2288_v36 = vpack.c.bf16 %v1781_v41, %v1781_v41  ;;  %v2289_v51 = vpack.c.bf16 %v19229_v38, %v19229_v38 }
 0x5bf   : > { %v18219_v43 = vpop.eup %18218 }
 0x5c0   : > { %v2231_v4 = vmul.f32 1.442695, %v2217_v22  ;;  %v2241_v39 = vsel %vm1800_vm2, %v18219_v43, 0.0  ;;  %v2526_v22 = vsel %vm2294_vm3, %v2288_v36, 0 }
 0x5c1   : > { %2242 = vadd.xlane.f32.xlu0 %v2241_v39  ;;  %v2210_v56 = vpop.xlane.xlu1 %2209 }
 0x5c2   : > { %18226 = vpow2.f32 %v2231_v4  ;;  %v2218_v58 = vsub.f32 %v2186_v5, %v2210_v56  ;;  %v2572_v56 = vsel %vm2294_vm3, %v2289_v51, 0  ;;  %v17983_v51 = vld [vmem:[%s22317_s10 + $0x70] sm:$0xff]  }
 0x5c3   : > { %v18221_v46 = vpop.eup %18220 }
 0x5c4   : > { %v2233_v61 = vmul.f32 1.442695, %v2218_v58  ;;  %v2244_v49 = vsel %vm1800_vm2, %v18221_v46, 0.0  ;;  %v2290_v58 = vpack.c.bf16 %v19240_v54, %v19240_v54 }
 0x5c5   : > { %2245 = vadd.xlane.f32.xlu1 %v2244_v49 }
 0x5c6   : > { %18228 = vpow2.f32 %v2233_v61  ;;  %v17966_v61 = vld [vmem:[%s22316_s29 + $0x78] sm:$0xff]  }
 0x5c7   : > { %v19278_v62 = vpop.eup %18222 }
 0x5c8   : > { %v2247_v0 = vsel %vm1800_vm2, %v19278_v62, 0.0 }
 0x5c9   : > { %2248 = vadd.xlane.f32.xlu0 %v2247_v0 }
 0x5cb   : > { %v19282_v16 = vpop.eup %18224 }
 0x5cc   : > { %v2250_v1 = vsel %vm1800_vm2, %v19282_v16, 0.0 }
 0x5cd   : > { %2251 = vadd.xlane.f32.xlu1 %v2250_v1 }
 0x5cf   : > { %v19286_v24 = vpop.eup %18226 }
 0x5d0   : > { %v2253_v3 = vsel %vm1800_vm2, %v19286_v24, 0.0 }
 0x5d1   : > { %2254 = vadd.xlane.f32.xlu0 %v2253_v3 }
 0x5d3   : > { %v19290_v5 = vpop.eup %18228 }
 0x5d4   : > { %v2256_v6 = vsel %vm1800_vm2, %v19290_v5, 0.0 }
 0x5d5   : > { %2257 = vadd.xlane.f32.xlu1 %v2256_v6  ;;  %v17967_v6 = vld [vmem:[%s22316_s29 + $0x70] sm:$0xff]  }
 0x642   : > { %v2237_v37 = vpop.xlane.xlu0 %2236 }
 0x643   : > { %18230 = vrcp.f32 %v2237_v37  ;;  %v17970_v37 = vld [vmem:[%s22316_s29 + $0x58] sm:$0xff]  }
 0x646   : > { %v2240_v7 = vpop.xlane.xlu1 %2239 }
 0x647   : > { %18232 = vrcp.f32 %v2240_v7  ;;  %v17971_v7 = vld [vmem:[%s22316_s29 + $0x50] sm:$0xff]  }
 0x64a   : > { %v2243_v9 = vpop.xlane.xlu0 %2242 }
 0x64b   : > { %18234 = vrcp.f32 %v2243_v9  ;;  %v17972_v9 = vld [vmem:[%s22316_s29 + $0x48] sm:$0xff]  }
 0x64e   : > { %v2246_v10 = vpop.xlane.xlu1 %2245 }
 0x64f   : > { %18236 = vrcp.f32 %v2246_v10  ;;  %v17973_v10 = vld [vmem:[%s22316_s29 + $0x40] sm:$0xff]  }
 0x650   : > { %v18231_v13 = vpop.eup %18230 }
 0x651   : > { %v2267_v19 = vmul.f32 %v18231_v13, %v18215_v42  ;;  %v2287_v42 = vpack.c.bf16 %v19233_v52, %v19233_v52  ;;  %v17974_v13 = vld [vmem:[%s22318_s26 + $0x78] sm:$0xff]  }
 0x652   : > { %v2249_v21 = vpop.xlane.xlu0 %2248 }
 0x653   : > { %18238 = vrcp.f32 %v2249_v21  ;;  %v2275_v15 = vpack.c.bf16 %v2267_v19, %v2267_v19  ;;  %v17976_v19 = vld [vmem:[%s22318_s26 + $0x68] sm:$0xff]   ;;  %v17977_v21 = vld [vmem:[%s22318_s26 + $0x60] sm:$0xff]  }
 0x654   : > { %v18233_v23 = vpop.eup %18232 }
 0x655   : > { %16428 = vmatmul.mubr.msk.bf16.vlgmr.msra.gmra.mxu0 %vm1800_vm2, %v2275_v15  ;;  %v2268_v20 = vmul.f32 %v18233_v23, %v18217_v48  ;;  %v2480_v48 = vsel %vm2294_vm3, %v2287_v42, 0  ;;  %v17978_v15 = vld [vmem:[%s22318_s26 + $0x58] sm:$0xff]   ;;  %v17979_v23 = vld [vmem:[%s22318_s26 + $0x50] sm:$0xff]  }
 0x656   : > { %16438 = vmatpush3.bf16.msra.mxu0 %v2388_v29  ;;  %v2252_v59 = vpop.xlane.xlu1 %2251  ;;  %16439 = vmatprep.mubr.msk.bf16.mxu0 %vm18647_vm1, %v18646_v31  ;;  %v2668_v29 = vld [vmem:[%s22257_s13] sm:$0xf] }
 0x657   : > { %18240 = vrcp.f32 %v2252_v59  ;;  %v2276_v28 = vpack.c.bf16 %v2268_v20, %v2268_v20  ;;  %16449 = vmatprep.subr.bf16.mxu0 %v18646_v31  ;;  %v2702_v30 = vsel %vm2294_vm3, %v2668_v29, 0  ;;  %v17982_v20 = vld [vmem:[%s22317_s10 + $0x78] sm:$0xff]   ;;  %v17980_v59 = vld [vmem:[%s22318_s26 + $0x48] sm:$0xff]  }
 0x658   : > { %v18235_v35 = vpop.eup %18234 }
 0x659   : > { %16434 = vmatmul.mubr.msk.bf16.vlgmr.msra.gmra.mxu1 %vm1800_vm2, %v2276_v28  ;;  %v2269_v63 = vmul.f32 %v18235_v35, %v18219_v43  ;;  %v17981_v28 = vld [vmem:[%s22318_s26 + $0x40] sm:$0xff]  }
 0x65a   : > { %16444 = vmatpush3.bf16.msra.mxu1 %v2434_v26  ;;  %v2255_v60 = vpop.xlane.xlu0 %2254  ;;  %16445 = vmatprep.mubr.msk.bf16.mxu1 %vm18647_vm1, %v18646_v31 }
 0x65b   : > { %18242 = vrcp.f32 %v2255_v60  ;;  %v2277_v47 = vpack.c.bf16 %v2269_v63, %v2269_v63  ;;  %16455 = vmatprep.subr.bf16.mxu1 %v18646_v31 }
 0x65c   : > { %v18237_v57 = vpop.eup %18236 }
 0x65d   : > { %16440 = vmatmul.mubr.msk.bf16.vlgmr.msra.gmra.mxu0 %vm1800_vm2, %v2277_v47  ;;  %v2270_v52 = vmul.f32 %v18237_v57, %v18221_v46 }
 0x65e   : > { %16450 = vmatpush3.bf16.msra.mxu0 %v2480_v48  ;;  %v2258_v18 = vpop.xlane.xlu1 %2257  ;;  %16451 = vmatprep.mubr.msk.bf16.mxu0 %vm18647_vm1, %v18646_v31 }
 0x65f   : > { %18244 = vrcp.f32 %v2258_v18  ;;  %v2278_v11 = vpack.c.bf16 %v2270_v52, %v2270_v52  ;;  %16461 = vmatprep.subr.bf16.mxu0 %v18646_v31 }
 0x660   : > { %v18239_v44 = vpop.eup %18238 }
 0x661   : > { %16446 = vmatmul.mubr.msk.bf16.vlgmr.msra.gmra.mxu1 %vm1800_vm2, %v2278_v11  ;;  %v2271_v43 = vmul.f32 %v18239_v44, %v19278_v62  ;;  %v2618_v62 = vsel %vm2294_vm3, %v2290_v58, 0 }
 0x662   : > { %16456 = vmatpush3.bf16.msra.mxu1 %v2526_v22  ;;  %16457 = vmatprep.mubr.msk.bf16.mxu1 %vm18647_vm1, %v18646_v31 }
 0x663   : > { %v2279_v4 = vpack.c.bf16 %v2271_v43, %v2271_v43  ;;  %16467 = vmatprep.subr.bf16.mxu1 %v18646_v31 }
 0x664   : > { %v18241_v39 = vpop.eup %18240 }
 0x665   : > { %16452 = vmatmul.mubr.msk.bf16.vlgmr.msra.gmra.mxu0 %vm1800_vm2, %v2279_v4  ;;  %v2272_v38 = vmul.f32 %v18241_v39, %v19282_v16 }
 0x666   : > { %16462 = vmatpush3.bf16.msra.mxu0 %v2572_v56  ;;  %16463 = vmatprep.mubr.msk.bf16.mxu0 %vm18647_vm1, %v18646_v31  ;;  %v17984_v56 = vld [vmem:[%s22317_s10 + $0x68] sm:$0xff]  }
 0x667   : > { %v2280_v46 = vpack.c.bf16 %v2272_v38, %v2272_v38  ;;  %17865 = vmatprep.subr.msk.bf16.mxu0 %vm2294_vm3, %v2668_v29 }
 0x668   : > { %v18243_v49 = vpop.eup %18242 }
 0x669   : > { %16458 = vmatmul.mubr.msk.bf16.vlgmr.msra.gmra.mxu1 %vm1800_vm2, %v2280_v46  ;;  %v2273_v54 = vmul.f32 %v18243_v49, %v19286_v24  ;;  %v17968_v24 = vld [vmem:[%s22316_s29 + $0x68] sm:$0xff]  }
 0x66a   : > { %16468 = vmatpush3.bf16.msra.mxu1 %v2618_v62  ;;  %16469 = vmatprep.mubr.msk.bf16.mxu1 %vm18647_vm1, %v18646_v31  ;;  %v17985_v62 = vld [vmem:[%s22317_s10 + $0x60] sm:$0xff]  }
 0x66b   : > { %v2281_v0 = vpack.c.bf16 %v2273_v54, %v2273_v54  ;;  %16483 = vmatprep.subr.bf16.mxu1 %v17966_v61 }
 0x66c   : > { %v18245_v16 = vpop.eup %18244 }
 0x66d   : > { %16464 = vmatmul.mubr.msk.bf16.vlgmr.msra.gmra.mxu0 %vm1800_vm2, %v2281_v0  ;;  %v2274_v1 = vmul.f32 %v18245_v16, %v19290_v5  ;;  %v17969_v5 = vld [vmem:[%s22316_s29 + $0x60] sm:$0xff]  }
 0x66e   : > { %16474 = vmatpush3.bf16.msra.mxu0 %v2702_v30 }
 0x66f   : > { %v2282_v3 = vpack.c.bf16 %v2274_v1, %v2274_v1  ;;  %16507 = vmatprep.subr.bf16.mxu0 %v17982_v20 }
 0x671   : > { %16470 = vmatmul.mubr.msk.bf16.vlgmr.msra.gmra.mxu1 %vm1800_vm2, %v2282_v3  ;;  %v17986_v3 = vld [vmem:[%s22317_s10 + $0x58] sm:$0xff]  }
 0x672   : > { %16484 = vmatpush3.bf16.msra.mxu1 %v17966_v61  ;;  %16499 = vmatprep.mubr.bf16.mxu1 %v19109_v33 }
 0x673   : > { %16485 = vmatprep.subr.bf16.mxu1 %v17967_v6 }
 0x676   : > { %16486 = vmatpush3.bf16.msra.mxu1 %v17967_v6 }
 0x677   : > { %16487 = vmatprep.subr.bf16.mxu1 %v17968_v24 }
 0x67a   : > { %16488 = vmatpush3.bf16.msra.mxu1 %v17968_v24 }
 0x67b   : > { %16489 = vmatprep.subr.bf16.mxu1 %v17969_v5 }
 0x67e   : > { %16490 = vmatpush3.bf16.msra.mxu1 %v17969_v5 }
 0x67f   : > { %16491 = vmatprep.subr.bf16.mxu1 %v17970_v37 }
 0x682   : > { %16492 = vmatpush3.bf16.msra.mxu1 %v17970_v37 }
 0x683   : > { %16493 = vmatprep.subr.bf16.mxu1 %v17971_v7 }
 0x686   : > { %16494 = vmatpush3.bf16.msra.mxu1 %v17971_v7 }
 0x687   : > { %16495 = vmatprep.subr.bf16.mxu1 %v17972_v9 }
 0x68a   : > { %16496 = vmatpush3.bf16.msra.mxu1 %v17972_v9  ;;  %v17987_v9 = vld [vmem:[%s22317_s10 + $0x50] sm:$0xff]  }
 0x68b   : > { %16497 = vmatprep.subr.bf16.mxu1 %v17973_v10 }
 0x68e   : > { %16498 = vmatpush3.bf16.msra.mxu1 %v17973_v10 }
 0x68f   : > { %16531 = vmatprep.subr.bf16.mxu1 %v17974_v13 }
 0x691   : > { %16500 = vmatmul.mubr.bf16.vlgmr.msra.gmra.mxu1 %v19115_v55 }
 0x692   : > { %16503 = vmatprep.mubr.bf16.mxu1 %v19128_v2  ;;  %16532 = vmatpush3.bf16.msra.mxu1 %v17974_v13 }
 0x693   : > { %16533 = vmatprep.subr.bf16.mxu1 %v17975_v14 }
 0x696   : > { %16534 = vmatpush3.bf16.msra.mxu1 %v17975_v14 }
 0x697   : > { %16535 = vmatprep.subr.bf16.mxu1 %v17976_v19 }
 0x699   : > { %16504 = vmatmul.mubr.bf16.gmra.mxu1 %v19139_v12 }
 0x69a   : > { %16536 = vmatpush3.bf16.msra.mxu1 %v17976_v19  ;;  %16547 = vmatprep.mubr.bf16.mxu1 %v19109_v33  ;;  %v17988_v19 = vld [vmem:[%s22317_s10 + $0x48] sm:$0xff]  }
 0x69b   : > { %16537 = vmatprep.subr.bf16.mxu1 %v17977_v21 }
 0x69e   : > { %16538 = vmatpush3.bf16.msra.mxu1 %v17977_v21 }
 0x69f   : > { %16539 = vmatprep.subr.bf16.mxu1 %v17978_v15 }
 0x6a2   : > { %16540 = vmatpush3.bf16.msra.mxu1 %v17978_v15  ;;  %v17989_v15 = vld [vmem:[%s22317_s10 + $0x40] sm:$0xff]  }
 0x6a3   : > { %16541 = vmatprep.subr.bf16.mxu1 %v17979_v23 }
 0x6a6   : > { %16542 = vmatpush3.bf16.msra.mxu1 %v17979_v23 }
 0x6a7   : > { %16543 = vmatprep.subr.bf16.mxu1 %v17980_v59 }
 0x6aa   : > { %16544 = vmatpush3.bf16.msra.mxu1 %v17980_v59 }
 0x6ab   : > { %16545 = vmatprep.subr.bf16.mxu1 %v17981_v28 }
 0x6ae   : > { %16546 = vmatpush3.bf16.msra.mxu1 %v17981_v28 }
 0x6af   : > { %16579 = vmatprep.subr.bf16.mxu1 %v18646_v31 }
 0x6b1   : > { %16548 = vmatmul.mubr.bf16.vlgmr.msra.gmra.mxu1 %v19115_v55 }
 0x6b2   : > { %16551 = vmatprep.mubr.bf16.mxu1 %v19128_v2 }
 0x6b9   : > { %16552 = vmatmul.mubr.bf16.gmra.mxu1 %v19139_v12 }
 0x6ba   : > { %16581 = vmatprep.mubr.msk.bf16.mxu1 %vm18647_vm1, %v18646_v31 }
 0x715   : > { %v2332_v35 = vpop.f32.mrf.mxu0 }
 0x717   : > { %v16429_v26 = vpop.f32.mrf.mxu0 }
 0x719   : > { %v2335_v42 = vpop.f32.mrf.mxu0  ;;  %v2378_v41 = vpop.f32.mrf.mxu1 }
 0x71a   : > { %v15563_v63 = vpack.c.bf16 %v2378_v41, %v2332_v35  ;;  %v19452_v42 = vld [vmem:[%s22256_s12 + $0x1] ss:$0 sm:$0xff] }
 0x71b   : > { %v16430_v60 = vpop.f32.mrf.mxu0  ;;  %v16435_v47 = vpop.f32.mrf.mxu1 }
 0x71c   : > { %16475 = vmatprep.mubr.msk.bf16.mxu0 %vm1800_vm2, %v15563_v63 }
 0x71d   : > { %v2381_v57 = vpop.f32.mrf.mxu1  ;;  %v2424_v48 = vpop.f32.mrf.mxu0 }
 0x71f   : > { %v16436_v36 = vpop.f32.mrf.mxu1  ;;  %v16441_v52 = vpop.f32.mrf.mxu0 }
 0x721   : > { %v2427_v18 = vpop.f32.mrf.mxu0  ;;  %v2470_v11 = vpop.f32.mrf.mxu1 }
 0x722   : > { %v15564_v44 = vpack.c.bf16 %v2470_v11, %v2424_v48 }
 0x723   : > { %v16442_v22 = vpop.f32.mrf.mxu0  ;;  %v16447_v43 = vpop.f32.mrf.mxu1 }
 0x724   : > { %16476 = vmatmul.mubr.msk.bf16.vlgmr.msra.gmra.mxu0 %vm1800_vm2, %v15564_v44 }
 0x725   : > { %16508 = vmatpush3.bf16.msra.mxu0 %v17982_v20  ;;  %v2473_v4 = vpop.f32.mrf.mxu1  ;;  %v2516_v39 = vpop.f32.mrf.mxu0 }
 0x726   : > { %16509 = vmatprep.subr.bf16.mxu0 %v17983_v51 }
 0x727   : > { %v16448_v58 = vpop.f32.mrf.mxu1  ;;  %v16453_v38 = vpop.f32.mrf.mxu0 }
 0x729   : > { %16510 = vmatpush3.bf16.msra.mxu0 %v17983_v51  ;;  %v2519_v46 = vpop.f32.mrf.mxu0  ;;  %v2562_v61 = vpop.f32.mrf.mxu1 }
 0x72a   : > { %v15565_v49 = vpack.c.bf16 %v2562_v61, %v2516_v39  ;;  %16511 = vmatprep.subr.bf16.mxu0 %v17984_v56 }
 0x72b   : > { %v16454_v54 = vpop.f32.mrf.mxu0  ;;  %v16459_v0 = vpop.f32.mrf.mxu1 }
 0x72c   : > { %16479 = vmatprep.mubr.msk.bf16.mxu0 %vm1800_vm2, %v15565_v49  ;;  %v19490_v49 = vld [vmem:[%s22322_s11 + $0x1] ss:$0 sm:$0xff] }
 0x72d   : > { %16512 = vmatpush3.bf16.msra.mxu0 %v17984_v56  ;;  %v2565_v16 = vpop.f32.mrf.mxu1  ;;  %v2608_v1 = vpop.f32.mrf.mxu0 }
 0x72e   : > { %16513 = vmatprep.subr.bf16.mxu0 %v17985_v62 }
 0x72f   : > { %v16460_v6 = vpop.f32.mrf.mxu1  ;;  %v16465_v24 = vpop.f32.mrf.mxu0 }
 0x730   : > { %v19498_v24 = vld [vmem:[%s22324_s0 + $0x1] ss:$0 sm:$0xff] }
 0x731   : > { %16514 = vmatpush3.bf16.msra.mxu0 %v17985_v62  ;;  %v2611_v5 = vpop.f32.mrf.mxu0  ;;  %v2654_v37 = vpop.f32.mrf.mxu1 }
 0x732   : > { %v15566_v7 = vpack.c.bf16 %v2654_v37, %v2608_v1  ;;  %16515 = vmatprep.subr.bf16.mxu0 %v17986_v3 }
 0x733   : > { %v16466_v10 = vpop.f32.mrf.mxu0  ;;  %v16471_v13 = vpop.f32.mrf.mxu1 }
 0x734   : > { %16480 = vmatmul.mubr.msk.bf16.gmra.mxu0 %vm1800_vm2, %v15566_v7 }
 0x735   : > { %16516 = vmatpush3.bf16.msra.mxu0 %v17986_v3  ;;  %v2657_v14 = vpop.f32.mrf.mxu1  ;;  %16523 = vmatprep.mubr.bf16.mxu0 %v19109_v33 }
 0x736   : > { %16517 = vmatprep.subr.bf16.mxu0 %v17987_v9 }
 0x737   : > { %v16472_v21 = vpop.f32.mrf.mxu1 }
 0x739   : > { %16518 = vmatpush3.bf16.msra.mxu0 %v17987_v9 }
 0x73a   : > { %16519 = vmatprep.subr.bf16.mxu0 %v17988_v19 }
 0x73d   : > { %16520 = vmatpush3.bf16.msra.mxu0 %v17988_v19 }
 0x73e   : > { %16521 = vmatprep.subr.bf16.mxu0 %v17989_v15 }
 0x741   : > { %16522 = vmatpush3.bf16.msra.mxu0 %v17989_v15 }
 0x742   : > { %16555 = vmatprep.subr.bf16.mxu0 %v18646_v31 }
 0x744   : > { %16524 = vmatmul.mubr.bf16.vlgmr.msra.gmra.mxu0 %v19115_v55 }
 0x745   : > { %16527 = vmatprep.mubr.bf16.mxu0 %v19128_v2 }
 0x74c   : > { %16528 = vmatmul.mubr.bf16.gmra.mxu0 %v19139_v12 }
 0x74d   : > { %16557 = vmatprep.mubr.msk.bf16.mxu0 %vm18647_vm1, %v18646_v31 }
 0x751   : > { %v19439_v23 = vpop.f32.mrf.mxu1 }
 0x753   : > { %v2876_v29 = vpop.f32.mrf.mxu1 }
 0x754   : > { %v2915_v37 = vadd.f32 %v19498_v24, %v2876_v29 }
 0x755   : > { %v19441_v30 = vpop.f32.mrf.mxu1 }
 0x756   : > { %v3215_v13 = vpack.c.bf16 %v2915_v37, %v2915_v37 }
 0x757   : > { %v2879_v20 = vpop.f32.mrf.mxu1 }
 0x758   : > { %v2916_v29 = vadd.f32 %v19498_v24, %v2879_v20 }
 0x759   : > { %v19443_v59 = vpop.f32.mrf.mxu1 }
 0x75b   : > { %v2892_v28 = vpop.f32.mrf.mxu1 }
 0x75d   : > { %v19445_v35 = vpop.f32.mrf.mxu1 }
 0x75f   : > { %v19447_v26 = vpop.f32.mrf.mxu1 }
 0x771   : > { %v16549_v41 = vpop.f32.mrf.mxu1 }
 0x772   : > { %v19455_v63 = vadd.f32 %v16549_v41, %v19452_v42 }
 0x773   : > { %v3168_v60 = vpop.f32.mrf.mxu1 }
 0x775   : > { %v16550_v47 = vpop.f32.mrf.mxu1 }
 0x776   : > { %v19458_v57 = vadd.f32 %v16550_v47, %v19452_v42  ;;  %v2919_v47 = vadd.f32 %v19498_v24, %v2892_v28 }
 0x777   : > { %v19460_v48 = vpop.f32.mrf.mxu1 }
 0x779   : > { %v16553_v36 = vpop.f32.mrf.mxu1 }
 0x77a   : > { %v19463_v52 = vadd.f32 %v16553_v36, %v19452_v42 }
 0x77b   : > { %v3184_v18 = vpop.f32.mrf.mxu1 }
 0x77c   : > { %v19466_v11 = vadd.f32 %v19452_v42, %v3184_v18 }
 0x77d   : > { %v16554_v44 = vpop.f32.mrf.mxu1 }
 0x77e   : > { %v19469_v51 = vadd.f32 %v16554_v44, %v19452_v42  ;;  %v3216_v44 = vpack.c.bf16 %v2916_v29, %v2916_v29  ;;  %v2922_v29 = vadd.f32 %v19445_v35, %v19498_v24 }
 0x7e4   : > { %v19471_v22 = vpop.f32.mrf.mxu0 }
 0x7e6   : > { %v19473_v43 = vpop.f32.mrf.mxu0 }
 0x7e8   : > { %v19475_v4 = vpop.f32.mrf.mxu0 }
 0x7ea   : > { %v19477_v39 = vpop.f32.mrf.mxu0 }
 0x7f4   : > { %v19479_v56 = vpop.f32.mrf.mxu0 }
 0x7f6   : > { %v19481_v58 = vpop.f32.mrf.mxu0 }
 0x7f8   : > { %v19483_v38 = vpop.f32.mrf.mxu0 }
 0x7fa   : > { %v19485_v46 = vpop.f32.mrf.mxu0 }
 0x804   : > { %v16525_v61 = vpop.f32.mrf.mxu0 }
 0x805   : > { %v3063_v19 = vadd.f32 %v16525_v61, %v19490_v49  ;;  %v3219_v61 = vpack.c.bf16 %v2919_v47, %v2919_v47  ;;  %v3222_v47 = vpack.c.bf16 %v2922_v29, %v2922_v29 }
 0x806   : > { %v3022_v62 = vpop.f32.mrf.mxu0 }
 0x807   : > { %v3061_v54 = vadd.f32 %v19490_v49, %v3022_v62  ;;  %v3225_v36 = vpack.c.bf16 %v3063_v19, %v3063_v19  ;;  %v3207_v62 = vadd.f32 %v19452_v42, %v3168_v60 }
 0x808   : > { %v16526_v0 = vpop.f32.mrf.mxu0 }
 0x809   : > { %v3223_v16 = vpack.c.bf16 %v3061_v54, %v3061_v54  ;;  %v3327_v54 = vsel %vm1800_vm2, %v3225_v36, 0  ;;  %v3711_v60 = vpack.c.bf16 %v3207_v62, %v3207_v62  ;;  %v19571_v62 = vpop.f32.mrf.mxu1 }
 0x80a   : > { %v3025_v1 = vpop.f32.mrf.mxu0 }
 0x80b   : > { %v3235_v3 = vsel %vm1800_vm2, %v3223_v16, 0  ;;  %v3062_v6 = vadd.f32 %v19490_v49, %v3025_v1  ;;  %v3064_v16 = vadd.f32 %v16526_v0, %v19490_v49  ;;  %v2917_v1 = vadd.f32 %v19439_v23, %v19498_v24 }
 0x80c   : > { %v16529_v5 = vpop.f32.mrf.mxu0  ;;  %16556 = vmatpush3.bf16.xpose.msra.mxu0 %v3235_v3  ;;  %v2921_v3 = vadd.f32 %v19443_v59, %v19498_v24  ;;  %v3723_v23 = vsel %vm2294_vm3, %v3711_v60, 0 }
 0x80d   : > { %16561 = vmatprep.subr.bf16.mxu0 %v18646_v31  ;;  %v3224_v9 = vpack.c.bf16 %v3062_v6, %v3062_v6  ;;  %v3067_v21 = vadd.f32 %v16529_v5, %v19490_v49  ;;  %v3226_v0 = vpack.c.bf16 %v3064_v16, %v3064_v16  ;;  %v3217_v5 = vpack.c.bf16 %v2917_v1, %v2917_v1 }
 0x80e   : > { %v3038_v7 = vpop.f32.mrf.mxu0  ;;  %v3221_v37 = vpack.c.bf16 %v2921_v3, %v2921_v3 }
 0x80f   : > { %v3065_v10 = vadd.f32 %v19490_v49, %v3038_v7  ;;  %v3281_v41 = vsel %vm1800_vm2, %v3224_v9, 0  ;;  %v3229_v18 = vpack.c.bf16 %v3067_v21, %v3067_v21  ;;  %v3373_v7 = vsel %vm1800_vm2, %v3226_v0, 0 }
 0x810   : > { %v16530_v28 = vpop.f32.mrf.mxu0  ;;  %v2918_v9 = vadd.f32 %v19441_v30, %v19498_v24  ;;  %v2920_v30 = vadd.f32 %v19498_v24, %v19447_v26 }
 0x811   : > { %v3227_v14 = vpack.c.bf16 %v3065_v10, %v3065_v10  ;;  %v3511_v20 = vsel %vm1800_vm2, %v3229_v18, 0 }
 0x812   : > { %v3041_v6 = vpop.f32.mrf.mxu0 }
 0x813   : > { %v3419_v15 = vsel %vm1800_vm2, %v3227_v14, 0  ;;  %16558 = vmatmul.mubr.msk.bf16.vlgmr.msra.gmra.mxu0 %vm1800_vm2, %v3215_v13  ;;  %v3066_v59 = vadd.f32 %v19490_v49, %v3041_v6  ;;  %v3218_v13 = vpack.c.bf16 %v2918_v9, %v2918_v9  ;;  %v3068_v14 = vadd.f32 %v16530_v28, %v19490_v49 }
 0x814   : > { %16562 = vmatpush3.bf16.xpose.msra.mxu0 %v3281_v41  ;;  %16580 = vmatpush3.bf16.xpose.msra.mxu1 %v3419_v15  ;;  %v3220_v15 = vpack.c.bf16 %v2920_v30, %v2920_v30  ;;  %v3208_v41 = vadd.f32 %v19452_v42, %v19460_v48 }
 0x815   : > { %16563 = vmatprep.mubr.msk.bf16.mxu0 %vm18647_vm1, %v18646_v31  ;;  %16567 = vmatprep.subr.bf16.mxu0 %v18646_v31  ;;  %v3228_v10 = vpack.c.bf16 %v3066_v59, %v3066_v59  ;;  %v3230_v21 = vpack.c.bf16 %v3068_v14, %v3068_v14 }
 0x816   : > { %16591 = vmatprep.subr.bf16.mxu1 %v18646_v31  ;;  %v3712_v26 = vpack.c.bf16 %v3208_v41, %v3208_v41 }
 0x817   : > { %v3465_v19 = vsel %vm1800_vm2, %v3228_v10, 0  ;;  %v3557_v49 = vsel %vm1800_vm2, %v3230_v21, 0 }
 0x818   : > { %v3769_v36 = vsel %vm2294_vm3, %v3712_v26, 0 }
 0x81b   : > { %16564 = vmatmul.mubr.msk.bf16.vlgmr.msra.gmra.mxu0 %vm1800_vm2, %v3216_v44  ;;  %16582 = vmatmul.mubr.msk.bf16.vlgmr.msra.gmra.mxu1 %vm1800_vm2, %v3219_v61 }
 0x81c   : > { %16568 = vmatpush3.bf16.xpose.msra.mxu0 %v3327_v54  ;;  %16592 = vmatpush3.bf16.xpose.msra.mxu1 %v3511_v20 }
 0x81d   : > { %16569 = vmatprep.mubr.msk.bf16.mxu0 %vm18647_vm1, %v18646_v31  ;;  %16593 = vmatprep.mubr.msk.bf16.mxu1 %vm18647_vm1, %v18646_v31 }
 0x81e   : > { %16573 = vmatprep.subr.bf16.mxu0 %v18646_v31  ;;  %16603 = vmatprep.subr.bf16.mxu1 %v18646_v31 }
 0x823   : > { %16570 = vmatmul.mubr.msk.bf16.vlgmr.msra.gmra.mxu0 %vm1800_vm2, %v3217_v5  ;;  %16594 = vmatmul.mubr.msk.bf16.vlgmr.msra.gmra.mxu1 %vm1800_vm2, %v3221_v37 }
 0x824   : > { %16574 = vmatpush3.bf16.xpose.msra.mxu0 %v3373_v7  ;;  %16604 = vmatpush3.bf16.msra.mxu1 %v3723_v23 }
 0x825   : > { %16575 = vmatprep.mubr.msk.bf16.mxu0 %vm18647_vm1, %v18646_v31  ;;  %16585 = vmatprep.subr.bf16.mxu0 %v18646_v31 }
 0x826   : > { %16605 = vmatprep.mubr.msk.bf16.mxu1 %vm18647_vm1, %v18646_v31  ;;  %16615 = vmatprep.subr.bf16.mxu1 %v18646_v31 }
 0x82b   : > { %16576 = vmatmul.mubr.msk.bf16.vlgmr.msra.gmra.mxu0 %vm1800_vm2, %v3218_v13 }
 0x82c   : > { %16586 = vmatpush3.bf16.xpose.msra.mxu0 %v3465_v19  ;;  %16587 = vmatprep.mubr.msk.bf16.mxu0 %vm18647_vm1, %v18646_v31 }
 0x82d   : > { %16597 = vmatprep.subr.bf16.mxu0 %v18646_v31 }
 0x833   : > { %16588 = vmatmul.mubr.msk.bf16.vlgmr.msra.gmra.mxu0 %vm1800_vm2, %v3220_v15 }
 0x834   : > { %16598 = vmatpush3.bf16.xpose.msra.mxu0 %v3557_v49  ;;  %16599 = vmatprep.mubr.msk.bf16.mxu0 %vm18647_vm1, %v18646_v31 }
 0x835   : > { %16609 = vmatprep.subr.bf16.mxu0 %v18646_v31 }
 0x83b   : > { %16600 = vmatmul.mubr.msk.bf16.vlgmr.msra.gmra.mxu0 %vm1800_vm2, %v3222_v47 }
 0x83c   : > { %16610 = vmatpush3.bf16.msra.mxu0 %v3769_v36  ;;  %16611 = vmatprep.mubr.msk.bf16.mxu0 %vm18647_vm1, %v18646_v31 }
 0x83d   : > { %16621 = vmatprep.subr.bf16.mxu0 %v18646_v31 }
 0x8d3   : > { %v3271_v48 = vpop.f32.mrf.mxu0 }
 0x8d4   : > { %v3599_v18 = vmul.f32 0.35355338, %v3271_v48 }
 0x8d5   : > { %v16559_v44 = vpop.f32.mrf.mxu0 }
 0x8d6   : > { %v19567_v35 = vsel %vm801_vm4, %v3599_v18, -1e+30 }
 0x8d7   : > { %v3274_v24 = vpop.f32.mrf.mxu0  ;;  %v3615_v61 = vsel %vm1800_vm2, %v19567_v35, -inf }
 0x8d8   : > { %3616 = vmax.xlane.f32.xlu0 %v3615_v61 }
 0x8d9   : > { %v16560_v54 = vpop.f32.mrf.mxu0 }
 0x8db   : > { %v3317_v16 = vpop.f32.mrf.mxu0  ;;  %v3455_v20 = vpop.f32.mrf.mxu1 }
 0x8dc   : > { %v3600_v28 = vmul.f32 0.35355338, %v3317_v16  ;;  %v3603_v9 = vmul.f32 0.35355338, %v3455_v20 }
 0x8dd   : > { %v16565_v1 = vpop.f32.mrf.mxu0  ;;  %v16583_v3 = vpop.f32.mrf.mxu1 }
 0x8de   : > { %v3608_v60 = vsel %vm801_vm4, %v3600_v28, -1e+30  ;;  %v3611_v49 = vsel %vm801_vm4, %v3603_v9, -1e+30 }
 0x8df   : > { %v3320_v0 = vpop.f32.mrf.mxu0  ;;  %v3458_v6 = vpop.f32.mrf.mxu1  ;;  %v3618_v5 = vsel %vm1800_vm2, %v3608_v60, -inf  ;;  %v3627_v36 = vsel %vm1800_vm2, %v3611_v49, -inf }
 0x8e0   : > { %3619 = vmax.xlane.f32.xlu1 %v3618_v5 }
 0x8e1   : > { %v16566_v37 = vpop.f32.mrf.mxu0  ;;  %v16584_v23 = vpop.f32.mrf.mxu1 }
 0x8e3   : > { %v3363_v7 = vpop.f32.mrf.mxu0  ;;  %v3547_v59 = vpop.f32.mrf.mxu1 }
 0x8e4   : > { %v3601_v10 = vmul.f32 0.35355338, %v3363_v7  ;;  %v3605_v41 = vmul.f32 0.35355338, %v3547_v59 }
 0x8e5   : > { %v16571_v13 = vpop.f32.mrf.mxu0  ;;  %v16595_v14 = vpop.f32.mrf.mxu1 }
 0x8e6   : > { %v3609_v19 = vsel %vm801_vm4, %v3601_v10, -1e+30  ;;  %v3613_v18 = vsel %vm801_vm4, %v3605_v41, -1e+30 }
 0x8e7   : > { %v3366_v30 = vpop.f32.mrf.mxu0  ;;  %v3550_v21 = vpop.f32.mrf.mxu1  ;;  %v3621_v15 = vsel %vm1800_vm2, %v3609_v19, -inf  ;;  %v3633_v16 = vsel %vm1800_vm2, %v3613_v18, -inf }
 0x8e8   : > { %3622 = vmax.xlane.f32.xlu0 %v3621_v15 }
 0x8e9   : > { %v16572_v29 = vpop.f32.mrf.mxu0  ;;  %v16596_v26 = vpop.f32.mrf.mxu1 }
 0x8eb   : > { %v3409_v47 = vpop.f32.mrf.mxu0 }
 0x8ec   : > { %v3602_v48 = vmul.f32 0.35355338, %v3409_v47  ;;  %3628 = vmax.xlane.f32.xlu0 %v3627_v36 }
 0x8ed   : > { %v16577_v44 = vpop.f32.mrf.mxu0 }
 0x8ee   : > { %v3610_v24 = vsel %vm801_vm4, %v3602_v48, -1e+30 }
 0x8ef   : > { %v3412_v61 = vpop.f32.mrf.mxu0  ;;  %v3624_v54 = vsel %vm1800_vm2, %v3610_v24, -inf }
 0x8f0   : > { %3625 = vmax.xlane.f32.xlu1 %v3624_v54  ;;  %3634 = vmax.xlane.f32.xlu0 %v3633_v16 }
 0x8f1   : > { %v16578_v20 = vpop.f32.mrf.mxu0 }
 0x8f3   : > { %v3501_v28 = vpop.f32.mrf.mxu0 }
 0x8f4   : > { %v3604_v1 = vmul.f32 0.35355338, %v3501_v28 }
 0x8f5   : > { %v16589_v3 = vpop.f32.mrf.mxu0 }
 0x8f6   : > { %v3612_v0 = vsel %vm801_vm4, %v3604_v1, -1e+30 }
 0x8f7   : > { %v3504_v6 = vpop.f32.mrf.mxu0  ;;  %v3630_v5 = vsel %vm1800_vm2, %v3612_v0, -inf }
 0x8f8   : > { %3631 = vmax.xlane.f32.xlu1 %v3630_v5 }
 0x8f9   : > { %v16590_v37 = vpop.f32.mrf.mxu0 }
 0x8fb   : > { %v3593_v23 = vpop.f32.mrf.mxu0 }
 0x8fc   : > { %v3606_v7 = vmul.f32 0.35355338, %v3593_v23 }
 0x8fd   : > { %v16601_v59 = vpop.f32.mrf.mxu0 }
 0x8fe   : > { %v3614_v9 = vsel %vm801_vm4, %v3606_v7, -1e+30 }
 0x8ff   : > { %v3596_v10 = vpop.f32.mrf.mxu0  ;;  %v3636_v13 = vsel %vm1800_vm2, %v3614_v9, -inf }
 0x900   : > { %3637 = vmax.xlane.f32.xlu1 %v3636_v13 }
 0x901   : > { %v16602_v14 = vpop.f32.mrf.mxu0 }
 0x961   : > { %v3617_v30 = vpop.xlane.xlu0 %3616 }
 0x962   : > { %v3639_v21 = vsub.f32 %v19567_v35, %v3617_v30 }
 0x964   : > { %v3647_v15 = vmul.f32 1.442695, %v3639_v21 }
 0x966   : > { %18246 = vpow2.f32 %v3647_v15 }
 0x969   : > { %v3620_v41 = vpop.xlane.xlu1 %3619 }
 0x96a   : > { %v3640_v29 = vsub.f32 %v3608_v60, %v3620_v41 }
 0x96c   : > { %v3649_v26 = vmul.f32 1.442695, %v3640_v29 }
 0x96e   : > { %18248 = vpow2.f32 %v3649_v26 }
 0x971   : > { %v3623_v47 = vpop.xlane.xlu0 %3622 }
 0x972   : > { %v3641_v36 = vsub.f32 %v3609_v19, %v3623_v47 }
 0x973   : > { %v18247_v48 = vpop.eup %18246 }
 0x974   : > { %v3651_v44 = vmul.f32 1.442695, %v3641_v36  ;;  %v3663_v61 = vsel %vm1800_vm2, %v18247_v48, 0.0 }
 0x975   : > { %v3629_v54 = vpop.xlane.xlu0 %3628  ;;  %3664 = vadd.xlane.f32.xlu0 %v3663_v61  ;;  %v3713_v61 = vpack.c.bf16 %v19455_v63, %v19455_v63  ;;  %v3714_v63 = vpack.c.bf16 %v19458_v57, %v19458_v57  ;;  %v3715_v57 = vpack.c.bf16 %v19466_v11, %v19466_v11 }
 0x976   : > { %18250 = vpow2.f32 %v3651_v44  ;;  %v3643_v16 = vsub.f32 %v3611_v49, %v3629_v54 }
 0x978   : > { %v3655_v20 = vmul.f32 1.442695, %v3643_v16 }
 0x979   : > { %v3626_v28 = vpop.xlane.xlu1 %3625  ;;  %v3635_v1 = vpop.xlane.xlu0 %3634 }
 0x97a   : > { %18252 = vpow2.f32 %v3655_v20  ;;  %v3642_v35 = vsub.f32 %v3610_v24, %v3626_v28  ;;  %v3645_v3 = vsub.f32 %v3613_v18, %v3635_v1  ;;  %v3815_v28 = vsel %vm2294_vm3, %v3713_v61, 0 }
 0x97b   : > { %v18249_v6 = vpop.eup %18248 }
 0x97c   : > { %v3653_v60 = vmul.f32 1.442695, %v3642_v35  ;;  %v3659_v5 = vmul.f32 1.442695, %v3645_v3  ;;  %v3666_v37 = vsel %vm1800_vm2, %v18249_v6, 0.0 }
 0x97d   : > { %3667 = vadd.xlane.f32.xlu1 %v3666_v37  ;;  %v3861_v37 = vsel %vm2294_vm3, %v3714_v63, 0  ;;  %v17996_v63 = vld [vmem:[%s22316_s29 + $0x88] sm:$0xff]  }
 0x97e   : > { %18254 = vpow2.f32 %v3653_v60 }
 0x97f   : > { %18256 = vpow2.f32 %v3659_v5 }
 0x981   : > { %v3632_v19 = vpop.xlane.xlu1 %3631 }
 0x982   : > { %v3644_v23 = vsub.f32 %v3612_v0, %v3632_v19 }
 0x983   : > { %v18251_v7 = vpop.eup %18250 }
 0x984   : > { %v3657_v59 = vmul.f32 1.442695, %v3644_v23  ;;  %v3669_v49 = vsel %vm1800_vm2, %v18251_v7, 0.0 }
 0x985   : > { %3670 = vadd.xlane.f32.xlu0 %v3669_v49 }
 0x986   : > { %18258 = vpow2.f32 %v3657_v59 }
 0x987   : > { %v18253_v10 = vpop.eup %18252 }
 0x988   : > { %v3675_v24 = vsel %vm1800_vm2, %v18253_v10, 0.0 }
 0x989   : > { %3676 = vadd.xlane.f32.xlu0 %v3675_v24  ;;  %v3638_v18 = vpop.xlane.xlu1 %3637  ;;  %v3907_v24 = vsel %vm2294_vm3, %v3715_v57, 0  ;;  %v18003_v57 = vld [vmem:[%s22318_s26 + $0x90] sm:$0xff]  }
 0x98a   : > { %v3646_v13 = vsub.f32 %v3614_v9, %v3638_v18  ;;  %v3212_v18 = vadd.f32 %v19452_v42, %v19571_v62 }
 0x98b   : > { %v18255_v14 = vpop.eup %18254 }
 0x98c   : > { %v19599_v30 = vpop.eup %18256  ;;  %v3661_v21 = vmul.f32 1.442695, %v3646_v13  ;;  %v3672_v15 = vsel %vm1800_vm2, %v18255_v14, 0.0 }
 0x98d   : > { %v3681_v0 = vsel %vm1800_vm2, %v19599_v30, 0.0  ;;  %3673 = vadd.xlane.f32.xlu1 %v3672_v15 }
 0x98e   : > { %18260 = vpow2.f32 %v3661_v21  ;;  %3682 = vadd.xlane.f32.xlu0 %v3681_v0  ;;  %v3716_v21 = vpack.c.bf16 %v3212_v18, %v3212_v18 }
 0x993   : > { %v19604_v41 = vpop.eup %18258 }
 0x994   : > { %v3678_v29 = vsel %vm1800_vm2, %v19604_v41, 0.0 }
 0x995   : > { %3679 = vadd.xlane.f32.xlu1 %v3678_v29 }
 0x99b   : > { %v19608_v26 = vpop.eup %18260 }
 0x99c   : > { %v3684_v9 = vsel %vm1800_vm2, %v19608_v26, 0.0 }
 0x99d   : > { %3685 = vadd.xlane.f32.xlu1 %v3684_v9 }
 0x9fe   : > { %v3665_v47 = vpop.xlane.xlu0 %3664 }
 0x9ff   : > { %18262 = vrcp.f32 %v3665_v47  ;;  %v3953_v47 = vsel %vm2294_vm3, %v3716_v21, 0 }
 0xa06   : > { %v3668_v36 = vpop.xlane.xlu1 %3667 }
 0xa07   : > { %18264 = vrcp.f32 %v3668_v36 }
 0xa0c   : > { %v18263_v44 = vpop.eup %18262 }
 0xa0d   : > { %v3695_v54 = vmul.f32 %v18263_v44, %v18247_v48 }
 0xa0e   : > { %v3671_v16 = vpop.xlane.xlu0 %3670 }
 0xa0f   : > { %18266 = vrcp.f32 %v3671_v16  ;;  %v3703_v20 = vpack.c.bf16 %v3695_v54, %v3695_v54  ;;  %v17990_v54 = vld [vmem:[%s22316_s29 + $0xb8] sm:$0xff]  }
 0xa11   : > { %16606 = vmatmul.mubr.msk.bf16.vlgmr.msra.gmra.mxu1 %vm1800_vm2, %v3703_v20  ;;  %v17991_v20 = vld [vmem:[%s22316_s29 + $0xb0] sm:$0xff]  }
 0xa12   : > { %16616 = vmatpush3.bf16.msra.mxu1 %v3815_v28  ;;  %v3677_v1 = vpop.xlane.xlu0 %3676  ;;  %16617 = vmatprep.mubr.msk.bf16.mxu1 %vm18647_vm1, %v18646_v31  ;;  %v17992_v28 = vld [vmem:[%s22316_s29 + $0xa8] sm:$0xff]  }
 0xa13   : > { %18268 = vrcp.f32 %v3677_v1  ;;  %16627 = vmatprep.subr.bf16.mxu1 %v18646_v31  ;;  %v17994_v1 = vld [vmem:[%s22316_s29 + $0x98] sm:$0xff]  }
 0xa14   : > { %v18265_v35 = vpop.eup %18264 }
 0xa15   : > { %v3696_v48 = vmul.f32 %v18265_v35, %v18249_v6  ;;  %v17995_v35 = vld [vmem:[%s22316_s29 + $0x90] sm:$0xff]  }
 0xa16   : > { %v3674_v3 = vpop.xlane.xlu1 %3673 }
 0xa17   : > { %18270 = vrcp.f32 %v3674_v3  ;;  %v3704_v60 = vpack.c.bf16 %v3696_v48, %v3696_v48  ;;  %v3683_v5 = vpop.xlane.xlu0 %3682  ;;  %v17997_v48 = vld [vmem:[%s22316_s29 + $0x80] sm:$0xff]   ;;  %v17998_v3 = vld [vmem:[%s22318_s26 + $0xb8] sm:$0xff]  }
 0xa18   : > { %18272 = vrcp.f32 %v3683_v5  ;;  %v18000_v5 = vld [vmem:[%s22318_s26 + $0xa8] sm:$0xff]  }
 0xa19   : > { %16612 = vmatmul.mubr.msk.bf16.vlgmr.msra.gmra.mxu0 %vm1800_vm2, %v3704_v60  ;;  %v17999_v60 = vld [vmem:[%s22318_s26 + $0xb0] sm:$0xff]  }
 0xa1a   : > { %16622 = vmatpush3.bf16.msra.mxu0 %v3861_v37  ;;  %16623 = vmatprep.mubr.msk.bf16.mxu0 %vm18647_vm1, %v18646_v31  ;;  %v18001_v37 = vld [vmem:[%s22318_s26 + $0xa0] sm:$0xff]  }
 0xa1b   : > { %16633 = vmatprep.subr.bf16.mxu0 %v18646_v31 }
 0xa1c   : > { %v18267_v19 = vpop.eup %18266 }
 0xa1d   : > { %v3697_v6 = vmul.f32 %v18267_v19, %v18251_v7  ;;  %v3717_v7 = vpack.c.bf16 %v19463_v52, %v19463_v52  ;;  %v18002_v19 = vld [vmem:[%s22318_s26 + $0x98] sm:$0xff]  }
 0xa1e   : > { %v3680_v23 = vpop.xlane.xlu1 %3679 }
 0xa1f   : > { %18274 = vrcp.f32 %v3680_v23  ;;  %v3705_v59 = vpack.c.bf16 %v3697_v6, %v3697_v6  ;;  %v3999_v62 = vsel %vm2294_vm3, %v3717_v7, 0  ;;  %v14789_v6 = vld [vmem:[%s22257_s13 + $0x4] sm:$0xf] }
 0xa20   : > { %v18269_v49 = vpop.eup %18268  ;;  %v4130_v23 = vsel %vm2294_vm3, %v14789_v6, 0 }
 0xa21   : > { %16618 = vmatmul.mubr.msk.bf16.vlgmr.msra.gmra.mxu1 %vm1800_vm2, %v3705_v59  ;;  %v3699_v13 = vmul.f32 %v18269_v49, %v18253_v10  ;;  %v18006_v59 = vld [vmem:[%s22317_s10 + $0xb8] sm:$0xff]   ;;  %v18004_v49 = vld [vmem:[%s22318_s26 + $0x88] sm:$0xff]  }
 0xa22   : > { %16628 = vmatpush3.bf16.msra.mxu1 %v3907_v24  ;;  %16629 = vmatprep.mubr.msk.bf16.mxu1 %vm18647_vm1, %v18646_v31  ;;  %v18005_v24 = vld [vmem:[%s22318_s26 + $0x80] sm:$0xff]  }
 0xa23   : > { %16639 = vmatprep.subr.bf16.mxu1 %v18646_v31  ;;  %v3707_v9 = vpack.c.bf16 %v3699_v13, %v3699_v13 }
 0xa24   : > { %v18271_v11 = vpop.eup %18270 }
 0xa25   : > { %v3698_v15 = vmul.f32 %v18271_v11, %v18255_v14  ;;  %v18273_v42 = vpop.eup %18272  ;;  %v3718_v14 = vpack.c.bf16 %v19469_v51, %v19469_v51 }
 0xa26   : > { %v3686_v0 = vpop.xlane.xlu1 %3685  ;;  %v3701_v52 = vmul.f32 %v18273_v42, %v19599_v30 }
 0xa27   : > { %18276 = vrcp.f32 %v3686_v0  ;;  %v3706_v29 = vpack.c.bf16 %v3698_v15, %v3698_v15  ;;  %v4045_v16 = vsel %vm2294_vm3, %v3718_v14, 0 }
 0xa28   : > { %v3709_v61 = vpack.c.bf16 %v3701_v52, %v3701_v52 }
 0xa29   : > { %16624 = vmatmul.mubr.msk.bf16.vlgmr.msra.gmra.mxu0 %vm1800_vm2, %v3706_v29  ;;  %16630 = vmatmul.mubr.msk.bf16.vlgmr.msra.gmra.mxu1 %vm1800_vm2, %v3707_v9 }
 0xa2a   : > { %16634 = vmatpush3.bf16.msra.mxu0 %v3953_v47  ;;  %16640 = vmatpush3.bf16.msra.mxu1 %v3999_v62 }
 0xa2b   : > { %16635 = vmatprep.mubr.msk.bf16.mxu0 %vm18647_vm1, %v18646_v31  ;;  %16641 = vmatprep.mubr.msk.bf16.mxu1 %vm18647_vm1, %v18646_v31 }
 0xa2c   : > { %v18275_v10 = vpop.eup %18274  ;;  %16645 = vmatprep.subr.bf16.mxu0 %v18646_v31  ;;  %17866 = vmatprep.subr.msk.bf16.mxu1 %vm2294_vm3, %v14789_v6 }
 0xa2d   : > { %v3700_v36 = vmul.f32 %v18275_v10, %v19604_v41 }
 0xa2f   : > { %v3708_v44 = vpack.c.bf16 %v3700_v36, %v3700_v36 }
 0xa31   : > { %16636 = vmatmul.mubr.msk.bf16.vlgmr.msra.gmra.mxu0 %vm1800_vm2, %v3708_v44  ;;  %16642 = vmatmul.mubr.msk.bf16.vlgmr.msra.gmra.mxu1 %vm1800_vm2, %v3709_v61  ;;  %v18007_v44 = vld [vmem:[%s22317_s10 + $0xb0] sm:$0xff]  }
 0xa32   : > { %16646 = vmatpush3.bf16.msra.mxu0 %v4045_v16  ;;  %16647 = vmatprep.mubr.msk.bf16.mxu0 %vm18647_vm1, %v18646_v31 }
 0xa33   : > { %16661 = vmatprep.subr.bf16.mxu0 %v17990_v54  ;;  %16652 = vmatpush3.bf16.msra.mxu1 %v4130_v23  ;;  %v18011_v23 = vld [vmem:[%s22317_s10 + $0x90] sm:$0xff]  }
 0xa34   : > { %v18277_v51 = vpop.eup %18276  ;;  %16685 = vmatprep.subr.bf16.mxu1 %v18006_v59 }
 0xa35   : > { %v3702_v30 = vmul.f32 %v18277_v51, %v19608_v26  ;;  %v17993_v26 = vld [vmem:[%s22316_s29 + $0xa0] sm:$0xff]  }
 0xa37   : > { %v3710_v41 = vpack.c.bf16 %v3702_v30, %v3702_v30  ;;  %v18008_v30 = vld [vmem:[%s22317_s10 + $0xa8] sm:$0xff]  }
 0xa39   : > { %16648 = vmatmul.mubr.msk.bf16.vlgmr.msra.gmra.mxu0 %vm1800_vm2, %v3710_v41 }
 0xa3a   : > { %16662 = vmatpush3.bf16.msra.mxu0 %v17990_v54  ;;  %16677 = vmatprep.mubr.bf16.mxu0 %v19109_v33 }
 0xa3b   : > { %16663 = vmatprep.subr.bf16.mxu0 %v17991_v20 }
 0xa3e   : > { %16664 = vmatpush3.bf16.msra.mxu0 %v17991_v20 }
 0xa3f   : > { %16665 = vmatprep.subr.bf16.mxu0 %v17992_v28 }
 0xa42   : > { %16666 = vmatpush3.bf16.msra.mxu0 %v17992_v28 }
 0xa43   : > { %16667 = vmatprep.subr.bf16.mxu0 %v17993_v26 }
 0xa46   : > { %16668 = vmatpush3.bf16.msra.mxu0 %v17993_v26 }
 0xa47   : > { %16669 = vmatprep.subr.bf16.mxu0 %v17994_v1 }
 0xa4a   : > { %16670 = vmatpush3.bf16.msra.mxu0 %v17994_v1 }
 0xa4b   : > { %16671 = vmatprep.subr.bf16.mxu0 %v17995_v35 }
 0xa4e   : > { %16672 = vmatpush3.bf16.msra.mxu0 %v17995_v35  ;;  %v18009_v35 = vld [vmem:[%s22317_s10 + $0xa0] sm:$0xff]  }
 0xa4f   : > { %16673 = vmatprep.subr.bf16.mxu0 %v17996_v63 }
 0xa52   : > { %16674 = vmatpush3.bf16.msra.mxu0 %v17996_v63 }
 0xa53   : > { %16675 = vmatprep.subr.bf16.mxu0 %v17997_v48 }
 0xa56   : > { %16676 = vmatpush3.bf16.msra.mxu0 %v17997_v48 }
 0xa57   : > { %16709 = vmatprep.subr.bf16.mxu0 %v17998_v3 }
 0xa59   : > { %16678 = vmatmul.mubr.bf16.vlgmr.msra.gmra.mxu0 %v19115_v55 }
 0xa5a   : > { %16681 = vmatprep.mubr.bf16.mxu0 %v19128_v2  ;;  %16710 = vmatpush3.bf16.msra.mxu0 %v17998_v3 }
 0xa5b   : > { %16711 = vmatprep.subr.bf16.mxu0 %v17999_v60 }
 0xa5e   : > { %16712 = vmatpush3.bf16.msra.mxu0 %v17999_v60 }
 0xa5f   : > { %16713 = vmatprep.subr.bf16.mxu0 %v18000_v5 }
 0xa61   : > { %16682 = vmatmul.mubr.bf16.gmra.mxu0 %v19139_v12 }
 0xa62   : > { %16714 = vmatpush3.bf16.msra.mxu0 %v18000_v5  ;;  %16725 = vmatprep.mubr.bf16.mxu0 %v19109_v33  ;;  %v18010_v5 = vld [vmem:[%s22317_s10 + $0x98] sm:$0xff]  }
 0xa63   : > { %16715 = vmatprep.subr.bf16.mxu0 %v18001_v37 }
 0xa66   : > { %16716 = vmatpush3.bf16.msra.mxu0 %v18001_v37 }
 0xa67   : > { %16717 = vmatprep.subr.bf16.mxu0 %v18002_v19 }
 0xa6a   : > { %16718 = vmatpush3.bf16.msra.mxu0 %v18002_v19 }
 0xa6b   : > { %16719 = vmatprep.subr.bf16.mxu0 %v18003_v57 }
 0xa6e   : > { %16720 = vmatpush3.bf16.msra.mxu0 %v18003_v57 }
 0xa6f   : > { %16721 = vmatprep.subr.bf16.mxu0 %v18004_v49 }
 0xa72   : > { %16722 = vmatpush3.bf16.msra.mxu0 %v18004_v49 }
 0xa73   : > { %16723 = vmatprep.subr.bf16.mxu0 %v18005_v24 }
 0xa76   : > { %16724 = vmatpush3.bf16.msra.mxu0 %v18005_v24  ;;  %v18012_v24 = vld [vmem:[%s22317_s10 + $0x88] sm:$0xff]  }
 0xa77   : > { %16757 = vmatprep.subr.bf16.mxu0 %v18646_v31 }
 0xa79   : > { %16726 = vmatmul.mubr.bf16.vlgmr.msra.gmra.mxu0 %v19115_v55 }
 0xa7a   : > { %16729 = vmatprep.mubr.bf16.mxu0 %v19128_v2 }
 0xa81   : > { %16730 = vmatmul.mubr.bf16.gmra.mxu0 %v19139_v12 }
 0xa82   : > { %16759 = vmatprep.mubr.msk.bf16.mxu0 %vm18647_vm1, %v18646_v31 }
 0xad1   : > { %v3759_v18 = vpop.f32.mrf.mxu1 }
 0xad3   : > { %v16607_v13 = vpop.f32.mrf.mxu1 }
 0xad4   : > { %v18013_v13 = vld [vmem:[%s22317_s10 + $0x80] sm:$0xff]  }
 0xad5   : > { %v3762_v11 = vpop.f32.mrf.mxu1 }
 0xad7   : > { %v16608_v7 = vpop.f32.mrf.mxu1 }
 0xad9   : > { %v3805_v21 = vpop.f32.mrf.mxu0 }
 0xada   : > { %v15567_v15 = vpack.c.bf16 %v3805_v21, %v3759_v18 }
 0xadb   : > { %v16613_v0 = vpop.f32.mrf.mxu0 }
 0xadc   : > { %16653 = vmatprep.mubr.msk.bf16.mxu1 %vm1800_vm2, %v15567_v15 }
 0xadd   : > { %v3808_v29 = vpop.f32.mrf.mxu0 }
 0xadf   : > { %v16614_v9 = vpop.f32.mrf.mxu0 }
 0xae1   : > { %v3851_v42 = vpop.f32.mrf.mxu1 }
 0xae3   : > { %v16619_v62 = vpop.f32.mrf.mxu1 }
 0xae4   : > { %v19769_v62 = vld [vmem:[%s22256_s12 + $0x2] ss:$0 sm:$0xff] }
 0xae5   : > { %v3854_v47 = vpop.f32.mrf.mxu1 }
 0xae7   : > { %v16620_v52 = vpop.f32.mrf.mxu1 }
 0xae9   : > { %v3897_v10 = vpop.f32.mrf.mxu0  ;;  %v3943_v14 = vpop.f32.mrf.mxu1 }
 0xaea   : > { %v15568_v36 = vpack.c.bf16 %v3897_v10, %v3851_v42 }
 0xaeb   : > { %v16625_v61 = vpop.f32.mrf.mxu0  ;;  %v16631_v54 = vpop.f32.mrf.mxu1 }
 0xaec   : > { %16654 = vmatmul.mubr.msk.bf16.vlgmr.msra.gmra.mxu1 %vm1800_vm2, %v15568_v36 }
 0xaed   : > { %16686 = vmatpush3.bf16.msra.mxu1 %v18006_v59  ;;  %v3900_v16 = vpop.f32.mrf.mxu0  ;;  %v3946_v51 = vpop.f32.mrf.mxu1 }
 0xaee   : > { %16687 = vmatprep.subr.bf16.mxu1 %v18007_v44 }
 0xaef   : > { %v16626_v41 = vpop.f32.mrf.mxu0  ;;  %v16632_v20 = vpop.f32.mrf.mxu1 }
 0xaf1   : > { %16688 = vmatpush3.bf16.msra.mxu1 %v18007_v44  ;;  %v3989_v28 = vpop.f32.mrf.mxu0  ;;  %v4035_v26 = vpop.f32.mrf.mxu1 }
 0xaf2   : > { %v15569_v1 = vpack.c.bf16 %v3989_v28, %v3943_v14  ;;  %16689 = vmatprep.subr.bf16.mxu1 %v18008_v30 }
 0xaf3   : > { %v16637_v63 = vpop.f32.mrf.mxu0  ;;  %v16643_v48 = vpop.f32.mrf.mxu1 }
 0xaf4   : > { %16657 = vmatprep.mubr.msk.bf16.mxu1 %vm1800_vm2, %v15569_v1 }
 0xaf5   : > { %16690 = vmatpush3.bf16.msra.mxu1 %v18008_v30  ;;  %v3992_v3 = vpop.f32.mrf.mxu0  ;;  %v4038_v60 = vpop.f32.mrf.mxu1 }
 0xaf6   : > { %16691 = vmatprep.subr.bf16.mxu1 %v18009_v35 }
 0xaf7   : > { %v16638_v37 = vpop.f32.mrf.mxu0  ;;  %v16644_v19 = vpop.f32.mrf.mxu1 }
 0xaf9   : > { %16692 = vmatpush3.bf16.msra.mxu1 %v18009_v35  ;;  %v4081_v57 = vpop.f32.mrf.mxu0 }
 0xafa   : > { %v15570_v6 = vpack.c.bf16 %v4081_v57, %v4035_v26  ;;  %16693 = vmatprep.subr.bf16.mxu1 %v18010_v5 }
 0xafb   : > { %v16649_v59 = vpop.f32.mrf.mxu0 }
 0xafc   : > { %16658 = vmatmul.mubr.msk.bf16.gmra.mxu1 %vm1800_vm2, %v15570_v6 }
 0xafd   : > { %16694 = vmatpush3.bf16.msra.mxu1 %v18010_v5  ;;  %v4084_v49 = vpop.f32.mrf.mxu0  ;;  %16701 = vmatprep.mubr.bf16.mxu1 %v19109_v33  ;;  %v19807_v5 = vld [vmem:[%s22322_s11 + $0x2] ss:$0 sm:$0xff] }
 0xafe   : > { %16695 = vmatprep.subr.bf16.mxu1 %v18011_v23 }
 0xaff   : > { %v16650_v18 = vpop.f32.mrf.mxu0 }
 0xb01   : > { %16696 = vmatpush3.bf16.msra.mxu1 %v18011_v23 }
 0xb02   : > { %16697 = vmatprep.subr.bf16.mxu1 %v18012_v24 }
 0xb05   : > { %16698 = vmatpush3.bf16.msra.mxu1 %v18012_v24  ;;  %v19815_v24 = vld [vmem:[%s22324_s0 + $0x2] ss:$0 sm:$0xff] }
 0xb06   : > { %16699 = vmatprep.subr.bf16.mxu1 %v18013_v13 }
 0xb09   : > { %16700 = vmatpush3.bf16.msra.mxu1 %v18013_v13 }
 0xb0a   : > { %16733 = vmatprep.subr.bf16.mxu1 %v18646_v31 }
 0xb0c   : > { %16702 = vmatmul.mubr.bf16.vlgmr.msra.gmra.mxu1 %v19115_v55 }
 0xb0d   : > { %16705 = vmatprep.mubr.bf16.mxu1 %v19128_v2 }
 0xb14   : > { %16706 = vmatmul.mubr.bf16.gmra.mxu1 %v19139_v12 }
 0xb15   : > { %16735 = vmatprep.mubr.msk.bf16.mxu1 %vm18647_vm1, %v18646_v31 }
 0xb19   : > { %v19756_v11 = vpop.f32.mrf.mxu0 }
 0xb1b   : > { %v4304_v7 = vpop.f32.mrf.mxu0 }
 0xb1c   : > { %v4343_v13 = vadd.f32 %v19815_v24, %v4304_v7 }
 0xb1d   : > { %v19758_v21 = vpop.f32.mrf.mxu0 }
 0xb1f   : > { %v4307_v15 = vpop.f32.mrf.mxu0 }
 0xb20   : > { %v4344_v7 = vadd.f32 %v19815_v24, %v4307_v15 }
 0xb21   : > { %v19760_v0 = vpop.f32.mrf.mxu0 }
 0xb23   : > { %v4320_v29 = vpop.f32.mrf.mxu0 }
 0xb25   : > { %v19762_v9 = vpop.f32.mrf.mxu0 }
 0xb27   : > { %v19764_v42 = vpop.f32.mrf.mxu0 }
 0xb39   : > { %v16727_v47 = vpop.f32.mrf.mxu0 }
 0xb3a   : > { %v19772_v52 = vadd.f32 %v16727_v47, %v19769_v62 }
 0xb3b   : > { %v4596_v10 = vpop.f32.mrf.mxu0 }
 0xb3d   : > { %v16728_v14 = vpop.f32.mrf.mxu0 }
 0xb3e   : > { %v19775_v36 = vadd.f32 %v16728_v14, %v19769_v62 }
 0xb3f   : > { %v19777_v44 = vpop.f32.mrf.mxu0 }
 0xb41   : > { %v16731_v61 = vpop.f32.mrf.mxu0 }
 0xb42   : > { %v19780_v54 = vadd.f32 %v16731_v61, %v19769_v62 }
 0xb43   : > { %v4612_v16 = vpop.f32.mrf.mxu0 }
 0xb44   : > { %v19783_v51 = vadd.f32 %v19769_v62, %v4612_v16  ;;  %v4643_v16 = vpack.c.bf16 %v4343_v13, %v4343_v13 }
 0xb45   : > { %v16732_v30 = vpop.f32.mrf.mxu0 }
 0xb46   : > { %v19786_v41 = vadd.f32 %v16732_v30, %v19769_v62 }
 0xbac   : > { %v19788_v20 = vpop.f32.mrf.mxu1 }
 0xbae   : > { %v19790_v28 = vpop.f32.mrf.mxu1 }
 0xbb0   : > { %v19792_v26 = vpop.f32.mrf.mxu1 }
 0xbb2   : > { %v19794_v1 = vpop.f32.mrf.mxu1 }
 0xbbc   : > { %v19796_v35 = vpop.f32.mrf.mxu1 }
 0xbbe   : > { %v19798_v63 = vpop.f32.mrf.mxu1 }
 0xbc0   : > { %v19800_v48 = vpop.f32.mrf.mxu1 }
 0xbc2   : > { %v19802_v3 = vpop.f32.mrf.mxu1 }
 0xbcc   : > { %v16703_v60 = vpop.f32.mrf.mxu1 }
 0xbce   : > { %v4450_v37 = vpop.f32.mrf.mxu1 }
 0xbcf   : > { %v4489_v19 = vadd.f32 %v19807_v5, %v4450_v37  ;;  %v4491_v37 = vadd.f32 %v16703_v60, %v19807_v5 }
 0xbd0   : > { %v16704_v57 = vpop.f32.mrf.mxu1 }
 0xbd1   : > { %v4651_v6 = vpack.c.bf16 %v4489_v19, %v4489_v19  ;;  %v4653_v60 = vpack.c.bf16 %v4491_v37, %v4491_v37 }
 0xbd2   : > { %v4453_v23 = vpop.f32.mrf.mxu1 }
 0xbd3   : > { %v4663_v59 = vsel %vm1800_vm2, %v4651_v6, 0  ;;  %v4490_v49 = vadd.f32 %v19807_v5, %v4453_v23 }
 0xbd4   : > { %v16707_v18 = vpop.f32.mrf.mxu1  ;;  %16734 = vmatpush3.bf16.xpose.msra.mxu1 %v4663_v59  ;;  %v4347_v59 = vadd.f32 %v19815_v24, %v4320_v29 }
 0xbd5   : > { %16739 = vmatprep.subr.bf16.mxu1 %v18646_v31  ;;  %v4652_v14 = vpack.c.bf16 %v4490_v49, %v4490_v49  ;;  %v4495_v19 = vadd.f32 %v16707_v18, %v19807_v5  ;;  %v4644_v18 = vpack.c.bf16 %v4344_v7, %v4344_v7  ;;  %v4346_v7 = vadd.f32 %v19758_v21, %v19815_v24 }
 0xbd6   : > { %v4466_v47 = vpop.f32.mrf.mxu1  ;;  %v4647_v13 = vpack.c.bf16 %v4347_v59, %v4347_v59  ;;  %v4348_v21 = vadd.f32 %v19815_v24, %v19764_v42 }
 0xbd7   : > { %v4493_v61 = vadd.f32 %v19807_v5, %v4466_v47  ;;  %v4709_v23 = vsel %vm1800_vm2, %v4652_v14, 0  ;;  %v4657_v49 = vpack.c.bf16 %v4495_v19, %v4495_v19  ;;  %v4635_v47 = vadd.f32 %v19769_v62, %v4596_v10 }
 0xbd8   : > { %v4755_v14 = vsel %vm1800_vm2, %v4653_v60, 0  ;;  %v16708_v29 = vpop.f32.mrf.mxu1  ;;  %v4646_v60 = vpack.c.bf16 %v4346_v7, %v4346_v7 }
 0xbd9   : > { %v4655_v30 = vpack.c.bf16 %v4493_v61, %v4493_v61  ;;  %v4492_v61 = vadd.f32 %v16704_v57, %v19807_v5  ;;  %v4939_v15 = vsel %vm1800_vm2, %v4657_v49, 0  ;;  %v5139_v10 = vpack.c.bf16 %v4635_v47, %v4635_v47 }
 0xbda   : > { %v4469_v37 = vpop.f32.mrf.mxu1  ;;  %v4496_v49 = vadd.f32 %v16708_v29, %v19807_v5  ;;  %v4648_v47 = vpack.c.bf16 %v4348_v21, %v4348_v21 }
 0xbdb   : > { %v4847_v6 = vsel %vm1800_vm2, %v4655_v30, 0  ;;  %16736 = vmatmul.mubr.msk.bf16.vlgmr.msra.gmra.mxu1 %vm1800_vm2, %v4643_v16  ;;  %v4345_v16 = vadd.f32 %v19756_v11, %v19815_v24  ;;  %v4349_v30 = vadd.f32 %v19760_v0, %v19815_v24  ;;  %v4654_v57 = vpack.c.bf16 %v4492_v61, %v4492_v61 }
 0xbdc   : > { %16740 = vmatpush3.bf16.xpose.msra.mxu1 %v4709_v23  ;;  %16758 = vmatpush3.bf16.xpose.msra.mxu0 %v4847_v6  ;;  %v5151_v11 = vsel %vm2294_vm3, %v5139_v10, 0  ;;  %v4494_v0 = vadd.f32 %v19807_v5, %v4469_v37  ;;  %v4350_v61 = vadd.f32 %v19762_v9, %v19815_v24 }
 0xbdd   : > { %16741 = vmatprep.mubr.msk.bf16.mxu1 %vm18647_vm1, %v18646_v31  ;;  %16745 = vmatprep.subr.bf16.mxu1 %v18646_v31  ;;  %v4645_v19 = vpack.c.bf16 %v4345_v16, %v4345_v16  ;;  %v4649_v6 = vpack.c.bf16 %v4349_v30, %v4349_v30  ;;  %v4801_v23 = vsel %vm1800_vm2, %v4654_v57, 0  ;;  %v19888_v57 = vpop.f32.mrf.mxu0 }
 0xbde   : > { %16769 = vmatprep.subr.bf16.mxu0 %v18646_v31  ;;  %v4656_v59 = vpack.c.bf16 %v4494_v0, %v4494_v0 }
 0xbe3   : > { %16742 = vmatmul.mubr.msk.bf16.vlgmr.msra.gmra.mxu1 %vm1800_vm2, %v4644_v18  ;;  %16760 = vmatmul.mubr.msk.bf16.vlgmr.msra.gmra.mxu0 %vm1800_vm2, %v4647_v13  ;;  %v4893_v18 = vsel %vm1800_vm2, %v4656_v59, 0  ;;  %v4658_v13 = vpack.c.bf16 %v4496_v49, %v4496_v49 }
 0xbe4   : > { %16746 = vmatpush3.bf16.xpose.msra.mxu1 %v4755_v14  ;;  %16770 = vmatpush3.bf16.xpose.msra.mxu0 %v4939_v15  ;;  %v4636_v14 = vadd.f32 %v19769_v62, %v19777_v44  ;;  %v4650_v15 = vpack.c.bf16 %v4350_v61, %v4350_v61 }
 0xbe5   : > { %16747 = vmatprep.mubr.msk.bf16.mxu1 %vm18647_vm1, %v18646_v31  ;;  %16771 = vmatprep.mubr.msk.bf16.mxu0 %vm18647_vm1, %v18646_v31  ;;  %v4985_v5 = vsel %vm1800_vm2, %v4658_v13, 0 }
 0xbe6   : > { %16751 = vmatprep.subr.bf16.mxu1 %v18646_v31  ;;  %16781 = vmatprep.subr.bf16.mxu0 %v18646_v31  ;;  %v5140_v42 = vpack.c.bf16 %v4636_v14, %v4636_v14 }
 0xbe8   : > { %v5197_v29 = vsel %vm2294_vm3, %v5140_v42, 0 }
 0xbeb   : > { %16748 = vmatmul.mubr.msk.bf16.vlgmr.msra.gmra.mxu1 %vm1800_vm2, %v4645_v19  ;;  %16772 = vmatmul.mubr.msk.bf16.vlgmr.msra.gmra.mxu0 %vm1800_vm2, %v4649_v6 }
 0xbec   : > { %16752 = vmatpush3.bf16.xpose.msra.mxu1 %v4801_v23  ;;  %16782 = vmatpush3.bf16.msra.mxu0 %v5151_v11 }
 0xbed   : > { %16753 = vmatprep.mubr.msk.bf16.mxu1 %vm18647_vm1, %v18646_v31  ;;  %16763 = vmatprep.subr.bf16.mxu1 %v18646_v31 }
 0xbee   : > { %16783 = vmatprep.mubr.msk.bf16.mxu0 %vm18647_vm1, %v18646_v31  ;;  %16793 = vmatprep.subr.bf16.mxu0 %v18646_v31 }
 0xbf3   : > { %16754 = vmatmul.mubr.msk.bf16.vlgmr.msra.gmra.mxu1 %vm1800_vm2, %v4646_v60 }
 0xbf4   : > { %16764 = vmatpush3.bf16.xpose.msra.mxu1 %v4893_v18  ;;  %16765 = vmatprep.mubr.msk.bf16.mxu1 %vm18647_vm1, %v18646_v31 }
 0xbf5   : > { %16775 = vmatprep.subr.bf16.mxu1 %v18646_v31 }
 0xbfb   : > { %16766 = vmatmul.mubr.msk.bf16.vlgmr.msra.gmra.mxu1 %vm1800_vm2, %v4648_v47 }
 0xbfc   : > { %16776 = vmatpush3.bf16.xpose.msra.mxu1 %v4985_v5  ;;  %16777 = vmatprep.mubr.msk.bf16.mxu1 %vm18647_vm1, %v18646_v31 }
 0xbfd   : > { %16787 = vmatprep.subr.bf16.mxu1 %v18646_v31 }
 0xc03   : > { %16778 = vmatmul.mubr.msk.bf16.vlgmr.msra.gmra.mxu1 %vm1800_vm2, %v4650_v15 }
 0xc04   : > { %16788 = vmatpush3.bf16.msra.mxu1 %v5197_v29  ;;  %16789 = vmatprep.mubr.msk.bf16.mxu1 %vm18647_vm1, %v18646_v31 }
 0xc05   : > { %16799 = vmatprep.subr.bf16.mxu1 %v18646_v31 }
 0xc9b   : > { %v4699_v44 = vpop.f32.mrf.mxu1 }
 0xc9c   : > { %v5027_v16 = vmul.f32 0.35355338, %v4699_v44 }
 0xc9d   : > { %v16737_v30 = vpop.f32.mrf.mxu1 }
 0xc9e   : > { %v19884_v9 = vsel %vm801_vm4, %v5027_v16, -1e+30 }
 0xc9f   : > { %v4702_v24 = vpop.f32.mrf.mxu1  ;;  %v5043_v10 = vsel %vm1800_vm2, %v19884_v9, -inf }
 0xca0   : > { %5044 = vmax.xlane.f32.xlu0 %v5043_v10 }
 0xca1   : > { %v16738_v37 = vpop.f32.mrf.mxu1 }
 0xca3   : > { %v4745_v19 = vpop.f32.mrf.mxu1  ;;  %v4883_v6 = vpop.f32.mrf.mxu0 }
 0xca4   : > { %v5028_v11 = vmul.f32 0.35355338, %v4745_v19  ;;  %v5031_v14 = vmul.f32 0.35355338, %v4883_v6 }
 0xca5   : > { %v16743_v23 = vpop.f32.mrf.mxu1  ;;  %v16761_v0 = vpop.f32.mrf.mxu0 }
 0xca6   : > { %v5036_v7 = vsel %vm801_vm4, %v5028_v11, -1e+30  ;;  %v5039_v24 = vsel %vm801_vm4, %v5031_v14, -1e+30 }
 0xca7   : > { %v4748_v59 = vpop.f32.mrf.mxu1  ;;  %v4886_v60 = vpop.f32.mrf.mxu0  ;;  %v5046_v49 = vsel %vm1800_vm2, %v5036_v7, -inf  ;;  %v5055_v6 = vsel %vm1800_vm2, %v5039_v24, -inf }
 0xca8   : > { %5047 = vmax.xlane.f32.xlu1 %v5046_v49 }
 0xca9   : > { %v16744_v18 = vpop.f32.mrf.mxu1  ;;  %v16762_v21 = vpop.f32.mrf.mxu0 }
 0xcab   : > { %v4791_v13 = vpop.f32.mrf.mxu1  ;;  %v4975_v47 = vpop.f32.mrf.mxu0 }
 0xcac   : > { %v5029_v5 = vmul.f32 0.35355338, %v4791_v13  ;;  %v5033_v30 = vmul.f32 0.35355338, %v4975_v47 }
 0xcad   : > { %v16749_v61 = vpop.f32.mrf.mxu1  ;;  %v16773_v42 = vpop.f32.mrf.mxu0 }
 0xcae   : > { %v5037_v15 = vsel %vm801_vm4, %v5029_v5, -1e+30  ;;  %v5041_v23 = vsel %vm801_vm4, %v5033_v30, -1e+30 }
 0xcaf   : > { %v4794_v29 = vpop.f32.mrf.mxu1  ;;  %v4978_v44 = vpop.f32.mrf.mxu0  ;;  %v5049_v16 = vsel %vm1800_vm2, %v5037_v15, -inf  ;;  %v5061_v18 = vsel %vm1800_vm2, %v5041_v23, -inf }
 0xcb0   : > { %5050 = vmax.xlane.f32.xlu0 %v5049_v16 }
 0xcb1   : > { %v16750_v10 = vpop.f32.mrf.mxu1  ;;  %v16774_v37 = vpop.f32.mrf.mxu0 }
 0xcb3   : > { %v4837_v19 = vpop.f32.mrf.mxu1 }
 0xcb4   : > { %v5030_v11 = vmul.f32 0.35355338, %v4837_v19  ;;  %5056 = vmax.xlane.f32.xlu0 %v5055_v6 }
 0xcb5   : > { %v16755_v0 = vpop.f32.mrf.mxu1 }
 0xcb6   : > { %v5038_v59 = vsel %vm801_vm4, %v5030_v11, -1e+30 }
 0xcb7   : > { %v4840_v60 = vpop.f32.mrf.mxu1  ;;  %v5052_v49 = vsel %vm1800_vm2, %v5038_v59, -inf }
 0xcb8   : > { %5053 = vmax.xlane.f32.xlu1 %v5052_v49  ;;  %5062 = vmax.xlane.f32.xlu0 %v5061_v18 }
 0xcb9   : > { %v16756_v21 = vpop.f32.mrf.mxu1 }
 0xcbb   : > { %v4929_v13 = vpop.f32.mrf.mxu1 }
 0xcbc   : > { %v5032_v47 = vmul.f32 0.35355338, %v4929_v13 }
 0xcbd   : > { %v16767_v14 = vpop.f32.mrf.mxu1 }
 0xcbe   : > { %v5040_v5 = vsel %vm801_vm4, %v5032_v47, -1e+30 }
 0xcbf   : > { %v4932_v61 = vpop.f32.mrf.mxu1  ;;  %v5058_v42 = vsel %vm1800_vm2, %v5040_v5, -inf }
 0xcc0   : > { %5059 = vmax.xlane.f32.xlu1 %v5058_v42 }
 0xcc1   : > { %v16768_v29 = vpop.f32.mrf.mxu1 }
 0xcc3   : > { %v5021_v44 = vpop.f32.mrf.mxu1 }
 0xcc4   : > { %v5034_v16 = vmul.f32 0.35355338, %v5021_v44 }
 0xcc5   : > { %v16779_v30 = vpop.f32.mrf.mxu1 }
 0xcc6   : > { %v5042_v10 = vsel %vm801_vm4, %v5034_v16, -1e+30 }
 0xcc7   : > { %v5024_v37 = vpop.f32.mrf.mxu1  ;;  %v5064_v19 = vsel %vm1800_vm2, %v5042_v10, -inf }
 0xcc8   : > { %5065 = vmax.xlane.f32.xlu1 %v5064_v19 }
 0xcc9   : > { %v16780_v6 = vpop.f32.mrf.mxu1 }
 0xd29   : > { %v5045_v11 = vpop.xlane.xlu0 %5044 }
 0xd2a   : > { %v5067_v0 = vsub.f32 %v19884_v9, %v5045_v11 }
 0xd2c   : > { %v5075_v60 = vmul.f32 1.442695, %v5067_v0 }
 0xd2e   : > { %18278 = vpow2.f32 %v5075_v60 }
 0xd31   : > { %v5048_v49 = vpop.xlane.xlu1 %5047 }
 0xd32   : > { %v5068_v18 = vsub.f32 %v5036_v7, %v5048_v49 }
 0xd34   : > { %v5077_v21 = vmul.f32 1.442695, %v5068_v18 }
 0xd36   : > { %18280 = vpow2.f32 %v5077_v21 }
 0xd39   : > { %v5051_v13 = vpop.xlane.xlu0 %5050 }
 0xd3a   : > { %v5069_v47 = vsub.f32 %v5037_v15, %v5051_v13 }
 0xd3b   : > { %v18279_v14 = vpop.eup %18278 }
 0xd3c   : > { %v5079_v61 = vmul.f32 1.442695, %v5069_v47  ;;  %v5091_v42 = vsel %vm1800_vm2, %v18279_v14, 0.0 }
 0xd3d   : > { %v5057_v29 = vpop.xlane.xlu0 %5056  ;;  %5092 = vadd.xlane.f32.xlu0 %v5091_v42 }
 0xd3e   : > { %18282 = vpow2.f32 %v5079_v61  ;;  %v5071_v44 = vsub.f32 %v5039_v24, %v5057_v29 }
 0xd40   : > { %v5083_v16 = vmul.f32 1.442695, %v5071_v44 }
 0xd41   : > { %v5054_v30 = vpop.xlane.xlu1 %5053  ;;  %v5063_v37 = vpop.xlane.xlu0 %5062 }
 0xd42   : > { %18284 = vpow2.f32 %v5083_v16  ;;  %v5070_v9 = vsub.f32 %v5038_v59, %v5054_v30  ;;  %v5073_v19 = vsub.f32 %v5041_v23, %v5063_v37 }
 0xd43   : > { %v18281_v6 = vpop.eup %18280 }
 0xd44   : > { %v5081_v7 = vmul.f32 1.442695, %v5070_v9  ;;  %v5087_v11 = vmul.f32 1.442695, %v5073_v19  ;;  %v5094_v0 = vsel %vm1800_vm2, %v18281_v6, 0.0 }
 0xd45   : > { %5095 = vadd.xlane.f32.xlu1 %v5094_v0 }
 0xd46   : > { %18286 = vpow2.f32 %v5081_v7  ;;  %v5141_v7 = vpack.c.bf16 %v19772_v52, %v19772_v52  ;;  %v5142_v52 = vpack.c.bf16 %v19775_v36, %v19775_v36  ;;  %v5143_v36 = vpack.c.bf16 %v19783_v51, %v19783_v51 }
 0xd47   : > { %18288 = vpow2.f32 %v5087_v11 }
 0xd49   : > { %v5060_v15 = vpop.xlane.xlu1 %5059 }
 0xd4a   : > { %v5072_v60 = vsub.f32 %v5040_v5, %v5060_v15 }
 0xd4b   : > { %v18283_v49 = vpop.eup %18282 }
 0xd4c   : > { %v5085_v18 = vmul.f32 1.442695, %v5072_v60  ;;  %v5097_v24 = vsel %vm1800_vm2, %v18283_v49, 0.0  ;;  %v5243_v60 = vsel %vm2294_vm3, %v5141_v7, 0 }
 0xd4d   : > { %5098 = vadd.xlane.f32.xlu0 %v5097_v24 }
 0xd4e   : > { %18290 = vpow2.f32 %v5085_v18 }
 0xd4f   : > { %v18285_v21 = vpop.eup %18284 }
 0xd50   : > { %v5103_v59 = vsel %vm1800_vm2, %v18285_v21, 0.0 }
 0xd51   : > { %5104 = vadd.xlane.f32.xlu0 %v5103_v59  ;;  %v5066_v23 = vpop.xlane.xlu1 %5065 }
 0xd52   : > { %v5074_v13 = vsub.f32 %v5042_v10, %v5066_v23 }
 0xd53   : > { %v18287_v47 = vpop.eup %18286 }
 0xd54   : > { %v19916_v61 = vpop.eup %18288  ;;  %v5089_v42 = vmul.f32 1.442695, %v5074_v13  ;;  %v5100_v29 = vsel %vm1800_vm2, %v18287_v47, 0.0 }
 0xd55   : > { %v5109_v5 = vsel %vm1800_vm2, %v19916_v61, 0.0  ;;  %5101 = vadd.xlane.f32.xlu1 %v5100_v29 }
 0xd56   : > { %18292 = vpow2.f32 %v5089_v42  ;;  %5110 = vadd.xlane.f32.xlu0 %v5109_v5  ;;  %v5289_v42 = vsel %vm2294_vm3, %v5142_v52, 0 }
 0xd5b   : > { %v19921_v44 = vpop.eup %18290 }
 0xd5c   : > { %v5106_v16 = vsel %vm1800_vm2, %v19921_v44, 0.0 }
 0xd5d   : > { %5107 = vadd.xlane.f32.xlu1 %v5106_v16 }
 0xd63   : > { %v19925_v30 = vpop.eup %18292 }
 0xd64   : > { %v5112_v10 = vsel %vm1800_vm2, %v19925_v30, 0.0 }
 0xd65   : > { %5113 = vadd.xlane.f32.xlu1 %v5112_v10 }
 0xdc6   : > { %v5093_v37 = vpop.xlane.xlu0 %5092 }
 0xdc7   : > { %18294 = vrcp.f32 %v5093_v37  ;;  %v5335_v37 = vsel %vm2294_vm3, %v5143_v36, 0  ;;  %v18019_v36 = vld [vmem:[%s22316_s29 + $0xd0] sm:$0xff]  }
 0xdce   : > { %v5096_v9 = vpop.xlane.xlu1 %5095 }
 0xdcf   : > { %18296 = vrcp.f32 %v5096_v9  ;;  %v4640_v9 = vadd.f32 %v19769_v62, %v19888_v57 }
 0xdd1   : > { %v5144_v7 = vpack.c.bf16 %v4640_v9, %v4640_v9  ;;  %v18025_v9 = vld [vmem:[%s22318_s26 + $0xe0] sm:$0xff]  }
 0xdd4   : > { %v18295_v19 = vpop.eup %18294 }
 0xdd5   : > { %v5123_v11 = vmul.f32 %v18295_v19, %v18279_v14 }
 0xdd6   : > { %v5099_v0 = vpop.xlane.xlu0 %5098 }
 0xdd7   : > { %v5131_v15 = vpack.c.bf16 %v5123_v11, %v5123_v11  ;;  %18298 = vrcp.f32 %v5099_v0 }
 0xdd9   : > { %16784 = vmatmul.mubr.msk.bf16.vlgmr.msra.gmra.mxu0 %vm1800_vm2, %v5131_v15 }
 0xdda   : > { %16794 = vmatpush3.bf16.msra.mxu0 %v5243_v60  ;;  %v5105_v18 = vpop.xlane.xlu0 %5104  ;;  %16795 = vmatprep.mubr.msk.bf16.mxu0 %vm18647_vm1, %v18646_v31 }
 0xddb   : > { %18300 = vrcp.f32 %v5105_v18  ;;  %16805 = vmatprep.subr.bf16.mxu0 %v18646_v31 }
 0xddc   : > { %v18297_v24 = vpop.eup %18296 }
 0xddd   : > { %v5124_v14 = vmul.f32 %v18297_v24, %v18281_v6 }
 0xdde   : > { %v5102_v59 = vpop.xlane.xlu1 %5101 }
 0xddf   : > { %v5132_v23 = vpack.c.bf16 %v5124_v14, %v5124_v14  ;;  %18302 = vrcp.f32 %v5102_v59  ;;  %v5111_v13 = vpop.xlane.xlu0 %5110 }
 0xde0   : > { %18304 = vrcp.f32 %v5111_v13  ;;  %v18015_v13 = vld [vmem:[%s22316_s29 + $0xf0] sm:$0xff]  }
 0xde1   : > { %16790 = vmatmul.mubr.msk.bf16.vlgmr.msra.gmra.mxu1 %vm1800_vm2, %v5132_v23 }
 0xde2   : > { %16800 = vmatpush3.bf16.msra.mxu1 %v5289_v42  ;;  %16801 = vmatprep.mubr.msk.bf16.mxu1 %vm18647_vm1, %v18646_v31  ;;  %v18016_v42 = vld [vmem:[%s22316_s29 + $0xe8] sm:$0xff]  }
 0xde3   : > { %16811 = vmatprep.subr.bf16.mxu1 %v18646_v31 }
 0xde4   : > { %v18299_v29 = vpop.eup %18298 }
 0xde5   : > { %v5125_v6 = vmul.f32 %v18299_v29, %v18283_v49  ;;  %v5145_v49 = vpack.c.bf16 %v19780_v54, %v19780_v54  ;;  %v18018_v29 = vld [vmem:[%s22316_s29 + $0xd8] sm:$0xff]  }
 0xde6   : > { %v5108_v5 = vpop.xlane.xlu1 %5107 }
 0xde7   : > { %v5133_v16 = vpack.c.bf16 %v5125_v6, %v5125_v6  ;;  %18306 = vrcp.f32 %v5108_v5  ;;  %v5427_v57 = vsel %vm2294_vm3, %v5145_v49, 0  ;;  %v18020_v6 = vld [vmem:[%s22316_s29 + $0xc8] sm:$0xff]   ;;  %v18021_v5 = vld [vmem:[%s22316_s29 + $0xc0] sm:$0xff]  }
 0xde8   : > { %v18301_v10 = vpop.eup %18300  ;;  %v14892_v49 = vld [vmem:[%s22257_s13 + $0x8] sm:$0xf] }
 0xde9   : > { %16796 = vmatmul.mubr.msk.bf16.vlgmr.msra.gmra.mxu0 %vm1800_vm2, %v5133_v16  ;;  %v5127_v19 = vmul.f32 %v18301_v10, %v18285_v21  ;;  %v5381_v21 = vsel %vm2294_vm3, %v5144_v7, 0  ;;  %v18022_v16 = vld [vmem:[%s22318_s26 + $0xf8] sm:$0xff]   ;;  %v18023_v10 = vld [vmem:[%s22318_s26 + $0xf0] sm:$0xff]   ;;  %v5558_v7 = vsel %vm2294_vm3, %v14892_v49, 0 }
 0xdea   : > { %16806 = vmatpush3.bf16.msra.mxu0 %v5335_v37  ;;  %16807 = vmatprep.mubr.msk.bf16.mxu0 %vm18647_vm1, %v18646_v31  ;;  %v18024_v37 = vld [vmem:[%s22318_s26 + $0xe8] sm:$0xff]  }
 0xdeb   : > { %16817 = vmatprep.subr.bf16.mxu0 %v18646_v31  ;;  %v5135_v15 = vpack.c.bf16 %v5127_v19, %v5127_v19  ;;  %v18026_v19 = vld [vmem:[%s22318_s26 + $0xd8] sm:$0xff]  }
 0xdec   : > { %v18303_v51 = vpop.eup %18302 }
 0xded   : > { %v5126_v11 = vmul.f32 %v18303_v51, %v18287_v47  ;;  %v18305_v62 = vpop.eup %18304  ;;  %v5146_v47 = vpack.c.bf16 %v19786_v41, %v19786_v41  ;;  %v18027_v51 = vld [vmem:[%s22318_s26 + $0xd0] sm:$0xff]  }
 0xdee   : > { %v5114_v0 = vpop.xlane.xlu1 %5113  ;;  %v5129_v18 = vmul.f32 %v18305_v62, %v19916_v61  ;;  %v18014_v61 = vld [vmem:[%s22316_s29 + $0xf8] sm:$0xff]  }
 0xdef   : > { %v5134_v60 = vpack.c.bf16 %v5126_v11, %v5126_v11  ;;  %18308 = vrcp.f32 %v5114_v0  ;;  %v5473_v59 = vsel %vm2294_vm3, %v5146_v47, 0  ;;  %v18030_v11 = vld [vmem:[%s22317_s10 + $0xf8] sm:$0xff]   ;;  %v18028_v0 = vld [vmem:[%s22318_s26 + $0xc8] sm:$0xff]  }
 0xdf0   : > { %v5137_v52 = vpack.c.bf16 %v5129_v18, %v5129_v18 }
 0xdf1   : > { %16802 = vmatmul.mubr.msk.bf16.vlgmr.msra.gmra.mxu1 %vm1800_vm2, %v5134_v60  ;;  %16808 = vmatmul.mubr.msk.bf16.vlgmr.msra.gmra.mxu0 %vm1800_vm2, %v5135_v15  ;;  %v18029_v15 = vld [vmem:[%s22318_s26 + $0xc0] sm:$0xff]  }
 0xdf2   : > { %16812 = vmatpush3.bf16.msra.mxu1 %v5381_v21  ;;  %16818 = vmatpush3.bf16.msra.mxu0 %v5427_v57 }
 0xdf3   : > { %16813 = vmatprep.mubr.msk.bf16.mxu1 %vm18647_vm1, %v18646_v31  ;;  %16819 = vmatprep.mubr.msk.bf16.mxu0 %vm18647_vm1, %v18646_v31 }
 0xdf4   : > { %v18307_v54 = vpop.eup %18306  ;;  %16823 = vmatprep.subr.bf16.mxu1 %v18646_v31  ;;  %17867 = vmatprep.subr.msk.bf16.mxu0 %vm2294_vm3, %v14892_v49 }
 0xdf5   : > { %v5128_v24 = vmul.f32 %v18307_v54, %v19921_v44 }
 0xdf7   : > { %v5136_v14 = vpack.c.bf16 %v5128_v24, %v5128_v24 }
 0xdf9   : > { %16814 = vmatmul.mubr.msk.bf16.vlgmr.msra.gmra.mxu1 %vm1800_vm2, %v5136_v14  ;;  %16820 = vmatmul.mubr.msk.bf16.vlgmr.msra.gmra.mxu0 %vm1800_vm2, %v5137_v52 }
 0xdfa   : > { %16824 = vmatpush3.bf16.msra.mxu1 %v5473_v59  ;;  %16825 = vmatprep.mubr.msk.bf16.mxu1 %vm18647_vm1, %v18646_v31 }
 0xdfb   : > { %16839 = vmatprep.subr.bf16.mxu1 %v18014_v61  ;;  %16830 = vmatpush3.bf16.msra.mxu0 %v5558_v7 }
 0xdfc   : > { %v18309_v41 = vpop.eup %18308  ;;  %16863 = vmatprep.subr.bf16.mxu0 %v18030_v11 }
 0xdfd   : > { %v5130_v44 = vmul.f32 %v18309_v41, %v19925_v30  ;;  %v18017_v30 = vld [vmem:[%s22316_s29 + $0xe0] sm:$0xff]  }
 0xdff   : > { %v5138_v23 = vpack.c.bf16 %v5130_v44, %v5130_v44 }
 0xe01   : > { %16826 = vmatmul.mubr.msk.bf16.vlgmr.msra.gmra.mxu1 %vm1800_vm2, %v5138_v23 }
 0xe02   : > { %16840 = vmatpush3.bf16.msra.mxu1 %v18014_v61  ;;  %16855 = vmatprep.mubr.bf16.mxu1 %v19109_v33 }
 0xe03   : > { %16841 = vmatprep.subr.bf16.mxu1 %v18015_v13 }
 0xe06   : > { %16842 = vmatpush3.bf16.msra.mxu1 %v18015_v13 }
 0xe07   : > { %16843 = vmatprep.subr.bf16.mxu1 %v18016_v42 }
 0xe0a   : > { %16844 = vmatpush3.bf16.msra.mxu1 %v18016_v42  ;;  %v18031_v42 = vld [vmem:[%s22317_s10 + $0xf0] sm:$0xff]  }
 0xe0b   : > { %16845 = vmatprep.subr.bf16.mxu1 %v18017_v30 }
 0xe0e   : > { %16846 = vmatpush3.bf16.msra.mxu1 %v18017_v30 }
 0xe0f   : > { %16847 = vmatprep.subr.bf16.mxu1 %v18018_v29 }
 0xe12   : > { %16848 = vmatpush3.bf16.msra.mxu1 %v18018_v29 }
 0xe13   : > { %16849 = vmatprep.subr.bf16.mxu1 %v18019_v36 }
 0xe16   : > { %16850 = vmatpush3.bf16.msra.mxu1 %v18019_v36 }
 0xe17   : > { %16851 = vmatprep.subr.bf16.mxu1 %v18020_v6 }
 0xe1a   : > { %16852 = vmatpush3.bf16.msra.mxu1 %v18020_v6 }
 0xe1b   : > { %16853 = vmatprep.subr.bf16.mxu1 %v18021_v5 }
 0xe1e   : > { %16854 = vmatpush3.bf16.msra.mxu1 %v18021_v5  ;;  %v18032_v5 = vld [vmem:[%s22317_s10 + $0xe8] sm:$0xff]  }
 0xe1f   : > { %16887 = vmatprep.subr.bf16.mxu1 %v18022_v16 }
 0xe21   : > { %16856 = vmatmul.mubr.bf16.vlgmr.msra.gmra.mxu1 %v19115_v55 }
 0xe22   : > { %16859 = vmatprep.mubr.bf16.mxu1 %v19128_v2  ;;  %16888 = vmatpush3.bf16.msra.mxu1 %v18022_v16 }
 0xe23   : > { %16889 = vmatprep.subr.bf16.mxu1 %v18023_v10 }
 0xe26   : > { %16890 = vmatpush3.bf16.msra.mxu1 %v18023_v10 }
 0xe27   : > { %16891 = vmatprep.subr.bf16.mxu1 %v18024_v37 }
 0xe29   : > { %16860 = vmatmul.mubr.bf16.gmra.mxu1 %v19139_v12 }
 0xe2a   : > { %16892 = vmatpush3.bf16.msra.mxu1 %v18024_v37  ;;  %16903 = vmatprep.mubr.bf16.mxu1 %v19109_v33 }
 0xe2b   : > { %16893 = vmatprep.subr.bf16.mxu1 %v18025_v9 }
 0xe2e   : > { %16894 = vmatpush3.bf16.msra.mxu1 %v18025_v9 }
 0xe2f   : > { %16895 = vmatprep.subr.bf16.mxu1 %v18026_v19 }
 0xe32   : > { %16896 = vmatpush3.bf16.msra.mxu1 %v18026_v19 }
 0xe33   : > { %16897 = vmatprep.subr.bf16.mxu1 %v18027_v51 }
 0xe36   : > { %16898 = vmatpush3.bf16.msra.mxu1 %v18027_v51  ;;  %v18033_v51 = vld [vmem:[%s22317_s10 + $0xe0] sm:$0xff]  }
 0xe37   : > { %16899 = vmatprep.subr.bf16.mxu1 %v18028_v0 }
 0xe3a   : > { %16900 = vmatpush3.bf16.msra.mxu1 %v18028_v0 }
 0xe3b   : > { %16901 = vmatprep.subr.bf16.mxu1 %v18029_v15 }
 0xe3e   : > { %16902 = vmatpush3.bf16.msra.mxu1 %v18029_v15  ;;  %v18034_v15 = vld [vmem:[%s22317_s10 + $0xd8] sm:$0xff]  }
 0xe3f   : > { %16935 = vmatprep.subr.bf16.mxu1 %v18646_v31 }
 0xe41   : > { %16904 = vmatmul.mubr.bf16.vlgmr.msra.gmra.mxu1 %v19115_v55 }
 0xe42   : > { %16907 = vmatprep.mubr.bf16.mxu1 %v19128_v2 }
 0xe49   : > { %16908 = vmatmul.mubr.bf16.gmra.mxu1 %v19139_v12 }
 0xe4a   : > { %16937 = vmatprep.mubr.msk.bf16.mxu1 %vm18647_vm1, %v18646_v31 }
 0xe99   : > { %v5187_v60 = vpop.f32.mrf.mxu0 }
 0xe9b   : > { %v16785_v62 = vpop.f32.mrf.mxu0 }
 0xe9d   : > { %v5190_v57 = vpop.f32.mrf.mxu0 }
 0xe9f   : > { %v16786_v21 = vpop.f32.mrf.mxu0 }
 0xea1   : > { %v5233_v18 = vpop.f32.mrf.mxu1 }
 0xea2   : > { %v15571_v54 = vpack.c.bf16 %v5233_v18, %v5187_v60  ;;  %v18035_v18 = vld [vmem:[%s22317_s10 + $0xd0] sm:$0xff]  }
 0xea3   : > { %v16791_v47 = vpop.f32.mrf.mxu1 }
 0xea4   : > { %16831 = vmatprep.mubr.msk.bf16.mxu0 %vm1800_vm2, %v15571_v54 }
 0xea5   : > { %v5236_v24 = vpop.f32.mrf.mxu1 }
 0xea6   : > { %v18036_v24 = vld [vmem:[%s22317_s10 + $0xc8] sm:$0xff]  }
 0xea7   : > { %v16792_v52 = vpop.f32.mrf.mxu1 }
 0xea9   : > { %v5279_v14 = vpop.f32.mrf.mxu0 }
 0xeab   : > { %v16797_v61 = vpop.f32.mrf.mxu0 }
 0xead   : > { %v5282_v59 = vpop.f32.mrf.mxu0 }
 0xeaf   : > { %v16798_v41 = vpop.f32.mrf.mxu0 }
 0xeb1   : > { %v5325_v44 = vpop.f32.mrf.mxu1  ;;  %v5371_v23 = vpop.f32.mrf.mxu0 }
 0xeb2   : > { %v15572_v13 = vpack.c.bf16 %v5325_v44, %v5279_v14  ;;  %v18037_v14 = vld [vmem:[%s22317_s10 + $0xc0] sm:$0xff]  }
 0xeb3   : > { %v16803_v30 = vpop.f32.mrf.mxu1  ;;  %v16809_v29 = vpop.f32.mrf.mxu0 }
 0xeb4   : > { %16832 = vmatmul.mubr.msk.bf16.vlgmr.msra.gmra.mxu0 %vm1800_vm2, %v15572_v13 }
 0xeb5   : > { %16864 = vmatpush3.bf16.msra.mxu0 %v18030_v11  ;;  %v5328_v36 = vpop.f32.mrf.mxu1  ;;  %v5374_v6 = vpop.f32.mrf.mxu0 }
 0xeb6   : > { %16865 = vmatprep.subr.bf16.mxu0 %v18031_v42 }
 0xeb7   : > { %v16804_v16 = vpop.f32.mrf.mxu1  ;;  %v16810_v10 = vpop.f32.mrf.mxu0 }
 0xeb9   : > { %16866 = vmatpush3.bf16.msra.mxu0 %v18031_v42  ;;  %v5417_v37 = vpop.f32.mrf.mxu1  ;;  %v5463_v9 = vpop.f32.mrf.mxu0 }
 0xeba   : > { %v15573_v19 = vpack.c.bf16 %v5417_v37, %v5371_v23  ;;  %16867 = vmatprep.subr.bf16.mxu0 %v18032_v5 }
 0xebb   : > { %v16815_v49 = vpop.f32.mrf.mxu1  ;;  %v16821_v7 = vpop.f32.mrf.mxu0 }
 0xebc   : > { %16835 = vmatprep.mubr.msk.bf16.mxu0 %vm1800_vm2, %v15573_v19  ;;  %v4197_v7 = vadd.f32 %v19790_v28, %v19473_v43  ;;  %v4201_v43 = vadd.f32 %v19798_v63, %v19481_v58 }
 0xebd   : > { %16868 = vmatpush3.bf16.msra.mxu0 %v18032_v5  ;;  %v5420_v11 = vpop.f32.mrf.mxu1  ;;  %v5466_v0 = vpop.f32.mrf.mxu0 }
 0xebe   : > { %16869 = vmatprep.subr.bf16.mxu0 %v18033_v51 }
 0xebf   : > { %v16816_v60 = vpop.f32.mrf.mxu1  ;;  %v16822_v62 = vpop.f32.mrf.mxu0 }
 0xec1   : > { %16870 = vmatpush3.bf16.msra.mxu0 %v18033_v51  ;;  %v5509_v57 = vpop.f32.mrf.mxu1  ;;  %v4199_v51 = vadd.f32 %v19788_v20, %v19471_v22  ;;  %v4203_v22 = vadd.f32 %v19796_v35, %v19479_v56  ;;  %v20142_v56 = vld [vmem:[%s22322_s11 + $0x3] ss:$0 sm:$0xff] }
 0xec2   : > { %v15574_v21 = vpack.c.bf16 %v5509_v57, %v5463_v9  ;;  %16871 = vmatprep.subr.bf16.mxu0 %v18034_v15 }
 0xec3   : > { %v16827_v54 = vpop.f32.mrf.mxu1 }
 0xec4   : > { %16836 = vmatmul.mubr.msk.bf16.gmra.mxu0 %vm1800_vm2, %v15574_v21 }
 0xec5   : > { %16872 = vmatpush3.bf16.msra.mxu0 %v18034_v15  ;;  %v5512_v47 = vpop.f32.mrf.mxu1  ;;  %16879 = vmatprep.mubr.bf16.mxu0 %v19109_v33  ;;  %v4200_v15 = vadd.f32 %v19792_v26, %v19475_v4  ;;  %v4204_v4 = vadd.f32 %v19800_v48, %v19483_v38 }
 0xec6   : > { %16873 = vmatprep.subr.bf16.mxu0 %v18035_v18 }
 0xec7   : > { %v16828_v52 = vpop.f32.mrf.mxu1 }
 0xec9   : > { %16874 = vmatpush3.bf16.msra.mxu0 %v18035_v18 }
 0xeca   : > { %16875 = vmatprep.subr.bf16.mxu0 %v18036_v24 }
 0xecd   : > { %16876 = vmatpush3.bf16.msra.mxu0 %v18036_v24 }
 0xece   : > { %16877 = vmatprep.subr.bf16.mxu0 %v18037_v14 }
 0xed1   : > { %16878 = vmatpush3.bf16.msra.mxu0 %v18037_v14 }
 0xed2   : > { %16911 = vmatprep.subr.bf16.mxu0 %v18646_v31 }
 0xed4   : > { %16880 = vmatmul.mubr.bf16.vlgmr.msra.gmra.mxu0 %v19115_v55 }
 0xed5   : > { %16883 = vmatprep.mubr.bf16.mxu0 %v19128_v2  ;;  %v20090_v2 = vld [vmem:[%s22256_s12 + $0x3] ss:$0 sm:$0xff] }
 0xedc   : > { %16884 = vmatmul.mubr.bf16.gmra.mxu0 %v19139_v12 }
 0xedd   : > { %16913 = vmatprep.mubr.msk.bf16.mxu0 %vm18647_vm1, %v18646_v31 }
 0xee1   : > { %v20073_v33 = vpop.f32.mrf.mxu1 }
 0xee3   : > { %v5732_v61 = vpop.f32.mrf.mxu1 }
 0xee5   : > { %v20075_v59 = vpop.f32.mrf.mxu1 }
 0xee7   : > { %v20077_v41 = vpop.f32.mrf.mxu1 }
 0xee9   : > { %v20079_v44 = vpop.f32.mrf.mxu1 }
 0xeeb   : > { %v20081_v23 = vpop.f32.mrf.mxu1 }
 0xeed   : > { %v20083_v13 = vpop.f32.mrf.mxu1 }
 0xeef   : > { %v20085_v55 = vpop.f32.mrf.mxu1 }
 0xf01   : > { %v16905_v12 = vpop.f32.mrf.mxu1 }
 0xf02   : > { %v20093_v42 = vadd.f32 %v16905_v12, %v20090_v2 }
 0xf03   : > { %v20095_v30 = vpop.f32.mrf.mxu1 }
 0xf05   : > { %v16906_v29 = vpop.f32.mrf.mxu1 }
 0xf06   : > { %v20098_v36 = vadd.f32 %v16906_v29, %v20090_v2  ;;  %v20150_v29 = vld [vmem:[%s22324_s0 + $0x3] ss:$0 sm:$0xff] }
 0xf07   : > { %v20100_v6 = vpop.f32.mrf.mxu1 }
 0xf09   : > { %v16909_v5 = vpop.f32.mrf.mxu1 }
 0xf0a   : > { %v20103_v16 = vadd.f32 %v16909_v5, %v20090_v2 }
 0xf0b   : > { %v6040_v10 = vpop.f32.mrf.mxu1 }
 0xf0c   : > { %v20106_v37 = vadd.f32 %v20090_v2, %v6040_v10  ;;  %v5771_v10 = vadd.f32 %v20150_v29, %v5732_v61  ;;  %v5772_v61 = vadd.f32 %v20150_v29, %v20077_v41 }
 0xf0d   : > { %v16910_v9 = vpop.f32.mrf.mxu1 }
 0xf0e   : > { %v20109_v19 = vadd.f32 %v16910_v9, %v20090_v2 }
 0xf74   : > { %v16833_v49 = vpop.f32.mrf.mxu0 }
 0xf75   : > { %v20115_v11 = vadd.f32 %v16833_v49, %v4199_v51 }
 0xf76   : > { %v5594_v0 = vpop.f32.mrf.mxu0 }
 0xf77   : > { %v20119_v60 = vadd.f32 %v5594_v0, %v4197_v7  ;;  %v6071_v7 = vpack.c.bf16 %v5771_v10, %v5771_v10 }
 0xf78   : > { %v16834_v62 = vpop.f32.mrf.mxu0 }
 0xf79   : > { %v20121_v57 = vadd.f32 %v16834_v62, %v4200_v15 }
 0xf7a   : > { %v20123_v21 = vpop.f32.mrf.mxu0 }
 0xf84   : > { %v16837_v20 = vpop.f32.mrf.mxu0 }
 0xf85   : > { %v20129_v28 = vadd.f32 %v16837_v20, %v4203_v22 }
 0xf86   : > { %v5610_v18 = vpop.f32.mrf.mxu0 }
 0xf87   : > { %v20133_v26 = vadd.f32 %v5610_v18, %v4201_v43  ;;  %v5775_v43 = vadd.f32 %v20150_v29, %v20081_v23 }
 0xf88   : > { %v16838_v54 = vpop.f32.mrf.mxu0 }
 0xf89   : > { %v20135_v47 = vadd.f32 %v16838_v54, %v4204_v4  ;;  %v6072_v54 = vpack.c.bf16 %v5772_v61, %v5772_v61  ;;  %v5778_v61 = vadd.f32 %v20083_v13, %v20150_v29 }
 0xf8a   : > { %v20137_v24 = vpop.f32.mrf.mxu0 }
 0xf94   : > { %v16881_v52 = vpop.f32.mrf.mxu0 }
 0xf95   : > { %v5919_v15 = vadd.f32 %v16881_v52, %v20142_v56  ;;  %v6075_v52 = vpack.c.bf16 %v5775_v43, %v5775_v43  ;;  %v6078_v43 = vpack.c.bf16 %v5778_v61, %v5778_v61 }
 0xf96   : > { %v5878_v58 = vpop.f32.mrf.mxu0 }
 0xf97   : > { %v5917_v35 = vadd.f32 %v20142_v56, %v5878_v58  ;;  %v6081_v18 = vpack.c.bf16 %v5919_v15, %v5919_v15  ;;  %v6063_v58 = vadd.f32 %v20090_v2, %v20095_v30 }
 0xf98   : > { %v16882_v63 = vpop.f32.mrf.mxu0 }
 0xf99   : > { %v6079_v14 = vpack.c.bf16 %v5917_v35, %v5917_v35  ;;  %v6183_v35 = vsel %vm1800_vm2, %v6081_v18, 0  ;;  %v5920_v41 = vadd.f32 %v16882_v63, %v20142_v56  ;;  %v6567_v30 = vpack.c.bf16 %v6063_v58, %v6063_v58  ;;  %v20226_v58 = vpop.f32.mrf.mxu1 }
 0xf9a   : > { %v5881_v12 = vpop.f32.mrf.mxu0 }
 0xf9b   : > { %v6091_v38 = vsel %vm1800_vm2, %v6079_v14, 0  ;;  %v5918_v48 = vadd.f32 %v20142_v56, %v5881_v12  ;;  %v5773_v12 = vadd.f32 %v20073_v33, %v20150_v29  ;;  %v6082_v63 = vpack.c.bf16 %v5920_v41, %v5920_v41 }
 0xf9c   : > { %v16885_v5 = vpop.f32.mrf.mxu0  ;;  %16912 = vmatpush3.bf16.xpose.msra.mxu0 %v6091_v38  ;;  %v5777_v38 = vadd.f32 %v20079_v44, %v20150_v29  ;;  %v6579_v33 = vsel %vm2294_vm3, %v6567_v30, 0 }
 0xf9d   : > { %16917 = vmatprep.subr.bf16.mxu0 %v18646_v31  ;;  %v6080_v51 = vpack.c.bf16 %v5918_v48, %v5918_v48  ;;  %v5923_v62 = vadd.f32 %v16885_v5, %v20142_v56  ;;  %v6073_v5 = vpack.c.bf16 %v5773_v12, %v5773_v12 }
 0xf9e   : > { %v5894_v9 = vpop.f32.mrf.mxu0  ;;  %v6077_v10 = vpack.c.bf16 %v5777_v38, %v5777_v38 }
 0xf9f   : > { %v5921_v49 = vadd.f32 %v20142_v56, %v5894_v9  ;;  %v6137_v20 = vsel %vm1800_vm2, %v6080_v51, 0  ;;  %v6085_v4 = vpack.c.bf16 %v5923_v62, %v5923_v62  ;;  %v6229_v9 = vsel %vm1800_vm2, %v6082_v63, 0 }
 0xfa0   : > { %v16886_v14 = vpop.f32.mrf.mxu0  ;;  %v5774_v51 = vadd.f32 %v20075_v59, %v20150_v29  ;;  %v5776_v59 = vadd.f32 %v20150_v29, %v20085_v55 }
 0xfa1   : > { %v6083_v0 = vpack.c.bf16 %v5921_v49, %v5921_v49  ;;  %v6367_v23 = vsel %vm1800_vm2, %v6085_v4, 0 }
 0xfa2   : > { %v5897_v48 = vpop.f32.mrf.mxu0 }
 0xfa3   : > { %v6275_v22 = vsel %vm1800_vm2, %v6083_v0, 0  ;;  %16914 = vmatmul.mubr.msk.bf16.vlgmr.msra.gmra.mxu0 %vm1800_vm2, %v6071_v7  ;;  %v5922_v44 = vadd.f32 %v20142_v56, %v5897_v48  ;;  %v6074_v7 = vpack.c.bf16 %v5774_v51, %v5774_v51  ;;  %v5924_v0 = vadd.f32 %v16886_v14, %v20142_v56 }
 0xfa4   : > { %16918 = vmatpush3.bf16.xpose.msra.mxu0 %v6137_v20  ;;  %16936 = vmatpush3.bf16.xpose.msra.mxu1 %v6275_v22  ;;  %v6076_v22 = vpack.c.bf16 %v5776_v59, %v5776_v59  ;;  %v6064_v20 = vadd.f32 %v20090_v2, %v20100_v6 }
 0xfa5   : > { %16919 = vmatprep.mubr.msk.bf16.mxu0 %vm18647_vm1, %v18646_v31  ;;  %16923 = vmatprep.subr.bf16.mxu0 %v18646_v31  ;;  %v6084_v49 = vpack.c.bf16 %v5922_v44, %v5922_v44  ;;  %v6086_v62 = vpack.c.bf16 %v5924_v0, %v5924_v0 }
 0xfa6   : > { %16947 = vmatprep.subr.bf16.mxu1 %v18646_v31  ;;  %v6568_v55 = vpack.c.bf16 %v6064_v20, %v6064_v20 }
 0xfa7   : > { %v6321_v15 = vsel %vm1800_vm2, %v6084_v49, 0  ;;  %v6413_v56 = vsel %vm1800_vm2, %v6086_v62, 0 }
 0xfa8   : > { %v6625_v18 = vsel %vm2294_vm3, %v6568_v55, 0 }
 0xfab   : > { %16920 = vmatmul.mubr.msk.bf16.vlgmr.msra.gmra.mxu0 %vm1800_vm2, %v6072_v54  ;;  %16938 = vmatmul.mubr.msk.bf16.vlgmr.msra.gmra.mxu1 %vm1800_vm2, %v6075_v52 }
 0xfac   : > { %16924 = vmatpush3.bf16.xpose.msra.mxu0 %v6183_v35  ;;  %16948 = vmatpush3.bf16.xpose.msra.mxu1 %v6367_v23 }
 0xfad   : > { %16925 = vmatprep.mubr.msk.bf16.mxu0 %vm18647_vm1, %v18646_v31  ;;  %16949 = vmatprep.mubr.msk.bf16.mxu1 %vm18647_vm1, %v18646_v31 }
 0xfae   : > { %16929 = vmatprep.subr.bf16.mxu0 %v18646_v31  ;;  %16959 = vmatprep.subr.bf16.mxu1 %v18646_v31 }
 0xfb3   : > { %16926 = vmatmul.mubr.msk.bf16.vlgmr.msra.gmra.mxu0 %vm1800_vm2, %v6073_v5  ;;  %16950 = vmatmul.mubr.msk.bf16.vlgmr.msra.gmra.mxu1 %vm1800_vm2, %v6077_v10 }
 0xfb4   : > { %16930 = vmatpush3.bf16.xpose.msra.mxu0 %v6229_v9  ;;  %16960 = vmatpush3.bf16.msra.mxu1 %v6579_v33 }
 0xfb5   : > { %16931 = vmatprep.mubr.msk.bf16.mxu0 %vm18647_vm1, %v18646_v31  ;;  %16941 = vmatprep.subr.bf16.mxu0 %v18646_v31 }
 0xfb6   : > { %16961 = vmatprep.mubr.msk.bf16.mxu1 %vm18647_vm1, %v18646_v31  ;;  %16971 = vmatprep.subr.bf16.mxu1 %v18646_v31 }
 0xfbb   : > { %16932 = vmatmul.mubr.msk.bf16.vlgmr.msra.gmra.mxu0 %vm1800_vm2, %v6074_v7 }
 0xfbc   : > { %16942 = vmatpush3.bf16.xpose.msra.mxu0 %v6321_v15  ;;  %16943 = vmatprep.mubr.msk.bf16.mxu0 %vm18647_vm1, %v18646_v31 }
 0xfbd   : > { %16953 = vmatprep.subr.bf16.mxu0 %v18646_v31 }
 0xfc3   : > { %16944 = vmatmul.mubr.msk.bf16.vlgmr.msra.gmra.mxu0 %vm1800_vm2, %v6076_v22 }
 0xfc4   : > { %16954 = vmatpush3.bf16.xpose.msra.mxu0 %v6413_v56  ;;  %16955 = vmatprep.mubr.msk.bf16.mxu0 %vm18647_vm1, %v18646_v31 }
 0xfc5   : > { %16965 = vmatprep.subr.bf16.mxu0 %v18646_v31 }
 0xfcb   : > { %16956 = vmatmul.mubr.msk.bf16.vlgmr.msra.gmra.mxu0 %vm1800_vm2, %v6078_v43 }
 0xfcc   : > { %16966 = vmatpush3.bf16.msra.mxu0 %v6625_v18  ;;  %16967 = vmatprep.mubr.msk.bf16.mxu0 %vm18647_vm1, %v18646_v31 }
 0xfcd   : > { %16977 = vmatprep.subr.bf16.mxu0 %v18646_v31 }
0x1063   : > { %v6127_v6 = vpop.f32.mrf.mxu0 }
0x1064   : > { %v6455_v4 = vmul.f32 0.35355338, %v6127_v6 }
0x1065   : > { %v16915_v54 = vpop.f32.mrf.mxu0 }
0x1066   : > { %v20222_v13 = vsel %vm801_vm4, %v6455_v4, -1e+30 }
0x1067   : > { %v6130_v29 = vpop.f32.mrf.mxu0  ;;  %v6471_v52 = vsel %vm1800_vm2, %v20222_v13, -inf }
0x1068   : > { %6472 = vmax.xlane.f32.xlu0 %v6471_v52 }
0x1069   : > { %v16916_v35 = vpop.f32.mrf.mxu0 }
0x106b   : > { %v6173_v41 = vpop.f32.mrf.mxu0  ;;  %v6311_v23 = vpop.f32.mrf.mxu1 }
0x106c   : > { %v6456_v14 = vmul.f32 0.35355338, %v6173_v41  ;;  %v6459_v51 = vmul.f32 0.35355338, %v6311_v23 }
0x106d   : > { %v16921_v12 = vpop.f32.mrf.mxu0  ;;  %v16939_v38 = vpop.f32.mrf.mxu1 }
0x106e   : > { %v6464_v30 = vsel %vm801_vm4, %v6456_v14, -1e+30  ;;  %v6467_v56 = vsel %vm801_vm4, %v6459_v51, -1e+30 }
0x106f   : > { %v6176_v63 = vpop.f32.mrf.mxu0  ;;  %v6314_v48 = vpop.f32.mrf.mxu1  ;;  %v6474_v5 = vsel %vm1800_vm2, %v6464_v30, -inf  ;;  %v6483_v18 = vsel %vm1800_vm2, %v6467_v56, -inf }
0x1070   : > { %6475 = vmax.xlane.f32.xlu1 %v6474_v5 }
0x1071   : > { %v16922_v10 = vpop.f32.mrf.mxu0  ;;  %v16940_v33 = vpop.f32.mrf.mxu1 }
0x1073   : > { %v6219_v9 = vpop.f32.mrf.mxu0  ;;  %v6403_v44 = vpop.f32.mrf.mxu1 }
0x1074   : > { %v6457_v49 = vmul.f32 0.35355338, %v6219_v9  ;;  %v6461_v20 = vmul.f32 0.35355338, %v6403_v44 }
0x1075   : > { %v16927_v7 = vpop.f32.mrf.mxu0  ;;  %v16951_v0 = vpop.f32.mrf.mxu1 }
0x1076   : > { %v6465_v15 = vsel %vm801_vm4, %v6457_v49, -1e+30  ;;  %v6469_v4 = vsel %vm801_vm4, %v6461_v20, -1e+30 }
0x1077   : > { %v6222_v59 = vpop.f32.mrf.mxu0  ;;  %v6406_v62 = vpop.f32.mrf.mxu1  ;;  %v6477_v22 = vsel %vm1800_vm2, %v6465_v15, -inf  ;;  %v6489_v41 = vsel %vm1800_vm2, %v6469_v4, -inf }
0x1078   : > { %6478 = vmax.xlane.f32.xlu0 %v6477_v22 }
0x1079   : > { %v16928_v61 = vpop.f32.mrf.mxu0  ;;  %v16952_v55 = vpop.f32.mrf.mxu1 }
0x107b   : > { %v6265_v43 = vpop.f32.mrf.mxu0 }
0x107c   : > { %v6458_v6 = vmul.f32 0.35355338, %v6265_v43  ;;  %6484 = vmax.xlane.f32.xlu0 %v6483_v18 }
0x107d   : > { %v16933_v54 = vpop.f32.mrf.mxu0 }
0x107e   : > { %v6466_v29 = vsel %vm801_vm4, %v6458_v6, -1e+30 }
0x107f   : > { %v6268_v52 = vpop.f32.mrf.mxu0  ;;  %v6480_v35 = vsel %vm1800_vm2, %v6466_v29, -inf }
0x1080   : > { %6481 = vmax.xlane.f32.xlu1 %v6480_v35  ;;  %6490 = vmax.xlane.f32.xlu0 %v6489_v41 }
0x1081   : > { %v16934_v23 = vpop.f32.mrf.mxu0 }
0x1083   : > { %v6357_v14 = vpop.f32.mrf.mxu0 }
0x1084   : > { %v6460_v12 = vmul.f32 0.35355338, %v6357_v14 }
0x1085   : > { %v16945_v38 = vpop.f32.mrf.mxu0 }
0x1086   : > { %v6468_v63 = vsel %vm801_vm4, %v6460_v12, -1e+30 }
0x1087   : > { %v6360_v48 = vpop.f32.mrf.mxu0  ;;  %v6486_v5 = vsel %vm1800_vm2, %v6468_v63, -inf }
0x1088   : > { %6487 = vmax.xlane.f32.xlu1 %v6486_v5 }
0x1089   : > { %v16946_v10 = vpop.f32.mrf.mxu0 }
0x108b   : > { %v6449_v33 = vpop.f32.mrf.mxu0 }
0x108c   : > { %v6462_v9 = vmul.f32 0.35355338, %v6449_v33 }
0x108d   : > { %v16957_v44 = vpop.f32.mrf.mxu0 }
0x108e   : > { %v6470_v51 = vsel %vm801_vm4, %v6462_v9, -1e+30 }
0x108f   : > { %v6452_v49 = vpop.f32.mrf.mxu0  ;;  %v6492_v7 = vsel %vm1800_vm2, %v6470_v51, -inf }
0x1090   : > { %6493 = vmax.xlane.f32.xlu1 %v6492_v7 }
0x1091   : > { %v16958_v0 = vpop.f32.mrf.mxu0 }
0x10f1   : > { %v6473_v59 = vpop.xlane.xlu0 %6472 }
0x10f2   : > { %v6495_v62 = vsub.f32 %v20222_v13, %v6473_v59 }
0x10f4   : > { %v6503_v22 = vmul.f32 1.442695, %v6495_v62 }
0x10f6   : > { %18310 = vpow2.f32 %v6503_v22 }
0x10f9   : > { %v6476_v20 = vpop.xlane.xlu1 %6475 }
0x10fa   : > { %v6496_v61 = vsub.f32 %v6464_v30, %v6476_v20 }
0x10fc   : > { %v6505_v55 = vmul.f32 1.442695, %v6496_v61 }
0x10fe   : > { %18312 = vpow2.f32 %v6505_v55 }
0x1101   : > { %v6479_v43 = vpop.xlane.xlu0 %6478 }
0x1102   : > { %v6497_v18 = vsub.f32 %v6465_v15, %v6479_v43 }
0x1103   : > { %v18311_v6 = vpop.eup %18310 }
0x1104   : > { %v6507_v54 = vmul.f32 1.442695, %v6497_v18  ;;  %v6519_v52 = vsel %vm1800_vm2, %v18311_v6, 0.0 }
0x1105   : > { %v6485_v35 = vpop.xlane.xlu0 %6484  ;;  %6520 = vadd.xlane.f32.xlu0 %v6519_v52  ;;  %v6569_v52 = vpack.c.bf16 %v20093_v42, %v20093_v42  ;;  %v6570_v42 = vpack.c.bf16 %v20098_v36, %v20098_v36  ;;  %v6571_v36 = vpack.c.bf16 %v20106_v37, %v20106_v37 }
0x1106   : > { %18314 = vpow2.f32 %v6507_v54  ;;  %v6499_v41 = vsub.f32 %v6467_v56, %v6485_v35 }
0x1108   : > { %v6511_v23 = vmul.f32 1.442695, %v6499_v41 }
0x1109   : > { %v6482_v14 = vpop.xlane.xlu1 %6481  ;;  %v6491_v12 = vpop.xlane.xlu0 %6490 }
0x110a   : > { %18316 = vpow2.f32 %v6511_v23  ;;  %v6498_v13 = vsub.f32 %v6466_v29, %v6482_v14  ;;  %v6501_v38 = vsub.f32 %v6469_v4, %v6491_v12  ;;  %v6671_v14 = vsel %vm2294_vm3, %v6569_v52, 0 }
0x110b   : > { %v18313_v48 = vpop.eup %18312 }
0x110c   : > { %v6509_v30 = vmul.f32 1.442695, %v6498_v13  ;;  %v6515_v5 = vmul.f32 1.442695, %v6501_v38  ;;  %v6522_v10 = vsel %vm1800_vm2, %v18313_v48, 0.0 }
0x110d   : > { %6523 = vadd.xlane.f32.xlu1 %v6522_v10  ;;  %v6717_v10 = vsel %vm2294_vm3, %v6570_v42, 0 }
0x110e   : > { %18318 = vpow2.f32 %v6509_v30 }
0x110f   : > { %18320 = vpow2.f32 %v6515_v5 }
0x1111   : > { %v6488_v15 = vpop.xlane.xlu1 %6487 }
0x1112   : > { %v6500_v33 = vsub.f32 %v6468_v63, %v6488_v15 }
0x1113   : > { %v18315_v9 = vpop.eup %18314 }
0x1114   : > { %v6513_v44 = vmul.f32 1.442695, %v6500_v33  ;;  %v6525_v56 = vsel %vm1800_vm2, %v18315_v9, 0.0 }
0x1115   : > { %6526 = vadd.xlane.f32.xlu0 %v6525_v56 }
0x1116   : > { %18322 = vpow2.f32 %v6513_v44 }
0x1117   : > { %v18317_v49 = vpop.eup %18316 }
0x1118   : > { %v6531_v29 = vsel %vm1800_vm2, %v18317_v49, 0.0 }
0x1119   : > { %6532 = vadd.xlane.f32.xlu0 %v6531_v29  ;;  %v6494_v4 = vpop.xlane.xlu1 %6493  ;;  %v6763_v29 = vsel %vm2294_vm3, %v6571_v36, 0 }
0x111a   : > { %v6502_v7 = vsub.f32 %v6470_v51, %v6494_v4  ;;  %v6068_v4 = vadd.f32 %v20090_v2, %v20226_v58 }
0x111b   : > { %v18319_v0 = vpop.eup %18318 }
0x111c   : > { %v20254_v59 = vpop.eup %18320  ;;  %v6517_v62 = vmul.f32 1.442695, %v6502_v7  ;;  %v6528_v22 = vsel %vm1800_vm2, %v18319_v0, 0.0 }
0x111d   : > { %v6537_v63 = vsel %vm1800_vm2, %v20254_v59, 0.0  ;;  %6529 = vadd.xlane.f32.xlu1 %v6528_v22 }
0x111e   : > { %18324 = vpow2.f32 %v6517_v62  ;;  %6538 = vadd.xlane.f32.xlu0 %v6537_v63  ;;  %v6572_v62 = vpack.c.bf16 %v6068_v4, %v6068_v4 }
0x1123   : > { %v20259_v20 = vpop.eup %18322 }
0x1124   : > { %v6534_v61 = vsel %vm1800_vm2, %v20259_v20, 0.0 }
0x1125   : > { %6535 = vadd.xlane.f32.xlu1 %v6534_v61 }
0x112b   : > { %v20263_v55 = vpop.eup %18324 }
0x112c   : > { %v6540_v51 = vsel %vm1800_vm2, %v20263_v55, 0.0 }
0x112d   : > { %6541 = vadd.xlane.f32.xlu1 %v6540_v51 }
0x118e   : > { %v6521_v43 = vpop.xlane.xlu0 %6520 }
0x118f   : > { %18326 = vrcp.f32 %v6521_v43 }
0x1196   : > { %v6524_v18 = vpop.xlane.xlu1 %6523 }
0x1197   : > { %18328 = vrcp.f32 %v6524_v18 }
0x119c   : > { %v18327_v54 = vpop.eup %18326 }
0x119d   : > { %v6551_v35 = vmul.f32 %v18327_v54, %v18311_v6 }
0x119e   : > { %v6527_v41 = vpop.xlane.xlu0 %6526 }
0x119f   : > { %v6559_v23 = vpack.c.bf16 %v6551_v35, %v6551_v35  ;;  %18330 = vrcp.f32 %v6527_v41 }
0x11a1   : > { %16962 = vmatmul.mubr.msk.bf16.vlgmr.msra.gmra.mxu1 %vm1800_vm2, %v6559_v23 }
0x11a2   : > { %16972 = vmatpush3.bf16.msra.mxu1 %v6671_v14  ;;  %v6533_v12 = vpop.xlane.xlu0 %6532  ;;  %16973 = vmatprep.mubr.msk.bf16.mxu1 %vm18647_vm1, %v18646_v31 }
0x11a3   : > { %18332 = vrcp.f32 %v6533_v12  ;;  %16983 = vmatprep.subr.bf16.mxu1 %v18646_v31 }
0x11a4   : > { %v18329_v13 = vpop.eup %18328 }
0x11a5   : > { %v6552_v6 = vmul.f32 %v18329_v13, %v18313_v48 }
0x11a6   : > { %v6530_v38 = vpop.xlane.xlu1 %6529 }
0x11a7   : > { %v6560_v30 = vpack.c.bf16 %v6552_v6, %v6552_v6  ;;  %18334 = vrcp.f32 %v6530_v38  ;;  %v6539_v5 = vpop.xlane.xlu0 %6538 }
0x11a8   : > { %18336 = vrcp.f32 %v6539_v5 }
0x11a9   : > { %16968 = vmatmul.mubr.msk.bf16.vlgmr.msra.gmra.mxu0 %vm1800_vm2, %v6560_v30 }
0x11aa   : > { %16978 = vmatpush3.bf16.msra.mxu0 %v6717_v10  ;;  %16979 = vmatprep.mubr.msk.bf16.mxu0 %vm18647_vm1, %v18646_v31 }
0x11ab   : > { %16989 = vmatprep.subr.bf16.mxu0 %v18646_v31 }
0x11ac   : > { %v18331_v15 = vpop.eup %18330 }
0x11ad   : > { %v6553_v48 = vmul.f32 %v18331_v15, %v18315_v9  ;;  %v6573_v9 = vpack.c.bf16 %v20103_v16, %v20103_v16 }
0x11ae   : > { %v6536_v33 = vpop.xlane.xlu1 %6535 }
0x11af   : > { %v6561_v44 = vpack.c.bf16 %v6553_v48, %v6553_v48  ;;  %18338 = vrcp.f32 %v6536_v33  ;;  %v6855_v58 = vsel %vm2294_vm3, %v6573_v9, 0 }
0x11b0   : > { %v18333_v56 = vpop.eup %18332 }
0x11b1   : > { %16974 = vmatmul.mubr.msk.bf16.vlgmr.msra.gmra.mxu1 %vm1800_vm2, %v6561_v44  ;;  %v6555_v7 = vmul.f32 %v18333_v56, %v18317_v49  ;;  %v6809_v49 = vsel %vm2294_vm3, %v6572_v62, 0 }
0x11b2   : > { %16984 = vmatpush3.bf16.msra.mxu1 %v6763_v29  ;;  %16985 = vmatprep.mubr.msk.bf16.mxu1 %vm18647_vm1, %v18646_v31 }
0x11b3   : > { %16995 = vmatprep.subr.bf16.mxu1 %v18646_v31  ;;  %v6563_v61 = vpack.c.bf16 %v6555_v7, %v6555_v7 }
0x11b4   : > { %v18335_v37 = vpop.eup %18334 }
0x11b5   : > { %v6554_v22 = vmul.f32 %v18335_v37, %v18319_v0  ;;  %v18337_v2 = vpop.eup %18336  ;;  %v6574_v0 = vpack.c.bf16 %v20109_v19, %v20109_v19  ;;  %v14995_v19 = vld [vmem:[%s22257_s13 + $0xc] sm:$0xf] }
0x11b6   : > { %v6542_v63 = vpop.xlane.xlu1 %6541  ;;  %v6557_v43 = vmul.f32 %v18337_v2, %v20254_v59 }
0x11b7   : > { %v6562_v51 = vpack.c.bf16 %v6554_v22, %v6554_v22  ;;  %18340 = vrcp.f32 %v6542_v63  ;;  %v6901_v35 = vsel %vm2294_vm3, %v6574_v0, 0 }
0x11b8   : > { %v6565_v54 = vpack.c.bf16 %v6557_v43, %v6557_v43 }
0x11b9   : > { %16980 = vmatmul.mubr.msk.bf16.vlgmr.msra.gmra.mxu0 %vm1800_vm2, %v6562_v51  ;;  %16986 = vmatmul.mubr.msk.bf16.vlgmr.msra.gmra.mxu1 %vm1800_vm2, %v6563_v61 }
0x11ba   : > { %16990 = vmatpush3.bf16.msra.mxu0 %v6809_v49  ;;  %16996 = vmatpush3.bf16.msra.mxu1 %v6855_v58 }
0x11bb   : > { %16991 = vmatprep.mubr.msk.bf16.mxu0 %vm18647_vm1, %v18646_v31  ;;  %16997 = vmatprep.mubr.msk.bf16.mxu1 %vm18647_vm1, %v18646_v31 }
0x11bc   : > { %v18339_v16 = vpop.eup %18338  ;;  %17001 = vmatprep.subr.bf16.mxu0 %v18646_v31  ;;  %17868 = vmatprep.subr.msk.bf16.mxu1 %vm2294_vm3, %v14995_v19 }
0x11bd   : > { %v6556_v18 = vmul.f32 %v18339_v16, %v20259_v20  ;;  %v6986_v20 = vsel %vm2294_vm3, %v14995_v19, 0  ;;  %v4198_v19 = vadd.f32 %v19794_v1, %v19477_v39 }
0x11bf   : > { %v6564_v52 = vpack.c.bf16 %v6556_v18, %v6556_v18 }
0x11c1   : > { %16992 = vmatmul.mubr.msk.bf16.vlgmr.msra.gmra.mxu0 %vm1800_vm2, %v6564_v52  ;;  %16998 = vmatmul.mubr.msk.bf16.vlgmr.msra.gmra.mxu1 %vm1800_vm2, %v6565_v54 }
0x11c2   : > { %17002 = vmatpush3.bf16.msra.mxu0 %v6901_v35  ;;  %17003 = vmatprep.mubr.msk.bf16.mxu0 %vm18647_vm1, %v18646_v31 }
0x11c3   : > { %17008 = vmatpush3.bf16.msra.mxu1 %v6986_v20 }
0x11c4   : > { %v18341_v59 = vpop.eup %18340 }
0x11c5   : > { %v6558_v41 = vmul.f32 %v18341_v59, %v20263_v55 }
0x11c7   : > { %v6566_v23 = vpack.c.bf16 %v6558_v41, %v6558_v41 }
0x11c9   : > { %17004 = vmatmul.mubr.msk.bf16.vlgmr.msra.gmra.mxu0 %vm1800_vm2, %v6566_v23 }
0x1261   : > { %v6615_v14 = vpop.f32.mrf.mxu1 }
0x1263   : > { %v16963_v12 = vpop.f32.mrf.mxu1 }
0x1264   : > { %v5626_v12 = vadd.f32 %v20123_v21, %v4198_v19 }
0x1265   : > { %v6618_v13 = vpop.f32.mrf.mxu1 }
0x1267   : > { %v16964_v42 = vpop.f32.mrf.mxu1 }
0x1269   : > { %v6661_v6 = vpop.f32.mrf.mxu0 }
0x126a   : > { %v15575_v38 = vpack.c.bf16 %v6661_v6, %v6615_v14 }
0x126b   : > { %v16969_v30 = vpop.f32.mrf.mxu0 }
0x126c   : > { %17009 = vmatprep.mubr.msk.bf16.mxu1 %vm1800_vm2, %v15575_v38  ;;  %v15004_v38 = vld [vmem:[%s22258_s14] ss:$0 sm:$0xff] }
0x126d   : > { %v6664_v55 = vpop.f32.mrf.mxu0 }
0x126f   : > { %v16970_v5 = vpop.f32.mrf.mxu0 }
0x1271   : > { %v6707_v10 = vpop.f32.mrf.mxu1 }
0x1273   : > { %v16975_v15 = vpop.f32.mrf.mxu1 }
0x1275   : > { %v6710_v36 = vpop.f32.mrf.mxu1 }
0x1276   : > { %v4202_v36 = vadd.f32 %v19802_v3, %v19485_v46 }
0x1277   : > { %v16976_v48 = vpop.f32.mrf.mxu1 }
0x1279   : > { %v6753_v33 = vpop.f32.mrf.mxu0  ;;  %v6799_v44 = vpop.f32.mrf.mxu1 }
0x127a   : > { %v15576_v56 = vpack.c.bf16 %v6753_v33, %v6707_v10 }
0x127b   : > { %v16981_v29 = vpop.f32.mrf.mxu0  ;;  %v16987_v4 = vpop.f32.mrf.mxu1 }
0x127c   : > { %17010 = vmatmul.mubr.msk.bf16.vlgmr.msra.gmra.mxu1 %vm1800_vm2, %v15576_v56 }
0x127d   : > { %v6756_v7 = vpop.f32.mrf.mxu0  ;;  %v6802_v37 = vpop.f32.mrf.mxu1 }
0x127f   : > { %v16982_v9 = vpop.f32.mrf.mxu0  ;;  %v16988_v62 = vpop.f32.mrf.mxu1 }
0x1281   : > { %v6845_v22 = vpop.f32.mrf.mxu0  ;;  %v6891_v63 = vpop.f32.mrf.mxu1 }
0x1282   : > { %v15577_v61 = vpack.c.bf16 %v6845_v22, %v6799_v44  ;;  %v5630_v44 = vadd.f32 %v20137_v24, %v4202_v36 }
0x1283   : > { %v16993_v51 = vpop.f32.mrf.mxu0  ;;  %v16999_v2 = vpop.f32.mrf.mxu1 }
0x1284   : > { %17013 = vmatprep.mubr.msk.bf16.mxu1 %vm1800_vm2, %v15577_v61 }
0x1285   : > { %v6848_v58 = vpop.f32.mrf.mxu0  ;;  %v6894_v49 = vpop.f32.mrf.mxu1 }
0x1287   : > { %v16994_v43 = vpop.f32.mrf.mxu0  ;;  %v17000_v16 = vpop.f32.mrf.mxu1 }
0x1289   : > { %v6937_v0 = vpop.f32.mrf.mxu0 }
0x128a   : > { %v15578_v18 = vpack.c.bf16 %v6937_v0, %v6891_v63 }
0x128b   : > { %v17005_v54 = vpop.f32.mrf.mxu0 }
0x128c   : > { %17014 = vmatmul.mubr.msk.bf16.gmra.mxu1 %vm1800_vm2, %v15578_v18 }
0x128d   : > { %v6940_v52 = vpop.f32.mrf.mxu0 }
0x128f   : > { %v17006_v35 = vpop.f32.mrf.mxu0 }
0x133c   : > { %v17011_v59 = vpop.f32.mrf.mxu1 }
0x133d   : > { %v7055_v41 = vadd.f32 %v17011_v59, %v20115_v11 }
0x133e   : > { %v7022_v23 = vpop.f32.mrf.mxu1 }
0x133f   : > { %v7053_v20 = vadd.f32 %v7022_v23, %v20119_v60  ;;  %v7063_v13 = vadd.f32 %v7055_v41, %v18968_v27 }
0x1340   : > { %v17012_v14 = vpop.f32.mrf.mxu1 }
0x1341   : > { %v7061_v42 = vadd.f32 %v7053_v20, %v18958_v8  ;;  %v7056_v6 = vadd.f32 %v17012_v14, %v20121_v57  ;;  %v20334_v39 = vadd.f32 %v15004_v38, %v7063_v13 }
0x1342   : > { %v7025_v11 = vpop.f32.mrf.mxu1 }
0x1343   : > { %v20332_v30 = vadd.f32 %v15004_v38, %v7061_v42  ;;  %v7054_v55 = vadd.f32 %v7025_v11, %v5626_v12  ;;  %v7064_v1 = vadd.f32 %v7056_v6, %v18973_v34  ;;  %v7088_v21 = vmul.f32 %v18901_v32, %v20334_v39  ;;  %v18038_v6 = vld [vmem:[%s22261_s17 + $0x38] sm:$0xff]  }
0x1344   : > { %17017 = vmatprep.subr.bf16.mxu0 %v18038_v6 }
0x1345   : > { %v7062_v60 = vadd.f32 %v7054_v55, %v18963_v17  ;;  %v7086_v27 = vmul.f32 %v18901_v32, %v20332_v30  ;;  %v20342_v57 = vadd.f32 %v15004_v38, %v7064_v1  ;;  %17018 = vmatpush3.bf16.msra.mxu0 %v18038_v6 }
0x1347   : > { %v20340_v8 = vadd.f32 %v15004_v38, %v7062_v60  ;;  %7094 = vadd.xlane.f32.xlu0 %v7086_v27  ;;  %v7089_v17 = vmul.f32 %v18901_v32, %v20342_v57 }
0x1349   : > { %v7087_v5 = vmul.f32 %v18901_v32, %v20340_v8 }
0x134b   : > { %7098 = vadd.xlane.f32.xlu0 %v7088_v21  ;;  %7096 = vadd.xlane.f32.xlu1 %v7087_v5  ;;  %v18039_v5 = vld [vmem:[%s22261_s17 + $0x30] sm:$0xff]  }
0x134c   : > { %v17015_v10 = vpop.f32.mrf.mxu1  ;;  %17019 = vmatprep.subr.bf16.mxu0 %v18039_v5 }
0x134d   : > { %v7059_v34 = vadd.f32 %v17015_v10, %v20129_v28  ;;  %17020 = vmatpush3.bf16.msra.mxu0 %v18039_v5 }
0x134e   : > { %v7038_v15 = vpop.f32.mrf.mxu1 }
0x134f   : > { %v7057_v48 = vadd.f32 %v7038_v15, %v20133_v26  ;;  %7100 = vadd.xlane.f32.xlu1 %v7089_v17  ;;  %v7067_v56 = vadd.f32 %v7059_v34, %v18988_v50 }
0x1350   : > { %v17016_v33 = vpop.f32.mrf.mxu1 }
0x1351   : > { %v7065_v29 = vadd.f32 %v7057_v48, %v18978_v40  ;;  %v7060_v4 = vadd.f32 %v17016_v33, %v20135_v47  ;;  %v20360_v9 = vadd.f32 %v15004_v38, %v7067_v56  ;;  %v18040_v33 = vld [vmem:[%s22261_s17 + $0x28] sm:$0xff]  }
0x1352   : > { %v7041_v28 = vpop.f32.mrf.mxu1  ;;  %17021 = vmatprep.subr.bf16.mxu0 %v18040_v33 }
0x1353   : > { %v20358_v7 = vadd.f32 %v15004_v38, %v7065_v29  ;;  %v7058_v37 = vadd.f32 %v7041_v28, %v5630_v44  ;;  %v7068_v46 = vadd.f32 %v7060_v4, %v18993_v53  ;;  %v7092_v40 = vmul.f32 %v18901_v32, %v20360_v9  ;;  %17022 = vmatpush3.bf16.msra.mxu0 %v18040_v33  ;;  %v18041_v29 = vld [vmem:[%s22261_s17 + $0x20] sm:$0xff]   ;;  %v18042_v4 = vld [vmem:[%s22261_s17 + $0x18] sm:$0xff]   ;;  %v18043_v28 = vld [vmem:[%s22261_s17 + $0x10] sm:$0xff]  }
0x1354   : > { %17023 = vmatprep.subr.bf16.mxu0 %v18041_v29 }
0x1355   : > { %v7066_v3 = vadd.f32 %v7058_v37, %v18983_v45  ;;  %v7090_v26 = vmul.f32 %v18901_v32, %v20358_v7  ;;  %v20368_v50 = vadd.f32 %v15004_v38, %v7068_v46  ;;  %v18044_v37 = vld [vmem:[%s22261_s17 + $0x8] sm:$0xff]   ;;  %v18045_v46 = vld [vmem:[%s22261_s17] sm:$0xff]  }
0x1357   : > { %v20366_v24 = vadd.f32 %v15004_v38, %v7066_v3  ;;  %7102 = vadd.xlane.f32.xlu0 %v7090_v26  ;;  %v7093_v53 = vmul.f32 %v18901_v32, %v20368_v50  ;;  %17024 = vmatpush3.bf16.msra.mxu0 %v18041_v29 }
0x1358   : > { %17025 = vmatprep.subr.bf16.mxu0 %v18042_v4 }
0x1359   : > { %v7091_v47 = vmul.f32 %v18901_v32, %v20366_v24 }
0x135b   : > { %7106 = vadd.xlane.f32.xlu0 %v7092_v40  ;;  %7104 = vadd.xlane.f32.xlu1 %v7091_v47 }
0x135c   : > { %17026 = vmatpush3.bf16.msra.mxu0 %v18042_v4 }
0x135d   : > { %17027 = vmatprep.subr.bf16.mxu0 %v18043_v28 }
0x135f   : > { %7108 = vadd.xlane.f32.xlu1 %v7093_v53 }
0x1360   : > { %17028 = vmatpush3.bf16.msra.mxu0 %v18043_v28 }
0x1361   : > { %17029 = vmatprep.subr.bf16.mxu0 %v18044_v37 }
0x1364   : > { %17030 = vmatpush3.bf16.msra.mxu0 %v18044_v37 }
0x1365   : > { %17031 = vmatprep.subr.bf16.mxu0 %v18045_v46 }
0x1368   : > { %17032 = vmatpush3.bf16.msra.mxu0 %v18045_v46 }
0x13d0   : > { %v7095_v45 = vpop.xlane.xlu0 %7094 }
0x13d1   : > { %v7110_v62 = vmul.f32 0.03125, %v7095_v45 }
0x13d3   : > { %v7118_v22 = vsub.f32 %v20332_v30, %v7110_v62 }
0x13d4   : > { %v7099_v63 = vpop.xlane.xlu0 %7098  ;;  %v7097_v61 = vpop.xlane.xlu1 %7096 }
0x13d5   : > { %v20378_v51 = vmul.f32 %v18901_v32, %v7118_v22  ;;  %v7112_v2 = vmul.f32 0.03125, %v7099_v63  ;;  %v7111_v58 = vmul.f32 0.03125, %v7097_v61 }
0x13d7   : > { %v7120_v49 = vsub.f32 %v20334_v39, %v7112_v2  ;;  %v7119_v43 = vsub.f32 %v20340_v8, %v7111_v58  ;;  %v7134_v16 = vmul.f32 %v20378_v51, %v20378_v51 }
0x13d8   : > { %v7101_v0 = vpop.xlane.xlu1 %7100 }
0x13d9   : > { %v20385_v18 = vmul.f32 %v18901_v32, %v7120_v49  ;;  %v20388_v54 = vmul.f32 %v18901_v32, %v7119_v43  ;;  %v7113_v52 = vmul.f32 0.03125, %v7101_v0  ;;  %7142 = vadd.xlane.f32.xlu0 %v7134_v16 }
0x13db   : > { %v7121_v35 = vsub.f32 %v20342_v57, %v7113_v52  ;;  %v7136_v59 = vmul.f32 %v20385_v18, %v20385_v18  ;;  %v7135_v41 = vmul.f32 %v20388_v54, %v20388_v54 }
0x13dd   : > { %v20396_v23 = vmul.f32 %v18901_v32, %v7121_v35  ;;  %7146 = vadd.xlane.f32.xlu0 %v7136_v59  ;;  %7144 = vadd.xlane.f32.xlu1 %v7135_v41 }
0x13df   : > { %v7137_v19 = vmul.f32 %v20396_v23, %v20396_v23 }
0x13e0   : > { %v7103_v20 = vpop.xlane.xlu0 %7102 }
0x13e1   : > { %v7114_v14 = vmul.f32 0.03125, %v7103_v20  ;;  %7148 = vadd.xlane.f32.xlu1 %v7137_v19  ;;  %v15005_v20 = vld [vmem:[%s22259_s15] ss:$0 sm:$0xff] }
0x13e3   : > { %v7122_v12 = vsub.f32 %v20358_v7, %v7114_v14 }
0x13e4   : > { %v7107_v13 = vpop.xlane.xlu0 %7106  ;;  %v7105_v42 = vpop.xlane.xlu1 %7104 }
0x13e5   : > { %v20405_v38 = vmul.f32 %v18901_v32, %v7122_v12  ;;  %v7116_v11 = vmul.f32 0.03125, %v7107_v13  ;;  %v7115_v55 = vmul.f32 0.03125, %v7105_v42 }
0x13e7   : > { %v7124_v1 = vsub.f32 %v20360_v9, %v7116_v11  ;;  %v7123_v60 = vsub.f32 %v20366_v24, %v7115_v55  ;;  %v7138_v27 = vmul.f32 %v20405_v38, %v20405_v38 }
0x13e8   : > { %v7109_v21 = vpop.xlane.xlu1 %7108 }
0x13e9   : > { %v20415_v10 = vmul.f32 %v18901_v32, %v7124_v1  ;;  %v20418_v34 = vmul.f32 %v18901_v32, %v7123_v60  ;;  %v7117_v17 = vmul.f32 0.03125, %v7109_v21  ;;  %7150 = vadd.xlane.f32.xlu0 %v7138_v27 }
0x13eb   : > { %v7125_v15 = vsub.f32 %v20368_v50, %v7117_v17  ;;  %v7140_v36 = vmul.f32 %v20415_v10, %v20415_v10  ;;  %v7139_v48 = vmul.f32 %v20418_v34, %v20418_v34 }
0x13ed   : > { %v20429_v44 = vmul.f32 %v18901_v32, %v7125_v15  ;;  %7154 = vadd.xlane.f32.xlu0 %v7140_v36  ;;  %7152 = vadd.xlane.f32.xlu1 %v7139_v48 }
0x13ef   : > { %v7141_v56 = vmul.f32 %v20429_v44, %v20429_v44 }
0x13f1   : > { %7156 = vadd.xlane.f32.xlu1 %v7141_v56 }
0x1462   : > { %v7143_v3 = vpop.xlane.xlu0 %7142 }
0x1463   : > { %v7158_v26 = vmul.f32 0.03125, %v7143_v3 }
0x1465   : > { %v7166_v40 = vadd.f32 1e-05, %v7158_v26 }
0x1466   : > { %v7147_v47 = vpop.xlane.xlu0 %7146  ;;  %v7145_v53 = vpop.xlane.xlu1 %7144 }
0x1467   : > { %18342 = vrsqrt.f32 %v7166_v40  ;;  %v7160_v45 = vmul.f32 0.03125, %v7147_v47  ;;  %v7159_v62 = vmul.f32 0.03125, %v7145_v53 }
0x1469   : > { %v7168_v22 = vadd.f32 1e-05, %v7160_v45  ;;  %v7167_v63 = vadd.f32 1e-05, %v7159_v62 }
0x146a   : > { %v7149_v61 = vpop.xlane.xlu1 %7148 }
0x146b   : > { %18344 = vrsqrt.f32 %v7168_v22  ;;  %v7161_v2 = vmul.f32 0.03125, %v7149_v61 }
0x146c   : > { %18346 = vrsqrt.f32 %v7167_v63 }
0x146d   : > { %v7169_v58 = vadd.f32 1e-05, %v7161_v2 }
0x146f   : > { %18348 = vrsqrt.f32 %v7169_v58 }
0x1472   : > { %v7151_v49 = vpop.xlane.xlu0 %7150 }
0x1473   : > { %v7162_v43 = vmul.f32 0.03125, %v7151_v49  ;;  %v18049_v49 = vld [vmem:[%s22263_s19 + $0x20] sm:$0xff]  }
0x1474   : > { %v18343_v16 = vpop.eup %18342 }
0x1475   : > { %v7170_v0 = vadd.f32 1e-05, %v7162_v43  ;;  %v7182_v59 = vmul.f32 %v18343_v16, %v20378_v51  ;;  %v15006_v51 = vld [vmem:[%s22260_s16] ss:$0 sm:$0xff]  ;;  %v18050_v43 = vld [vmem:[%s22263_s19 + $0x18] sm:$0xff]   ;;  %v18051_v16 = vld [vmem:[%s22263_s19 + $0x10] sm:$0xff]  }
0x1476   : > { %v7155_v52 = vpop.xlane.xlu0 %7154  ;;  %v7153_v35 = vpop.xlane.xlu1 %7152 }
0x1477   : > { %18350 = vrsqrt.f32 %v7170_v0  ;;  %v7164_v41 = vmul.f32 0.03125, %v7155_v52  ;;  %v7163_v19 = vmul.f32 0.03125, %v7153_v35  ;;  %v7196_v1 = vmul.f32 %v15005_v20, %v7182_v59  ;;  %v18052_v0 = vld [vmem:[%s22263_s19 + $0x8] sm:$0xff]   ;;  %v18053_v52 = vld [vmem:[%s22263_s19] sm:$0xff]  }
0x1478   : > { %v18345_v14 = vpop.eup %18344  ;;  %v15019_v35 = vld [vmem:[%s22262_s18] ss:$0 sm:$0xff] }
0x1479   : > { %v18347_v12 = vpop.eup %18346  ;;  %v7184_v13 = vmul.f32 %v18345_v14, %v20385_v18  ;;  %v7172_v42 = vadd.f32 1e-05, %v7164_v41  ;;  %v7171_v6 = vadd.f32 1e-05, %v7163_v19  ;;  %v7210_v18 = vadd.f32 %v15006_v51, %v7196_v1 }
0x147a   : > { %v7157_v11 = vpop.xlane.xlu1 %7156  ;;  %v7183_v55 = vmul.f32 %v18347_v12, %v20388_v54 }
0x147b   : > { %18352 = vrsqrt.f32 %v7172_v42  ;;  %v7165_v60 = vmul.f32 0.03125, %v7157_v11  ;;  %v7198_v15 = vmul.f32 %v15005_v20, %v7184_v13 }
0x147c   : > { %v18349_v27 = vpop.eup %18348  ;;  %18354 = vrsqrt.f32 %v7171_v6  ;;  %v7197_v21 = vmul.f32 %v15005_v20, %v7183_v55 }
0x147d   : > { %v7185_v5 = vmul.f32 %v18349_v27, %v20396_v23  ;;  %v7173_v17 = vadd.f32 1e-05, %v7165_v60  ;;  %v7212_v54 = vadd.f32 %v15006_v51, %v7198_v15 }
0x147e   : > { %v7211_v36 = vadd.f32 %v15006_v51, %v7197_v21 }
0x147f   : > { %18356 = vrsqrt.f32 %v7173_v17  ;;  %v7199_v48 = vmul.f32 %v15005_v20, %v7185_v5 }
0x1480   : > { %v15579_v33 = vpack.c.bf16 %v7211_v36, %v7210_v18 }
0x1481   : > { %v7213_v56 = vadd.f32 %v15006_v51, %v7199_v48 }
0x1482   : > { %17033 = vmatprep.mubr.bf16.mxu0 %v15579_v33 }
0x1483   : > { %v15580_v29 = vpack.c.bf16 %v7213_v56, %v7212_v54 }
0x1484   : > { %v18351_v4 = vpop.eup %18350 }
0x1485   : > { %17034 = vmatmul.mubr.bf16.vlgmr.msra.gmra.mxu0 %v15580_v29  ;;  %v7186_v28 = vmul.f32 %v18351_v4, %v20405_v38 }
0x1487   : > { %v7200_v26 = vmul.f32 %v15005_v20, %v7186_v28 }
0x1488   : > { %v18353_v37 = vpop.eup %18352 }
0x1489   : > { %v18355_v46 = vpop.eup %18354  ;;  %v7188_v3 = vmul.f32 %v18353_v37, %v20415_v10  ;;  %v7214_v62 = vadd.f32 %v15006_v51, %v7200_v26  ;;  %v18046_v10 = vld [vmem:[%s22263_s19 + $0x38] sm:$0xff]  }
0x148a   : > { %v7187_v23 = vmul.f32 %v18355_v46, %v20418_v34  ;;  %17041 = vmatprep.subr.bf16.mxu1 %v18046_v10  ;;  %v18047_v34 = vld [vmem:[%s22263_s19 + $0x30] sm:$0xff]  }
0x148b   : > { %v7202_v45 = vmul.f32 %v15005_v20, %v7188_v3  ;;  %17042 = vmatpush3.bf16.msra.mxu1 %v18046_v10 }
0x148c   : > { %v18357_v40 = vpop.eup %18356  ;;  %v7201_v47 = vmul.f32 %v15005_v20, %v7187_v23  ;;  %17043 = vmatprep.subr.bf16.mxu1 %v18047_v34 }
0x148d   : > { %v7189_v53 = vmul.f32 %v18357_v40, %v20429_v44  ;;  %v7216_v2 = vadd.f32 %v15006_v51, %v7202_v45  ;;  %v18048_v44 = vld [vmem:[%s22263_s19 + $0x28] sm:$0xff]  }
0x148e   : > { %v7215_v22 = vadd.f32 %v15006_v51, %v7201_v47 }
0x148f   : > { %v7203_v63 = vmul.f32 %v15005_v20, %v7189_v53  ;;  %17044 = vmatpush3.bf16.msra.mxu1 %v18047_v34 }
0x1490   : > { %v15581_v61 = vpack.c.bf16 %v7215_v22, %v7214_v62  ;;  %17045 = vmatprep.subr.bf16.mxu1 %v18048_v44 }
0x1491   : > { %v7217_v58 = vadd.f32 %v15006_v51, %v7203_v63 }
0x1492   : > { %17037 = vmatprep.mubr.bf16.mxu0 %v15581_v61 }
0x1493   : > { %v15582_v38 = vpack.c.bf16 %v7217_v58, %v7216_v2  ;;  %17046 = vmatpush3.bf16.msra.mxu1 %v18048_v44 }
0x1494   : > { %17047 = vmatprep.subr.bf16.mxu1 %v18049_v49 }
0x1495   : > { %17038 = vmatmul.mubr.bf16.gmra.mxu0 %v15582_v38 }
0x1497   : > { %17048 = vmatpush3.bf16.msra.mxu1 %v18049_v49 }
0x1498   : > { %17049 = vmatprep.subr.bf16.mxu1 %v18050_v43 }
0x149b   : > { %17050 = vmatpush3.bf16.msra.mxu1 %v18050_v43 }
0x149c   : > { %17051 = vmatprep.subr.bf16.mxu1 %v18051_v16 }
0x149f   : > { %17052 = vmatpush3.bf16.msra.mxu1 %v18051_v16 }
0x14a0   : > { %17053 = vmatprep.subr.bf16.mxu1 %v18052_v0 }
0x14a3   : > { %17054 = vmatpush3.bf16.msra.mxu1 %v18052_v0 }
0x14a4   : > { %17055 = vmatprep.subr.bf16.mxu1 %v18053_v52 }
0x14a7   : > { %17056 = vmatpush3.bf16.msra.mxu1 %v18053_v52 }
0x1545   : > { %v17035_v59 = vpop.f32.mrf.mxu0 }
0x1546   : > { %v20489_v41 = vadd.f32 %v17035_v59, %v15019_v35 }
0x1547   : > { %v7348_v19 = vpop.f32.mrf.mxu0 }
0x1548   : > { %v15022_v20 = vmul.f32 -1.702, %v20489_v41  ;;  %v7386_v14 = vadd.f32 %v15019_v35, %v7348_v19 }
0x1549   : > { %v17036_v12 = vpop.f32.mrf.mxu0 }
0x154a   : > { %v7414_v13 = vmul.f32 1.442695, %v15022_v20  ;;  %v15020_v42 = vmul.f32 -1.702, %v7386_v14  ;;  %v7389_v6 = vadd.f32 %v17036_v12, %v15019_v35 }
0x154b   : > { %v7351_v11 = vpop.f32.mrf.mxu0 }
0x154c   : > { %18358 = vpow2.f32 %v7414_v13  ;;  %v7410_v55 = vmul.f32 1.442695, %v15020_v42  ;;  %v15023_v1 = vmul.f32 -1.702, %v7389_v6  ;;  %v7387_v60 = vadd.f32 %v15019_v35, %v7351_v11 }
0x154e   : > { %18360 = vpow2.f32 %v7410_v55  ;;  %v7416_v51 = vmul.f32 1.442695, %v15023_v1  ;;  %v15021_v27 = vmul.f32 -1.702, %v7387_v60 }
0x1550   : > { %18362 = vpow2.f32 %v7416_v51  ;;  %v7412_v21 = vmul.f32 1.442695, %v15021_v27 }
0x1552   : > { %18364 = vpow2.f32 %v7412_v21 }
0x1555   : > { %v17039_v5 = vpop.f32.mrf.mxu0 }
0x1556   : > { %v7392_v17 = vadd.f32 %v17039_v5, %v15019_v35  ;;  %v15040_v5 = vld [vmem:[%s22264_s20] ss:$0 sm:$0xff] }
0x1557   : > { %v7364_v15 = vpop.f32.mrf.mxu0 }
0x1558   : > { %v15026_v18 = vmul.f32 -1.702, %v7392_v17  ;;  %v7390_v36 = vadd.f32 %v15019_v35, %v7364_v15 }
0x1559   : > { %v18359_v48 = vpop.eup %18358  ;;  %v17040_v33 = vpop.f32.mrf.mxu0 }
0x155a   : > { %v7428_v54 = vadd.f32 1.0, %v18359_v48  ;;  %v7422_v56 = vmul.f32 1.442695, %v15026_v18  ;;  %v15024_v29 = vmul.f32 -1.702, %v7390_v36  ;;  %v7393_v4 = vadd.f32 %v17040_v33, %v15019_v35 }
0x155b   : > { %v18361_v28 = vpop.eup %18360  ;;  %v7367_v37 = vpop.f32.mrf.mxu0 }
0x155c   : > { %18366 = vrcp.f32 %v7428_v54  ;;  %v7426_v46 = vadd.f32 1.0, %v18361_v28  ;;  %v7418_v3 = vmul.f32 1.442695, %v15024_v29  ;;  %v15027_v23 = vmul.f32 -1.702, %v7393_v4 }
0x155d   : > { %v18363_v26 = vpop.eup %18362  ;;  %18368 = vpow2.f32 %v7422_v56  ;;  %v7391_v40 = vadd.f32 %v15019_v35, %v7367_v37 }
0x155e   : > { %18370 = vrcp.f32 %v7426_v46  ;;  %v7429_v47 = vadd.f32 1.0, %v18363_v26  ;;  %v7424_v53 = vmul.f32 1.442695, %v15027_v23 }
0x155f   : > { %v18365_v45 = vpop.eup %18364  ;;  %18372 = vpow2.f32 %v7418_v3  ;;  %v15025_v62 = vmul.f32 -1.702, %v7391_v40 }
0x1560   : > { %18374 = vrcp.f32 %v7429_v47  ;;  %v7427_v22 = vadd.f32 1.0, %v18365_v45 }
0x1561   : > { %18376 = vpow2.f32 %v7424_v53  ;;  %v7420_v63 = vmul.f32 1.442695, %v15025_v62 }
0x1562   : > { %18378 = vrcp.f32 %v7427_v22 }
0x1563   : > { %18380 = vpow2.f32 %v7420_v63 }
0x1569   : > { %v18367_v61 = vpop.eup %18366 }
0x156a   : > { %v18369_v2 = vpop.eup %18368  ;;  %v7452_v19 = vmul.f32 %v18367_v61, %v20489_v41 }
0x156b   : > { %v18371_v58 = vpop.eup %18370  ;;  %v7432_v49 = vadd.f32 1.0, %v18369_v2 }
0x156c   : > { %v18373_v38 = vpop.eup %18372  ;;  %v7450_v35 = vmul.f32 %v18371_v58, %v7386_v14 }
0x156d   : > { %v18375_v10 = vpop.eup %18374  ;;  %v7430_v34 = vadd.f32 1.0, %v18373_v38 }
0x156e   : > { %v18377_v44 = vpop.eup %18376  ;;  %v7453_v16 = vmul.f32 %v18375_v10, %v7389_v6 }
0x156f   : > { %v18379_v43 = vpop.eup %18378  ;;  %v7433_v0 = vadd.f32 1.0, %v18377_v44  ;;  %18382 = vrcp.f32 %v7430_v34 }
0x1570   : > { %v18381_v52 = vpop.eup %18380  ;;  %v7451_v59 = vmul.f32 %v18379_v43, %v7387_v60  ;;  %v15584_v13 = vpack.c.bf16 %v7453_v16, %v7452_v19 }
0x1571   : > { %18384 = vrcp.f32 %v7433_v0  ;;  %v7431_v20 = vadd.f32 1.0, %v18381_v52 }
0x1572   : > { %18386 = vrcp.f32 %v7432_v49  ;;  %v15583_v12 = vpack.c.bf16 %v7451_v59, %v7450_v35 }
0x1573   : > { %18388 = vrcp.f32 %v7431_v20 }
0x1574   : > { %17057 = vmatprep.mubr.bf16.mxu1 %v15583_v12 }
0x1575   : > { %17058 = vmatmul.mubr.bf16.vlgmr.msra.gmra.mxu1 %v15584_v13 }
0x157c   : > { %v18383_v42 = vpop.eup %18382 }
0x157d   : > { %v7454_v51 = vmul.f32 %v18383_v42, %v7390_v36 }
0x157e   : > { %v18385_v11 = vpop.eup %18384 }
0x157f   : > { %v18387_v55 = vpop.eup %18386  ;;  %v7457_v6 = vmul.f32 %v18385_v11, %v7393_v4 }
0x1580   : > { %v18389_v1 = vpop.eup %18388  ;;  %v7456_v14 = vmul.f32 %v18387_v55, %v7392_v17 }
0x1581   : > { %v7455_v27 = vmul.f32 %v18389_v1, %v7391_v40 }
0x1582   : > { %v15586_v21 = vpack.c.bf16 %v7457_v6, %v7456_v14  ;;  %v18054_v6 = vld [vmem:[%s22316_s29 + $0x138] sm:$0xff]  }
0x1583   : > { %v15585_v60 = vpack.c.bf16 %v7455_v27, %v7454_v51  ;;  %v18055_v27 = vld [vmem:[%s22317_s10 + $0x138] sm:$0xff]   ;;  %17065 = vmatprep.subr.bf16.mxu0 %v18054_v6 }
0x1584   : > { %17066 = vmatpush3.bf16.msra.mxu0 %v18054_v6  ;;  %17089 = vmatprep.subr.bf16.mxu1 %v18055_v27 }
0x1585   : > { %17061 = vmatprep.mubr.bf16.mxu1 %v15585_v60  ;;  %17090 = vmatpush3.bf16.msra.mxu1 %v18055_v27 }
0x1586   : > { %17062 = vmatmul.mubr.bf16.gmra.mxu1 %v15586_v21 }
0x1635   : > { %v17059_v41 = vpop.f32.mrf.mxu1 }
0x1636   : > { %v7628_v18 = vadd.f32 %v17059_v41, %v15040_v5 }
0x1637   : > { %v7588_v15 = vpop.f32.mrf.mxu1 }
0x1638   : > { %v7626_v48 = vadd.f32 %v15040_v5, %v7588_v15  ;;  %v20500_v36 = vadd.f32 %v7628_v18, %v20334_v39  ;;  %v18056_v15 = vld [vmem:[%s22316_s29 + $0x130] sm:$0xff]  }
0x1639   : > { %v17060_v33 = vpop.f32.mrf.mxu1  ;;  %17067 = vmatprep.subr.bf16.mxu0 %v18056_v15 }
0x163a   : > { %v20497_v54 = vadd.f32 %v7626_v48, %v20332_v30  ;;  %v7629_v17 = vadd.f32 %v17060_v33, %v15040_v5  ;;  %v7648_v30 = vmul.f32 %v18901_v32, %v20500_v36  ;;  %17068 = vmatpush3.bf16.msra.mxu0 %v18056_v15 }
0x163b   : > { %v7591_v56 = vpop.f32.mrf.mxu1 }
0x163c   : > { %v7627_v29 = vadd.f32 %v15040_v5, %v7591_v56  ;;  %v7646_v4 = vmul.f32 %v18901_v32, %v20497_v54  ;;  %v20508_v37 = vadd.f32 %v7629_v17, %v20342_v57  ;;  %v18057_v56 = vld [vmem:[%s22317_s10 + $0x130] sm:$0xff]  }
0x163d   : > { %17091 = vmatprep.subr.bf16.mxu1 %v18057_v56 }
0x163e   : > { %v20505_v28 = vadd.f32 %v7627_v29, %v20340_v8  ;;  %7654 = vadd.xlane.f32.xlu0 %v7646_v4  ;;  %v7649_v39 = vmul.f32 %v18901_v32, %v20508_v37  ;;  %17092 = vmatpush3.bf16.msra.mxu1 %v18057_v56 }
0x1640   : > { %v7647_v46 = vmul.f32 %v18901_v32, %v20505_v28 }
0x1642   : > { %7658 = vadd.xlane.f32.xlu0 %v7648_v30  ;;  %7656 = vadd.xlane.f32.xlu1 %v7647_v46  ;;  %v18058_v46 = vld [vmem:[%s22316_s29 + $0x128] sm:$0xff]  }
0x1643   : > { %17069 = vmatprep.subr.bf16.mxu0 %v18058_v46 }
0x1644   : > { %17070 = vmatpush3.bf16.msra.mxu0 %v18058_v46 }
0x1646   : > { %v17063_v3 = vpop.f32.mrf.mxu1  ;;  %7660 = vadd.xlane.f32.xlu1 %v7649_v39 }
0x1647   : > { %v7632_v8 = vadd.f32 %v17063_v3, %v15040_v5 }
0x1648   : > { %v7604_v23 = vpop.f32.mrf.mxu1 }
0x1649   : > { %v7630_v26 = vadd.f32 %v15040_v5, %v7604_v23  ;;  %v20520_v53 = vadd.f32 %v7632_v8, %v20360_v9  ;;  %v18059_v8 = vld [vmem:[%s22317_s10 + $0x128] sm:$0xff]  }
0x164a   : > { %v17064_v40 = vpop.f32.mrf.mxu1  ;;  %17093 = vmatprep.subr.bf16.mxu1 %v18059_v8 }
0x164b   : > { %v20517_v57 = vadd.f32 %v7630_v26, %v20358_v7  ;;  %v7633_v45 = vadd.f32 %v17064_v40, %v15040_v5  ;;  %v7652_v7 = vmul.f32 %v18901_v32, %v20520_v53  ;;  %v18060_v40 = vld [vmem:[%s22316_s29 + $0x120] sm:$0xff]   ;;  %17094 = vmatpush3.bf16.msra.mxu1 %v18059_v8 }
0x164c   : > { %v7607_v47 = vpop.f32.mrf.mxu1  ;;  %17071 = vmatprep.subr.bf16.mxu0 %v18060_v40 }
0x164d   : > { %v7631_v62 = vadd.f32 %v15040_v5, %v7607_v47  ;;  %v7650_v22 = vmul.f32 %v18901_v32, %v20517_v57  ;;  %v20528_v61 = vadd.f32 %v7633_v45, %v20368_v50  ;;  %v18061_v45 = vld [vmem:[%s22317_s10 + $0x120] sm:$0xff]   ;;  %17072 = vmatpush3.bf16.msra.mxu0 %v18060_v40 }
0x164e   : > { %17095 = vmatprep.subr.bf16.mxu1 %v18061_v45 }
0x164f   : > { %v20525_v63 = vadd.f32 %v7631_v62, %v20366_v24  ;;  %7662 = vadd.xlane.f32.xlu0 %v7650_v22  ;;  %v7653_v9 = vmul.f32 %v18901_v32, %v20528_v61  ;;  %v18062_v62 = vld [vmem:[%s22316_s29 + $0x118] sm:$0xff]   ;;  %17096 = vmatpush3.bf16.msra.mxu1 %v18061_v45 }
0x1650   : > { %v18063_v22 = vld [vmem:[%s22317_s10 + $0x118] sm:$0xff]   ;;  %17073 = vmatprep.subr.bf16.mxu0 %v18062_v62 }
0x1651   : > { %v7651_v2 = vmul.f32 %v18901_v32, %v20525_v63  ;;  %17097 = vmatprep.subr.bf16.mxu1 %v18063_v22  ;;  %17074 = vmatpush3.bf16.msra.mxu0 %v18062_v62 }
0x1653   : > { %7666 = vadd.xlane.f32.xlu0 %v7652_v7  ;;  %7664 = vadd.xlane.f32.xlu1 %v7651_v2  ;;  %v18064_v7 = vld [vmem:[%s22316_s29 + $0x110] sm:$0xff]  }
0x1654   : > { %17098 = vmatpush3.bf16.msra.mxu1 %v18063_v22  ;;  %v18065_v2 = vld [vmem:[%s22317_s10 + $0x110] sm:$0xff]   ;;  %17075 = vmatprep.subr.bf16.mxu0 %v18064_v7 }
0x1655   : > { %17076 = vmatpush3.bf16.msra.mxu0 %v18064_v7  ;;  %17099 = vmatprep.subr.bf16.mxu1 %v18065_v2 }
0x1657   : > { %7668 = vadd.xlane.f32.xlu1 %v7653_v9  ;;  %v18066_v9 = vld [vmem:[%s22316_s29 + $0x108] sm:$0xff]  }
0x1658   : > { %17100 = vmatpush3.bf16.msra.mxu1 %v18065_v2  ;;  %17077 = vmatprep.subr.bf16.mxu0 %v18066_v9 }
0x1659   : > { %17078 = vmatpush3.bf16.msra.mxu0 %v18066_v9 }
0x16c7   : > { %v7655_v58 = vpop.xlane.xlu0 %7654 }
0x16c8   : > { %v7670_v38 = vmul.f32 0.03125, %v7655_v58  ;;  %v18067_v58 = vld [vmem:[%s22317_s10 + $0x108] sm:$0xff]  }
0x16c9   : > { %17101 = vmatprep.subr.bf16.mxu1 %v18067_v58 }
0x16ca   : > { %v7678_v24 = vsub.f32 %v20497_v54, %v7670_v38  ;;  %17102 = vmatpush3.bf16.msra.mxu1 %v18067_v58  ;;  %v18068_v38 = vld [vmem:[%s22316_s29 + $0x100] sm:$0xff]  }
0x16cb   : > { %v7659_v10 = vpop.xlane.xlu0 %7658  ;;  %v7657_v34 = vpop.xlane.xlu1 %7656  ;;  %17079 = vmatprep.subr.bf16.mxu0 %v18068_v38 }
0x16cc   : > { %v20538_v50 = vmul.f32 %v18901_v32, %v7678_v24  ;;  %v7672_v44 = vmul.f32 0.03125, %v7659_v10  ;;  %v7671_v49 = vmul.f32 0.03125, %v7657_v34  ;;  %v18069_v24 = vld [vmem:[%s22317_s10 + $0x100] sm:$0xff]   ;;  %17080 = vmatpush3.bf16.msra.mxu0 %v18068_v38  ;;  %v18070_v10 = vld [vmem:[%s22318_s26 + $0x138] sm:$0xff]  }
0x16cd   : > { %17103 = vmatprep.subr.bf16.mxu1 %v18069_v24  ;;  %17113 = vmatprep.subr.bf16.mxu0 %v18070_v10 }
0x16ce   : > { %v7680_v43 = vsub.f32 %v20500_v36, %v7672_v44  ;;  %v7679_v16 = vsub.f32 %v20505_v28, %v7671_v49  ;;  %v7694_v0 = vmul.f32 %v20538_v50, %v20538_v50  ;;  %17104 = vmatpush3.bf16.msra.mxu1 %v18069_v24  ;;  %v18072_v24 = vld [vmem:[%s22318_s26 + $0x128] sm:$0xff]  }
0x16cf   : > { %v7661_v52 = vpop.xlane.xlu1 %7660  ;;  %17137 = vmatprep.subr.bf16.mxu1 %v18646_v31 }
0x16d0   : > { %v20545_v35 = vmul.f32 %v18901_v32, %v7680_v43  ;;  %v20548_v59 = vmul.f32 %v18901_v32, %v7679_v16  ;;  %v7673_v19 = vmul.f32 0.03125, %v7661_v52  ;;  %7702 = vadd.xlane.f32.xlu0 %v7694_v0 }
0x16d2   : > { %v7681_v20 = vsub.f32 %v20508_v37, %v7673_v19  ;;  %v7696_v12 = vmul.f32 %v20545_v35, %v20545_v35  ;;  %v7695_v13 = vmul.f32 %v20548_v59, %v20548_v59 }
0x16d4   : > { %v20556_v42 = vmul.f32 %v18901_v32, %v7681_v20  ;;  %7706 = vadd.xlane.f32.xlu0 %v7696_v12  ;;  %7704 = vadd.xlane.f32.xlu1 %v7695_v13 }
0x16d6   : > { %v7697_v11 = vmul.f32 %v20556_v42, %v20556_v42 }
0x16d8   : > { %v7663_v55 = vpop.xlane.xlu0 %7662  ;;  %7708 = vadd.xlane.f32.xlu1 %v7697_v11 }
0x16d9   : > { %v7674_v1 = vmul.f32 0.03125, %v7663_v55 }
0x16db   : > { %v7682_v51 = vsub.f32 %v20517_v57, %v7674_v1 }
0x16dc   : > { %v7667_v14 = vpop.xlane.xlu0 %7666  ;;  %v7665_v60 = vpop.xlane.xlu1 %7664 }
0x16dd   : > { %v20568_v21 = vmul.f32 %v18901_v32, %v7682_v51  ;;  %v7676_v41 = vmul.f32 0.03125, %v7667_v14  ;;  %v7675_v5 = vmul.f32 0.03125, %v7665_v60  ;;  %v15043_v14 = vld [vmem:[%s22319_s6 + $0x1] ss:$0 sm:$0xff] }
0x16df   : > { %v7684_v18 = vsub.f32 %v20520_v53, %v7676_v41  ;;  %v7683_v48 = vsub.f32 %v20525_v63, %v7675_v5  ;;  %v7698_v33 = vmul.f32 %v20568_v21, %v20568_v21 }
0x16e0   : > { %v7669_v17 = vpop.xlane.xlu1 %7668 }
0x16e1   : > { %v20581_v29 = vmul.f32 %v18901_v32, %v7684_v18  ;;  %v20584_v4 = vmul.f32 %v18901_v32, %v7683_v48  ;;  %v7677_v30 = vmul.f32 0.03125, %v7669_v17  ;;  %7710 = vadd.xlane.f32.xlu0 %v7698_v33 }
0x16e3   : > { %v7685_v39 = vsub.f32 %v20528_v61, %v7677_v30  ;;  %v7700_v3 = vmul.f32 %v20581_v29, %v20581_v29  ;;  %v7699_v23 = vmul.f32 %v20584_v4, %v20584_v4 }
0x16e5   : > { %v20598_v26 = vmul.f32 %v18901_v32, %v7685_v39  ;;  %7714 = vadd.xlane.f32.xlu0 %v7700_v3  ;;  %7712 = vadd.xlane.f32.xlu1 %v7699_v23 }
0x16e7   : > { %v7701_v47 = vmul.f32 %v20598_v26, %v20598_v26 }
0x16e9   : > { %7716 = vadd.xlane.f32.xlu1 %v7701_v47 }
0x1759   : > { %v7703_v34 = vpop.xlane.xlu0 %7702 }
0x175a   : > { %v7718_v44 = vmul.f32 0.03125, %v7703_v34 }
0x175c   : > { %v7726_v49 = vadd.f32 1e-05, %v7718_v44 }
0x175d   : > { %v7707_v43 = vpop.xlane.xlu0 %7706  ;;  %v7705_v16 = vpop.xlane.xlu1 %7704 }
0x175e   : > { %18390 = vrsqrt.f32 %v7726_v49  ;;  %v7720_v0 = vmul.f32 0.03125, %v7707_v43  ;;  %v7719_v52 = vmul.f32 0.03125, %v7705_v16 }
0x1760   : > { %v7728_v19 = vadd.f32 1e-05, %v7720_v0  ;;  %v7727_v20 = vadd.f32 1e-05, %v7719_v52 }
0x1761   : > { %v7709_v12 = vpop.xlane.xlu1 %7708 }
0x1762   : > { %18392 = vrsqrt.f32 %v7728_v19  ;;  %v7721_v13 = vmul.f32 0.03125, %v7709_v12 }
0x1763   : > { %18394 = vrsqrt.f32 %v7727_v20 }
0x1764   : > { %v7729_v11 = vadd.f32 1e-05, %v7721_v13 }
0x1766   : > { %18396 = vrsqrt.f32 %v7729_v11 }
0x176a   : > { %v7711_v55 = vpop.xlane.xlu0 %7710 }
0x176b   : > { %v18391_v1 = vpop.eup %18390  ;;  %v7722_v6 = vmul.f32 0.03125, %v7711_v55 }
0x176c   : > { %v7742_v51 = vmul.f32 %v18391_v1, %v20538_v50  ;;  %v15044_v50 = vld [vmem:[%s22321_s30 + $0x1] ss:$0 sm:$0xff] }
0x176d   : > { %v7730_v27 = vadd.f32 1e-05, %v7722_v6  ;;  %v18076_v6 = vld [vmem:[%s22318_s26 + $0x108] sm:$0xff]  }
0x176e   : > { %v7715_v60 = vpop.xlane.xlu0 %7714  ;;  %v7713_v41 = vpop.xlane.xlu1 %7712  ;;  %v7756_v56 = vmul.f32 %v15043_v14, %v7742_v51  ;;  %v18077_v51 = vld [vmem:[%s22318_s26 + $0x100] sm:$0xff]  }
0x176f   : > { %v18393_v5 = vpop.eup %18392  ;;  %18398 = vrsqrt.f32 %v7730_v27  ;;  %v7724_v15 = vmul.f32 0.03125, %v7715_v60  ;;  %v7723_v18 = vmul.f32 0.03125, %v7713_v41  ;;  %v20699_v60 = vld [vmem:[%s22322_s11 + $0x4] ss:$0 sm:$0xff] }
0x1770   : > { %v18395_v48 = vpop.eup %18394  ;;  %v7744_v33 = vmul.f32 %v18393_v5, %v20545_v35  ;;  %v7770_v45 = vadd.f32 %v15044_v50, %v7756_v56 }
0x1771   : > { %v7743_v17 = vmul.f32 %v18395_v48, %v20548_v59  ;;  %v7732_v30 = vadd.f32 1e-05, %v7724_v15  ;;  %v7731_v46 = vadd.f32 1e-05, %v7723_v18 }
0x1772   : > { %v7717_v39 = vpop.xlane.xlu1 %7716  ;;  %v7758_v40 = vmul.f32 %v15043_v14, %v7744_v33 }
0x1773   : > { %v18397_v3 = vpop.eup %18396  ;;  %v7757_v23 = vmul.f32 %v15043_v14, %v7743_v17  ;;  %18400 = vrsqrt.f32 %v7732_v30  ;;  %v7725_v8 = vmul.f32 0.03125, %v7717_v39  ;;  %v20707_v30 = vld [vmem:[%s22324_s0 + $0x4] ss:$0 sm:$0xff] }
0x1774   : > { %v7745_v47 = vmul.f32 %v18397_v3, %v20556_v42  ;;  %18402 = vrsqrt.f32 %v7731_v46  ;;  %v7772_v7 = vadd.f32 %v15044_v50, %v7758_v40  ;;  %v18071_v42 = vld [vmem:[%s22318_s26 + $0x130] sm:$0xff]  }
0x1775   : > { %v7771_v35 = vadd.f32 %v15044_v50, %v7757_v23  ;;  %v7733_v62 = vadd.f32 1e-05, %v7725_v8 }
0x1776   : > { %v7759_v22 = vmul.f32 %v15043_v14, %v7745_v47 }
0x1777   : > { %v20646_v59 = vpack.c.bf16 %v7771_v35, %v7770_v45  ;;  %18404 = vrsqrt.f32 %v7733_v62 }
0x1778   : > { %v7773_v2 = vadd.f32 %v15044_v50, %v7759_v22 }
0x1779   : > { %17081 = vmatprep.mubr.bf16.mxu0 %v20646_v59  ;;  %17105 = vmatprep.mubr.bf16.mxu1 %v20646_v59 }
0x177a   : > { %v20650_v9 = vpack.c.bf16 %v7773_v2, %v7772_v7 }
0x177c   : > { %v18399_v58 = vpop.eup %18398  ;;  %17082 = vmatmul.mubr.bf16.vlgmr.msra.gmra.mxu0 %v20650_v9  ;;  %17106 = vmatmul.mubr.bf16.vlgmr.msra.gmra.mxu1 %v20650_v9 }
0x177d   : > { %17114 = vmatpush3.bf16.msra.mxu0 %v18070_v10  ;;  %v7746_v38 = vmul.f32 %v18399_v58, %v20568_v21  ;;  %v18073_v10 = vld [vmem:[%s22318_s26 + $0x120] sm:$0xff]  }
0x177e   : > { %17115 = vmatprep.subr.bf16.mxu0 %v18071_v42 }
0x177f   : > { %v7760_v43 = vmul.f32 %v15043_v14, %v7746_v38 }
0x1780   : > { %v18401_v34 = vpop.eup %18400 }
0x1781   : > { %v18403_v44 = vpop.eup %18402  ;;  %v7748_v49 = vmul.f32 %v18401_v34, %v20581_v29  ;;  %17116 = vmatpush3.bf16.msra.mxu0 %v18071_v42  ;;  %v7774_v20 = vadd.f32 %v15044_v50, %v7760_v43  ;;  %v18074_v29 = vld [vmem:[%s22318_s26 + $0x118] sm:$0xff]  }
0x1782   : > { %v7747_v16 = vmul.f32 %v18403_v44, %v20584_v4  ;;  %17117 = vmatprep.subr.bf16.mxu0 %v18072_v24 }
0x1783   : > { %v7762_v52 = vmul.f32 %v15043_v14, %v7748_v49 }
0x1784   : > { %v18405_v0 = vpop.eup %18404  ;;  %v7761_v21 = vmul.f32 %v15043_v14, %v7747_v16 }
0x1785   : > { %v7749_v19 = vmul.f32 %v18405_v0, %v20598_v26  ;;  %17118 = vmatpush3.bf16.msra.mxu0 %v18072_v24  ;;  %v7776_v11 = vadd.f32 %v15044_v50, %v7762_v52  ;;  %v18075_v26 = vld [vmem:[%s22318_s26 + $0x110] sm:$0xff]  }
0x1786   : > { %v7775_v12 = vadd.f32 %v15044_v50, %v7761_v21  ;;  %17119 = vmatprep.subr.bf16.mxu0 %v18073_v10 }
0x1787   : > { %v7763_v13 = vmul.f32 %v15043_v14, %v7749_v19 }
0x1788   : > { %v20670_v4 = vpack.c.bf16 %v7775_v12, %v7774_v20 }
0x1789   : > { %v7777_v55 = vadd.f32 %v15044_v50, %v7763_v13  ;;  %17120 = vmatpush3.bf16.msra.mxu0 %v18073_v10 }
0x178a   : > { %17085 = vmatprep.mubr.bf16.mxu0 %v20670_v4  ;;  %17109 = vmatprep.mubr.bf16.mxu1 %v20670_v4 }
0x178b   : > { %v20674_v1 = vpack.c.bf16 %v7777_v55, %v7776_v11  ;;  %17121 = vmatprep.subr.bf16.mxu0 %v18074_v29  ;;  %v20735_v11 = vld [vmem:[%s22256_s12 + $0x4] ss:$0 sm:$0xff] }
0x178d   : > { %17086 = vmatmul.mubr.bf16.gmra.mxu0 %v20674_v1  ;;  %17110 = vmatmul.mubr.bf16.gmra.mxu1 %v20674_v1 }
0x178e   : > { %17122 = vmatpush3.bf16.msra.mxu0 %v18074_v29  ;;  %17129 = vmatprep.mubr.bf16.mxu0 %v20646_v59 }
0x178f   : > { %17123 = vmatprep.subr.bf16.mxu0 %v18075_v26  ;;  %17139 = vmatprep.mubr.msk.bf16.mxu1 %vm18647_vm1, %v18646_v31 }
0x1792   : > { %17124 = vmatpush3.bf16.msra.mxu0 %v18075_v26 }
0x1793   : > { %17125 = vmatprep.subr.bf16.mxu0 %v18076_v6 }
0x1796   : > { %17126 = vmatpush3.bf16.msra.mxu0 %v18076_v6 }
0x1797   : > { %17127 = vmatprep.subr.bf16.mxu0 %v18077_v51 }
0x179a   : > { %17128 = vmatpush3.bf16.msra.mxu0 %v18077_v51 }
0x179b   : > { %17161 = vmatprep.subr.bf16.mxu0 %v18646_v31 }
0x179d   : > { %17130 = vmatmul.mubr.bf16.vlgmr.msra.gmra.mxu0 %v20650_v9 }
0x179e   : > { %17133 = vmatprep.mubr.bf16.mxu0 %v20670_v4 }
0x17a5   : > { %17134 = vmatmul.mubr.bf16.gmra.mxu0 %v20674_v1 }
0x17a6   : > { %17163 = vmatprep.mubr.msk.bf16.mxu0 %vm18647_vm1, %v18646_v31 }
0x183c   : > { %v17107_v27 = vpop.f32.mrf.mxu1  ;;  %v17083_v14 = vpop.f32.mrf.mxu0 }
0x183d   : > { %v8096_v8 = vadd.f32 %v17107_v27, %v20699_v60  ;;  %v7950_v43 = vadd.f32 %v17083_v14, %v20707_v30 }
0x183e   : > { %v8055_v41 = vpop.f32.mrf.mxu1  ;;  %v7909_v48 = vpop.f32.mrf.mxu0 }
0x183f   : > { %v8094_v5 = vadd.f32 %v20699_v60, %v8055_v41  ;;  %v7948_v46 = vadd.f32 %v20707_v30, %v7909_v48  ;;  %v8258_v35 = vpack.c.bf16 %v8096_v8, %v8096_v8  ;;  %v8250_v19 = vpack.c.bf16 %v7950_v43, %v7950_v43 }
0x1840   : > { %v17108_v15 = vpop.f32.mrf.mxu1  ;;  %v17084_v50 = vpop.f32.mrf.mxu0 }
0x1841   : > { %v8256_v18 = vpack.c.bf16 %v8094_v5, %v8094_v5  ;;  %v8248_v3 = vpack.c.bf16 %v7948_v46, %v7948_v46  ;;  %v8360_v58 = vsel %vm1800_vm2, %v8258_v35, 0  ;;  %v8097_v38 = vadd.f32 %v17108_v15, %v20699_v60 }
0x1842   : > { %v8058_v33 = vpop.f32.mrf.mxu1  ;;  %v7912_v23 = vpop.f32.mrf.mxu0  ;;  %v7951_v26 = vadd.f32 %v17084_v50, %v20707_v30 }
0x1843   : > { %v8268_v56 = vsel %vm1800_vm2, %v8256_v18, 0  ;;  %v8095_v17 = vadd.f32 %v20699_v60, %v8058_v33  ;;  %v7949_v47 = vadd.f32 %v20707_v30, %v7912_v23  ;;  %v8259_v10 = vpack.c.bf16 %v8097_v38, %v8097_v38 }
0x1844   : > { %17138 = vmatpush3.bf16.xpose.msra.mxu1 %v8268_v56  ;;  %v8251_v15 = vpack.c.bf16 %v7951_v26, %v7951_v26 }
0x1845   : > { %17143 = vmatprep.subr.bf16.mxu1 %v18646_v31  ;;  %v8257_v39 = vpack.c.bf16 %v8095_v17, %v8095_v17  ;;  %v8249_v2 = vpack.c.bf16 %v7949_v47, %v7949_v47  ;;  %v8406_v12 = vsel %vm1800_vm2, %v8259_v10, 0 }
0x1847   : > { %v8314_v40 = vsel %vm1800_vm2, %v8257_v39, 0 }
0x184b   : > { %17140 = vmatmul.mubr.msk.bf16.vlgmr.msra.gmra.mxu1 %vm1800_vm2, %v8248_v3 }
0x184c   : > { %17144 = vmatpush3.bf16.xpose.msra.mxu1 %v8314_v40  ;;  %17145 = vmatprep.mubr.msk.bf16.mxu1 %vm18647_vm1, %v18646_v31 }
0x184d   : > { %v17111_v45 = vpop.f32.mrf.mxu1  ;;  %17149 = vmatprep.subr.bf16.mxu1 %v18646_v31  ;;  %v17087_v62 = vpop.f32.mrf.mxu0 }
0x184e   : > { %v8100_v34 = vadd.f32 %v17111_v45, %v20699_v60  ;;  %v7954_v51 = vadd.f32 %v17087_v62, %v20707_v30 }
0x184f   : > { %v8071_v22 = vpop.f32.mrf.mxu1  ;;  %v7925_v24 = vpop.f32.mrf.mxu0 }
0x1850   : > { %v8098_v7 = vadd.f32 %v20699_v60, %v8071_v22  ;;  %v7952_v16 = vadd.f32 %v20707_v30, %v7925_v24  ;;  %v8262_v21 = vpack.c.bf16 %v8100_v34, %v8100_v34  ;;  %v8254_v48 = vpack.c.bf16 %v7954_v51, %v7954_v51 }
0x1851   : > { %v17112_v49 = vpop.f32.mrf.mxu1  ;;  %v17088_v0 = vpop.f32.mrf.mxu0 }
0x1852   : > { %v8260_v42 = vpack.c.bf16 %v8098_v7, %v8098_v7  ;;  %v8252_v20 = vpack.c.bf16 %v7952_v16, %v7952_v16  ;;  %v8544_v55 = vsel %vm1800_vm2, %v8262_v21, 0  ;;  %v8101_v17 = vadd.f32 %v17112_v49, %v20699_v60 }
0x1853   : > { %17146 = vmatmul.mubr.msk.bf16.vlgmr.msra.gmra.mxu1 %vm1800_vm2, %v8249_v2  ;;  %v8074_v52 = vpop.f32.mrf.mxu1  ;;  %v7928_v13 = vpop.f32.mrf.mxu0  ;;  %v7955_v2 = vadd.f32 %v17088_v0, %v20707_v30 }
0x1854   : > { %v8452_v44 = vsel %vm1800_vm2, %v8260_v42, 0  ;;  %17150 = vmatpush3.bf16.xpose.msra.mxu1 %v8360_v58  ;;  %17151 = vmatprep.mubr.msk.bf16.mxu1 %vm18647_vm1, %v18646_v31  ;;  %v8099_v29 = vadd.f32 %v20699_v60, %v8074_v52  ;;  %v7953_v3 = vadd.f32 %v20707_v30, %v7928_v13  ;;  %v8263_v60 = vpack.c.bf16 %v8101_v17, %v8101_v17 }
0x1855   : > { %17162 = vmatpush3.bf16.xpose.msra.mxu0 %v8452_v44  ;;  %17155 = vmatprep.subr.bf16.mxu1 %v18646_v31  ;;  %v8255_v58 = vpack.c.bf16 %v7955_v2, %v7955_v2 }
0x1856   : > { %17173 = vmatprep.subr.bf16.mxu0 %v18646_v31  ;;  %v8261_v14 = vpack.c.bf16 %v8099_v29, %v8099_v29  ;;  %v8253_v45 = vpack.c.bf16 %v7953_v3, %v7953_v3  ;;  %v8590_v22 = vsel %vm1800_vm2, %v8263_v60, 0 }
0x1858   : > { %v8498_v50 = vsel %vm1800_vm2, %v8261_v14, 0 }
0x185b   : > { %17152 = vmatmul.mubr.msk.bf16.vlgmr.msra.gmra.mxu1 %vm1800_vm2, %v8250_v19 }
0x185c   : > { %17164 = vmatmul.mubr.msk.bf16.vlgmr.msra.gmra.mxu0 %vm1800_vm2, %v8252_v20  ;;  %17156 = vmatpush3.bf16.xpose.msra.mxu1 %v8406_v12 }
0x185d   : > { %v17131_v6 = vpop.f32.mrf.mxu0  ;;  %17174 = vmatpush3.bf16.xpose.msra.mxu0 %v8544_v55  ;;  %17157 = vmatprep.mubr.msk.bf16.mxu1 %vm18647_vm1, %v18646_v31 }
0x185e   : > { %v20745_v27 = vadd.f32 %v17131_v6, %v20735_v11  ;;  %17175 = vmatprep.mubr.msk.bf16.mxu0 %vm18647_vm1, %v18646_v31  ;;  %17167 = vmatprep.subr.bf16.mxu1 %v18646_v31 }
0x185f   : > { %v8201_v41 = vpop.f32.mrf.mxu0  ;;  %17185 = vmatprep.subr.bf16.mxu0 %v18646_v31 }
0x1860   : > { %v8240_v5 = vadd.f32 %v20735_v11, %v8201_v41 }
0x1861   : > { %v17132_v18 = vpop.f32.mrf.mxu0 }
0x1862   : > { %v8744_v33 = vpack.c.bf16 %v8240_v5, %v8240_v5  ;;  %v20753_v56 = vadd.f32 %v17132_v18, %v20735_v11 }
0x1863   : > { %v8204_v46 = vpop.f32.mrf.mxu0  ;;  %17158 = vmatmul.mubr.msk.bf16.vlgmr.msra.gmra.mxu1 %vm1800_vm2, %v8251_v15 }
0x1864   : > { %v8756_v39 = vsel %vm2294_vm3, %v8744_v33, 0  ;;  %17176 = vmatmul.mubr.msk.bf16.vlgmr.msra.gmra.mxu0 %vm1800_vm2, %v8254_v48  ;;  %17168 = vmatpush3.bf16.xpose.msra.mxu1 %v8498_v50  ;;  %v8241_v7 = vadd.f32 %v20735_v11, %v8204_v46 }
0x1865   : > { %v17135_v23 = vpop.f32.mrf.mxu0  ;;  %17186 = vmatpush3.bf16.msra.mxu0 %v8756_v39  ;;  %17169 = vmatprep.mubr.msk.bf16.mxu1 %vm18647_vm1, %v18646_v31 }
0x1866   : > { %v20764_v8 = vadd.f32 %v17135_v23, %v20735_v11  ;;  %17179 = vmatprep.subr.bf16.mxu1 %v18646_v31  ;;  %17187 = vmatprep.mubr.msk.bf16.mxu0 %vm18647_vm1, %v18646_v31  ;;  %v8745_v42 = vpack.c.bf16 %v8241_v7, %v8241_v7 }
0x1867   : > { %v8217_v40 = vpop.f32.mrf.mxu0  ;;  %17197 = vmatprep.subr.bf16.mxu0 %v18646_v31 }
0x1868   : > { %v20771_v47 = vadd.f32 %v20735_v11, %v8217_v40  ;;  %v8802_v38 = vsel %vm2294_vm3, %v8745_v42, 0 }
0x1869   : > { %v17136_v35 = vpop.f32.mrf.mxu0 }
0x186a   : > { %v20774_v62 = vadd.f32 %v17136_v35, %v20735_v11 }
0x186b   : > { %17170 = vmatmul.mubr.msk.bf16.vlgmr.msra.gmra.mxu1 %vm1800_vm2, %v8253_v45  ;;  %v20797_v13 = vpop.f32.mrf.mxu0 }
0x186c   : > { %17180 = vmatpush3.bf16.xpose.msra.mxu1 %v8590_v22  ;;  %17181 = vmatprep.mubr.msk.bf16.mxu1 %vm18647_vm1, %v18646_v31 }
0x186d   : > { %17191 = vmatprep.subr.bf16.mxu1 %v18646_v31 }
0x1873   : > { %17182 = vmatmul.mubr.msk.bf16.vlgmr.msra.gmra.mxu1 %vm1800_vm2, %v8255_v58 }
0x1874   : > { %17192 = vmatpush3.bf16.msra.mxu1 %v8802_v38  ;;  %17193 = vmatprep.mubr.msk.bf16.mxu1 %vm18647_vm1, %v18646_v31 }
0x1875   : > { %17203 = vmatprep.subr.bf16.mxu1 %v18646_v31 }
0x190b   : > { %v8304_v24 = vpop.f32.mrf.mxu1 }
0x190c   : > { %v8632_v34 = vmul.f32 0.35355338, %v8304_v24 }
0x190d   : > { %v17141_v44 = vpop.f32.mrf.mxu1 }
0x190e   : > { %v20790_v30 = vsel %vm801_vm4, %v8632_v34, -1e+30 }
0x190f   : > { %v8307_v49 = vpop.f32.mrf.mxu1  ;;  %v8648_v43 = vsel %vm1800_vm2, %v20790_v30, -inf }
0x1910   : > { %8649 = vmax.xlane.f32.xlu0 %v8648_v43 }
0x1911   : > { %v17142_v16 = vpop.f32.mrf.mxu1 }
0x1913   : > { %v8350_v10 = vpop.f32.mrf.mxu1 }
0x1914   : > { %v8633_v0 = vmul.f32 0.35355338, %v8350_v10 }
0x1915   : > { %v17147_v21 = vpop.f32.mrf.mxu1 }
0x1916   : > { %v8641_v52 = vsel %vm801_vm4, %v8633_v0, -1e+30 }
0x1917   : > { %v8353_v19 = vpop.f32.mrf.mxu1  ;;  %v8651_v20 = vsel %vm1800_vm2, %v8641_v52, -inf }
0x1918   : > { %8652 = vmax.xlane.f32.xlu1 %v8651_v20 }
0x1919   : > { %v17148_v12 = vpop.f32.mrf.mxu1 }
0x191b   : > { %v8396_v29 = vpop.f32.mrf.mxu1 }
0x191c   : > { %v8634_v55 = vmul.f32 0.35355338, %v8396_v29  ;;  %v8488_v26 = vpop.f32.mrf.mxu0 }
0x191d   : > { %v8636_v6 = vmul.f32 0.35355338, %v8488_v26  ;;  %v17153_v51 = vpop.f32.mrf.mxu1 }
0x191e   : > { %v8642_v14 = vsel %vm801_vm4, %v8634_v55, -1e+30  ;;  %v17165_v41 = vpop.f32.mrf.mxu0 }
0x191f   : > { %v8399_v5 = vpop.f32.mrf.mxu1  ;;  %v8654_v15 = vsel %vm1800_vm2, %v8642_v14, -inf  ;;  %v8644_v18 = vsel %vm801_vm4, %v8636_v6, -1e+30 }
0x1920   : > { %v8491_v48 = vpop.f32.mrf.mxu0  ;;  %8655 = vmax.xlane.f32.xlu0 %v8654_v15  ;;  %v8660_v50 = vsel %vm1800_vm2, %v8644_v18, -inf }
0x1921   : > { %v17154_v33 = vpop.f32.mrf.mxu1 }
0x1922   : > { %v17166_v17 = vpop.f32.mrf.mxu0 }
0x1923   : > { %v8442_v46 = vpop.f32.mrf.mxu1 }
0x1924   : > { %v8635_v39 = vmul.f32 0.35355338, %v8442_v46  ;;  %v8580_v3 = vpop.f32.mrf.mxu0  ;;  %8661 = vmax.xlane.f32.xlu0 %v8660_v50 }
0x1925   : > { %v8638_v23 = vmul.f32 0.35355338, %v8580_v3  ;;  %v17159_v60 = vpop.f32.mrf.mxu1 }
0x1926   : > { %v8643_v40 = vsel %vm801_vm4, %v8635_v39, -1e+30  ;;  %v17177_v45 = vpop.f32.mrf.mxu0 }
0x1927   : > { %v8646_v35 = vsel %vm801_vm4, %v8638_v23, -1e+30  ;;  %v8445_v22 = vpop.f32.mrf.mxu1  ;;  %v8657_v7 = vsel %vm1800_vm2, %v8643_v40, -inf }
0x1928   : > { %v8583_v2 = vpop.f32.mrf.mxu0  ;;  %8658 = vmax.xlane.f32.xlu1 %v8657_v7  ;;  %v8666_v42 = vsel %vm1800_vm2, %v8646_v35, -inf }
0x1929   : > { %8667 = vmax.xlane.f32.xlu0 %v8666_v42  ;;  %v17160_v58 = vpop.f32.mrf.mxu1 }
0x192a   : > { %v17178_v38 = vpop.f32.mrf.mxu0 }
0x192b   : > { %v8534_v24 = vpop.f32.mrf.mxu1 }
0x192c   : > { %v8637_v34 = vmul.f32 0.35355338, %v8534_v24 }
0x192d   : > { %v17171_v44 = vpop.f32.mrf.mxu1 }
0x192e   : > { %v8645_v49 = vsel %vm801_vm4, %v8637_v34, -1e+30 }
0x192f   : > { %v8537_v43 = vpop.f32.mrf.mxu1  ;;  %v8663_v16 = vsel %vm1800_vm2, %v8645_v49, -inf }
0x1930   : > { %8664 = vmax.xlane.f32.xlu1 %v8663_v16 }
0x1931   : > { %v17172_v10 = vpop.f32.mrf.mxu1 }
0x1933   : > { %v8626_v0 = vpop.f32.mrf.mxu1 }
0x1934   : > { %v8639_v21 = vmul.f32 0.35355338, %v8626_v0 }
0x1935   : > { %v17183_v19 = vpop.f32.mrf.mxu1 }
0x1936   : > { %v8647_v20 = vsel %vm801_vm4, %v8639_v21, -1e+30 }
0x1937   : > { %v8629_v12 = vpop.f32.mrf.mxu1  ;;  %v8669_v29 = vsel %vm1800_vm2, %v8647_v20, -inf }
0x1938   : > { %8670 = vmax.xlane.f32.xlu1 %v8669_v29 }
0x1939   : > { %v17184_v55 = vpop.f32.mrf.mxu1 }
0x1999   : > { %v8650_v26 = vpop.xlane.xlu0 %8649 }
0x199a   : > { %v8672_v6 = vsub.f32 %v20790_v30, %v8650_v26 }
0x199c   : > { %v8680_v51 = vmul.f32 1.442695, %v8672_v6  ;;  %v8746_v6 = vpack.c.bf16 %v20745_v27, %v20745_v27  ;;  %v8747_v27 = vpack.c.bf16 %v20753_v56, %v20753_v56  ;;  %v8748_v56 = vpack.c.bf16 %v20771_v47, %v20771_v47 }
0x199e   : > { %18406 = vpow2.f32 %v8680_v51 }
0x19a1   : > { %v8653_v41 = vpop.xlane.xlu1 %8652 }
0x19a2   : > { %v8673_v5 = vsub.f32 %v8641_v52, %v8653_v41 }
0x19a4   : > { %v8682_v15 = vmul.f32 1.442695, %v8673_v5 }
0x19a6   : > { %18408 = vpow2.f32 %v8682_v15  ;;  %v8848_v15 = vsel %vm2294_vm3, %v8746_v6, 0  ;;  %v18085_v6 = vld [vmem:[%s22316_s29 + $0x140] sm:$0xff]  }
0x19a9   : > { %v8656_v48 = vpop.xlane.xlu0 %8655 }
0x19aa   : > { %v8674_v33 = vsub.f32 %v8642_v14, %v8656_v48 }
0x19ab   : > { %v18407_v17 = vpop.eup %18406 }
0x19ac   : > { %v8684_v46 = vmul.f32 1.442695, %v8674_v33  ;;  %v8696_v50 = vsel %vm1800_vm2, %v18407_v17, 0.0 }
0x19ad   : > { %v8662_v39 = vpop.xlane.xlu0 %8661  ;;  %8697 = vadd.xlane.f32.xlu0 %v8696_v50 }
0x19ae   : > { %18410 = vpow2.f32 %v8684_v46  ;;  %v8676_v3 = vsub.f32 %v8644_v18, %v8662_v39 }
0x19b0   : > { %v8688_v23 = vmul.f32 1.442695, %v8676_v3  ;;  %v8894_v3 = vsel %vm2294_vm3, %v8747_v27, 0  ;;  %v15143_v27 = vld [vmem:[%s22257_s13 + $0x10] sm:$0xf] }
0x19b1   : > { %v8659_v60 = vpop.xlane.xlu1 %8658 }
0x19b2   : > { %18412 = vpow2.f32 %v8688_v23  ;;  %v8675_v30 = vsub.f32 %v8643_v40, %v8659_v60  ;;  %v8668_v45 = vpop.xlane.xlu0 %8667 }
0x19b3   : > { %v18409_v22 = vpop.eup %18408  ;;  %v8678_v7 = vsub.f32 %v8646_v35, %v8668_v45 }
0x19b4   : > { %v8686_v52 = vmul.f32 1.442695, %v8675_v30  ;;  %v8699_v2 = vsel %vm1800_vm2, %v18409_v22, 0.0 }
0x19b5   : > { %v8692_v42 = vmul.f32 1.442695, %v8678_v7  ;;  %8700 = vadd.xlane.f32.xlu1 %v8699_v2  ;;  %v8940_v7 = vsel %vm2294_vm3, %v8748_v56, 0 }
0x19b6   : > { %18414 = vpow2.f32 %v8686_v52  ;;  %v8245_v52 = vadd.f32 %v20735_v11, %v20797_v13 }
0x19b7   : > { %18416 = vpow2.f32 %v8692_v42  ;;  %v8750_v42 = vpack.c.bf16 %v20764_v8, %v20764_v8 }
0x19b9   : > { %v8665_v14 = vpop.xlane.xlu1 %8664  ;;  %v9032_v13 = vsel %vm2294_vm3, %v8750_v42, 0 }
0x19ba   : > { %v8677_v58 = vsub.f32 %v8645_v49, %v8665_v14  ;;  %v8749_v14 = vpack.c.bf16 %v8245_v52, %v8245_v52 }
0x19bb   : > { %v18411_v38 = vpop.eup %18410 }
0x19bc   : > { %v8690_v24 = vmul.f32 1.442695, %v8677_v58  ;;  %v8702_v18 = vsel %vm1800_vm2, %v18411_v38, 0.0 }
0x19bd   : > { %8703 = vadd.xlane.f32.xlu0 %v8702_v18 }
0x19be   : > { %18418 = vpow2.f32 %v8690_v24 }
0x19bf   : > { %v18413_v34 = vpop.eup %18412 }
0x19c0   : > { %v8708_v40 = vsel %vm1800_vm2, %v18413_v34, 0.0 }
0x19c1   : > { %8709 = vadd.xlane.f32.xlu0 %v8708_v40  ;;  %v8671_v35 = vpop.xlane.xlu1 %8670 }
0x19c2   : > { %v8679_v44 = vsub.f32 %v8647_v20, %v8671_v35  ;;  %v8751_v35 = vpack.c.bf16 %v20774_v62, %v20774_v62 }
0x19c3   : > { %v18415_v43 = vpop.eup %18414 }
0x19c4   : > { %v20822_v16 = vpop.eup %18416  ;;  %v8694_v10 = vmul.f32 1.442695, %v8679_v44  ;;  %v8705_v0 = vsel %vm1800_vm2, %v18415_v43, 0.0 }
0x19c5   : > { %v8714_v49 = vsel %vm1800_vm2, %v20822_v16, 0.0  ;;  %8706 = vadd.xlane.f32.xlu1 %v8705_v0  ;;  %v9078_v0 = vsel %vm2294_vm3, %v8751_v35, 0 }
0x19c6   : > { %18420 = vpow2.f32 %v8694_v10  ;;  %8715 = vadd.xlane.f32.xlu0 %v8714_v49 }
0x19cb   : > { %v20827_v21 = vpop.eup %18418 }
0x19cc   : > { %v8711_v19 = vsel %vm1800_vm2, %v20827_v21, 0.0 }
0x19cd   : > { %8712 = vadd.xlane.f32.xlu1 %v8711_v19  ;;  %v18079_v19 = vld [vmem:[%s22316_s29 + $0x170] sm:$0xff]  }
0x19d3   : > { %v20831_v12 = vpop.eup %18420 }
0x19d4   : > { %v8717_v20 = vsel %vm1800_vm2, %v20831_v12, 0.0 }
0x19d5   : > { %8718 = vadd.xlane.f32.xlu1 %v8717_v20  ;;  %v18080_v20 = vld [vmem:[%s22316_s29 + $0x168] sm:$0xff]  }
0x1a36   : > { %v8698_v29 = vpop.xlane.xlu0 %8697 }
0x1a37   : > { %18422 = vrcp.f32 %v8698_v29  ;;  %v18082_v29 = vld [vmem:[%s22316_s29 + $0x158] sm:$0xff]  }
0x1a3e   : > { %v8701_v55 = vpop.xlane.xlu1 %8700 }
0x1a3f   : > { %18424 = vrcp.f32 %v8701_v55  ;;  %v18083_v55 = vld [vmem:[%s22316_s29 + $0x150] sm:$0xff]  }
0x1a44   : > { %v18423_v26 = vpop.eup %18422 }
0x1a45   : > { %v8728_v51 = vmul.f32 %v18423_v26, %v18407_v17  ;;  %v18084_v26 = vld [vmem:[%s22316_s29 + $0x148] sm:$0xff]  }
0x1a46   : > { %v8704_v41 = vpop.xlane.xlu0 %8703 }
0x1a47   : > { %v8736_v5 = vpack.c.bf16 %v8728_v51, %v8728_v51  ;;  %18426 = vrcp.f32 %v8704_v41  ;;  %v18086_v51 = vld [vmem:[%s22318_s26 + $0x178] sm:$0xff]   ;;  %v18087_v41 = vld [vmem:[%s22318_s26 + $0x170] sm:$0xff]  }
0x1a49   : > { %17188 = vmatmul.mubr.msk.bf16.vlgmr.msra.gmra.mxu0 %vm1800_vm2, %v8736_v5  ;;  %v18088_v5 = vld [vmem:[%s22318_s26 + $0x168] sm:$0xff]  }
0x1a4a   : > { %17198 = vmatpush3.bf16.msra.mxu0 %v8848_v15  ;;  %v8710_v48 = vpop.xlane.xlu0 %8709  ;;  %17199 = vmatprep.mubr.msk.bf16.mxu0 %vm18647_vm1, %v18646_v31  ;;  %v18089_v15 = vld [vmem:[%s22318_s26 + $0x160] sm:$0xff]  }
0x1a4b   : > { %18428 = vrcp.f32 %v8710_v48  ;;  %17209 = vmatprep.subr.bf16.mxu0 %v18646_v31  ;;  %v18090_v48 = vld [vmem:[%s22318_s26 + $0x158] sm:$0xff]  }
0x1a4c   : > { %v18425_v33 = vpop.eup %18424 }
0x1a4d   : > { %v8729_v17 = vmul.f32 %v18425_v33, %v18409_v22  ;;  %v18091_v33 = vld [vmem:[%s22318_s26 + $0x150] sm:$0xff]  }
0x1a4e   : > { %v8707_v46 = vpop.xlane.xlu1 %8706 }
0x1a4f   : > { %v8737_v50 = vpack.c.bf16 %v8729_v17, %v8729_v17  ;;  %18430 = vrcp.f32 %v8707_v46  ;;  %v8716_v39 = vpop.xlane.xlu0 %8715  ;;  %v9163_v17 = vsel %vm2294_vm3, %v15143_v27, 0  ;;  %v18092_v46 = vld [vmem:[%s22318_s26 + $0x148] sm:$0xff]  }
0x1a50   : > { %18432 = vrcp.f32 %v8716_v39  ;;  %v18093_v39 = vld [vmem:[%s22318_s26 + $0x140] sm:$0xff]  }
0x1a51   : > { %17194 = vmatmul.mubr.msk.bf16.vlgmr.msra.gmra.mxu1 %vm1800_vm2, %v8737_v50  ;;  %v18094_v50 = vld [vmem:[%s22317_s10 + $0x178] sm:$0xff]  }
0x1a52   : > { %17204 = vmatpush3.bf16.msra.mxu1 %v8894_v3  ;;  %17205 = vmatprep.mubr.msk.bf16.mxu1 %vm18647_vm1, %v18646_v31 }
0x1a53   : > { %17215 = vmatprep.subr.bf16.mxu1 %v18646_v31 }
0x1a54   : > { %v18427_v23 = vpop.eup %18426 }
0x1a55   : > { %v8730_v60 = vmul.f32 %v18427_v23, %v18411_v38 }
0x1a56   : > { %v8713_v30 = vpop.xlane.xlu1 %8712 }
0x1a57   : > { %v8738_v45 = vpack.c.bf16 %v8730_v60, %v8730_v60  ;;  %18434 = vrcp.f32 %v8713_v30 }
0x1a58   : > { %v18429_v22 = vpop.eup %18428 }
0x1a59   : > { %17200 = vmatmul.mubr.msk.bf16.vlgmr.msra.gmra.mxu0 %vm1800_vm2, %v8738_v45  ;;  %v8732_v2 = vmul.f32 %v18429_v22, %v18413_v34  ;;  %v8986_v34 = vsel %vm2294_vm3, %v8749_v14, 0 }
0x1a5a   : > { %17210 = vmatpush3.bf16.msra.mxu0 %v8940_v7  ;;  %17211 = vmatprep.mubr.msk.bf16.mxu0 %vm18647_vm1, %v18646_v31 }
0x1a5b   : > { %17221 = vmatprep.subr.bf16.mxu0 %v18646_v31  ;;  %v8740_v24 = vpack.c.bf16 %v8732_v2, %v8732_v2 }
0x1a5c   : > { %v18431_v47 = vpop.eup %18430 }
0x1a5d   : > { %v8731_v58 = vmul.f32 %v18431_v47, %v18415_v43  ;;  %v18433_v11 = vpop.eup %18432 }
0x1a5e   : > { %v8719_v38 = vpop.xlane.xlu1 %8718  ;;  %v8734_v40 = vmul.f32 %v18433_v11, %v20822_v16  ;;  %v18078_v16 = vld [vmem:[%s22316_s29 + $0x178] sm:$0xff]  }
0x1a5f   : > { %v8739_v18 = vpack.c.bf16 %v8731_v58, %v8731_v58  ;;  %18436 = vrcp.f32 %v8719_v38 }
0x1a60   : > { %v8742_v43 = vpack.c.bf16 %v8734_v40, %v8734_v40 }
0x1a61   : > { %17206 = vmatmul.mubr.msk.bf16.vlgmr.msra.gmra.mxu1 %vm1800_vm2, %v8739_v18  ;;  %17212 = vmatmul.mubr.msk.bf16.vlgmr.msra.gmra.mxu0 %vm1800_vm2, %v8740_v24  ;;  %v18095_v18 = vld [vmem:[%s22317_s10 + $0x170] sm:$0xff]  }
0x1a62   : > { %17216 = vmatpush3.bf16.msra.mxu1 %v8986_v34  ;;  %17222 = vmatpush3.bf16.msra.mxu0 %v9032_v13 }
0x1a63   : > { %17217 = vmatprep.mubr.msk.bf16.mxu1 %vm18647_vm1, %v18646_v31  ;;  %17223 = vmatprep.mubr.msk.bf16.mxu0 %vm18647_vm1, %v18646_v31 }
0x1a64   : > { %v18435_v8 = vpop.eup %18434  ;;  %17227 = vmatprep.subr.bf16.mxu1 %v18646_v31  ;;  %17869 = vmatprep.subr.msk.bf16.mxu0 %vm2294_vm3, %v15143_v27 }
0x1a65   : > { %v8733_v44 = vmul.f32 %v18435_v8, %v20827_v21  ;;  %v18096_v8 = vld [vmem:[%s22317_s10 + $0x168] sm:$0xff]  }
0x1a67   : > { %v8741_v10 = vpack.c.bf16 %v8733_v44, %v8733_v44 }
0x1a69   : > { %17218 = vmatmul.mubr.msk.bf16.vlgmr.msra.gmra.mxu1 %vm1800_vm2, %v8741_v10  ;;  %17224 = vmatmul.mubr.msk.bf16.vlgmr.msra.gmra.mxu0 %vm1800_vm2, %v8742_v43 }
0x1a6a   : > { %17228 = vmatpush3.bf16.msra.mxu1 %v9078_v0  ;;  %17229 = vmatprep.mubr.msk.bf16.mxu1 %vm18647_vm1, %v18646_v31  ;;  %v18097_v0 = vld [vmem:[%s22317_s10 + $0x160] sm:$0xff]  }
0x1a6b   : > { %17243 = vmatprep.subr.bf16.mxu1 %v18078_v16  ;;  %17234 = vmatpush3.bf16.msra.mxu0 %v9163_v17 }
0x1a6c   : > { %v18437_v62 = vpop.eup %18436  ;;  %17267 = vmatprep.subr.bf16.mxu0 %v18094_v50 }
0x1a6d   : > { %v8735_v49 = vmul.f32 %v18437_v62, %v20831_v12  ;;  %v18081_v12 = vld [vmem:[%s22316_s29 + $0x160] sm:$0xff]  }
0x1a6f   : > { %v8743_v21 = vpack.c.bf16 %v8735_v49, %v8735_v49 }
0x1a71   : > { %17230 = vmatmul.mubr.msk.bf16.vlgmr.msra.gmra.mxu1 %vm1800_vm2, %v8743_v21 }
0x1a72   : > { %17244 = vmatpush3.bf16.msra.mxu1 %v18078_v16  ;;  %17259 = vmatprep.mubr.bf16.mxu1 %v20646_v59 }
0x1a73   : > { %17245 = vmatprep.subr.bf16.mxu1 %v18079_v19 }
0x1a76   : > { %17246 = vmatpush3.bf16.msra.mxu1 %v18079_v19 }
0x1a77   : > { %17247 = vmatprep.subr.bf16.mxu1 %v18080_v20 }
0x1a7a   : > { %17248 = vmatpush3.bf16.msra.mxu1 %v18080_v20  ;;  %v18098_v20 = vld [vmem:[%s22317_s10 + $0x158] sm:$0xff]  }
0x1a7b   : > { %17249 = vmatprep.subr.bf16.mxu1 %v18081_v12 }
0x1a7e   : > { %17250 = vmatpush3.bf16.msra.mxu1 %v18081_v12 }
0x1a7f   : > { %17251 = vmatprep.subr.bf16.mxu1 %v18082_v29 }
0x1a82   : > { %17252 = vmatpush3.bf16.msra.mxu1 %v18082_v29 }
0x1a83   : > { %17253 = vmatprep.subr.bf16.mxu1 %v18083_v55 }
0x1a86   : > { %17254 = vmatpush3.bf16.msra.mxu1 %v18083_v55 }
0x1a87   : > { %17255 = vmatprep.subr.bf16.mxu1 %v18084_v26 }
0x1a8a   : > { %17256 = vmatpush3.bf16.msra.mxu1 %v18084_v26 }
0x1a8b   : > { %17257 = vmatprep.subr.bf16.mxu1 %v18085_v6 }
0x1a8e   : > { %17258 = vmatpush3.bf16.msra.mxu1 %v18085_v6  ;;  %v18099_v6 = vld [vmem:[%s22317_s10 + $0x150] sm:$0xff]  }
0x1a8f   : > { %17291 = vmatprep.subr.bf16.mxu1 %v18086_v51 }
0x1a91   : > { %17260 = vmatmul.mubr.bf16.vlgmr.msra.gmra.mxu1 %v20650_v9 }
0x1a92   : > { %17263 = vmatprep.mubr.bf16.mxu1 %v20670_v4  ;;  %17292 = vmatpush3.bf16.msra.mxu1 %v18086_v51 }
0x1a93   : > { %17293 = vmatprep.subr.bf16.mxu1 %v18087_v41 }
0x1a96   : > { %17294 = vmatpush3.bf16.msra.mxu1 %v18087_v41 }
0x1a97   : > { %17295 = vmatprep.subr.bf16.mxu1 %v18088_v5 }
0x1a99   : > { %17264 = vmatmul.mubr.bf16.gmra.mxu1 %v20674_v1 }
0x1a9a   : > { %17296 = vmatpush3.bf16.msra.mxu1 %v18088_v5  ;;  %17307 = vmatprep.mubr.bf16.mxu1 %v20646_v59  ;;  %v18100_v5 = vld [vmem:[%s22317_s10 + $0x148] sm:$0xff]  }
0x1a9b   : > { %17297 = vmatprep.subr.bf16.mxu1 %v18089_v15 }
0x1a9e   : > { %17298 = vmatpush3.bf16.msra.mxu1 %v18089_v15 }
0x1a9f   : > { %17299 = vmatprep.subr.bf16.mxu1 %v18090_v48 }
0x1aa2   : > { %17300 = vmatpush3.bf16.msra.mxu1 %v18090_v48  ;;  %v18101_v48 = vld [vmem:[%s22317_s10 + $0x140] sm:$0xff]  }
0x1aa3   : > { %17301 = vmatprep.subr.bf16.mxu1 %v18091_v33 }
0x1aa6   : > { %17302 = vmatpush3.bf16.msra.mxu1 %v18091_v33 }
0x1aa7   : > { %17303 = vmatprep.subr.bf16.mxu1 %v18092_v46 }
0x1aaa   : > { %17304 = vmatpush3.bf16.msra.mxu1 %v18092_v46 }
0x1aab   : > { %17305 = vmatprep.subr.bf16.mxu1 %v18093_v39 }
0x1aae   : > { %17306 = vmatpush3.bf16.msra.mxu1 %v18093_v39 }
0x1aaf   : > { %17339 = vmatprep.subr.bf16.mxu1 %v18646_v31 }
0x1ab1   : > { %17308 = vmatmul.mubr.bf16.vlgmr.msra.gmra.mxu1 %v20650_v9 }
0x1ab2   : > { %17311 = vmatprep.mubr.bf16.mxu1 %v20670_v4 }
0x1ab9   : > { %17312 = vmatmul.mubr.bf16.gmra.mxu1 %v20674_v1 }
0x1aba   : > { %17341 = vmatprep.mubr.msk.bf16.mxu1 %vm18647_vm1, %v18646_v31 }
0x1b09   : > { %v8792_v3 = vpop.f32.mrf.mxu0 }
0x1b0b   : > { %v17189_v23 = vpop.f32.mrf.mxu0 }
0x1b0d   : > { %v8795_v56 = vpop.f32.mrf.mxu0 }
0x1b0e   : > { %v20992_v56 = vld [vmem:[%s22256_s12 + $0x5] ss:$0 sm:$0xff] }
0x1b0f   : > { %v17190_v60 = vpop.f32.mrf.mxu0 }
0x1b11   : > { %v8838_v30 = vpop.f32.mrf.mxu1 }
0x1b12   : > { %v15591_v45 = vpack.c.bf16 %v8838_v30, %v8792_v3 }
0x1b13   : > { %v17195_v22 = vpop.f32.mrf.mxu1 }
0x1b14   : > { %17235 = vmatprep.mubr.msk.bf16.mxu0 %vm1800_vm2, %v15591_v45 }
0x1b15   : > { %v8841_v7 = vpop.f32.mrf.mxu1 }
0x1b17   : > { %v17196_v52 = vpop.f32.mrf.mxu1 }
0x1b19   : > { %v8884_v2 = vpop.f32.mrf.mxu0 }
0x1b1b   : > { %v17201_v47 = vpop.f32.mrf.mxu0 }
0x1b1d   : > { %v8887_v42 = vpop.f32.mrf.mxu0 }
0x1b1f   : > { %v17202_v14 = vpop.f32.mrf.mxu0 }
0x1b21   : > { %v8930_v58 = vpop.f32.mrf.mxu1  ;;  %v8976_v38 = vpop.f32.mrf.mxu0 }
0x1b22   : > { %v15592_v24 = vpack.c.bf16 %v8930_v58, %v8884_v2 }
0x1b23   : > { %v17207_v11 = vpop.f32.mrf.mxu1  ;;  %v17213_v13 = vpop.f32.mrf.mxu0 }
0x1b24   : > { %17236 = vmatmul.mubr.msk.bf16.vlgmr.msra.gmra.mxu0 %vm1800_vm2, %v15592_v24 }
0x1b25   : > { %17268 = vmatpush3.bf16.msra.mxu0 %v18094_v50  ;;  %v8933_v34 = vpop.f32.mrf.mxu1  ;;  %v8979_v40 = vpop.f32.mrf.mxu0 }
0x1b26   : > { %17269 = vmatprep.subr.bf16.mxu0 %v18095_v18 }
0x1b27   : > { %v17208_v35 = vpop.f32.mrf.mxu1  ;;  %v17214_v44 = vpop.f32.mrf.mxu0 }
0x1b29   : > { %17270 = vmatpush3.bf16.msra.mxu0 %v18095_v18  ;;  %v9022_v43 = vpop.f32.mrf.mxu1  ;;  %v9068_v10 = vpop.f32.mrf.mxu0 }
0x1b2a   : > { %v15593_v16 = vpack.c.bf16 %v9022_v43, %v8976_v38  ;;  %17271 = vmatprep.subr.bf16.mxu0 %v18096_v8  ;;  %v21030_v43 = vld [vmem:[%s22322_s11 + $0x5] ss:$0 sm:$0xff] }
0x1b2b   : > { %v17219_v62 = vpop.f32.mrf.mxu1  ;;  %v17225_v49 = vpop.f32.mrf.mxu0 }
0x1b2c   : > { %17239 = vmatprep.mubr.msk.bf16.mxu0 %vm1800_vm2, %v15593_v16 }
0x1b2d   : > { %17272 = vmatpush3.bf16.msra.mxu0 %v18096_v8  ;;  %v9025_v21 = vpop.f32.mrf.mxu1  ;;  %v9071_v19 = vpop.f32.mrf.mxu0 }
0x1b2e   : > { %17273 = vmatprep.subr.bf16.mxu0 %v18097_v0 }
0x1b2f   : > { %v17220_v12 = vpop.f32.mrf.mxu1  ;;  %v17226_v29 = vpop.f32.mrf.mxu0 }
0x1b31   : > { %17274 = vmatpush3.bf16.msra.mxu0 %v18097_v0  ;;  %v9114_v55 = vpop.f32.mrf.mxu1 }
0x1b32   : > { %v15594_v26 = vpack.c.bf16 %v9114_v55, %v9068_v10  ;;  %17275 = vmatprep.subr.bf16.mxu0 %v18098_v20 }
0x1b33   : > { %v17231_v51 = vpop.f32.mrf.mxu1 }
0x1b34   : > { %17240 = vmatmul.mubr.msk.bf16.gmra.mxu0 %vm1800_vm2, %v15594_v26 }
0x1b35   : > { %17276 = vmatpush3.bf16.msra.mxu0 %v18098_v20  ;;  %v9117_v41 = vpop.f32.mrf.mxu1  ;;  %17283 = vmatprep.mubr.bf16.mxu0 %v20646_v59  ;;  %v21038_v20 = vld [vmem:[%s22324_s0 + $0x5] ss:$0 sm:$0xff] }
0x1b36   : > { %17277 = vmatprep.subr.bf16.mxu0 %v18099_v6 }
0x1b37   : > { %v17232_v15 = vpop.f32.mrf.mxu1 }
0x1b39   : > { %17278 = vmatpush3.bf16.msra.mxu0 %v18099_v6 }
0x1b3a   : > { %17279 = vmatprep.subr.bf16.mxu0 %v18100_v5 }
0x1b3d   : > { %17280 = vmatpush3.bf16.msra.mxu0 %v18100_v5 }
0x1b3e   : > { %17281 = vmatprep.subr.bf16.mxu0 %v18101_v48 }
0x1b41   : > { %17282 = vmatpush3.bf16.msra.mxu0 %v18101_v48 }
0x1b42   : > { %17315 = vmatprep.subr.bf16.mxu0 %v18646_v31 }
0x1b44   : > { %17284 = vmatmul.mubr.bf16.vlgmr.msra.gmra.mxu0 %v20650_v9 }
0x1b45   : > { %17287 = vmatprep.mubr.bf16.mxu0 %v20670_v4 }
0x1b4c   : > { %17288 = vmatmul.mubr.bf16.gmra.mxu0 %v20674_v1 }
0x1b4d   : > { %17317 = vmatprep.mubr.msk.bf16.mxu0 %vm18647_vm1, %v18646_v31 }
0x1b51   : > { %v20979_v33 = vpop.f32.mrf.mxu1 }
0x1b53   : > { %v9337_v27 = vpop.f32.mrf.mxu1 }
0x1b54   : > { %v9376_v29 = vadd.f32 %v21038_v20, %v9337_v27 }
0x1b55   : > { %v20981_v17 = vpop.f32.mrf.mxu1 }
0x1b56   : > { %v9676_v51 = vpack.c.bf16 %v9376_v29, %v9376_v29 }
0x1b57   : > { %v9340_v46 = vpop.f32.mrf.mxu1 }
0x1b58   : > { %v9377_v27 = vadd.f32 %v21038_v20, %v9340_v46 }
0x1b59   : > { %v20983_v50 = vpop.f32.mrf.mxu1 }
0x1b5b   : > { %v9353_v39 = vpop.f32.mrf.mxu1 }
0x1b5d   : > { %v20985_v3 = vpop.f32.mrf.mxu1 }
0x1b5f   : > { %v20987_v23 = vpop.f32.mrf.mxu1 }
0x1b71   : > { %v17309_v60 = vpop.f32.mrf.mxu1 }
0x1b72   : > { %v20995_v30 = vadd.f32 %v17309_v60, %v20992_v56 }
0x1b73   : > { %v9629_v45 = vpop.f32.mrf.mxu1 }
0x1b75   : > { %v17310_v22 = vpop.f32.mrf.mxu1 }
0x1b76   : > { %v20998_v7 = vadd.f32 %v17310_v22, %v20992_v56  ;;  %v9380_v22 = vadd.f32 %v21038_v20, %v9353_v39 }
0x1b77   : > { %v21000_v52 = vpop.f32.mrf.mxu1 }
0x1b79   : > { %v17313_v2 = vpop.f32.mrf.mxu1 }
0x1b7a   : > { %v21003_v47 = vadd.f32 %v17313_v2, %v20992_v56 }
0x1b7b   : > { %v9645_v42 = vpop.f32.mrf.mxu1 }
0x1b7c   : > { %v21006_v14 = vadd.f32 %v20992_v56, %v9645_v42 }
0x1b7d   : > { %v17314_v58 = vpop.f32.mrf.mxu1 }
0x1b7e   : > { %v21009_v38 = vadd.f32 %v17314_v58, %v20992_v56  ;;  %v9677_v58 = vpack.c.bf16 %v9377_v27, %v9377_v27  ;;  %v9383_v27 = vadd.f32 %v20985_v3, %v21038_v20 }
0x1be4   : > { %v21011_v24 = vpop.f32.mrf.mxu0 }
0x1be6   : > { %v21013_v18 = vpop.f32.mrf.mxu0 }
0x1be8   : > { %v21015_v11 = vpop.f32.mrf.mxu0 }
0x1bea   : > { %v21017_v13 = vpop.f32.mrf.mxu0 }
0x1bf4   : > { %v21019_v34 = vpop.f32.mrf.mxu0 }
0x1bf6   : > { %v21021_v40 = vpop.f32.mrf.mxu0 }
0x1bf8   : > { %v21023_v8 = vpop.f32.mrf.mxu0 }
0x1bfa   : > { %v21025_v35 = vpop.f32.mrf.mxu0 }
0x1c04   : > { %v17285_v44 = vpop.f32.mrf.mxu0 }
0x1c05   : > { %v9524_v5 = vadd.f32 %v17285_v44, %v21030_v43  ;;  %v9680_v44 = vpack.c.bf16 %v9380_v22, %v9380_v22  ;;  %v9683_v22 = vpack.c.bf16 %v9383_v27, %v9383_v27 }
0x1c06   : > { %v9483_v10 = vpop.f32.mrf.mxu0 }
0x1c07   : > { %v9522_v16 = vadd.f32 %v21030_v43, %v9483_v10  ;;  %v9686_v2 = vpack.c.bf16 %v9524_v5, %v9524_v5  ;;  %v9668_v10 = vadd.f32 %v20992_v56, %v9629_v45 }
0x1c08   : > { %v17286_v0 = vpop.f32.mrf.mxu0 }
0x1c09   : > { %v9684_v62 = vpack.c.bf16 %v9522_v16, %v9522_v16  ;;  %v9788_v16 = vsel %vm1800_vm2, %v9686_v2, 0  ;;  %v10172_v45 = vpack.c.bf16 %v9668_v10, %v9668_v10  ;;  %v21111_v10 = vpop.f32.mrf.mxu1 }
0x1c0a   : > { %v9486_v49 = vpop.f32.mrf.mxu0 }
0x1c0b   : > { %v9696_v21 = vsel %vm1800_vm2, %v9684_v62, 0  ;;  %v9523_v19 = vadd.f32 %v21030_v43, %v9486_v49  ;;  %v9525_v62 = vadd.f32 %v17286_v0, %v21030_v43  ;;  %v9378_v49 = vadd.f32 %v20979_v33, %v21038_v20 }
0x1c0c   : > { %v17289_v12 = vpop.f32.mrf.mxu0  ;;  %17316 = vmatpush3.bf16.xpose.msra.mxu0 %v9696_v21  ;;  %v9382_v21 = vadd.f32 %v20983_v50, %v21038_v20  ;;  %v10184_v33 = vsel %vm2294_vm3, %v10172_v45, 0 }
0x1c0d   : > { %17321 = vmatprep.subr.bf16.mxu0 %v18646_v31  ;;  %v9685_v26 = vpack.c.bf16 %v9523_v19, %v9523_v19  ;;  %v9528_v15 = vadd.f32 %v17289_v12, %v21030_v43  ;;  %v9687_v0 = vpack.c.bf16 %v9525_v62, %v9525_v62  ;;  %v9678_v12 = vpack.c.bf16 %v9378_v49, %v9378_v49 }
0x1c0e   : > { %v9499_v55 = vpop.f32.mrf.mxu0  ;;  %v9682_v29 = vpack.c.bf16 %v9382_v21, %v9382_v21 }
0x1c0f   : > { %v9526_v6 = vadd.f32 %v21030_v43, %v9499_v55  ;;  %v9742_v60 = vsel %vm1800_vm2, %v9685_v26, 0  ;;  %v9690_v42 = vpack.c.bf16 %v9528_v15, %v9528_v15  ;;  %v9834_v55 = vsel %vm1800_vm2, %v9687_v0, 0 }
0x1c10   : > { %v17290_v39 = vpop.f32.mrf.mxu0  ;;  %v9379_v26 = vadd.f32 %v20981_v17, %v21038_v20  ;;  %v9381_v17 = vadd.f32 %v21038_v20, %v20987_v23 }
0x1c11   : > { %v9688_v41 = vpack.c.bf16 %v9526_v6, %v9526_v6  ;;  %v9972_v46 = vsel %vm1800_vm2, %v9690_v42, 0 }
0x1c12   : > { %v9502_v19 = vpop.f32.mrf.mxu0 }
0x1c13   : > { %v9880_v48 = vsel %vm1800_vm2, %v9688_v41, 0  ;;  %17318 = vmatmul.mubr.msk.bf16.vlgmr.msra.gmra.mxu0 %vm1800_vm2, %v9676_v51  ;;  %v9527_v50 = vadd.f32 %v21030_v43, %v9502_v19  ;;  %v9679_v51 = vpack.c.bf16 %v9379_v26, %v9379_v26  ;;  %v9529_v41 = vadd.f32 %v17290_v39, %v21030_v43 }
0x1c14   : > { %17322 = vmatpush3.bf16.xpose.msra.mxu0 %v9742_v60  ;;  %17340 = vmatpush3.bf16.xpose.msra.mxu1 %v9880_v48  ;;  %v9681_v48 = vpack.c.bf16 %v9381_v17, %v9381_v17  ;;  %v9669_v60 = vadd.f32 %v20992_v56, %v21000_v52 }
0x1c15   : > { %17323 = vmatprep.mubr.msk.bf16.mxu0 %vm18647_vm1, %v18646_v31  ;;  %17327 = vmatprep.subr.bf16.mxu0 %v18646_v31  ;;  %v9689_v6 = vpack.c.bf16 %v9527_v50, %v9527_v50  ;;  %v9691_v15 = vpack.c.bf16 %v9529_v41, %v9529_v41 }
0x1c16   : > { %17351 = vmatprep.subr.bf16.mxu1 %v18646_v31  ;;  %v10173_v23 = vpack.c.bf16 %v9669_v60, %v9669_v60 }
0x1c17   : > { %v9926_v5 = vsel %vm1800_vm2, %v9689_v6, 0  ;;  %v10018_v43 = vsel %vm1800_vm2, %v9691_v15, 0 }
0x1c18   : > { %v10230_v2 = vsel %vm2294_vm3, %v10173_v23, 0 }
0x1c1b   : > { %17324 = vmatmul.mubr.msk.bf16.vlgmr.msra.gmra.mxu0 %vm1800_vm2, %v9677_v58  ;;  %17342 = vmatmul.mubr.msk.bf16.vlgmr.msra.gmra.mxu1 %vm1800_vm2, %v9680_v44 }
0x1c1c   : > { %17328 = vmatpush3.bf16.xpose.msra.mxu0 %v9788_v16  ;;  %17352 = vmatpush3.bf16.xpose.msra.mxu1 %v9972_v46 }
0x1c1d   : > { %17329 = vmatprep.mubr.msk.bf16.mxu0 %vm18647_vm1, %v18646_v31  ;;  %17353 = vmatprep.mubr.msk.bf16.mxu1 %vm18647_vm1, %v18646_v31 }
0x1c1e   : > { %17333 = vmatprep.subr.bf16.mxu0 %v18646_v31  ;;  %17363 = vmatprep.subr.bf16.mxu1 %v18646_v31 }
0x1c23   : > { %17330 = vmatmul.mubr.msk.bf16.vlgmr.msra.gmra.mxu0 %vm1800_vm2, %v9678_v12  ;;  %17354 = vmatmul.mubr.msk.bf16.vlgmr.msra.gmra.mxu1 %vm1800_vm2, %v9682_v29 }
0x1c24   : > { %17334 = vmatpush3.bf16.xpose.msra.mxu0 %v9834_v55  ;;  %17364 = vmatpush3.bf16.msra.mxu1 %v10184_v33 }
0x1c25   : > { %17335 = vmatprep.mubr.msk.bf16.mxu0 %vm18647_vm1, %v18646_v31  ;;  %17345 = vmatprep.subr.bf16.mxu0 %v18646_v31 }
0x1c26   : > { %17365 = vmatprep.mubr.msk.bf16.mxu1 %vm18647_vm1, %v18646_v31  ;;  %17375 = vmatprep.subr.bf16.mxu1 %v18646_v31 }
0x1c2b   : > { %17336 = vmatmul.mubr.msk.bf16.vlgmr.msra.gmra.mxu0 %vm1800_vm2, %v9679_v51 }
0x1c2c   : > { %17346 = vmatpush3.bf16.xpose.msra.mxu0 %v9926_v5  ;;  %17347 = vmatprep.mubr.msk.bf16.mxu0 %vm18647_vm1, %v18646_v31 }
0x1c2d   : > { %17357 = vmatprep.subr.bf16.mxu0 %v18646_v31 }
0x1c33   : > { %17348 = vmatmul.mubr.msk.bf16.vlgmr.msra.gmra.mxu0 %vm1800_vm2, %v9681_v48 }
0x1c34   : > { %17358 = vmatpush3.bf16.xpose.msra.mxu0 %v10018_v43  ;;  %17359 = vmatprep.mubr.msk.bf16.mxu0 %vm18647_vm1, %v18646_v31 }
0x1c35   : > { %17369 = vmatprep.subr.bf16.mxu0 %v18646_v31 }
0x1c3b   : > { %17360 = vmatmul.mubr.msk.bf16.vlgmr.msra.gmra.mxu0 %vm1800_vm2, %v9683_v22 }
0x1c3c   : > { %17370 = vmatpush3.bf16.msra.mxu0 %v10230_v2  ;;  %17371 = vmatprep.mubr.msk.bf16.mxu0 %vm18647_vm1, %v18646_v31 }
0x1c3d   : > { %17381 = vmatprep.subr.bf16.mxu0 %v18646_v31 }
0x1cd3   : > { %v9732_v52 = vpop.f32.mrf.mxu0 }
0x1cd4   : > { %v10060_v42 = vmul.f32 0.35355338, %v9732_v52 }
0x1cd5   : > { %v17319_v58 = vpop.f32.mrf.mxu0 }
0x1cd6   : > { %v21107_v3 = vsel %vm801_vm4, %v10060_v42, -1e+30 }
0x1cd7   : > { %v9735_v20 = vpop.f32.mrf.mxu0  ;;  %v10076_v44 = vsel %vm1800_vm2, %v21107_v3, -inf }
0x1cd8   : > { %10077 = vmax.xlane.f32.xlu0 %v10076_v44 }
0x1cd9   : > { %v17320_v16 = vpop.f32.mrf.mxu0 }
0x1cdb   : > { %v9778_v62 = vpop.f32.mrf.mxu0  ;;  %v9916_v46 = vpop.f32.mrf.mxu1 }
0x1cdc   : > { %v10061_v39 = vmul.f32 0.35355338, %v9778_v62  ;;  %v10064_v26 = vmul.f32 0.35355338, %v9916_v46 }
0x1cdd   : > { %v17325_v49 = vpop.f32.mrf.mxu0  ;;  %v17343_v21 = vpop.f32.mrf.mxu1 }
0x1cde   : > { %v10069_v45 = vsel %vm801_vm4, %v10061_v39, -1e+30  ;;  %v10072_v60 = vsel %vm801_vm4, %v10064_v26, -1e+30 }
0x1cdf   : > { %v9781_v0 = vpop.f32.mrf.mxu0  ;;  %v9919_v19 = vpop.f32.mrf.mxu1  ;;  %v10079_v12 = vsel %vm1800_vm2, %v10069_v45, -inf  ;;  %v10088_v2 = vsel %vm1800_vm2, %v10072_v60, -inf }
0x1ce0   : > { %10080 = vmax.xlane.f32.xlu1 %v10079_v12 }
0x1ce1   : > { %v17326_v29 = vpop.f32.mrf.mxu0  ;;  %v17344_v33 = vpop.f32.mrf.mxu1 }
0x1ce3   : > { %v9824_v55 = vpop.f32.mrf.mxu0  ;;  %v10008_v50 = vpop.f32.mrf.mxu1 }
0x1ce4   : > { %v10062_v6 = vmul.f32 0.35355338, %v9824_v55  ;;  %v10066_v43 = vmul.f32 0.35355338, %v10008_v50 }
0x1ce5   : > { %v17331_v51 = vpop.f32.mrf.mxu0  ;;  %v17355_v41 = vpop.f32.mrf.mxu1 }
0x1ce6   : > { %v10070_v5 = vsel %vm801_vm4, %v10062_v6, -1e+30  ;;  %v10074_v52 = vsel %vm801_vm4, %v10066_v43, -1e+30 }
0x1ce7   : > { %v9827_v17 = vpop.f32.mrf.mxu0  ;;  %v10011_v15 = vpop.f32.mrf.mxu1  ;;  %v10082_v48 = vsel %vm1800_vm2, %v10070_v5, -inf  ;;  %v10094_v62 = vsel %vm1800_vm2, %v10074_v52, -inf }
0x1ce8   : > { %10083 = vmax.xlane.f32.xlu0 %v10082_v48 }
0x1ce9   : > { %v17332_v27 = vpop.f32.mrf.mxu0  ;;  %v17356_v23 = vpop.f32.mrf.mxu1 }
0x1ceb   : > { %v9870_v22 = vpop.f32.mrf.mxu0 }
0x1cec   : > { %v10063_v42 = vmul.f32 0.35355338, %v9870_v22  ;;  %10089 = vmax.xlane.f32.xlu0 %v10088_v2 }
0x1ced   : > { %v17337_v58 = vpop.f32.mrf.mxu0 }
0x1cee   : > { %v10071_v20 = vsel %vm801_vm4, %v10063_v42, -1e+30 }
0x1cef   : > { %v9873_v44 = vpop.f32.mrf.mxu0  ;;  %v10085_v16 = vsel %vm1800_vm2, %v10071_v20, -inf }
0x1cf0   : > { %10086 = vmax.xlane.f32.xlu1 %v10085_v16  ;;  %10095 = vmax.xlane.f32.xlu0 %v10094_v62 }
0x1cf1   : > { %v17338_v46 = vpop.f32.mrf.mxu0 }
0x1cf3   : > { %v9962_v39 = vpop.f32.mrf.mxu0 }
0x1cf4   : > { %v10065_v49 = vmul.f32 0.35355338, %v9962_v39 }
0x1cf5   : > { %v17349_v21 = vpop.f32.mrf.mxu0 }
0x1cf6   : > { %v10073_v0 = vsel %vm801_vm4, %v10065_v49, -1e+30 }
0x1cf7   : > { %v9965_v19 = vpop.f32.mrf.mxu0  ;;  %v10091_v12 = vsel %vm1800_vm2, %v10073_v0, -inf }
0x1cf8   : > { %10092 = vmax.xlane.f32.xlu1 %v10091_v12 }
0x1cf9   : > { %v17350_v29 = vpop.f32.mrf.mxu0 }
0x1cfb   : > { %v10054_v33 = vpop.f32.mrf.mxu0 }
0x1cfc   : > { %v10067_v55 = vmul.f32 0.35355338, %v10054_v33 }
0x1cfd   : > { %v17361_v50 = vpop.f32.mrf.mxu0 }
0x1cfe   : > { %v10075_v26 = vsel %vm801_vm4, %v10067_v55, -1e+30 }
0x1cff   : > { %v10057_v6 = vpop.f32.mrf.mxu0  ;;  %v10097_v51 = vsel %vm1800_vm2, %v10075_v26, -inf }
0x1d00   : > { %10098 = vmax.xlane.f32.xlu1 %v10097_v51 }
0x1d01   : > { %v17362_v41 = vpop.f32.mrf.mxu0 }
0x1d61   : > { %v10078_v17 = vpop.xlane.xlu0 %10077 }
0x1d62   : > { %v10100_v15 = vsub.f32 %v21107_v3, %v10078_v17 }
0x1d64   : > { %v10108_v48 = vmul.f32 1.442695, %v10100_v15 }
0x1d66   : > { %18438 = vpow2.f32 %v10108_v48 }
0x1d69   : > { %v10081_v43 = vpop.xlane.xlu1 %10080 }
0x1d6a   : > { %v10101_v27 = vsub.f32 %v10069_v45, %v10081_v43 }
0x1d6c   : > { %v10110_v23 = vmul.f32 1.442695, %v10101_v27 }
0x1d6e   : > { %18440 = vpow2.f32 %v10110_v23 }
0x1d71   : > { %v10084_v22 = vpop.xlane.xlu0 %10083 }
0x1d72   : > { %v10102_v2 = vsub.f32 %v10070_v5, %v10084_v22 }
0x1d73   : > { %v18439_v42 = vpop.eup %18438 }
0x1d74   : > { %v10112_v58 = vmul.f32 1.442695, %v10102_v2  ;;  %v10124_v44 = vsel %vm1800_vm2, %v18439_v42, 0.0 }
0x1d75   : > { %v10090_v16 = vpop.xlane.xlu0 %10089  ;;  %10125 = vadd.xlane.f32.xlu0 %v10124_v44  ;;  %v10174_v44 = vpack.c.bf16 %v20995_v30, %v20995_v30  ;;  %v10175_v30 = vpack.c.bf16 %v20998_v7, %v20998_v7  ;;  %v10176_v7 = vpack.c.bf16 %v21006_v14, %v21006_v14 }
0x1d76   : > { %18442 = vpow2.f32 %v10112_v58  ;;  %v10104_v62 = vsub.f32 %v10072_v60, %v10090_v16 }
0x1d78   : > { %v10116_v46 = vmul.f32 1.442695, %v10104_v62 }
0x1d79   : > { %v10087_v39 = vpop.xlane.xlu1 %10086  ;;  %v10096_v49 = vpop.xlane.xlu0 %10095 }
0x1d7a   : > { %18444 = vpow2.f32 %v10116_v46  ;;  %v10103_v3 = vsub.f32 %v10071_v20, %v10087_v39  ;;  %v10106_v21 = vsub.f32 %v10074_v52, %v10096_v49  ;;  %v10276_v39 = vsel %vm2294_vm3, %v10174_v44, 0 }
0x1d7b   : > { %v18441_v19 = vpop.eup %18440 }
0x1d7c   : > { %v10114_v45 = vmul.f32 1.442695, %v10103_v3  ;;  %v10120_v12 = vmul.f32 1.442695, %v10106_v21  ;;  %v10127_v29 = vsel %vm1800_vm2, %v18441_v19, 0.0 }
0x1d7d   : > { %10128 = vadd.xlane.f32.xlu1 %v10127_v29  ;;  %v10322_v29 = vsel %vm2294_vm3, %v10175_v30, 0  ;;  %v18108_v30 = vld [vmem:[%s22316_s29 + $0x188] sm:$0xff]  }
0x1d7e   : > { %18446 = vpow2.f32 %v10114_v45 }
0x1d7f   : > { %18448 = vpow2.f32 %v10120_v12 }
0x1d81   : > { %v10093_v5 = vpop.xlane.xlu1 %10092 }
0x1d82   : > { %v10105_v33 = vsub.f32 %v10073_v0, %v10093_v5 }
0x1d83   : > { %v18443_v55 = vpop.eup %18442 }
0x1d84   : > { %v10118_v50 = vmul.f32 1.442695, %v10105_v33  ;;  %v10130_v60 = vsel %vm1800_vm2, %v18443_v55, 0.0 }
0x1d85   : > { %10131 = vadd.xlane.f32.xlu0 %v10130_v60 }
0x1d86   : > { %18450 = vpow2.f32 %v10118_v50 }
0x1d87   : > { %v18445_v6 = vpop.eup %18444 }
0x1d88   : > { %v10136_v20 = vsel %vm1800_vm2, %v18445_v6, 0.0 }
0x1d89   : > { %10137 = vadd.xlane.f32.xlu0 %v10136_v20  ;;  %v10099_v52 = vpop.xlane.xlu1 %10098  ;;  %v10368_v20 = vsel %vm2294_vm3, %v10176_v7, 0  ;;  %v18115_v7 = vld [vmem:[%s22318_s26 + $0x190] sm:$0xff]  }
0x1d8a   : > { %v10107_v51 = vsub.f32 %v10075_v26, %v10099_v52  ;;  %v9673_v52 = vadd.f32 %v20992_v56, %v21111_v10 }
0x1d8b   : > { %v18447_v41 = vpop.eup %18446 }
0x1d8c   : > { %v21139_v17 = vpop.eup %18448  ;;  %v10122_v15 = vmul.f32 1.442695, %v10107_v51  ;;  %v10133_v48 = vsel %vm1800_vm2, %v18447_v41, 0.0 }
0x1d8d   : > { %v10142_v0 = vsel %vm1800_vm2, %v21139_v17, 0.0  ;;  %10134 = vadd.xlane.f32.xlu1 %v10133_v48 }
0x1d8e   : > { %18452 = vpow2.f32 %v10122_v15  ;;  %10143 = vadd.xlane.f32.xlu0 %v10142_v0  ;;  %v10177_v15 = vpack.c.bf16 %v9673_v52, %v9673_v52 }
0x1d93   : > { %v21144_v43 = vpop.eup %18450 }
0x1d94   : > { %v10139_v27 = vsel %vm1800_vm2, %v21144_v43, 0.0 }
0x1d95   : > { %10140 = vadd.xlane.f32.xlu1 %v10139_v27 }
0x1d9b   : > { %v21148_v23 = vpop.eup %18452 }
0x1d9c   : > { %v10145_v26 = vsel %vm1800_vm2, %v21148_v23, 0.0 }
0x1d9d   : > { %10146 = vadd.xlane.f32.xlu1 %v10145_v26 }
0x1dfe   : > { %v10126_v22 = vpop.xlane.xlu0 %10125 }
0x1dff   : > { %18454 = vrcp.f32 %v10126_v22 }
0x1e06   : > { %v10129_v2 = vpop.xlane.xlu1 %10128 }
0x1e07   : > { %18456 = vrcp.f32 %v10129_v2 }
0x1e0c   : > { %v18455_v58 = vpop.eup %18454 }
0x1e0d   : > { %v10156_v16 = vmul.f32 %v18455_v58, %v18439_v42 }
0x1e0e   : > { %v10132_v62 = vpop.xlane.xlu0 %10131 }
0x1e0f   : > { %v10164_v46 = vpack.c.bf16 %v10156_v16, %v10156_v16  ;;  %18458 = vrcp.f32 %v10132_v62 }
0x1e11   : > { %17366 = vmatmul.mubr.msk.bf16.vlgmr.msra.gmra.mxu1 %vm1800_vm2, %v10164_v46  ;;  %v18103_v46 = vld [vmem:[%s22316_s29 + $0x1b0] sm:$0xff]  }
0x1e12   : > { %17376 = vmatpush3.bf16.msra.mxu1 %v10276_v39  ;;  %v10138_v49 = vpop.xlane.xlu0 %10137  ;;  %17377 = vmatprep.mubr.msk.bf16.mxu1 %vm18647_vm1, %v18646_v31  ;;  %v18104_v39 = vld [vmem:[%s22316_s29 + $0x1a8] sm:$0xff]  }
0x1e13   : > { %18460 = vrcp.f32 %v10138_v49  ;;  %17387 = vmatprep.subr.bf16.mxu1 %v18646_v31  ;;  %v18106_v49 = vld [vmem:[%s22316_s29 + $0x198] sm:$0xff]  }
0x1e14   : > { %v18457_v3 = vpop.eup %18456 }
0x1e15   : > { %v10157_v42 = vmul.f32 %v18457_v3, %v18441_v19  ;;  %v18107_v3 = vld [vmem:[%s22316_s29 + $0x190] sm:$0xff]  }
0x1e16   : > { %v10135_v21 = vpop.xlane.xlu1 %10134 }
0x1e17   : > { %v10165_v45 = vpack.c.bf16 %v10157_v42, %v10157_v42  ;;  %18462 = vrcp.f32 %v10135_v21  ;;  %v10144_v12 = vpop.xlane.xlu0 %10143  ;;  %v18109_v42 = vld [vmem:[%s22316_s29 + $0x180] sm:$0xff]   ;;  %v18110_v21 = vld [vmem:[%s22318_s26 + $0x1b8] sm:$0xff]  }
0x1e18   : > { %18464 = vrcp.f32 %v10144_v12  ;;  %v18112_v12 = vld [vmem:[%s22318_s26 + $0x1a8] sm:$0xff]  }
0x1e19   : > { %17372 = vmatmul.mubr.msk.bf16.vlgmr.msra.gmra.mxu0 %vm1800_vm2, %v10165_v45  ;;  %v18111_v45 = vld [vmem:[%s22318_s26 + $0x1b0] sm:$0xff]  }
0x1e1a   : > { %17382 = vmatpush3.bf16.msra.mxu0 %v10322_v29  ;;  %17383 = vmatprep.mubr.msk.bf16.mxu0 %vm18647_vm1, %v18646_v31  ;;  %v18113_v29 = vld [vmem:[%s22318_s26 + $0x1a0] sm:$0xff]  }
0x1e1b   : > { %17393 = vmatprep.subr.bf16.mxu0 %v18646_v31 }
0x1e1c   : > { %v18459_v5 = vpop.eup %18458 }
0x1e1d   : > { %v10158_v19 = vmul.f32 %v18459_v5, %v18443_v55  ;;  %v10178_v55 = vpack.c.bf16 %v21003_v47, %v21003_v47  ;;  %v18114_v5 = vld [vmem:[%s22318_s26 + $0x198] sm:$0xff]  }
0x1e1e   : > { %v10141_v33 = vpop.xlane.xlu1 %10140 }
0x1e1f   : > { %v10166_v50 = vpack.c.bf16 %v10158_v19, %v10158_v19  ;;  %18466 = vrcp.f32 %v10141_v33  ;;  %v10460_v10 = vsel %vm2294_vm3, %v10178_v55, 0  ;;  %v15246_v19 = vld [vmem:[%s22257_s13 + $0x14] sm:$0xf] }
0x1e20   : > { %v18461_v60 = vpop.eup %18460  ;;  %v10591_v33 = vsel %vm2294_vm3, %v15246_v19, 0 }
0x1e21   : > { %17378 = vmatmul.mubr.msk.bf16.vlgmr.msra.gmra.mxu1 %vm1800_vm2, %v10166_v50  ;;  %v10160_v51 = vmul.f32 %v18461_v60, %v18445_v6  ;;  %v10414_v6 = vsel %vm2294_vm3, %v10177_v15, 0  ;;  %v18118_v50 = vld [vmem:[%s22317_s10 + $0x1b8] sm:$0xff]   ;;  %v18116_v60 = vld [vmem:[%s22318_s26 + $0x188] sm:$0xff]  }
0x1e22   : > { %17388 = vmatpush3.bf16.msra.mxu1 %v10368_v20  ;;  %17389 = vmatprep.mubr.msk.bf16.mxu1 %vm18647_vm1, %v18646_v31  ;;  %v18117_v20 = vld [vmem:[%s22318_s26 + $0x180] sm:$0xff]  }
0x1e23   : > { %17399 = vmatprep.subr.bf16.mxu1 %v18646_v31  ;;  %v10168_v27 = vpack.c.bf16 %v10160_v51, %v10160_v51 }
0x1e24   : > { %v18463_v14 = vpop.eup %18462 }
0x1e25   : > { %v10159_v48 = vmul.f32 %v18463_v14, %v18447_v41  ;;  %v18465_v56 = vpop.eup %18464  ;;  %v10179_v41 = vpack.c.bf16 %v21009_v38, %v21009_v38 }
0x1e26   : > { %v10147_v0 = vpop.xlane.xlu1 %10146  ;;  %v10162_v22 = vmul.f32 %v18465_v56, %v21139_v17  ;;  %v18102_v17 = vld [vmem:[%s22316_s29 + $0x1b8] sm:$0xff]  }
0x1e27   : > { %v10167_v26 = vpack.c.bf16 %v10159_v48, %v10159_v48  ;;  %18468 = vrcp.f32 %v10147_v0  ;;  %v10506_v16 = vsel %vm2294_vm3, %v10179_v41, 0 }
0x1e28   : > { %v10170_v58 = vpack.c.bf16 %v10162_v22, %v10162_v22 }
0x1e29   : > { %17384 = vmatmul.mubr.msk.bf16.vlgmr.msra.gmra.mxu0 %vm1800_vm2, %v10167_v26  ;;  %17390 = vmatmul.mubr.msk.bf16.vlgmr.msra.gmra.mxu1 %vm1800_vm2, %v10168_v27 }
0x1e2a   : > { %17394 = vmatpush3.bf16.msra.mxu0 %v10414_v6  ;;  %17400 = vmatpush3.bf16.msra.mxu1 %v10460_v10 }
0x1e2b   : > { %17395 = vmatprep.mubr.msk.bf16.mxu0 %vm18647_vm1, %v18646_v31  ;;  %17401 = vmatprep.mubr.msk.bf16.mxu1 %vm18647_vm1, %v18646_v31 }
0x1e2c   : > { %v18467_v47 = vpop.eup %18466  ;;  %17405 = vmatprep.subr.bf16.mxu0 %v18646_v31  ;;  %17870 = vmatprep.subr.msk.bf16.mxu1 %vm2294_vm3, %v15246_v19 }
0x1e2d   : > { %v10161_v2 = vmul.f32 %v18467_v47, %v21144_v43 }
0x1e2f   : > { %v10169_v44 = vpack.c.bf16 %v10161_v2, %v10161_v2 }
0x1e31   : > { %17396 = vmatmul.mubr.msk.bf16.vlgmr.msra.gmra.mxu0 %vm1800_vm2, %v10169_v44  ;;  %17402 = vmatmul.mubr.msk.bf16.vlgmr.msra.gmra.mxu1 %vm1800_vm2, %v10170_v58  ;;  %v18119_v58 = vld [vmem:[%s22317_s10 + $0x1b0] sm:$0xff]  }
0x1e32   : > { %17406 = vmatpush3.bf16.msra.mxu0 %v10506_v16  ;;  %17407 = vmatprep.mubr.msk.bf16.mxu0 %vm18647_vm1, %v18646_v31 }
0x1e33   : > { %17421 = vmatprep.subr.bf16.mxu0 %v18102_v17  ;;  %17412 = vmatpush3.bf16.msra.mxu1 %v10591_v33  ;;  %v18123_v33 = vld [vmem:[%s22317_s10 + $0x190] sm:$0xff]  }
0x1e34   : > { %v18469_v38 = vpop.eup %18468  ;;  %17445 = vmatprep.subr.bf16.mxu1 %v18118_v50 }
0x1e35   : > { %v10163_v43 = vmul.f32 %v18469_v38, %v21148_v23  ;;  %v18105_v23 = vld [vmem:[%s22316_s29 + $0x1a0] sm:$0xff]  }
0x1e37   : > { %v10171_v62 = vpack.c.bf16 %v10163_v43, %v10163_v43  ;;  %v18120_v43 = vld [vmem:[%s22317_s10 + $0x1a8] sm:$0xff]  }
0x1e39   : > { %17408 = vmatmul.mubr.msk.bf16.vlgmr.msra.gmra.mxu0 %vm1800_vm2, %v10171_v62 }
0x1e3a   : > { %17422 = vmatpush3.bf16.msra.mxu0 %v18102_v17  ;;  %17437 = vmatprep.mubr.bf16.mxu0 %v20646_v59 }
0x1e3b   : > { %17423 = vmatprep.subr.bf16.mxu0 %v18103_v46 }
0x1e3e   : > { %17424 = vmatpush3.bf16.msra.mxu0 %v18103_v46 }
0x1e3f   : > { %17425 = vmatprep.subr.bf16.mxu0 %v18104_v39 }
0x1e42   : > { %17426 = vmatpush3.bf16.msra.mxu0 %v18104_v39 }
0x1e43   : > { %17427 = vmatprep.subr.bf16.mxu0 %v18105_v23 }
0x1e46   : > { %17428 = vmatpush3.bf16.msra.mxu0 %v18105_v23 }
0x1e47   : > { %17429 = vmatprep.subr.bf16.mxu0 %v18106_v49 }
0x1e4a   : > { %17430 = vmatpush3.bf16.msra.mxu0 %v18106_v49 }
0x1e4b   : > { %17431 = vmatprep.subr.bf16.mxu0 %v18107_v3 }
0x1e4e   : > { %17432 = vmatpush3.bf16.msra.mxu0 %v18107_v3  ;;  %v18121_v3 = vld [vmem:[%s22317_s10 + $0x1a0] sm:$0xff]  }
0x1e4f   : > { %17433 = vmatprep.subr.bf16.mxu0 %v18108_v30 }
0x1e52   : > { %17434 = vmatpush3.bf16.msra.mxu0 %v18108_v30 }
0x1e53   : > { %17435 = vmatprep.subr.bf16.mxu0 %v18109_v42 }
0x1e56   : > { %17436 = vmatpush3.bf16.msra.mxu0 %v18109_v42 }
0x1e57   : > { %17469 = vmatprep.subr.bf16.mxu0 %v18110_v21 }
0x1e59   : > { %17438 = vmatmul.mubr.bf16.vlgmr.msra.gmra.mxu0 %v20650_v9 }
0x1e5a   : > { %17441 = vmatprep.mubr.bf16.mxu0 %v20670_v4  ;;  %17470 = vmatpush3.bf16.msra.mxu0 %v18110_v21 }
0x1e5b   : > { %17471 = vmatprep.subr.bf16.mxu0 %v18111_v45 }
0x1e5e   : > { %17472 = vmatpush3.bf16.msra.mxu0 %v18111_v45 }
0x1e5f   : > { %17473 = vmatprep.subr.bf16.mxu0 %v18112_v12 }
0x1e61   : > { %17442 = vmatmul.mubr.bf16.gmra.mxu0 %v20674_v1 }
0x1e62   : > { %17474 = vmatpush3.bf16.msra.mxu0 %v18112_v12  ;;  %17485 = vmatprep.mubr.bf16.mxu0 %v20646_v59  ;;  %v18122_v12 = vld [vmem:[%s22317_s10 + $0x198] sm:$0xff]  }
0x1e63   : > { %17475 = vmatprep.subr.bf16.mxu0 %v18113_v29 }
0x1e66   : > { %17476 = vmatpush3.bf16.msra.mxu0 %v18113_v29 }
0x1e67   : > { %17477 = vmatprep.subr.bf16.mxu0 %v18114_v5 }
0x1e6a   : > { %17478 = vmatpush3.bf16.msra.mxu0 %v18114_v5 }
0x1e6b   : > { %17479 = vmatprep.subr.bf16.mxu0 %v18115_v7 }
0x1e6e   : > { %17480 = vmatpush3.bf16.msra.mxu0 %v18115_v7 }
0x1e6f   : > { %17481 = vmatprep.subr.bf16.mxu0 %v18116_v60 }
0x1e72   : > { %17482 = vmatpush3.bf16.msra.mxu0 %v18116_v60 }
0x1e73   : > { %17483 = vmatprep.subr.bf16.mxu0 %v18117_v20 }
0x1e76   : > { %17484 = vmatpush3.bf16.msra.mxu0 %v18117_v20  ;;  %v18124_v20 = vld [vmem:[%s22317_s10 + $0x188] sm:$0xff]  }
0x1e77   : > { %17517 = vmatprep.subr.bf16.mxu0 %v18646_v31 }
0x1e79   : > { %17486 = vmatmul.mubr.bf16.vlgmr.msra.gmra.mxu0 %v20650_v9 }
0x1e7a   : > { %17489 = vmatprep.mubr.bf16.mxu0 %v20670_v4 }
0x1e81   : > { %17490 = vmatmul.mubr.bf16.gmra.mxu0 %v20674_v1 }
0x1e82   : > { %17519 = vmatprep.mubr.msk.bf16.mxu0 %vm18647_vm1, %v18646_v31 }
0x1ed1   : > { %v10220_v52 = vpop.f32.mrf.mxu1 }
0x1ed3   : > { %v17367_v51 = vpop.f32.mrf.mxu1 }
0x1ed4   : > { %v18125_v51 = vld [vmem:[%s22317_s10 + $0x180] sm:$0xff]  }
0x1ed5   : > { %v10223_v14 = vpop.f32.mrf.mxu1 }
0x1ed7   : > { %v17368_v55 = vpop.f32.mrf.mxu1 }
0x1ed9   : > { %v10266_v15 = vpop.f32.mrf.mxu0 }
0x1eda   : > { %v15595_v48 = vpack.c.bf16 %v10266_v15, %v10220_v52 }
0x1edb   : > { %v17373_v0 = vpop.f32.mrf.mxu0 }
0x1edc   : > { %17413 = vmatprep.mubr.msk.bf16.mxu1 %vm1800_vm2, %v15595_v48 }
0x1edd   : > { %v10269_v27 = vpop.f32.mrf.mxu0 }
0x1edf   : > { %v17374_v26 = vpop.f32.mrf.mxu0 }
0x1ee1   : > { %v10312_v56 = vpop.f32.mrf.mxu1 }
0x1ee3   : > { %v17379_v10 = vpop.f32.mrf.mxu1 }
0x1ee4   : > { %v21309_v10 = vld [vmem:[%s22256_s12 + $0x6] ss:$0 sm:$0xff] }
0x1ee5   : > { %v10315_v6 = vpop.f32.mrf.mxu1 }
0x1ee7   : > { %v17380_v22 = vpop.f32.mrf.mxu1 }
0x1ee9   : > { %v10358_v47 = vpop.f32.mrf.mxu0  ;;  %v10404_v41 = vpop.f32.mrf.mxu1 }
0x1eea   : > { %v15596_v2 = vpack.c.bf16 %v10358_v47, %v10312_v56 }
0x1eeb   : > { %v17385_v44 = vpop.f32.mrf.mxu0  ;;  %v17391_v17 = vpop.f32.mrf.mxu1 }
0x1eec   : > { %17414 = vmatmul.mubr.msk.bf16.vlgmr.msra.gmra.mxu1 %vm1800_vm2, %v15596_v2 }
0x1eed   : > { %17446 = vmatpush3.bf16.msra.mxu1 %v18118_v50  ;;  %v10361_v16 = vpop.f32.mrf.mxu0  ;;  %v10407_v38 = vpop.f32.mrf.mxu1 }
0x1eee   : > { %17447 = vmatprep.subr.bf16.mxu1 %v18119_v58 }
0x1eef   : > { %v17386_v62 = vpop.f32.mrf.mxu0  ;;  %v17392_v46 = vpop.f32.mrf.mxu1 }
0x1ef1   : > { %17448 = vmatpush3.bf16.msra.mxu1 %v18119_v58  ;;  %v10450_v39 = vpop.f32.mrf.mxu0  ;;  %v10496_v23 = vpop.f32.mrf.mxu1 }
0x1ef2   : > { %v15597_v49 = vpack.c.bf16 %v10450_v39, %v10404_v41  ;;  %17449 = vmatprep.subr.bf16.mxu1 %v18120_v43 }
0x1ef3   : > { %v17397_v30 = vpop.f32.mrf.mxu0  ;;  %v17403_v42 = vpop.f32.mrf.mxu1 }
0x1ef4   : > { %17417 = vmatprep.mubr.msk.bf16.mxu1 %vm1800_vm2, %v15597_v49 }
0x1ef5   : > { %17450 = vmatpush3.bf16.msra.mxu1 %v18120_v43  ;;  %v10453_v21 = vpop.f32.mrf.mxu0  ;;  %v10499_v45 = vpop.f32.mrf.mxu1 }
0x1ef6   : > { %17451 = vmatprep.subr.bf16.mxu1 %v18121_v3 }
0x1ef7   : > { %v17398_v29 = vpop.f32.mrf.mxu0  ;;  %v17404_v5 = vpop.f32.mrf.mxu1 }
0x1ef9   : > { %17452 = vmatpush3.bf16.msra.mxu1 %v18121_v3  ;;  %v10542_v7 = vpop.f32.mrf.mxu0 }
0x1efa   : > { %v15598_v19 = vpack.c.bf16 %v10542_v7, %v10496_v23  ;;  %17453 = vmatprep.subr.bf16.mxu1 %v18122_v12 }
0x1efb   : > { %v17409_v50 = vpop.f32.mrf.mxu0 }
0x1efc   : > { %17418 = vmatmul.mubr.msk.bf16.gmra.mxu1 %vm1800_vm2, %v15598_v19 }
0x1efd   : > { %17454 = vmatpush3.bf16.msra.mxu1 %v18122_v12  ;;  %v10545_v60 = vpop.f32.mrf.mxu0  ;;  %17461 = vmatprep.mubr.bf16.mxu1 %v20646_v59  ;;  %v21347_v12 = vld [vmem:[%s22322_s11 + $0x6] ss:$0 sm:$0xff] }
0x1efe   : > { %17455 = vmatprep.subr.bf16.mxu1 %v18123_v33 }
0x1eff   : > { %v17410_v52 = vpop.f32.mrf.mxu0 }
0x1f01   : > { %17456 = vmatpush3.bf16.msra.mxu1 %v18123_v33 }
0x1f02   : > { %17457 = vmatprep.subr.bf16.mxu1 %v18124_v20 }
0x1f05   : > { %17458 = vmatpush3.bf16.msra.mxu1 %v18124_v20  ;;  %v21355_v20 = vld [vmem:[%s22324_s0 + $0x6] ss:$0 sm:$0xff] }
0x1f06   : > { %17459 = vmatprep.subr.bf16.mxu1 %v18125_v51 }
0x1f09   : > { %17460 = vmatpush3.bf16.msra.mxu1 %v18125_v51 }
0x1f0a   : > { %17493 = vmatprep.subr.bf16.mxu1 %v18646_v31 }
0x1f0c   : > { %17462 = vmatmul.mubr.bf16.vlgmr.msra.gmra.mxu1 %v20650_v9 }
0x1f0d   : > { %17465 = vmatprep.mubr.bf16.mxu1 %v20670_v4 }
0x1f14   : > { %17466 = vmatmul.mubr.bf16.gmra.mxu1 %v20674_v1 }
0x1f15   : > { %17495 = vmatprep.mubr.msk.bf16.mxu1 %vm18647_vm1, %v18646_v31 }
0x1f19   : > { %v21296_v14 = vpop.f32.mrf.mxu0 }
0x1f1b   : > { %v10765_v55 = vpop.f32.mrf.mxu0 }
0x1f1c   : > { %v10804_v51 = vadd.f32 %v21355_v20, %v10765_v55 }
0x1f1d   : > { %v21298_v15 = vpop.f32.mrf.mxu0 }
0x1f1f   : > { %v10768_v48 = vpop.f32.mrf.mxu0 }
0x1f20   : > { %v10805_v55 = vadd.f32 %v21355_v20, %v10768_v48 }
0x1f21   : > { %v21300_v0 = vpop.f32.mrf.mxu0 }
0x1f23   : > { %v10781_v27 = vpop.f32.mrf.mxu0 }
0x1f25   : > { %v21302_v26 = vpop.f32.mrf.mxu0 }
0x1f27   : > { %v21304_v56 = vpop.f32.mrf.mxu0 }
0x1f39   : > { %v17487_v6 = vpop.f32.mrf.mxu0 }
0x1f3a   : > { %v21312_v22 = vadd.f32 %v17487_v6, %v21309_v10 }
0x1f3b   : > { %v11057_v47 = vpop.f32.mrf.mxu0 }
0x1f3d   : > { %v17488_v41 = vpop.f32.mrf.mxu0 }
0x1f3e   : > { %v21315_v2 = vadd.f32 %v17488_v41, %v21309_v10 }
0x1f3f   : > { %v21317_v58 = vpop.f32.mrf.mxu0 }
0x1f41   : > { %v17491_v44 = vpop.f32.mrf.mxu0 }
0x1f42   : > { %v21320_v17 = vadd.f32 %v17491_v44, %v21309_v10 }
0x1f43   : > { %v11073_v16 = vpop.f32.mrf.mxu0 }
0x1f44   : > { %v21323_v38 = vadd.f32 %v21309_v10, %v11073_v16  ;;  %v11104_v16 = vpack.c.bf16 %v10804_v51, %v10804_v51 }
0x1f45   : > { %v17492_v43 = vpop.f32.mrf.mxu0 }
0x1f46   : > { %v21326_v62 = vadd.f32 %v17492_v43, %v21309_v10 }
0x1fac   : > { %v21328_v46 = vpop.f32.mrf.mxu1 }
0x1fae   : > { %v21330_v39 = vpop.f32.mrf.mxu1 }
0x1fb0   : > { %v21332_v23 = vpop.f32.mrf.mxu1 }
0x1fb2   : > { %v21334_v49 = vpop.f32.mrf.mxu1 }
0x1fbc   : > { %v21336_v3 = vpop.f32.mrf.mxu1 }
0x1fbe   : > { %v21338_v30 = vpop.f32.mrf.mxu1 }
0x1fc0   : > { %v21340_v42 = vpop.f32.mrf.mxu1 }
0x1fc2   : > { %v21342_v21 = vpop.f32.mrf.mxu1 }
0x1fcc   : > { %v17463_v45 = vpop.f32.mrf.mxu1 }
0x1fce   : > { %v10911_v29 = vpop.f32.mrf.mxu1 }
0x1fcf   : > { %v10950_v5 = vadd.f32 %v21347_v12, %v10911_v29  ;;  %v10952_v29 = vadd.f32 %v17463_v45, %v21347_v12 }
0x1fd0   : > { %v17464_v7 = vpop.f32.mrf.mxu1 }
0x1fd1   : > { %v11112_v19 = vpack.c.bf16 %v10950_v5, %v10950_v5  ;;  %v11114_v45 = vpack.c.bf16 %v10952_v29, %v10952_v29 }
0x1fd2   : > { %v10914_v33 = vpop.f32.mrf.mxu1 }
0x1fd3   : > { %v11124_v50 = vsel %vm1800_vm2, %v11112_v19, 0  ;;  %v10951_v60 = vadd.f32 %v21347_v12, %v10914_v33 }
0x1fd4   : > { %v17467_v52 = vpop.f32.mrf.mxu1  ;;  %17494 = vmatpush3.bf16.xpose.msra.mxu1 %v11124_v50  ;;  %v10808_v50 = vadd.f32 %v21355_v20, %v10781_v27 }
0x1fd5   : > { %17499 = vmatprep.subr.bf16.mxu1 %v18646_v31  ;;  %v11113_v41 = vpack.c.bf16 %v10951_v60, %v10951_v60  ;;  %v10956_v19 = vadd.f32 %v17467_v52, %v21347_v12  ;;  %v11105_v52 = vpack.c.bf16 %v10805_v55, %v10805_v55  ;;  %v10807_v55 = vadd.f32 %v21298_v15, %v21355_v20 }
0x1fd6   : > { %v10927_v6 = vpop.f32.mrf.mxu1  ;;  %v11108_v51 = vpack.c.bf16 %v10808_v50, %v10808_v50  ;;  %v10809_v15 = vadd.f32 %v21355_v20, %v21304_v56 }
0x1fd7   : > { %v10954_v44 = vadd.f32 %v21347_v12, %v10927_v6  ;;  %v11170_v5 = vsel %vm1800_vm2, %v11113_v41, 0  ;;  %v11118_v60 = vpack.c.bf16 %v10956_v19, %v10956_v19  ;;  %v11096_v6 = vadd.f32 %v21309_v10, %v11057_v47 }
0x1fd8   : > { %v11216_v41 = vsel %vm1800_vm2, %v11114_v45, 0  ;;  %v17468_v27 = vpop.f32.mrf.mxu1  ;;  %v11107_v45 = vpack.c.bf16 %v10807_v55, %v10807_v55 }
0x1fd9   : > { %v11116_v43 = vpack.c.bf16 %v10954_v44, %v10954_v44  ;;  %v10953_v44 = vadd.f32 %v17464_v7, %v21347_v12  ;;  %v11400_v48 = vsel %vm1800_vm2, %v11118_v60, 0  ;;  %v11600_v47 = vpack.c.bf16 %v11096_v6, %v11096_v6 }
0x1fda   : > { %v10930_v29 = vpop.f32.mrf.mxu1  ;;  %v10957_v60 = vadd.f32 %v17468_v27, %v21347_v12  ;;  %v11109_v6 = vpack.c.bf16 %v10809_v15, %v10809_v15 }
0x1fdb   : > { %v11308_v33 = vsel %vm1800_vm2, %v11116_v43, 0  ;;  %17496 = vmatmul.mubr.msk.bf16.vlgmr.msra.gmra.mxu1 %vm1800_vm2, %v11104_v16  ;;  %v10806_v16 = vadd.f32 %v21296_v14, %v21355_v20  ;;  %v10810_v43 = vadd.f32 %v21300_v0, %v21355_v20  ;;  %v11115_v7 = vpack.c.bf16 %v10953_v44, %v10953_v44 }
0x1fdc   : > { %17500 = vmatpush3.bf16.xpose.msra.mxu1 %v11170_v5  ;;  %17518 = vmatpush3.bf16.xpose.msra.mxu0 %v11308_v33  ;;  %v11612_v14 = vsel %vm2294_vm3, %v11600_v47, 0  ;;  %v10955_v0 = vadd.f32 %v21347_v12, %v10930_v29  ;;  %v10811_v44 = vadd.f32 %v21302_v26, %v21355_v20 }
0x1fdd   : > { %17501 = vmatprep.mubr.msk.bf16.mxu1 %vm18647_vm1, %v18646_v31  ;;  %17505 = vmatprep.subr.bf16.mxu1 %v18646_v31  ;;  %v11106_v5 = vpack.c.bf16 %v10806_v16, %v10806_v16  ;;  %v11110_v19 = vpack.c.bf16 %v10810_v43, %v10810_v43  ;;  %v11262_v33 = vsel %vm1800_vm2, %v11115_v7, 0  ;;  %v21428_v7 = vpop.f32.mrf.mxu0 }
0x1fde   : > { %17529 = vmatprep.subr.bf16.mxu0 %v18646_v31  ;;  %v11117_v50 = vpack.c.bf16 %v10955_v0, %v10955_v0 }
0x1fe3   : > { %17502 = vmatmul.mubr.msk.bf16.vlgmr.msra.gmra.mxu1 %vm1800_vm2, %v11105_v52  ;;  %17520 = vmatmul.mubr.msk.bf16.vlgmr.msra.gmra.mxu0 %vm1800_vm2, %v11108_v51  ;;  %v11354_v52 = vsel %vm1800_vm2, %v11117_v50, 0  ;;  %v11119_v51 = vpack.c.bf16 %v10957_v60, %v10957_v60 }
0x1fe4   : > { %17506 = vmatpush3.bf16.xpose.msra.mxu1 %v11216_v41  ;;  %17530 = vmatpush3.bf16.xpose.msra.mxu0 %v11400_v48  ;;  %v11097_v41 = vadd.f32 %v21309_v10, %v21317_v58  ;;  %v11111_v48 = vpack.c.bf16 %v10811_v44, %v10811_v44 }
0x1fe5   : > { %17507 = vmatprep.mubr.msk.bf16.mxu1 %vm18647_vm1, %v18646_v31  ;;  %17531 = vmatprep.mubr.msk.bf16.mxu0 %vm18647_vm1, %v18646_v31  ;;  %v11446_v12 = vsel %vm1800_vm2, %v11119_v51, 0 }
0x1fe6   : > { %17511 = vmatprep.subr.bf16.mxu1 %v18646_v31  ;;  %17541 = vmatprep.subr.bf16.mxu0 %v18646_v31  ;;  %v11601_v56 = vpack.c.bf16 %v11097_v41, %v11097_v41 }
0x1fe8   : > { %v11658_v27 = vsel %vm2294_vm3, %v11601_v56, 0 }
0x1feb   : > { %17508 = vmatmul.mubr.msk.bf16.vlgmr.msra.gmra.mxu1 %vm1800_vm2, %v11106_v5  ;;  %17532 = vmatmul.mubr.msk.bf16.vlgmr.msra.gmra.mxu0 %vm1800_vm2, %v11110_v19 }
0x1fec   : > { %17512 = vmatpush3.bf16.xpose.msra.mxu1 %v11262_v33  ;;  %17542 = vmatpush3.bf16.msra.mxu0 %v11612_v14 }
0x1fed   : > { %17513 = vmatprep.mubr.msk.bf16.mxu1 %vm18647_vm1, %v18646_v31  ;;  %17523 = vmatprep.subr.bf16.mxu1 %v18646_v31 }
0x1fee   : > { %17543 = vmatprep.mubr.msk.bf16.mxu0 %vm18647_vm1, %v18646_v31  ;;  %17553 = vmatprep.subr.bf16.mxu0 %v18646_v31 }
0x1ff3   : > { %17514 = vmatmul.mubr.msk.bf16.vlgmr.msra.gmra.mxu1 %vm1800_vm2, %v11107_v45 }
0x1ff4   : > { %17524 = vmatpush3.bf16.xpose.msra.mxu1 %v11354_v52  ;;  %17525 = vmatprep.mubr.msk.bf16.mxu1 %vm18647_vm1, %v18646_v31 }
0x1ff5   : > { %17535 = vmatprep.subr.bf16.mxu1 %v18646_v31 }
0x1ffb   : > { %17526 = vmatmul.mubr.msk.bf16.vlgmr.msra.gmra.mxu1 %vm1800_vm2, %v11109_v6 }
0x1ffc   : > { %17536 = vmatpush3.bf16.xpose.msra.mxu1 %v11446_v12  ;;  %17537 = vmatprep.mubr.msk.bf16.mxu1 %vm18647_vm1, %v18646_v31 }
0x1ffd   : > { %17547 = vmatprep.subr.bf16.mxu1 %v18646_v31 }
0x2003   : > { %17538 = vmatmul.mubr.msk.bf16.vlgmr.msra.gmra.mxu1 %vm1800_vm2, %v11111_v48 }
0x2004   : > { %17548 = vmatpush3.bf16.msra.mxu1 %v11658_v27  ;;  %17549 = vmatprep.mubr.msk.bf16.mxu1 %vm18647_vm1, %v18646_v31 }
0x2005   : > { %17559 = vmatprep.subr.bf16.mxu1 %v18646_v31 }
0x209b   : > { %v11160_v58 = vpop.f32.mrf.mxu1 }
0x209c   : > { %v11488_v16 = vmul.f32 0.35355338, %v11160_v58 }
0x209d   : > { %v17497_v43 = vpop.f32.mrf.mxu1 }
0x209e   : > { %v21424_v26 = vsel %vm801_vm4, %v11488_v16, -1e+30 }
0x209f   : > { %v11163_v20 = vpop.f32.mrf.mxu1  ;;  %v11504_v47 = vsel %vm1800_vm2, %v21424_v26, -inf }
0x20a0   : > { %11505 = vmax.xlane.f32.xlu0 %v11504_v47 }
0x20a1   : > { %v17498_v29 = vpop.f32.mrf.mxu1 }
0x20a3   : > { %v11206_v5 = vpop.f32.mrf.mxu1  ;;  %v11344_v19 = vpop.f32.mrf.mxu0 }
0x20a4   : > { %v11489_v14 = vmul.f32 0.35355338, %v11206_v5  ;;  %v11492_v41 = vmul.f32 0.35355338, %v11344_v19 }
0x20a5   : > { %v17503_v33 = vpop.f32.mrf.mxu1  ;;  %v17521_v0 = vpop.f32.mrf.mxu0 }
0x20a6   : > { %v11497_v55 = vsel %vm801_vm4, %v11489_v14, -1e+30  ;;  %v11500_v43 = vsel %vm801_vm4, %v11492_v41, -1e+30 }
0x20a7   : > { %v11209_v50 = vpop.f32.mrf.mxu1  ;;  %v11347_v45 = vpop.f32.mrf.mxu0  ;;  %v11507_v60 = vsel %vm1800_vm2, %v11497_v55, -inf  ;;  %v11516_v19 = vsel %vm1800_vm2, %v11500_v43, -inf }
0x20a8   : > { %11508 = vmax.xlane.f32.xlu1 %v11507_v60 }
0x20a9   : > { %v17504_v52 = vpop.f32.mrf.mxu1  ;;  %v17522_v15 = vpop.f32.mrf.mxu0 }
0x20ab   : > { %v11252_v51 = vpop.f32.mrf.mxu1  ;;  %v11436_v6 = vpop.f32.mrf.mxu0 }
0x20ac   : > { %v11490_v12 = vmul.f32 0.35355338, %v11252_v51  ;;  %v11494_v20 = vmul.f32 0.35355338, %v11436_v6 }
0x20ad   : > { %v17509_v44 = vpop.f32.mrf.mxu1  ;;  %v17533_v56 = vpop.f32.mrf.mxu0 }
0x20ae   : > { %v11498_v48 = vsel %vm801_vm4, %v11490_v12, -1e+30  ;;  %v11502_v14 = vsel %vm801_vm4, %v11494_v20, -1e+30 }
0x20af   : > { %v11255_v27 = vpop.f32.mrf.mxu1  ;;  %v11439_v58 = vpop.f32.mrf.mxu0  ;;  %v11510_v16 = vsel %vm1800_vm2, %v11498_v48, -inf  ;;  %v11522_v52 = vsel %vm1800_vm2, %v11502_v14, -inf }
0x20b0   : > { %11511 = vmax.xlane.f32.xlu0 %v11510_v16 }
0x20b1   : > { %v17510_v47 = vpop.f32.mrf.mxu1  ;;  %v17534_v29 = vpop.f32.mrf.mxu0 }
0x20b3   : > { %v11298_v5 = vpop.f32.mrf.mxu1 }
0x20b4   : > { %v11491_v33 = vmul.f32 0.35355338, %v11298_v5  ;;  %11517 = vmax.xlane.f32.xlu0 %v11516_v19 }
0x20b5   : > { %v17515_v0 = vpop.f32.mrf.mxu1 }
0x20b6   : > { %v11499_v50 = vsel %vm801_vm4, %v11491_v33, -1e+30 }
0x20b7   : > { %v11301_v45 = vpop.f32.mrf.mxu1  ;;  %v11513_v60 = vsel %vm1800_vm2, %v11499_v50, -inf }
0x20b8   : > { %11514 = vmax.xlane.f32.xlu1 %v11513_v60  ;;  %11523 = vmax.xlane.f32.xlu0 %v11522_v52 }
0x20b9   : > { %v17516_v15 = vpop.f32.mrf.mxu1 }
0x20bb   : > { %v11390_v51 = vpop.f32.mrf.mxu1 }
0x20bc   : > { %v11493_v6 = vmul.f32 0.35355338, %v11390_v51 }
0x20bd   : > { %v17527_v41 = vpop.f32.mrf.mxu1 }
0x20be   : > { %v11501_v12 = vsel %vm801_vm4, %v11493_v6, -1e+30 }
0x20bf   : > { %v11393_v44 = vpop.f32.mrf.mxu1  ;;  %v11519_v56 = vsel %vm1800_vm2, %v11501_v12, -inf }
0x20c0   : > { %11520 = vmax.xlane.f32.xlu1 %v11519_v56 }
0x20c1   : > { %v17528_v27 = vpop.f32.mrf.mxu1 }
0x20c3   : > { %v11482_v58 = vpop.f32.mrf.mxu1 }
0x20c4   : > { %v11495_v16 = vmul.f32 0.35355338, %v11482_v58 }
0x20c5   : > { %v17539_v20 = vpop.f32.mrf.mxu1 }
0x20c6   : > { %v11503_v47 = vsel %vm801_vm4, %v11495_v16, -1e+30 }
0x20c7   : > { %v11485_v29 = vpop.f32.mrf.mxu1  ;;  %v11525_v5 = vsel %vm1800_vm2, %v11503_v47, -inf }
0x20c8   : > { %11526 = vmax.xlane.f32.xlu1 %v11525_v5 }
0x20c9   : > { %v17540_v19 = vpop.f32.mrf.mxu1 }
0x2129   : > { %v11506_v33 = vpop.xlane.xlu0 %11505 }
0x212a   : > { %v11528_v0 = vsub.f32 %v21424_v26, %v11506_v33 }
0x212c   : > { %v11536_v45 = vmul.f32 1.442695, %v11528_v0 }
0x212e   : > { %18470 = vpow2.f32 %v11536_v45 }
0x2131   : > { %v11509_v60 = vpop.xlane.xlu1 %11508 }
0x2132   : > { %v11529_v52 = vsub.f32 %v11497_v55, %v11509_v60 }
0x2134   : > { %v11538_v15 = vmul.f32 1.442695, %v11529_v52 }
0x2136   : > { %18472 = vpow2.f32 %v11538_v15 }
0x2139   : > { %v11512_v51 = vpop.xlane.xlu0 %11511 }
0x213a   : > { %v11530_v6 = vsub.f32 %v11498_v48, %v11512_v51 }
0x213b   : > { %v18471_v41 = vpop.eup %18470 }
0x213c   : > { %v11540_v44 = vmul.f32 1.442695, %v11530_v6  ;;  %v11552_v56 = vsel %vm1800_vm2, %v18471_v41, 0.0 }
0x213d   : > { %v11518_v27 = vpop.xlane.xlu0 %11517  ;;  %11553 = vadd.xlane.f32.xlu0 %v11552_v56 }
0x213e   : > { %18474 = vpow2.f32 %v11540_v44  ;;  %v11532_v58 = vsub.f32 %v11500_v43, %v11518_v27 }
0x2140   : > { %v11544_v16 = vmul.f32 1.442695, %v11532_v58 }
0x2141   : > { %v11515_v20 = vpop.xlane.xlu1 %11514  ;;  %v11524_v29 = vpop.xlane.xlu0 %11523 }
0x2142   : > { %18476 = vpow2.f32 %v11544_v16  ;;  %v11531_v26 = vsub.f32 %v11499_v50, %v11515_v20  ;;  %v11534_v5 = vsub.f32 %v11502_v14, %v11524_v29 }
0x2143   : > { %v18473_v19 = vpop.eup %18472 }
0x2144   : > { %v11542_v55 = vmul.f32 1.442695, %v11531_v26  ;;  %v11548_v33 = vmul.f32 1.442695, %v11534_v5  ;;  %v11555_v0 = vsel %vm1800_vm2, %v18473_v19, 0.0 }
0x2145   : > { %11556 = vadd.xlane.f32.xlu1 %v11555_v0 }
0x2146   : > { %18478 = vpow2.f32 %v11542_v55  ;;  %v11602_v55 = vpack.c.bf16 %v21312_v22, %v21312_v22  ;;  %v11603_v22 = vpack.c.bf16 %v21315_v2, %v21315_v2  ;;  %v11604_v2 = vpack.c.bf16 %v21323_v38, %v21323_v38 }
0x2147   : > { %18480 = vpow2.f32 %v11548_v33 }
0x2149   : > { %v11521_v48 = vpop.xlane.xlu1 %11520 }
0x214a   : > { %v11533_v45 = vsub.f32 %v11501_v12, %v11521_v48 }
0x214b   : > { %v18475_v60 = vpop.eup %18474 }
0x214c   : > { %v11546_v52 = vmul.f32 1.442695, %v11533_v45  ;;  %v11558_v43 = vsel %vm1800_vm2, %v18475_v60, 0.0  ;;  %v11704_v45 = vsel %vm2294_vm3, %v11602_v55, 0 }
0x214d   : > { %11559 = vadd.xlane.f32.xlu0 %v11558_v43 }
0x214e   : > { %18482 = vpow2.f32 %v11546_v52 }
0x214f   : > { %v18477_v15 = vpop.eup %18476 }
0x2150   : > { %v11564_v50 = vsel %vm1800_vm2, %v18477_v15, 0.0 }
0x2151   : > { %11565 = vadd.xlane.f32.xlu0 %v11564_v50  ;;  %v11527_v14 = vpop.xlane.xlu1 %11526 }
0x2152   : > { %v11535_v51 = vsub.f32 %v11503_v47, %v11527_v14 }
0x2153   : > { %v18479_v6 = vpop.eup %18478 }
0x2154   : > { %v21456_v44 = vpop.eup %18480  ;;  %v11550_v56 = vmul.f32 1.442695, %v11535_v51  ;;  %v11561_v27 = vsel %vm1800_vm2, %v18479_v6, 0.0 }
0x2155   : > { %v11570_v12 = vsel %vm1800_vm2, %v21456_v44, 0.0  ;;  %11562 = vadd.xlane.f32.xlu1 %v11561_v27 }
0x2156   : > { %18484 = vpow2.f32 %v11550_v56  ;;  %11571 = vadd.xlane.f32.xlu0 %v11570_v12  ;;  %v11750_v56 = vsel %vm2294_vm3, %v11603_v22, 0 }
0x215b   : > { %v21461_v58 = vpop.eup %18482 }
0x215c   : > { %v11567_v16 = vsel %vm1800_vm2, %v21461_v58, 0.0 }
0x215d   : > { %11568 = vadd.xlane.f32.xlu1 %v11567_v16 }
0x2163   : > { %v21465_v20 = vpop.eup %18484 }
0x2164   : > { %v11573_v47 = vsel %vm1800_vm2, %v21465_v20, 0.0 }
0x2165   : > { %11574 = vadd.xlane.f32.xlu1 %v11573_v47 }
0x21c6   : > { %v11554_v29 = vpop.xlane.xlu0 %11553 }
0x21c7   : > { %18486 = vrcp.f32 %v11554_v29  ;;  %v11796_v29 = vsel %vm2294_vm3, %v11604_v2, 0  ;;  %v18131_v2 = vld [vmem:[%s22316_s29 + $0x1d0] sm:$0xff]  }
0x21ce   : > { %v11557_v26 = vpop.xlane.xlu1 %11556 }
0x21cf   : > { %18488 = vrcp.f32 %v11557_v26  ;;  %v11101_v26 = vadd.f32 %v21309_v10, %v21428_v7 }
0x21d1   : > { %v11605_v55 = vpack.c.bf16 %v11101_v26, %v11101_v26  ;;  %v18137_v26 = vld [vmem:[%s22318_s26 + $0x1e0] sm:$0xff]  }
0x21d4   : > { %v18487_v5 = vpop.eup %18486 }
0x21d5   : > { %v11584_v33 = vmul.f32 %v18487_v5, %v18471_v41 }
0x21d6   : > { %v11560_v0 = vpop.xlane.xlu0 %11559 }
0x21d7   : > { %v11592_v48 = vpack.c.bf16 %v11584_v33, %v11584_v33  ;;  %18490 = vrcp.f32 %v11560_v0 }
0x21d9   : > { %17544 = vmatmul.mubr.msk.bf16.vlgmr.msra.gmra.mxu0 %vm1800_vm2, %v11592_v48 }
0x21da   : > { %17554 = vmatpush3.bf16.msra.mxu0 %v11704_v45  ;;  %v11566_v52 = vpop.xlane.xlu0 %11565  ;;  %17555 = vmatprep.mubr.msk.bf16.mxu0 %vm18647_vm1, %v18646_v31 }
0x21db   : > { %18492 = vrcp.f32 %v11566_v52  ;;  %17565 = vmatprep.subr.bf16.mxu0 %v18646_v31  ;;  %v11842_v52 = vsel %vm2294_vm3, %v11605_v55, 0 }
0x21dc   : > { %v18489_v43 = vpop.eup %18488 }
0x21dd   : > { %v11585_v41 = vmul.f32 %v18489_v43, %v18473_v19 }
0x21de   : > { %v11563_v50 = vpop.xlane.xlu1 %11562 }
0x21df   : > { %v11593_v14 = vpack.c.bf16 %v11585_v41, %v11585_v41  ;;  %18494 = vrcp.f32 %v11563_v50  ;;  %v11572_v51 = vpop.xlane.xlu0 %11571 }
0x21e0   : > { %18496 = vrcp.f32 %v11572_v51  ;;  %v18127_v51 = vld [vmem:[%s22316_s29 + $0x1f0] sm:$0xff]  }
0x21e1   : > { %17550 = vmatmul.mubr.msk.bf16.vlgmr.msra.gmra.mxu1 %vm1800_vm2, %v11593_v14 }
0x21e2   : > { %17560 = vmatpush3.bf16.msra.mxu1 %v11750_v56  ;;  %17561 = vmatprep.mubr.msk.bf16.mxu1 %vm18647_vm1, %v18646_v31  ;;  %v18128_v56 = vld [vmem:[%s22316_s29 + $0x1e8] sm:$0xff]  }
0x21e3   : > { %17571 = vmatprep.subr.bf16.mxu1 %v18646_v31 }
0x21e4   : > { %v18491_v27 = vpop.eup %18490 }
0x21e5   : > { %v11586_v19 = vmul.f32 %v18491_v27, %v18475_v60  ;;  %v11606_v60 = vpack.c.bf16 %v21320_v17, %v21320_v17  ;;  %v18130_v27 = vld [vmem:[%s22316_s29 + $0x1d8] sm:$0xff]  }
0x21e6   : > { %v11569_v12 = vpop.xlane.xlu1 %11568 }
0x21e7   : > { %v11594_v16 = vpack.c.bf16 %v11586_v19, %v11586_v19  ;;  %18498 = vrcp.f32 %v11569_v12  ;;  %v11888_v7 = vsel %vm2294_vm3, %v11606_v60, 0  ;;  %v18132_v19 = vld [vmem:[%s22316_s29 + $0x1c8] sm:$0xff]   ;;  %v18133_v12 = vld [vmem:[%s22316_s29 + $0x1c0] sm:$0xff]   ;;  %v15349_v60 = vld [vmem:[%s22257_s13 + $0x18] sm:$0xf] }
0x21e8   : > { %v18493_v47 = vpop.eup %18492  ;;  %v12019_v55 = vsel %vm2294_vm3, %v15349_v60, 0 }
0x21e9   : > { %17556 = vmatmul.mubr.msk.bf16.vlgmr.msra.gmra.mxu0 %vm1800_vm2, %v11594_v16  ;;  %v11588_v5 = vmul.f32 %v18493_v47, %v18477_v15  ;;  %v18134_v16 = vld [vmem:[%s22318_s26 + $0x1f8] sm:$0xff]   ;;  %v18135_v47 = vld [vmem:[%s22318_s26 + $0x1f0] sm:$0xff]  }
0x21ea   : > { %17566 = vmatpush3.bf16.msra.mxu0 %v11796_v29  ;;  %17567 = vmatprep.mubr.msk.bf16.mxu0 %vm18647_vm1, %v18646_v31  ;;  %v18136_v29 = vld [vmem:[%s22318_s26 + $0x1e8] sm:$0xff]  }
0x21eb   : > { %17577 = vmatprep.subr.bf16.mxu0 %v18646_v31  ;;  %v11596_v48 = vpack.c.bf16 %v11588_v5, %v11588_v5  ;;  %v18138_v5 = vld [vmem:[%s22318_s26 + $0x1d8] sm:$0xff]  }
0x21ec   : > { %v18495_v38 = vpop.eup %18494 }
0x21ed   : > { %v11587_v33 = vmul.f32 %v18495_v38, %v18479_v6  ;;  %v18497_v10 = vpop.eup %18496  ;;  %v11607_v6 = vpack.c.bf16 %v21326_v62, %v21326_v62  ;;  %v18139_v38 = vld [vmem:[%s22318_s26 + $0x1d0] sm:$0xff]  }
0x21ee   : > { %v11575_v0 = vpop.xlane.xlu1 %11574  ;;  %v11590_v15 = vmul.f32 %v18497_v10, %v21456_v44  ;;  %v18126_v44 = vld [vmem:[%s22316_s29 + $0x1f8] sm:$0xff]  }
0x21ef   : > { %v11595_v45 = vpack.c.bf16 %v11587_v33, %v11587_v33  ;;  %18500 = vrcp.f32 %v11575_v0  ;;  %v11934_v50 = vsel %vm2294_vm3, %v11607_v6, 0  ;;  %v18142_v33 = vld [vmem:[%s22317_s10 + $0x1f8] sm:$0xff]   ;;  %v18140_v0 = vld [vmem:[%s22318_s26 + $0x1c8] sm:$0xff]  }
0x21f0   : > { %v11598_v22 = vpack.c.bf16 %v11590_v15, %v11590_v15 }
0x21f1   : > { %17562 = vmatmul.mubr.msk.bf16.vlgmr.msra.gmra.mxu1 %vm1800_vm2, %v11595_v45  ;;  %17568 = vmatmul.mubr.msk.bf16.vlgmr.msra.gmra.mxu0 %vm1800_vm2, %v11596_v48  ;;  %v18141_v48 = vld [vmem:[%s22318_s26 + $0x1c0] sm:$0xff]  }
0x21f2   : > { %17572 = vmatpush3.bf16.msra.mxu1 %v11842_v52  ;;  %17578 = vmatpush3.bf16.msra.mxu0 %v11888_v7 }
0x21f3   : > { %17573 = vmatprep.mubr.msk.bf16.mxu1 %vm18647_vm1, %v18646_v31  ;;  %17579 = vmatprep.mubr.msk.bf16.mxu0 %vm18647_vm1, %v18646_v31 }
0x21f4   : > { %v18499_v17 = vpop.eup %18498  ;;  %17583 = vmatprep.subr.bf16.mxu1 %v18646_v31  ;;  %17871 = vmatprep.subr.msk.bf16.mxu0 %vm2294_vm3, %v15349_v60 }
0x21f5   : > { %v11589_v43 = vmul.f32 %v18499_v17, %v21461_v58 }
0x21f7   : > { %v11597_v41 = vpack.c.bf16 %v11589_v43, %v11589_v43 }
0x21f9   : > { %17574 = vmatmul.mubr.msk.bf16.vlgmr.msra.gmra.mxu1 %vm1800_vm2, %v11597_v41  ;;  %17580 = vmatmul.mubr.msk.bf16.vlgmr.msra.gmra.mxu0 %vm1800_vm2, %v11598_v22 }
0x21fa   : > { %17584 = vmatpush3.bf16.msra.mxu1 %v11934_v50  ;;  %17585 = vmatprep.mubr.msk.bf16.mxu1 %vm18647_vm1, %v18646_v31 }
0x21fb   : > { %17599 = vmatprep.subr.bf16.mxu1 %v18126_v44  ;;  %17590 = vmatpush3.bf16.msra.mxu0 %v12019_v55 }
0x21fc   : > { %v18501_v62 = vpop.eup %18500  ;;  %17623 = vmatprep.subr.bf16.mxu0 %v18142_v33 }
0x21fd   : > { %v11591_v58 = vmul.f32 %v18501_v62, %v21465_v20  ;;  %v18129_v20 = vld [vmem:[%s22316_s29 + $0x1e0] sm:$0xff]  }
0x21ff   : > { %v11599_v14 = vpack.c.bf16 %v11591_v58, %v11591_v58 }
0x2201   : > { %17586 = vmatmul.mubr.msk.bf16.vlgmr.msra.gmra.mxu1 %vm1800_vm2, %v11599_v14 }
0x2202   : > { %17600 = vmatpush3.bf16.msra.mxu1 %v18126_v44  ;;  %17615 = vmatprep.mubr.bf16.mxu1 %v20646_v59 }
0x2203   : > { %17601 = vmatprep.subr.bf16.mxu1 %v18127_v51 }
0x2206   : > { %17602 = vmatpush3.bf16.msra.mxu1 %v18127_v51 }
0x2207   : > { %17603 = vmatprep.subr.bf16.mxu1 %v18128_v56 }
0x220a   : > { %17604 = vmatpush3.bf16.msra.mxu1 %v18128_v56  ;;  %v18143_v56 = vld [vmem:[%s22317_s10 + $0x1f0] sm:$0xff]  }
0x220b   : > { %17605 = vmatprep.subr.bf16.mxu1 %v18129_v20 }
0x220e   : > { %17606 = vmatpush3.bf16.msra.mxu1 %v18129_v20 }
0x220f   : > { %17607 = vmatprep.subr.bf16.mxu1 %v18130_v27 }
0x2212   : > { %17608 = vmatpush3.bf16.msra.mxu1 %v18130_v27 }
0x2213   : > { %17609 = vmatprep.subr.bf16.mxu1 %v18131_v2 }
0x2216   : > { %17610 = vmatpush3.bf16.msra.mxu1 %v18131_v2 }
0x2217   : > { %17611 = vmatprep.subr.bf16.mxu1 %v18132_v19 }
0x221a   : > { %17612 = vmatpush3.bf16.msra.mxu1 %v18132_v19 }
0x221b   : > { %17613 = vmatprep.subr.bf16.mxu1 %v18133_v12 }
0x221e   : > { %17614 = vmatpush3.bf16.msra.mxu1 %v18133_v12  ;;  %v18144_v12 = vld [vmem:[%s22317_s10 + $0x1e8] sm:$0xff]  }
0x221f   : > { %17647 = vmatprep.subr.bf16.mxu1 %v18134_v16 }
0x2221   : > { %17616 = vmatmul.mubr.bf16.vlgmr.msra.gmra.mxu1 %v20650_v9 }
0x2222   : > { %17619 = vmatprep.mubr.bf16.mxu1 %v20670_v4  ;;  %17648 = vmatpush3.bf16.msra.mxu1 %v18134_v16 }
0x2223   : > { %17649 = vmatprep.subr.bf16.mxu1 %v18135_v47 }
0x2226   : > { %17650 = vmatpush3.bf16.msra.mxu1 %v18135_v47 }
0x2227   : > { %17651 = vmatprep.subr.bf16.mxu1 %v18136_v29 }
0x2229   : > { %17620 = vmatmul.mubr.bf16.gmra.mxu1 %v20674_v1 }
0x222a   : > { %17652 = vmatpush3.bf16.msra.mxu1 %v18136_v29  ;;  %17663 = vmatprep.mubr.bf16.mxu1 %v20646_v59 }
0x222b   : > { %17653 = vmatprep.subr.bf16.mxu1 %v18137_v26 }
0x222e   : > { %17654 = vmatpush3.bf16.msra.mxu1 %v18137_v26 }
0x222f   : > { %17655 = vmatprep.subr.bf16.mxu1 %v18138_v5 }
0x2232   : > { %17656 = vmatpush3.bf16.msra.mxu1 %v18138_v5 }
0x2233   : > { %17657 = vmatprep.subr.bf16.mxu1 %v18139_v38 }
0x2236   : > { %17658 = vmatpush3.bf16.msra.mxu1 %v18139_v38  ;;  %v18145_v38 = vld [vmem:[%s22317_s10 + $0x1e0] sm:$0xff]  }
0x2237   : > { %17659 = vmatprep.subr.bf16.mxu1 %v18140_v0 }
0x223a   : > { %17660 = vmatpush3.bf16.msra.mxu1 %v18140_v0 }
0x223b   : > { %17661 = vmatprep.subr.bf16.mxu1 %v18141_v48 }
0x223e   : > { %17662 = vmatpush3.bf16.msra.mxu1 %v18141_v48  ;;  %v18146_v48 = vld [vmem:[%s22317_s10 + $0x1d8] sm:$0xff]  }
0x223f   : > { %17695 = vmatprep.subr.bf16.mxu1 %v18646_v31 }
0x2241   : > { %17664 = vmatmul.mubr.bf16.vlgmr.msra.gmra.mxu1 %v20650_v9 }
0x2242   : > { %17667 = vmatprep.mubr.bf16.mxu1 %v20670_v4 }
0x2249   : > { %17668 = vmatmul.mubr.bf16.gmra.mxu1 %v20674_v1 }
0x224a   : > { %17697 = vmatprep.mubr.msk.bf16.mxu1 %vm18647_vm1, %v18646_v31 }
0x2299   : > { %v11648_v45 = vpop.f32.mrf.mxu0 }
0x229b   : > { %v17545_v10 = vpop.f32.mrf.mxu0 }
0x229d   : > { %v11651_v7 = vpop.f32.mrf.mxu0 }
0x229f   : > { %v17546_v52 = vpop.f32.mrf.mxu0 }
0x22a1   : > { %v11694_v15 = vpop.f32.mrf.mxu1 }
0x22a2   : > { %v15599_v17 = vpack.c.bf16 %v11694_v15, %v11648_v45  ;;  %v18147_v15 = vld [vmem:[%s22317_s10 + $0x1d0] sm:$0xff]  }
0x22a3   : > { %v17551_v6 = vpop.f32.mrf.mxu1 }
0x22a4   : > { %17591 = vmatprep.mubr.msk.bf16.mxu0 %vm1800_vm2, %v15599_v17 }
0x22a5   : > { %v11697_v43 = vpop.f32.mrf.mxu1 }
0x22a6   : > { %v18148_v43 = vld [vmem:[%s22317_s10 + $0x1c8] sm:$0xff]  }
0x22a7   : > { %v17552_v22 = vpop.f32.mrf.mxu1 }
0x22a9   : > { %v11740_v41 = vpop.f32.mrf.mxu0 }
0x22ab   : > { %v17557_v44 = vpop.f32.mrf.mxu0 }
0x22ad   : > { %v11743_v50 = vpop.f32.mrf.mxu0 }
0x22af   : > { %v17558_v62 = vpop.f32.mrf.mxu0 }
0x22b1   : > { %v11786_v58 = vpop.f32.mrf.mxu1  ;;  %v11832_v14 = vpop.f32.mrf.mxu0 }
0x22b2   : > { %v15600_v51 = vpack.c.bf16 %v11786_v58, %v11740_v41  ;;  %v18149_v41 = vld [vmem:[%s22317_s10 + $0x1c0] sm:$0xff]   ;;  %s22326_s10 = sld [smem:[#allocation24_spill]] }
0x22b3   : > { %v17563_v20 = vpop.f32.mrf.mxu1  ;;  %v17569_v27 = vpop.f32.mrf.mxu0 }
0x22b4   : > { %17592 = vmatmul.mubr.msk.bf16.vlgmr.msra.gmra.mxu0 %vm1800_vm2, %v15600_v51 }
0x22b5   : > { %17624 = vmatpush3.bf16.msra.mxu0 %v18142_v33  ;;  %v11789_v2 = vpop.f32.mrf.mxu1  ;;  %v11835_v19 = vpop.f32.mrf.mxu0 }
0x22b6   : > { %17625 = vmatprep.subr.bf16.mxu0 %v18143_v56 }
0x22b7   : > { %v17564_v16 = vpop.f32.mrf.mxu1  ;;  %v17570_v47 = vpop.f32.mrf.mxu0 }
0x22b9   : > { %17626 = vmatpush3.bf16.msra.mxu0 %v18143_v56  ;;  %v11878_v29 = vpop.f32.mrf.mxu1  ;;  %v11924_v26 = vpop.f32.mrf.mxu0 }
0x22ba   : > { %v15601_v5 = vpack.c.bf16 %v11878_v29, %v11832_v14  ;;  %17627 = vmatprep.subr.bf16.mxu0 %v18144_v12 }
0x22bb   : > { %v17575_v60 = vpop.f32.mrf.mxu1  ;;  %v17581_v55 = vpop.f32.mrf.mxu0 }
0x22bc   : > { %17595 = vmatprep.mubr.msk.bf16.mxu0 %vm1800_vm2, %v15601_v5  ;;  %v10658_v55 = vadd.f32 %v21330_v39, %v21013_v18  ;;  %v10662_v18 = vadd.f32 %v21338_v30, %v21021_v40  ;;  %v21684_v40 = vld [vmem:[%s22322_s11 + $0x7] ss:$0 sm:$0xff]  ;;  %s22203_s11 = scalar_lea.hbm %s22326_s10, %s15555_s1 }
0x22bd   : > { %17628 = vmatpush3.bf16.msra.mxu0 %v18144_v12  ;;  %v11881_v33 = vpop.f32.mrf.mxu1  ;;  %v11927_v0 = vpop.f32.mrf.mxu0 }
0x22be   : > { %17629 = vmatprep.subr.bf16.mxu0 %v18145_v38 }
0x22bf   : > { %v17576_v45 = vpop.f32.mrf.mxu1  ;;  %v17582_v10 = vpop.f32.mrf.mxu0 }
0x22c1   : > { %17630 = vmatpush3.bf16.msra.mxu0 %v18145_v38  ;;  %v11970_v7 = vpop.f32.mrf.mxu1  ;;  %v10660_v38 = vadd.f32 %v21328_v46, %v21011_v24  ;;  %v10664_v24 = vadd.f32 %v21336_v3, %v21019_v34 }
0x22c2   : > { %v15602_v52 = vpack.c.bf16 %v11970_v7, %v11924_v26  ;;  %17631 = vmatprep.subr.bf16.mxu0 %v18146_v48 }
0x22c3   : > { %v17587_v17 = vpop.f32.mrf.mxu1 }
0x22c4   : > { %17596 = vmatmul.mubr.msk.bf16.gmra.mxu0 %vm1800_vm2, %v15602_v52 }
0x22c5   : > { %17632 = vmatpush3.bf16.msra.mxu0 %v18146_v48  ;;  %v11973_v6 = vpop.f32.mrf.mxu1  ;;  %17639 = vmatprep.mubr.bf16.mxu0 %v20646_v59  ;;  %v10661_v48 = vadd.f32 %v21332_v23, %v21015_v11  ;;  %v10665_v11 = vadd.f32 %v21340_v42, %v21023_v8 }
0x22c6   : > { %17633 = vmatprep.subr.bf16.mxu0 %v18147_v15  ;;  %v10663_v6 = vadd.f32 %v21342_v21, %v21025_v35  ;;  %v21692_v21 = vld [vmem:[%s22324_s0 + $0x7] ss:$0 sm:$0xff]  ;;  %s787_s0 = scalar_lea.vmem [#allocation2], %s14607_s28  ;;  %s18588_s28 = sshll.u32 %s18648_s8, 4  ;;  %s18589_s28 = int_to_ptr.vmem [resolvable:$false] %s18588_s28 }
0x22c7   : > { %v17588_v22 = vpop.f32.mrf.mxu1  ;;  %s14544_s6 = sshll.u32 %s787_s0, 4  ;;  %s22205_s6 = int_to_ptr.vmem [resolvable:$true] %s14544_s6 }
0x22c8   : > { %s18584_s27 = scalar_lea.vmem %s22205_s6, 128  ;;  %p18591_p0 = scmp.lt.s32.totalorder %s22205_s6, %s18589_s28 }
0x22c9   : > { %17634 = vmatpush3.bf16.msra.mxu0 %v18147_v15  ;;  %p18585_p11 = scmp.ne.s32.totalorder %s22205_s6, %s18584_s27 }
0x22ca   : > { %17635 = vmatprep.subr.bf16.mxu0 %v18148_v43 }
0x22cb   : > { %p18586_p12 = pnand %p18585_p11, %p18822_p5 }
0x22cd   : > { %17636 = vmatpush3.bf16.msra.mxu0 %v18148_v43  ;;  %p18587_p13 = pneg %p18586_p12 }
0x22ce   : > { %17637 = vmatprep.subr.bf16.mxu0 %v18149_v41 }
0x22d1   : > { %17638 = vmatpush3.bf16.msra.mxu0 %v18149_v41 }
0x22d2   : > { %17671 = vmatprep.subr.bf16.mxu0 %v18646_v31 }
0x22d4   : > { %17640 = vmatmul.mubr.bf16.vlgmr.msra.gmra.mxu0 %v20650_v9 }
0x22d5   : > { %17643 = vmatprep.mubr.bf16.mxu0 %v20670_v4  ;;  %v21630_v4 = vld [vmem:[%s22256_s12 + $0x7] ss:$0 sm:$0xff] }
0x22dc   : > { %17644 = vmatmul.mubr.bf16.gmra.mxu0 %v20674_v1 }
0x22dd   : > { %17673 = vmatprep.mubr.msk.bf16.mxu0 %vm18647_vm1, %v18646_v31 }
0x22e1   : > { %v21613_v59 = vpop.f32.mrf.mxu1 }
0x22e3   : > { %v12193_v44 = vpop.f32.mrf.mxu1 }
0x22e5   : > { %v21615_v50 = vpop.f32.mrf.mxu1 }
0x22e7   : > { %v21617_v62 = vpop.f32.mrf.mxu1 }
0x22e9   : > { %v21619_v58 = vpop.f32.mrf.mxu1 }
0x22eb   : > { %v21621_v14 = vpop.f32.mrf.mxu1 }
0x22ed   : > { %v21623_v51 = vpop.f32.mrf.mxu1 }
0x22ef   : > { %v21625_v9 = vpop.f32.mrf.mxu1 }
0x2301   : > { %v17665_v1 = vpop.f32.mrf.mxu1 }
0x2302   : > { %v21633_v56 = vadd.f32 %v17665_v1, %v21630_v4 }
0x2303   : > { %v21635_v20 = vpop.f32.mrf.mxu1 }
0x2305   : > { %v17666_v27 = vpop.f32.mrf.mxu1 }
0x2306   : > { %v21638_v2 = vadd.f32 %v17666_v27, %v21630_v4 }
0x2307   : > { %v21640_v19 = vpop.f32.mrf.mxu1 }
0x2309   : > { %v17669_v12 = vpop.f32.mrf.mxu1 }
0x230a   : > { %v21643_v16 = vadd.f32 %v17669_v12, %v21630_v4 }
0x230b   : > { %v12501_v47 = vpop.f32.mrf.mxu1 }
0x230c   : > { %v21646_v29 = vadd.f32 %v21630_v4, %v12501_v47  ;;  %v12232_v47 = vadd.f32 %v21692_v21, %v12193_v44  ;;  %v12233_v44 = vadd.f32 %v21692_v21, %v21617_v62 }
0x230d   : > { %v17670_v26 = vpop.f32.mrf.mxu1 }
0x230e   : > { %v21649_v5 = vadd.f32 %v17670_v26, %v21630_v4 }
0x2374   : > { %v17593_v60 = vpop.f32.mrf.mxu0 }
0x2375   : > { %v21655_v33 = vadd.f32 %v17593_v60, %v10660_v38 }
0x2376   : > { %v12055_v0 = vpop.f32.mrf.mxu0 }
0x2377   : > { %v21659_v45 = vadd.f32 %v12055_v0, %v10658_v55  ;;  %v12532_v55 = vpack.c.bf16 %v12232_v47, %v12232_v47  ;;  %v12235_v47 = vadd.f32 %v21615_v50, %v21692_v21  ;;  %v12237_v50 = vadd.f32 %v21692_v21, %v21625_v9 }
0x2378   : > { %v17594_v10 = vpop.f32.mrf.mxu0 }
0x2379   : > { %v21661_v7 = vadd.f32 %v17594_v10, %v10661_v48 }
0x237a   : > { %v21663_v52 = vpop.f32.mrf.mxu0 }
0x2384   : > { %v17597_v46 = vpop.f32.mrf.mxu0 }
0x2385   : > { %v21669_v39 = vadd.f32 %v17597_v46, %v10664_v24 }
0x2386   : > { %v12071_v15 = vpop.f32.mrf.mxu0 }
0x2387   : > { %v21673_v23 = vadd.f32 %v12071_v15, %v10662_v18  ;;  %v12236_v18 = vadd.f32 %v21692_v21, %v21621_v14 }
0x2388   : > { %v17598_v17 = vpop.f32.mrf.mxu0 }
0x2389   : > { %v21677_v43 = vadd.f32 %v17598_v17, %v10665_v11  ;;  %v12533_v17 = vpack.c.bf16 %v12233_v44, %v12233_v44 }
0x238a   : > { %v12074_v22 = vpop.f32.mrf.mxu0 }
0x238b   : > { %v21679_v34 = vadd.f32 %v12074_v22, %v10663_v6  ;;  %v12536_v6 = vpack.c.bf16 %v12236_v18, %v12236_v18  ;;  %v12524_v22 = vadd.f32 %v21630_v4, %v21635_v20 }
0x238d   : > { %v13028_v20 = vpack.c.bf16 %v12524_v22, %v12524_v22 }
0x2394   : > { %v17641_v3 = vpop.f32.mrf.mxu0 }
0x2395   : > { %v12380_v48 = vadd.f32 %v17641_v3, %v21684_v40 }
0x2396   : > { %v12339_v30 = vpop.f32.mrf.mxu0 }
0x2397   : > { %v12378_v8 = vadd.f32 %v21684_v40, %v12339_v30  ;;  %v12542_v15 = vpack.c.bf16 %v12380_v48, %v12380_v48  ;;  %v12537_v48 = vpack.c.bf16 %v12237_v50, %v12237_v50 }
0x2398   : > { %v17642_v42 = vpop.f32.mrf.mxu0 }
0x2399   : > { %v12540_v41 = vpack.c.bf16 %v12378_v8, %v12378_v8  ;;  %v12644_v3 = vsel %vm1800_vm2, %v12542_v15, 0  ;;  %v12381_v62 = vadd.f32 %v17642_v42, %v21684_v40  ;;  %v12234_v8 = vadd.f32 %v21613_v59, %v21692_v21 }
0x239a   : > { %v12342_v1 = vpop.f32.mrf.mxu0  ;;  %v13040_v59 = vsel %vm2294_vm3, %v13028_v20, 0 }
0x239b   : > { %v12552_v27 = vsel %vm1800_vm2, %v12540_v41, 0  ;;  %v12379_v35 = vadd.f32 %v21684_v40, %v12342_v1  ;;  %v12238_v41 = vadd.f32 %v21619_v58, %v21692_v21  ;;  %v12543_v42 = vpack.c.bf16 %v12381_v62, %v12381_v62 }
0x239c   : > { %v17645_v12 = vpop.f32.mrf.mxu0  ;;  %17672 = vmatpush3.bf16.xpose.msra.mxu0 %v12552_v27  ;;  %v12534_v27 = vpack.c.bf16 %v12234_v8, %v12234_v8 }
0x239d   : > { %17677 = vmatprep.subr.bf16.mxu0 %v18646_v31  ;;  %v12541_v38 = vpack.c.bf16 %v12379_v35, %v12379_v35  ;;  %v12384_v24 = vadd.f32 %v17645_v12, %v21684_v40  ;;  %v12538_v35 = vpack.c.bf16 %v12238_v41, %v12238_v41  ;;  %v12690_v12 = vsel %vm1800_vm2, %v12543_v42, 0 }
0x239e   : > { %v12355_v26 = vpop.f32.mrf.mxu0 }
0x239f   : > { %v12382_v60 = vadd.f32 %v21684_v40, %v12355_v26  ;;  %v12598_v10 = vsel %vm1800_vm2, %v12541_v38, 0  ;;  %v12546_v11 = vpack.c.bf16 %v12384_v24, %v12384_v24  ;;  %v12535_v38 = vpack.c.bf16 %v12235_v47, %v12235_v47 }
0x23a0   : > { %v17646_v30 = vpop.f32.mrf.mxu0  ;;  %v12239_v24 = vadd.f32 %v21623_v51, %v21692_v21 }
0x23a1   : > { %v12544_v0 = vpack.c.bf16 %v12382_v60, %v12382_v60  ;;  %v12828_v14 = vsel %vm1800_vm2, %v12546_v11, 0  ;;  %v12385_v60 = vadd.f32 %v17646_v30, %v21684_v40 }
0x23a2   : > { %v12358_v1 = vpop.f32.mrf.mxu0 }
0x23a3   : > { %v12736_v46 = vsel %vm1800_vm2, %v12544_v0, 0  ;;  %17674 = vmatmul.mubr.msk.bf16.vlgmr.msra.gmra.mxu0 %vm1800_vm2, %v12532_v55  ;;  %v12383_v58 = vadd.f32 %v21684_v40, %v12358_v1  ;;  %v12547_v0 = vpack.c.bf16 %v12385_v60, %v12385_v60 }
0x23a4   : > { %17678 = vmatpush3.bf16.xpose.msra.mxu0 %v12598_v10  ;;  %17696 = vmatpush3.bf16.xpose.msra.mxu1 %v12736_v46  ;;  %v12525_v10 = vadd.f32 %v21630_v4, %v21640_v19  ;;  %v12539_v46 = vpack.c.bf16 %v12239_v24, %v12239_v24 }
0x23a5   : > { %17679 = vmatprep.mubr.msk.bf16.mxu0 %vm18647_vm1, %v18646_v31  ;;  %17683 = vmatprep.subr.bf16.mxu0 %v18646_v31  ;;  %v12545_v26 = vpack.c.bf16 %v12383_v58, %v12383_v58  ;;  %v12874_v40 = vsel %vm1800_vm2, %v12547_v0, 0 }
0x23a6   : > { %17707 = vmatprep.subr.bf16.mxu1 %v18646_v31  ;;  %v13029_v9 = vpack.c.bf16 %v12525_v10, %v12525_v10 }
0x23a7   : > { %v12782_v55 = vsel %vm1800_vm2, %v12545_v26, 0 }
0x23a8   : > { %v13086_v44 = vsel %vm2294_vm3, %v13029_v9, 0 }
0x23ab   : > { %17680 = vmatmul.mubr.msk.bf16.vlgmr.msra.gmra.mxu0 %vm1800_vm2, %v12533_v17  ;;  %17698 = vmatmul.mubr.msk.bf16.vlgmr.msra.gmra.mxu1 %vm1800_vm2, %v12536_v6  ;;  %v21768_v17 = vpop.f32.mrf.mxu1 }
0x23ac   : > { %17684 = vmatpush3.bf16.xpose.msra.mxu0 %v12644_v3  ;;  %17708 = vmatpush3.bf16.xpose.msra.mxu1 %v12828_v14 }
0x23ad   : > { %17685 = vmatprep.mubr.msk.bf16.mxu0 %vm18647_vm1, %v18646_v31  ;;  %17709 = vmatprep.mubr.msk.bf16.mxu1 %vm18647_vm1, %v18646_v31 }
0x23ae   : > { %17689 = vmatprep.subr.bf16.mxu0 %v18646_v31  ;;  %17719 = vmatprep.subr.bf16.mxu1 %v18646_v31 }
0x23b3   : > { %17686 = vmatmul.mubr.msk.bf16.vlgmr.msra.gmra.mxu0 %vm1800_vm2, %v12534_v27  ;;  %17710 = vmatmul.mubr.msk.bf16.vlgmr.msra.gmra.mxu1 %vm1800_vm2, %v12538_v35 }
0x23b4   : > { %17690 = vmatpush3.bf16.xpose.msra.mxu0 %v12690_v12  ;;  %17720 = vmatpush3.bf16.msra.mxu1 %v13040_v59 }
0x23b5   : > { %17691 = vmatprep.mubr.msk.bf16.mxu0 %vm18647_vm1, %v18646_v31  ;;  %17701 = vmatprep.subr.bf16.mxu0 %v18646_v31 }
0x23b6   : > { %17721 = vmatprep.mubr.msk.bf16.mxu1 %vm18647_vm1, %v18646_v31  ;;  %17731 = vmatprep.subr.bf16.mxu1 %v18646_v31 }
0x23bb   : > { %17692 = vmatmul.mubr.msk.bf16.vlgmr.msra.gmra.mxu0 %vm1800_vm2, %v12535_v38 }
0x23bc   : > { %17702 = vmatpush3.bf16.xpose.msra.mxu0 %v12782_v55  ;;  %17703 = vmatprep.mubr.msk.bf16.mxu0 %vm18647_vm1, %v18646_v31 }
0x23bd   : > { %17713 = vmatprep.subr.bf16.mxu0 %v18646_v31 }
0x23c3   : > { %17704 = vmatmul.mubr.msk.bf16.vlgmr.msra.gmra.mxu0 %vm1800_vm2, %v12537_v48 }
0x23c4   : > { %17714 = vmatpush3.bf16.xpose.msra.mxu0 %v12874_v40  ;;  %17715 = vmatprep.mubr.msk.bf16.mxu0 %vm18647_vm1, %v18646_v31 }
0x23c5   : > { %17725 = vmatprep.subr.bf16.mxu0 %v18646_v31 }
0x23cb   : > { %17716 = vmatmul.mubr.msk.bf16.vlgmr.msra.gmra.mxu0 %vm1800_vm2, %v12539_v46 }
0x23cc   : > { %17726 = vmatpush3.bf16.msra.mxu0 %v13086_v44  ;;  %17727 = vmatprep.mubr.msk.bf16.mxu0 %vm18647_vm1, %v18646_v31 }
0x23cd   : > { %17737 = vmatprep.subr.bf16.mxu0 %v18646_v31 }
0x2463   : > { %v12588_v19 = vpop.f32.mrf.mxu0 }
0x2464   : > { %v12916_v18 = vmul.f32 0.35355338, %v12588_v19 }
0x2465   : > { %v17675_v15 = vpop.f32.mrf.mxu0 }
0x2466   : > { %v21764_v51 = vsel %vm801_vm4, %v12916_v18, -1e+30 }
0x2467   : > { %v12591_v21 = vpop.f32.mrf.mxu0  ;;  %v12932_v11 = vsel %vm1800_vm2, %v21764_v51, -inf }
0x2468   : > { %12933 = vmax.xlane.f32.xlu0 %v12932_v11 }
0x2469   : > { %v17676_v6 = vpop.f32.mrf.mxu0 }
0x246b   : > { %v12634_v22 = vpop.f32.mrf.mxu0  ;;  %v12772_v3 = vpop.f32.mrf.mxu1 }
0x246c   : > { %v12917_v62 = vmul.f32 0.35355338, %v12634_v22  ;;  %v12920_v12 = vmul.f32 0.35355338, %v12772_v3 }
0x246d   : > { %v17681_v14 = vpop.f32.mrf.mxu0  ;;  %v17699_v30 = vpop.f32.mrf.mxu1 }
0x246e   : > { %v12925_v8 = vsel %vm801_vm4, %v12917_v62, -1e+30  ;;  %v12928_v0 = vsel %vm801_vm4, %v12920_v12, -1e+30 }
0x246f   : > { %v12637_v41 = vpop.f32.mrf.mxu0  ;;  %v12775_v20 = vpop.f32.mrf.mxu1  ;;  %v12935_v42 = vsel %vm1800_vm2, %v12925_v8, -inf  ;;  %v12944_v9 = vsel %vm1800_vm2, %v12928_v0, -inf }
0x2470   : > { %12936 = vmax.xlane.f32.xlu1 %v12935_v42 }
0x2471   : > { %v17682_v1 = vpop.f32.mrf.mxu0  ;;  %v17700_v27 = vpop.f32.mrf.mxu1 }
0x2473   : > { %v12680_v35 = vpop.f32.mrf.mxu0  ;;  %v12864_v59 = vpop.f32.mrf.mxu1 }
0x2474   : > { %v12918_v58 = vmul.f32 0.35355338, %v12680_v35  ;;  %v12922_v48 = vmul.f32 0.35355338, %v12864_v59 }
0x2475   : > { %v17687_v47 = vpop.f32.mrf.mxu0  ;;  %v17711_v26 = vpop.f32.mrf.mxu1 }
0x2476   : > { %v12926_v38 = vsel %vm801_vm4, %v12918_v58, -1e+30  ;;  %v12930_v46 = vsel %vm801_vm4, %v12922_v48, -1e+30 }
0x2477   : > { %v12683_v60 = vpop.f32.mrf.mxu0  ;;  %v12867_v55 = vpop.f32.mrf.mxu1  ;;  %v12938_v50 = vsel %vm1800_vm2, %v12926_v38, -inf  ;;  %v12950_v11 = vsel %vm1800_vm2, %v12930_v46, -inf }
0x2478   : > { %12939 = vmax.xlane.f32.xlu0 %v12938_v50 }
0x2479   : > { %v17688_v10 = vpop.f32.mrf.mxu0  ;;  %v17712_v40 = vpop.f32.mrf.mxu1 }
0x247b   : > { %v12726_v24 = vpop.f32.mrf.mxu0 }
0x247c   : > { %v12919_v44 = vmul.f32 0.35355338, %v12726_v24  ;;  %12945 = vmax.xlane.f32.xlu0 %v12944_v9 }
0x247d   : > { %v17693_v19 = vpop.f32.mrf.mxu0 }
0x247e   : > { %v12927_v18 = vsel %vm801_vm4, %v12919_v44, -1e+30 }
0x247f   : > { %v12729_v15 = vpop.f32.mrf.mxu0  ;;  %v12941_v21 = vsel %vm1800_vm2, %v12927_v18, -inf }
0x2480   : > { %12942 = vmax.xlane.f32.xlu1 %v12941_v21  ;;  %12951 = vmax.xlane.f32.xlu0 %v12950_v11 }
0x2481   : > { %v17694_v6 = vpop.f32.mrf.mxu0 }
0x2483   : > { %v12818_v22 = vpop.f32.mrf.mxu0 }
0x2484   : > { %v12921_v3 = vmul.f32 0.35355338, %v12818_v22 }
0x2485   : > { %v17705_v62 = vpop.f32.mrf.mxu0 }
0x2486   : > { %v12929_v14 = vsel %vm801_vm4, %v12921_v3, -1e+30 }
0x2487   : > { %v12821_v30 = vpop.f32.mrf.mxu0  ;;  %v12947_v41 = vsel %vm1800_vm2, %v12929_v14, -inf }
0x2488   : > { %12948 = vmax.xlane.f32.xlu1 %v12947_v41 }
0x2489   : > { %v17706_v20 = vpop.f32.mrf.mxu0 }
0x248b   : > { %v12910_v42 = vpop.f32.mrf.mxu0 }
0x248c   : > { %v12923_v1 = vmul.f32 0.35355338, %v12910_v42 }
0x248d   : > { %v17717_v27 = vpop.f32.mrf.mxu0 }
0x248e   : > { %v12931_v35 = vsel %vm801_vm4, %v12923_v1, -1e+30 }
0x248f   : > { %v12913_v59 = vpop.f32.mrf.mxu0  ;;  %v12953_v12 = vsel %vm1800_vm2, %v12931_v35, -inf }
0x2490   : > { %12954 = vmax.xlane.f32.xlu1 %v12953_v12 }
0x2491   : > { %v17718_v58 = vpop.f32.mrf.mxu0 }
0x24f1   : > { %v12934_v47 = vpop.xlane.xlu0 %12933 }
0x24f2   : > { %v12956_v26 = vsub.f32 %v21764_v51, %v12934_v47 }
0x24f4   : > { %v12964_v60 = vmul.f32 1.442695, %v12956_v26 }
0x24f6   : > { %18502 = vpow2.f32 %v12964_v60 }
0x24f9   : > { %v12937_v55 = vpop.xlane.xlu1 %12936 }
0x24fa   : > { %v12957_v50 = vsub.f32 %v12925_v8, %v12937_v55 }
0x24fc   : > { %v12966_v48 = vmul.f32 1.442695, %v12957_v50 }
0x24fe   : > { %18504 = vpow2.f32 %v12966_v48 }
0x2501   : > { %v12940_v10 = vpop.xlane.xlu0 %12939 }
0x2502   : > { %v12958_v40 = vsub.f32 %v12926_v38, %v12940_v10  ;;  %v13030_v10 = vpack.c.bf16 %v21633_v56, %v21633_v56  ;;  %v13031_v56 = vpack.c.bf16 %v21638_v2, %v21638_v2  ;;  %v13032_v2 = vpack.c.bf16 %v21646_v29, %v21646_v29 }
0x2503   : > { %v18503_v24 = vpop.eup %18502 }
0x2504   : > { %v12968_v9 = vmul.f32 1.442695, %v12958_v40  ;;  %v12980_v25 = vsel %vm1800_vm2, %v18503_v24, 0.0 }
0x2505   : > { %v12946_v44 = vpop.xlane.xlu0 %12945  ;;  %12981 = vadd.xlane.f32.xlu0 %v12980_v25 }
0x2506   : > { %18506 = vpow2.f32 %v12968_v9  ;;  %v12960_v19 = vsub.f32 %v12928_v0, %v12946_v44  ;;  %v13132_v44 = vsel %vm2294_vm3, %v13030_v10, 0 }
0x2508   : > { %v12972_v15 = vmul.f32 1.442695, %v12960_v19 }
0x2509   : > { %v12943_v21 = vpop.xlane.xlu1 %12942  ;;  %v12952_v11 = vpop.xlane.xlu0 %12951 }
0x250a   : > { %18508 = vpow2.f32 %v12972_v15  ;;  %v12959_v51 = vsub.f32 %v12927_v18, %v12943_v21  ;;  %v12962_v6 = vsub.f32 %v12930_v46, %v12952_v11 }
0x250b   : > { %v18505_v22 = vpop.eup %18504 }
0x250c   : > { %v12970_v8 = vmul.f32 1.442695, %v12959_v51  ;;  %v12976_v3 = vmul.f32 1.442695, %v12962_v6  ;;  %v12983_v62 = vsel %vm1800_vm2, %v18505_v22, 0.0  ;;  %v13178_v6 = vsel %vm2294_vm3, %v13031_v56, 0 }
0x250d   : > { %12984 = vadd.xlane.f32.xlu1 %v12983_v62 }
0x250e   : > { %18510 = vpow2.f32 %v12970_v8 }
0x250f   : > { %18512 = vpow2.f32 %v12976_v3 }
0x2511   : > { %v12949_v38 = vpop.xlane.xlu1 %12948 }
0x2512   : > { %v12961_v30 = vsub.f32 %v12929_v14, %v12949_v38 }
0x2513   : > { %v18507_v41 = vpop.eup %18506 }
0x2514   : > { %v12974_v20 = vmul.f32 1.442695, %v12961_v30  ;;  %v12986_v0 = vsel %vm1800_vm2, %v18507_v41, 0.0  ;;  %v13224_v30 = vsel %vm2294_vm3, %v13032_v2, 0 }
0x2515   : > { %12987 = vadd.xlane.f32.xlu0 %v12986_v0 }
0x2516   : > { %18514 = vpow2.f32 %v12974_v20  ;;  %v12529_v20 = vadd.f32 %v21630_v4, %v21768_v17 }
0x2517   : > { %v18509_v42 = vpop.eup %18508 }
0x2518   : > { %v12992_v18 = vsel %vm1800_vm2, %v18509_v42, 0.0 }
0x2519   : > { %12993 = vadd.xlane.f32.xlu0 %v12992_v18  ;;  %v12955_v46 = vpop.xlane.xlu1 %12954  ;;  %v13033_v18 = vpack.c.bf16 %v12529_v20, %v12529_v20 }
0x251a   : > { %v12963_v1 = vsub.f32 %v12931_v35, %v12955_v46 }
0x251b   : > { %v18511_v27 = vpop.eup %18510 }
0x251c   : > { %v21796_v59 = vpop.eup %18512  ;;  %v12978_v12 = vmul.f32 1.442695, %v12963_v1  ;;  %v12989_v58 = vsel %vm1800_vm2, %v18511_v27, 0.0 }
0x251d   : > { %v12998_v14 = vsel %vm1800_vm2, %v21796_v59, 0.0  ;;  %12990 = vadd.xlane.f32.xlu1 %v12989_v58 }
0x251e   : > { %18516 = vpow2.f32 %v12978_v12  ;;  %12999 = vadd.xlane.f32.xlu0 %v12998_v14  ;;  %v13270_v14 = vsel %vm2294_vm3, %v13033_v18, 0 }
0x2523   : > { %v21801_v47 = vpop.eup %18514 }
0x2524   : > { %v12995_v26 = vsel %vm1800_vm2, %v21801_v47, 0.0 }
0x2525   : > { %12996 = vadd.xlane.f32.xlu1 %v12995_v26 }
0x252b   : > { %v21805_v60 = vpop.eup %18516 }
0x252c   : > { %v13001_v35 = vsel %vm1800_vm2, %v21805_v60, 0.0 }
0x252d   : > { %13002 = vadd.xlane.f32.xlu1 %v13001_v35 }
0x258e   : > { %v12982_v55 = vpop.xlane.xlu0 %12981 }
0x258f   : > { %18518 = vrcp.f32 %v12982_v55 }
0x2596   : > { %v12985_v50 = vpop.xlane.xlu1 %12984 }
0x2597   : > { %18520 = vrcp.f32 %v12985_v50 }
0x259c   : > { %v18519_v48 = vpop.eup %18518 }
0x259d   : > { %v13012_v40 = vmul.f32 %v18519_v48, %v18503_v24 }
0x259e   : > { %v12988_v9 = vpop.xlane.xlu0 %12987 }
0x259f   : > { %v13020_v25 = vpack.c.bf16 %v13012_v40, %v13012_v40  ;;  %18522 = vrcp.f32 %v12988_v9 }
0x25a1   : > { %17722 = vmatmul.mubr.msk.bf16.vlgmr.msra.gmra.mxu1 %vm1800_vm2, %v13020_v25 }
0x25a2   : > { %17732 = vmatpush3.bf16.msra.mxu1 %v13132_v44  ;;  %v12994_v19 = vpop.xlane.xlu0 %12993  ;;  %17733 = vmatprep.mubr.msk.bf16.mxu1 %vm18647_vm1, %v18646_v31 }
0x25a3   : > { %18524 = vrcp.f32 %v12994_v19  ;;  %17743 = vmatprep.subr.bf16.mxu1 %v18646_v31 }
0x25a4   : > { %v18521_v15 = vpop.eup %18520 }
0x25a5   : > { %v13013_v24 = vmul.f32 %v18521_v15, %v18505_v22 }
0x25a6   : > { %v12991_v21 = vpop.xlane.xlu1 %12990 }
0x25a7   : > { %v13021_v11 = vpack.c.bf16 %v13013_v24, %v13013_v24  ;;  %18526 = vrcp.f32 %v12991_v21  ;;  %v13000_v51 = vpop.xlane.xlu0 %12999 }
0x25a8   : > { %18528 = vrcp.f32 %v13000_v51 }
0x25a9   : > { %17728 = vmatmul.mubr.msk.bf16.vlgmr.msra.gmra.mxu0 %vm1800_vm2, %v13021_v11 }
0x25aa   : > { %17738 = vmatpush3.bf16.msra.mxu0 %v13178_v6  ;;  %17739 = vmatprep.mubr.msk.bf16.mxu0 %vm18647_vm1, %v18646_v31 }
0x25ab   : > { %17749 = vmatprep.subr.bf16.mxu0 %v18646_v31 }
0x25ac   : > { %v18523_v8 = vpop.eup %18522 }
0x25ad   : > { %v13014_v22 = vmul.f32 %v18523_v8, %v18507_v41  ;;  %v13034_v41 = vpack.c.bf16 %v21643_v16, %v21643_v16 }
0x25ae   : > { %v12997_v3 = vpop.xlane.xlu1 %12996 }
0x25af   : > { %v13022_v62 = vpack.c.bf16 %v13014_v22, %v13014_v22  ;;  %18530 = vrcp.f32 %v12997_v3  ;;  %v13316_v17 = vsel %vm2294_vm3, %v13034_v41, 0 }
0x25b0   : > { %v18525_v38 = vpop.eup %18524 }
0x25b1   : > { %17734 = vmatmul.mubr.msk.bf16.vlgmr.msra.gmra.mxu1 %vm1800_vm2, %v13022_v62  ;;  %v13016_v0 = vmul.f32 %v18525_v38, %v18509_v42 }
0x25b2   : > { %17744 = vmatpush3.bf16.msra.mxu1 %v13224_v30  ;;  %17745 = vmatprep.mubr.msk.bf16.mxu1 %vm18647_vm1, %v18646_v31 }
0x25b3   : > { %17755 = vmatprep.subr.bf16.mxu1 %v18646_v31  ;;  %v13024_v12 = vpack.c.bf16 %v13016_v0, %v13016_v0 }
0x25b4   : > { %v18527_v29 = vpop.eup %18526 }
0x25b5   : > { %v13015_v46 = vmul.f32 %v18527_v29, %v18511_v27  ;;  %v18529_v4 = vpop.eup %18528  ;;  %v13035_v27 = vpack.c.bf16 %v21649_v5, %v21649_v5  ;;  %v15452_v5 = vld [vmem:[%s22257_s13 + $0x1c] sm:$0xf] }
0x25b6   : > { %v13003_v1 = vpop.xlane.xlu1 %13002  ;;  %v13018_v42 = vmul.f32 %v18529_v4, %v21796_v59 }
0x25b7   : > { %v13023_v58 = vpack.c.bf16 %v13015_v46, %v13015_v46  ;;  %18532 = vrcp.f32 %v13003_v1  ;;  %v13362_v50 = vsel %vm2294_vm3, %v13035_v27, 0 }
0x25b8   : > { %v13026_v35 = vpack.c.bf16 %v13018_v42, %v13018_v42 }
0x25b9   : > { %17740 = vmatmul.mubr.msk.bf16.vlgmr.msra.gmra.mxu0 %vm1800_vm2, %v13023_v58  ;;  %17746 = vmatmul.mubr.msk.bf16.vlgmr.msra.gmra.mxu1 %vm1800_vm2, %v13024_v12 }
0x25ba   : > { %17750 = vmatpush3.bf16.msra.mxu0 %v13270_v14  ;;  %17756 = vmatpush3.bf16.msra.mxu1 %v13316_v17 }
0x25bb   : > { %17751 = vmatprep.mubr.msk.bf16.mxu0 %vm18647_vm1, %v18646_v31  ;;  %17757 = vmatprep.mubr.msk.bf16.mxu1 %vm18647_vm1, %v18646_v31 }
0x25bc   : > { %v18531_v16 = vpop.eup %18530  ;;  %17761 = vmatprep.subr.bf16.mxu0 %v18646_v31  ;;  %17872 = vmatprep.subr.msk.bf16.mxu1 %vm2294_vm3, %v15452_v5 }
0x25bd   : > { %v13017_v26 = vmul.f32 %v18531_v16, %v21801_v47  ;;  %v13447_v47 = vsel %vm2294_vm3, %v15452_v5, 0 }
0x25bf   : > { %v13025_v55 = vpack.c.bf16 %v13017_v26, %v13017_v26 }
0x25c1   : > { %17752 = vmatmul.mubr.msk.bf16.vlgmr.msra.gmra.mxu0 %vm1800_vm2, %v13025_v55  ;;  %17758 = vmatmul.mubr.msk.bf16.vlgmr.msra.gmra.mxu1 %vm1800_vm2, %v13026_v35 }
0x25c2   : > { %17762 = vmatpush3.bf16.msra.mxu0 %v13362_v50  ;;  %17763 = vmatprep.mubr.msk.bf16.mxu0 %vm18647_vm1, %v18646_v31 }
0x25c3   : > { %17768 = vmatpush3.bf16.msra.mxu1 %v13447_v47 }
0x25c4   : > { %v18533_v59 = vpop.eup %18532 }
0x25c5   : > { %v13019_v48 = vmul.f32 %v18533_v59, %v21805_v60  ;;  %v10659_v59 = vadd.f32 %v21334_v49, %v21017_v13 }
0x25c7   : > { %v13027_v10 = vpack.c.bf16 %v13019_v48, %v13019_v48  ;;  %v12087_v5 = vadd.f32 %v21663_v52, %v10659_v59 }
0x25c9   : > { %17764 = vmatmul.mubr.msk.bf16.vlgmr.msra.gmra.mxu0 %vm1800_vm2, %v13027_v10 }
0x2661   : > { %v13076_v40 = vpop.f32.mrf.mxu1 }
0x2663   : > { %v17723_v9 = vpop.f32.mrf.mxu1 }
0x2665   : > { %v13079_v25 = vpop.f32.mrf.mxu1 }
0x2666   : > { %v15462_v25 = vld [vmem:[%s22258_s14 + $0x1] ss:$0 sm:$0xff] }
0x2667   : > { %v17724_v44 = vpop.f32.mrf.mxu1 }
0x2669   : > { %v13122_v19 = vpop.f32.mrf.mxu0 }
0x266a   : > { %v15603_v15 = vpack.c.bf16 %v13122_v19, %v13076_v40 }
0x266b   : > { %v17729_v56 = vpop.f32.mrf.mxu0 }
0x266c   : > { %17769 = vmatprep.mubr.msk.bf16.mxu1 %vm1800_vm2, %v15603_v15 }
0x266d   : > { %v13125_v60 = vpop.f32.mrf.mxu0 }
0x266f   : > { %v17730_v24 = vpop.f32.mrf.mxu0 }
0x2671   : > { %v13168_v21 = vpop.f32.mrf.mxu1 }
0x2673   : > { %v17735_v11 = vpop.f32.mrf.mxu1 }
0x2675   : > { %v13171_v51 = vpop.f32.mrf.mxu1 }
0x2677   : > { %v17736_v6 = vpop.f32.mrf.mxu1 }
0x2679   : > { %v13214_v8 = vpop.f32.mrf.mxu0  ;;  %v13260_v2 = vpop.f32.mrf.mxu1 }
0x267a   : > { %v15604_v22 = vpack.c.bf16 %v13214_v8, %v13168_v21 }
0x267b   : > { %v17741_v3 = vpop.f32.mrf.mxu0  ;;  %v17747_v62 = vpop.f32.mrf.mxu1 }
0x267c   : > { %17770 = vmatmul.mubr.msk.bf16.vlgmr.msra.gmra.mxu1 %vm1800_vm2, %v15604_v22 }
0x267d   : > { %v13217_v38 = vpop.f32.mrf.mxu0  ;;  %v13263_v30 = vpop.f32.mrf.mxu1 }
0x267f   : > { %v17742_v20 = vpop.f32.mrf.mxu0  ;;  %v17748_v0 = vpop.f32.mrf.mxu1 }
0x2681   : > { %v13306_v29 = vpop.f32.mrf.mxu0  ;;  %v13352_v41 = vpop.f32.mrf.mxu1 }
0x2682   : > { %v15605_v18 = vpack.c.bf16 %v13306_v29, %v13260_v2 }
0x2683   : > { %v17753_v46 = vpop.f32.mrf.mxu0  ;;  %v17759_v1 = vpop.f32.mrf.mxu1 }
0x2684   : > { %17773 = vmatprep.mubr.msk.bf16.mxu1 %vm1800_vm2, %v15605_v18 }
0x2685   : > { %v13309_v12 = vpop.f32.mrf.mxu0  ;;  %v13355_v58 = vpop.f32.mrf.mxu1 }
0x2687   : > { %v17754_v4 = vpop.f32.mrf.mxu0  ;;  %v17760_v17 = vpop.f32.mrf.mxu1 }
0x2689   : > { %v13398_v14 = vpop.f32.mrf.mxu0 }
0x268a   : > { %v15606_v42 = vpack.c.bf16 %v13398_v14, %v13352_v41 }
0x268b   : > { %v17765_v16 = vpop.f32.mrf.mxu0 }
0x268c   : > { %17774 = vmatmul.mubr.msk.bf16.gmra.mxu1 %vm1800_vm2, %v15606_v42 }
0x268d   : > { %v13401_v27 = vpop.f32.mrf.mxu0 }
0x268f   : > { %v17766_v26 = vpop.f32.mrf.mxu0 }
0x273c   : > { %v17771_v35 = vpop.f32.mrf.mxu1 }
0x273d   : > { %v13516_v55 = vadd.f32 %v17771_v35, %v21655_v33 }
0x273e   : > { %v13483_v50 = vpop.f32.mrf.mxu1 }
0x273f   : > { %v13514_v48 = vadd.f32 %v13483_v50, %v21659_v45  ;;  %v13524_v47 = vadd.f32 %v13516_v55, %v20500_v36 }
0x2740   : > { %v17772_v10 = vpop.f32.mrf.mxu1 }
0x2741   : > { %v13522_v40 = vadd.f32 %v13514_v48, %v20497_v54  ;;  %v13517_v9 = vadd.f32 %v17772_v10, %v21661_v7  ;;  %v21876_v13 = vadd.f32 %v15462_v25, %v13524_v47 }
0x2742   : > { %v13486_v33 = vpop.f32.mrf.mxu1 }
0x2743   : > { %v21874_v44 = vadd.f32 %v15462_v25, %v13522_v40  ;;  %v13515_v19 = vadd.f32 %v13486_v33, %v12087_v5  ;;  %v13525_v49 = vadd.f32 %v13517_v9, %v20508_v37  ;;  %v13552_v52 = vmul.f32 %v18901_v32, %v21876_v13  ;;  %v18150_v5 = vld [vmem:[%s22261_s17 + $0x78] sm:$0xff]  }
0x2744   : > { %17777 = vmatprep.subr.bf16.mxu0 %v18150_v5 }
0x2745   : > { %v13523_v45 = vadd.f32 %v13515_v19, %v20505_v28  ;;  %v13550_v36 = vmul.f32 %v18901_v32, %v21874_v44  ;;  %v21884_v7 = vadd.f32 %v15462_v25, %v13525_v49  ;;  %17778 = vmatpush3.bf16.msra.mxu0 %v18150_v5 }
0x2747   : > { %v21882_v54 = vadd.f32 %v15462_v25, %v13523_v45  ;;  %13558 = vadd.xlane.f32.xlu0 %v13550_v36  ;;  %v13553_v28 = vmul.f32 %v18901_v32, %v21884_v7  ;;  %v18151_v45 = vld [vmem:[%s22261_s17 + $0x70] sm:$0xff]  }
0x2748   : > { %17779 = vmatprep.subr.bf16.mxu0 %v18151_v45 }
0x2749   : > { %v13551_v15 = vmul.f32 %v18901_v32, %v21882_v54  ;;  %17780 = vmatpush3.bf16.msra.mxu0 %v18151_v45 }
0x274b   : > { %13562 = vadd.xlane.f32.xlu0 %v13552_v52  ;;  %13560 = vadd.xlane.f32.xlu1 %v13551_v15 }
0x274c   : > { %v17775_v56 = vpop.f32.mrf.mxu1 }
0x274d   : > { %v13520_v37 = vadd.f32 %v17775_v56, %v21669_v39 }
0x274e   : > { %v13499_v60 = vpop.f32.mrf.mxu1 }
0x274f   : > { %v13518_v24 = vadd.f32 %v13499_v60, %v21673_v23  ;;  %13564 = vadd.xlane.f32.xlu1 %v13553_v28  ;;  %v13528_v11 = vadd.f32 %v13520_v37, %v20520_v53  ;;  %v18152_v60 = vld [vmem:[%s22261_s17 + $0x68] sm:$0xff]  }
0x2750   : > { %v17776_v21 = vpop.f32.mrf.mxu1  ;;  %17781 = vmatprep.subr.bf16.mxu0 %v18152_v60 }
0x2751   : > { %v13526_v51 = vadd.f32 %v13518_v24, %v20517_v57  ;;  %v13521_v6 = vadd.f32 %v17776_v21, %v21677_v43  ;;  %v21900_v39 = vadd.f32 %v15462_v25, %v13528_v11  ;;  %17782 = vmatpush3.bf16.msra.mxu0 %v18152_v60  ;;  %v18153_v11 = vld [vmem:[%s22261_s17 + $0x60] sm:$0xff]  }
0x2752   : > { %v13502_v8 = vpop.f32.mrf.mxu1  ;;  %17783 = vmatprep.subr.bf16.mxu0 %v18153_v11 }
0x2753   : > { %v21897_v2 = vadd.f32 %v15462_v25, %v13526_v51  ;;  %v13519_v22 = vadd.f32 %v13502_v8, %v21679_v34  ;;  %v13529_v3 = vadd.f32 %v13521_v6, %v20528_v61  ;;  %v13556_v53 = vmul.f32 %v18901_v32, %v21900_v39  ;;  %v18154_v51 = vld [vmem:[%s22261_s17 + $0x58] sm:$0xff]   ;;  %v18155_v6 = vld [vmem:[%s22261_s17 + $0x50] sm:$0xff]   ;;  %v18156_v8 = vld [vmem:[%s22261_s17 + $0x48] sm:$0xff]  }
0x2755   : > { %v13527_v62 = vadd.f32 %v13519_v22, %v20525_v63  ;;  %v13554_v23 = vmul.f32 %v18901_v32, %v21897_v2  ;;  %v21908_v57 = vadd.f32 %v15462_v25, %v13529_v3  ;;  %17784 = vmatpush3.bf16.msra.mxu0 %v18153_v11  ;;  %v18157_v22 = vld [vmem:[%s22261_s17 + $0x40] sm:$0xff]  }
0x2756   : > { %17785 = vmatprep.subr.bf16.mxu0 %v18154_v51 }
0x2757   : > { %v21906_v38 = vadd.f32 %v15462_v25, %v13527_v62  ;;  %13566 = vadd.xlane.f32.xlu0 %v13554_v23  ;;  %v13557_v61 = vmul.f32 %v18901_v32, %v21908_v57 }
0x2759   : > { %v13555_v43 = vmul.f32 %v18901_v32, %v21906_v38  ;;  %17786 = vmatpush3.bf16.msra.mxu0 %v18154_v51 }
0x275a   : > { %17787 = vmatprep.subr.bf16.mxu0 %v18155_v6 }
0x275b   : > { %13570 = vadd.xlane.f32.xlu0 %v13556_v53  ;;  %13568 = vadd.xlane.f32.xlu1 %v13555_v43 }
0x275d   : > { %17788 = vmatpush3.bf16.msra.mxu0 %v18155_v6 }
0x275e   : > { %17789 = vmatprep.subr.bf16.mxu0 %v18156_v8 }
0x275f   : > { %13572 = vadd.xlane.f32.xlu1 %v13557_v61 }
0x2761   : > { %17790 = vmatpush3.bf16.msra.mxu0 %v18156_v8 }
0x2762   : > { %17791 = vmatprep.subr.bf16.mxu0 %v18157_v22 }
0x2765   : > { %17792 = vmatpush3.bf16.msra.mxu0 %v18157_v22 }
0x2766   : > { %17825 = vmatprep.subr.bf16.mxu0 %v18646_v31 }
0x27d0   : > { %v13559_v63 = vpop.xlane.xlu0 %13558 }
0x27d1   : > { %v13574_v34 = vmul.f32 0.03125, %v13559_v63 }
0x27d3   : > { %v13582_v30 = vsub.f32 %v21874_v44, %v13574_v34 }
0x27d4   : > { %v13563_v20 = vpop.xlane.xlu0 %13562  ;;  %v13561_v0 = vpop.xlane.xlu1 %13560 }
0x27d5   : > { %v21918_v29 = vmul.f32 %v18901_v32, %v13582_v30  ;;  %v13576_v41 = vmul.f32 0.03125, %v13563_v20  ;;  %v13575_v18 = vmul.f32 0.03125, %v13561_v0 }
0x27d7   : > { %v13584_v46 = vsub.f32 %v21876_v13, %v13576_v41  ;;  %v13583_v1 = vsub.f32 %v21882_v54, %v13575_v18  ;;  %v13598_v12 = vmul.f32 %v21918_v29, %v21918_v29 }
0x27d8   : > { %v13565_v58 = vpop.xlane.xlu1 %13564 }
0x27d9   : > { %v21925_v4 = vmul.f32 %v18901_v32, %v13584_v46  ;;  %v21928_v17 = vmul.f32 %v18901_v32, %v13583_v1  ;;  %v13577_v14 = vmul.f32 0.03125, %v13565_v58  ;;  %13606 = vadd.xlane.f32.xlu0 %v13598_v12 }
0x27db   : > { %v13585_v42 = vsub.f32 %v21884_v7, %v13577_v14  ;;  %v13600_v16 = vmul.f32 %v21925_v4, %v21925_v4  ;;  %v13599_v27 = vmul.f32 %v21928_v17, %v21928_v17 }
0x27dd   : > { %v21936_v26 = vmul.f32 %v18901_v32, %v13585_v42  ;;  %13610 = vadd.xlane.f32.xlu0 %v13600_v16  ;;  %13608 = vadd.xlane.f32.xlu1 %v13599_v27 }
0x27df   : > { %v13601_v35 = vmul.f32 %v21936_v26, %v21936_v26 }
0x27e0   : > { %v13567_v55 = vpop.xlane.xlu0 %13566 }
0x27e1   : > { %v13578_v50 = vmul.f32 0.03125, %v13567_v55  ;;  %13612 = vadd.xlane.f32.xlu1 %v13601_v35  ;;  %v15465_v35 = vld [vmem:[%s22259_s15 + $0x1] ss:$0 sm:$0xff] }
0x27e3   : > { %v13586_v59 = vsub.f32 %v21897_v2, %v13578_v50 }
0x27e4   : > { %v13571_v48 = vpop.xlane.xlu0 %13570  ;;  %v13569_v10 = vpop.xlane.xlu1 %13568 }
0x27e5   : > { %v21945_v47 = vmul.f32 %v18901_v32, %v13586_v59  ;;  %v13580_v40 = vmul.f32 0.03125, %v13571_v48  ;;  %v13579_v9 = vmul.f32 0.03125, %v13569_v10 }
0x27e7   : > { %v13588_v25 = vsub.f32 %v21900_v39, %v13580_v40  ;;  %v13587_v33 = vsub.f32 %v21906_v38, %v13579_v9  ;;  %v13602_v19 = vmul.f32 %v21945_v47, %v21945_v47 }
0x27e8   : > { %v13573_v49 = vpop.xlane.xlu1 %13572 }
0x27e9   : > { %v21955_v36 = vmul.f32 %v18901_v32, %v13588_v25  ;;  %v21958_v52 = vmul.f32 %v18901_v32, %v13587_v33  ;;  %v13581_v15 = vmul.f32 0.03125, %v13573_v49  ;;  %13614 = vadd.xlane.f32.xlu0 %v13602_v19 }
0x27eb   : > { %v13589_v56 = vsub.f32 %v21908_v57, %v13581_v15  ;;  %v13604_v37 = vmul.f32 %v21955_v36, %v21955_v36  ;;  %v13603_v28 = vmul.f32 %v21958_v52, %v21958_v52 }
0x27ed   : > { %v21969_v24 = vmul.f32 %v18901_v32, %v13589_v56  ;;  %13618 = vadd.xlane.f32.xlu0 %v13604_v37  ;;  %13616 = vadd.xlane.f32.xlu1 %v13603_v28 }
0x27ef   : > { %v13605_v21 = vmul.f32 %v21969_v24, %v21969_v24 }
0x27f1   : > { %13620 = vadd.xlane.f32.xlu1 %v13605_v21 }
0x2862   : > { %v13607_v3 = vpop.xlane.xlu0 %13606 }
0x2863   : > { %v13622_v62 = vmul.f32 0.03125, %v13607_v3 }
0x2865   : > { %v13630_v23 = vadd.f32 1e-05, %v13622_v62 }
0x2866   : > { %v13611_v53 = vpop.xlane.xlu0 %13610  ;;  %v13609_v43 = vpop.xlane.xlu1 %13608 }
0x2867   : > { %18534 = vrsqrt.f32 %v13630_v23  ;;  %v13624_v61 = vmul.f32 0.03125, %v13611_v53  ;;  %v13623_v63 = vmul.f32 0.03125, %v13609_v43 }
0x2869   : > { %v13632_v34 = vadd.f32 1e-05, %v13624_v61  ;;  %v13631_v30 = vadd.f32 1e-05, %v13623_v63 }
0x286a   : > { %v13613_v20 = vpop.xlane.xlu1 %13612 }
0x286b   : > { %18536 = vrsqrt.f32 %v13632_v34  ;;  %v13625_v0 = vmul.f32 0.03125, %v13613_v20 }
0x286c   : > { %18538 = vrsqrt.f32 %v13631_v30 }
0x286d   : > { %v13633_v41 = vadd.f32 1e-05, %v13625_v0 }
0x286f   : > { %18540 = vrsqrt.f32 %v13633_v41  ;;  %v18161_v41 = vld [vmem:[%s22263_s19 + $0x60] sm:$0xff]  }
0x2872   : > { %v13615_v18 = vpop.xlane.xlu0 %13614 }
0x2873   : > { %v13626_v46 = vmul.f32 0.03125, %v13615_v18  ;;  %v18162_v18 = vld [vmem:[%s22263_s19 + $0x58] sm:$0xff]  }
0x2874   : > { %v18535_v1 = vpop.eup %18534 }
0x2875   : > { %v13634_v12 = vadd.f32 1e-05, %v13626_v46  ;;  %v13646_v42 = vmul.f32 %v18535_v1, %v21918_v29  ;;  %v15466_v29 = vld [vmem:[%s22260_s16 + $0x1] ss:$0 sm:$0xff]  ;;  %v18163_v46 = vld [vmem:[%s22263_s19 + $0x50] sm:$0xff]   ;;  %v18164_v1 = vld [vmem:[%s22263_s19 + $0x48] sm:$0xff]  }
0x2876   : > { %v13619_v58 = vpop.xlane.xlu0 %13618  ;;  %v13617_v14 = vpop.xlane.xlu1 %13616 }
0x2877   : > { %18542 = vrsqrt.f32 %v13634_v12  ;;  %v13628_v16 = vmul.f32 0.03125, %v13619_v58  ;;  %v13627_v27 = vmul.f32 0.03125, %v13617_v14  ;;  %v13660_v9 = vmul.f32 %v15465_v35, %v13646_v42  ;;  %v18165_v12 = vld [vmem:[%s22263_s19 + $0x40] sm:$0xff]  }
0x2878   : > { %v18537_v55 = vpop.eup %18536  ;;  %v15496_v58 = vld [vmem:[%s22262_s18 + $0x1] ss:$0 sm:$0xff] }
0x2879   : > { %v18539_v50 = vpop.eup %18538  ;;  %v13648_v59 = vmul.f32 %v18537_v55, %v21925_v4  ;;  %v13636_v48 = vadd.f32 1e-05, %v13628_v16  ;;  %v13635_v10 = vadd.f32 1e-05, %v13627_v27  ;;  %v13674_v4 = vadd.f32 %v15466_v29, %v13660_v9 }
0x287a   : > { %v13621_v5 = vpop.xlane.xlu1 %13620  ;;  %v13647_v40 = vmul.f32 %v18539_v50, %v21928_v17 }
0x287b   : > { %18544 = vrsqrt.f32 %v13636_v48  ;;  %v13629_v25 = vmul.f32 0.03125, %v13621_v5  ;;  %v13662_v15 = vmul.f32 %v15465_v35, %v13648_v59 }
0x287c   : > { %v18541_v33 = vpop.eup %18540  ;;  %18546 = vrsqrt.f32 %v13635_v10  ;;  %v13661_v19 = vmul.f32 %v15465_v35, %v13647_v40 }
0x287d   : > { %v13649_v49 = vmul.f32 %v18541_v33, %v21936_v26  ;;  %v13637_v45 = vadd.f32 1e-05, %v13629_v25  ;;  %v13676_v17 = vadd.f32 %v15466_v29, %v13662_v15 }
0x287e   : > { %v13675_v56 = vadd.f32 %v15466_v29, %v13661_v19 }
0x287f   : > { %18548 = vrsqrt.f32 %v13637_v45  ;;  %v13663_v37 = vmul.f32 %v15465_v35, %v13649_v49 }
0x2880   : > { %v15607_v28 = vpack.c.bf16 %v13675_v56, %v13674_v4 }
0x2881   : > { %v13677_v60 = vadd.f32 %v15466_v29, %v13663_v37 }
0x2882   : > { %17793 = vmatprep.mubr.bf16.mxu0 %v15607_v28 }
0x2883   : > { %v15608_v21 = vpack.c.bf16 %v13677_v60, %v13676_v17 }
0x2884   : > { %v18543_v11 = vpop.eup %18542 }
0x2885   : > { %17794 = vmatmul.mubr.bf16.vlgmr.msra.gmra.mxu0 %v15608_v21  ;;  %v13650_v51 = vmul.f32 %v18543_v11, %v21945_v47 }
0x2887   : > { %v13664_v3 = vmul.f32 %v15465_v35, %v13650_v51 }
0x2888   : > { %v18545_v6 = vpop.eup %18544 }
0x2889   : > { %v18547_v8 = vpop.eup %18546  ;;  %v13652_v22 = vmul.f32 %v18545_v6, %v21955_v36  ;;  %v13678_v61 = vadd.f32 %v15466_v29, %v13664_v3  ;;  %v18158_v36 = vld [vmem:[%s22263_s19 + $0x78] sm:$0xff]  }
0x288a   : > { %v13651_v26 = vmul.f32 %v18547_v8, %v21958_v52  ;;  %17801 = vmatprep.subr.bf16.mxu1 %v18158_v36  ;;  %v18159_v52 = vld [vmem:[%s22263_s19 + $0x70] sm:$0xff]  }
0x288b   : > { %v13666_v43 = vmul.f32 %v15465_v35, %v13652_v22  ;;  %17802 = vmatpush3.bf16.msra.mxu1 %v18158_v36 }
0x288c   : > { %v18549_v62 = vpop.eup %18548  ;;  %v13665_v23 = vmul.f32 %v15465_v35, %v13651_v26  ;;  %17803 = vmatprep.subr.bf16.mxu1 %v18159_v52 }
0x288d   : > { %v13653_v53 = vmul.f32 %v18549_v62, %v21969_v24  ;;  %v13680_v20 = vadd.f32 %v15466_v29, %v13666_v43  ;;  %v18160_v24 = vld [vmem:[%s22263_s19 + $0x68] sm:$0xff]  }
0x288e   : > { %v13679_v63 = vadd.f32 %v15466_v29, %v13665_v23 }
0x288f   : > { %v13667_v34 = vmul.f32 %v15465_v35, %v13653_v53  ;;  %17804 = vmatpush3.bf16.msra.mxu1 %v18159_v52 }
0x2890   : > { %v15609_v30 = vpack.c.bf16 %v13679_v63, %v13678_v61  ;;  %17805 = vmatprep.subr.bf16.mxu1 %v18160_v24 }
0x2891   : > { %v13681_v0 = vadd.f32 %v15466_v29, %v13667_v34 }
0x2892   : > { %17797 = vmatprep.mubr.bf16.mxu0 %v15609_v30 }
0x2893   : > { %v15610_v47 = vpack.c.bf16 %v13681_v0, %v13680_v20  ;;  %17806 = vmatpush3.bf16.msra.mxu1 %v18160_v24 }
0x2894   : > { %17807 = vmatprep.subr.bf16.mxu1 %v18161_v41 }
0x2895   : > { %17798 = vmatmul.mubr.bf16.gmra.mxu0 %v15610_v47 }
0x2896   : > { %17841 = vmatprep.mubr.msk.bf16.mxu0 %vm18647_vm1, %v18646_v31 }
0x2897   : > { %17808 = vmatpush3.bf16.msra.mxu1 %v18161_v41 }
0x2898   : > { %17809 = vmatprep.subr.bf16.mxu1 %v18162_v18 }
0x289b   : > { %17810 = vmatpush3.bf16.msra.mxu1 %v18162_v18 }
0x289c   : > { %17811 = vmatprep.subr.bf16.mxu1 %v18163_v46 }
0x289f   : > { %17812 = vmatpush3.bf16.msra.mxu1 %v18163_v46 }
0x28a0   : > { %17813 = vmatprep.subr.bf16.mxu1 %v18164_v1 }
0x28a3   : > { %17814 = vmatpush3.bf16.msra.mxu1 %v18164_v1 }
0x28a4   : > { %17815 = vmatprep.subr.bf16.mxu1 %v18165_v12 }
0x28a7   : > { %17816 = vmatpush3.bf16.msra.mxu1 %v18165_v12 }
0x28a8   : > { %17845 = vmatprep.subr.bf16.mxu1 %v18646_v31 }
0x2945   : > { %v17795_v14 = vpop.f32.mrf.mxu0 }
0x2946   : > { %v22033_v42 = vadd.f32 %v17795_v14, %v15496_v58 }
0x2947   : > { %v13813_v16 = vpop.f32.mrf.mxu0 }
0x2948   : > { %v15499_v27 = vmul.f32 -1.702, %v22033_v42  ;;  %v13852_v35 = vadd.f32 %v15496_v58, %v13813_v16 }
0x2949   : > { %v17796_v55 = vpop.f32.mrf.mxu0 }
0x294a   : > { %v13880_v50 = vmul.f32 1.442695, %v15499_v27  ;;  %v15497_v59 = vmul.f32 -1.702, %v13852_v35  ;;  %v13855_v48 = vadd.f32 %v17796_v55, %v15496_v58 }
0x294b   : > { %v13816_v10 = vpop.f32.mrf.mxu0 }
0x294c   : > { %18550 = vpow2.f32 %v13880_v50  ;;  %v13876_v5 = vmul.f32 1.442695, %v15497_v59  ;;  %v15500_v40 = vmul.f32 -1.702, %v13855_v48  ;;  %v13853_v9 = vadd.f32 %v15496_v58, %v13816_v10 }
0x294e   : > { %18552 = vpow2.f32 %v13876_v5  ;;  %v13882_v25 = vmul.f32 1.442695, %v15500_v40  ;;  %v15498_v29 = vmul.f32 -1.702, %v13853_v9 }
0x2950   : > { %18554 = vpow2.f32 %v13882_v25  ;;  %v13878_v33 = vmul.f32 1.442695, %v15498_v29 }
0x2952   : > { %18556 = vpow2.f32 %v13878_v33 }
0x2955   : > { %v17799_v19 = vpop.f32.mrf.mxu0 }
0x2956   : > { %v13858_v49 = vadd.f32 %v17799_v19, %v15496_v58 }
0x2957   : > { %v13829_v45 = vpop.f32.mrf.mxu0 }
0x2958   : > { %v15503_v15 = vmul.f32 -1.702, %v13858_v49  ;;  %v13856_v4 = vadd.f32 %v15496_v58, %v13829_v45 }
0x2959   : > { %v18551_v56 = vpop.eup %18550  ;;  %v17800_v37 = vpop.f32.mrf.mxu0 }
0x295a   : > { %v13894_v28 = vadd.f32 1.0, %v18551_v56  ;;  %v13888_v17 = vmul.f32 1.442695, %v15503_v15  ;;  %v15501_v60 = vmul.f32 -1.702, %v13856_v4  ;;  %v13859_v21 = vadd.f32 %v17800_v37, %v15496_v58 }
0x295b   : > { %v18553_v11 = vpop.eup %18552  ;;  %v13832_v51 = vpop.f32.mrf.mxu0  ;;  %v15534_v15 = vld [vmem:[%s22264_s20 + $0x1] ss:$0 sm:$0xff] }
0x295c   : > { %18558 = vrcp.f32 %v13894_v28  ;;  %v13892_v6 = vadd.f32 1.0, %v18553_v11  ;;  %v13884_v8 = vmul.f32 1.442695, %v15501_v60  ;;  %v15504_v22 = vmul.f32 -1.702, %v13859_v21 }
0x295d   : > { %v18555_v26 = vpop.eup %18554  ;;  %18560 = vpow2.f32 %v13888_v17  ;;  %v13857_v3 = vadd.f32 %v15496_v58, %v13832_v51 }
0x295e   : > { %18562 = vrcp.f32 %v13892_v6  ;;  %v13895_v62 = vadd.f32 1.0, %v18555_v26  ;;  %v13890_v23 = vmul.f32 1.442695, %v15504_v22 }
0x295f   : > { %v18557_v53 = vpop.eup %18556  ;;  %18564 = vpow2.f32 %v13884_v8  ;;  %v15502_v43 = vmul.f32 -1.702, %v13857_v3 }
0x2960   : > { %18566 = vrcp.f32 %v13895_v62  ;;  %v13893_v61 = vadd.f32 1.0, %v18557_v53 }
0x2961   : > { %18568 = vpow2.f32 %v13890_v23  ;;  %v13886_v63 = vmul.f32 1.442695, %v15502_v43 }
0x2962   : > { %18570 = vrcp.f32 %v13893_v61 }
0x2963   : > { %18572 = vpow2.f32 %v13886_v63 }
0x2969   : > { %v18559_v34 = vpop.eup %18558 }
0x296a   : > { %v18561_v30 = vpop.eup %18560  ;;  %v13918_v14 = vmul.f32 %v18559_v34, %v22033_v42 }
0x296b   : > { %v18563_v20 = vpop.eup %18562  ;;  %v13898_v24 = vadd.f32 1.0, %v18561_v30 }
0x296c   : > { %v18565_v0 = vpop.eup %18564  ;;  %v13916_v12 = vmul.f32 %v18563_v20, %v13852_v35 }
0x296d   : > { %v18567_v47 = vpop.eup %18566  ;;  %v13896_v36 = vadd.f32 1.0, %v18565_v0 }
0x296e   : > { %v18569_v52 = vpop.eup %18568  ;;  %v13919_v18 = vmul.f32 %v18567_v47, %v13855_v48 }
0x296f   : > { %v18571_v41 = vpop.eup %18570  ;;  %v13899_v46 = vadd.f32 1.0, %v18569_v52  ;;  %18574 = vrcp.f32 %v13896_v36 }
0x2970   : > { %v18573_v1 = vpop.eup %18572  ;;  %v13917_v58 = vmul.f32 %v18571_v41, %v13853_v9  ;;  %v15612_v55 = vpack.c.bf16 %v13919_v18, %v13918_v14 }
0x2971   : > { %18576 = vrcp.f32 %v13899_v46  ;;  %v13897_v16 = vadd.f32 1.0, %v18573_v1 }
0x2972   : > { %18578 = vrcp.f32 %v13898_v24  ;;  %v15611_v27 = vpack.c.bf16 %v13917_v58, %v13916_v12 }
0x2973   : > { %18580 = vrcp.f32 %v13897_v16 }
0x2974   : > { %17817 = vmatprep.mubr.bf16.mxu1 %v15611_v27 }
0x2975   : > { %17818 = vmatmul.mubr.bf16.vlgmr.msra.gmra.mxu1 %v15612_v55 }
0x297c   : > { %v18575_v50 = vpop.eup %18574 }
0x297d   : > { %v13920_v40 = vmul.f32 %v18575_v50, %v13856_v4 }
0x297e   : > { %v18577_v59 = vpop.eup %18576 }
0x297f   : > { %v18579_v10 = vpop.eup %18578  ;;  %v13923_v48 = vmul.f32 %v18577_v59, %v13859_v21 }
0x2980   : > { %v18581_v5 = vpop.eup %18580  ;;  %v13922_v35 = vmul.f32 %v18579_v10, %v13858_v49 }
0x2981   : > { %v13921_v25 = vmul.f32 %v18581_v5, %v13857_v3 }
0x2982   : > { %v15614_v29 = vpack.c.bf16 %v13923_v48, %v13922_v35 }
0x2983   : > { %v15613_v9 = vpack.c.bf16 %v13921_v25, %v13920_v40 }
0x2985   : > { %17821 = vmatprep.mubr.bf16.mxu1 %v15613_v9 }
0x2986   : > { %17822 = vmatmul.mubr.bf16.gmra.mxu1 %v15614_v29 }
0x2987   : > { %17861 = vmatprep.mubr.msk.bf16.mxu1 %vm18647_vm1, %v18646_v31 }
0x2a35   : > { %v17819_v42 = vpop.f32.mrf.mxu1 }
0x2a36   : > { %v14096_v37 = vadd.f32 %v17819_v42, %v15534_v15 }
0x2a37   : > { %v14055_v33 = vpop.f32.mrf.mxu1 }
0x2a38   : > { %v14094_v49 = vadd.f32 %v15534_v15, %v14055_v33  ;;  %v14104_v60 = vadd.f32 %v14096_v37, %v21876_v13 }
0x2a39   : > { %v17820_v19 = vpop.f32.mrf.mxu1 }
0x2a3a   : > { %v14097_v28 = vadd.f32 %v17820_v19, %v15534_v15  ;;  %v14102_v11 = vadd.f32 %v14094_v49, %v21874_v44  ;;  %v14114_v3 = vmul.f32 %v18901_v32, %v14104_v60 }
0x2a3b   : > { %v14058_v45 = vpop.f32.mrf.mxu1 }
0x2a3c   : > { %v14095_v56 = vadd.f32 %v15534_v15, %v14058_v45  ;;  %v14105_v51 = vadd.f32 %v14097_v28, %v21884_v7  ;;  %v14112_v62 = vmul.f32 %v18901_v32, %v14102_v11  ;;  %v14131_v30 = vrot.slane %v14114_v3, 6 }
0x2a3e   : > { %v14103_v4 = vadd.f32 %v14095_v56, %v21882_v54  ;;  %v14115_v13 = vmul.f32 %v18901_v32, %v14105_v51 }
0x2a40   : > { %v14113_v17 = vmul.f32 %v18901_v32, %v14103_v4  ;;  %v14134_v36 = vrot.slane %v14115_v13, 5 }
0x2a42   : > { %v14128_v22 = vrot.slane %v14113_v17, 7 }
0x2a44   : > { %v14130_v7 = vsel %vm14129_vm5, %v14128_v22, %v14112_v62 }
0x2a45   : > { %v14133_v0 = vsel %vm14132_vm6, %v14131_v30, %v14130_v7  ;;  %v18166_v30 = vld [vmem:[%s22267_s23 + $0x38] sm:$0xff]  }
0x2a46   : > { %v17823_v21 = vpop.f32.mrf.mxu1  ;;  %17826 = vmatpush3.bf16.msra.mxu0 %v18166_v30 }
0x2a47   : > { %v14100_v6 = vadd.f32 %v17823_v21, %v15534_v15  ;;  %17827 = vmatprep.subr.bf16.mxu0 %v18646_v31 }
0x2a48   : > { %v14071_v8 = vpop.f32.mrf.mxu1 }
0x2a49   : > { %v14098_v26 = vadd.f32 %v15534_v15, %v14071_v8  ;;  %v14108_v44 = vadd.f32 %v14100_v6, %v21900_v39 }
0x2a4a   : > { %v17824_v54 = vpop.f32.mrf.mxu1 }
0x2a4b   : > { %v14106_v23 = vadd.f32 %v14098_v26, %v21897_v2  ;;  %v14101_v53 = vadd.f32 %v17824_v54, %v15534_v15  ;;  %v14118_v2 = vmul.f32 %v18901_v32, %v14108_v44 }
0x2a4c   : > { %v14074_v43 = vpop.f32.mrf.mxu1 }
0x2a4d   : > { %v14116_v61 = vmul.f32 %v18901_v32, %v14106_v23  ;;  %v14109_v63 = vadd.f32 %v14101_v53, %v21908_v57  ;;  %v14099_v34 = vadd.f32 %v15534_v15, %v14074_v43  ;;  %v14136_v57 = vsel %vm14135_vm7, %v14134_v36, %v14133_v0  ;;  %v18168_v0 = vld [vmem:[%s22267_s23 + $0x28] sm:$0xff]   ;;  %v18171_v36 = vld [vmem:[%s22267_s23 + $0x10] sm:$0xff]  }
0x2a4e   : > { %v14143_v41 = vrot.slane %v14118_v2, 2  ;;  %v18169_v2 = vld [vmem:[%s22267_s23 + $0x20] sm:$0xff]  }
0x2a4f   : > { %v14107_v20 = vadd.f32 %v14099_v34, %v21906_v38  ;;  %v14137_v47 = vrot.slane %v14116_v61, 4  ;;  %v14119_v39 = vmul.f32 %v18901_v32, %v14109_v63 }
0x2a51   : > { %v14117_v52 = vmul.f32 %v18901_v32, %v14107_v20  ;;  %v14139_v38 = vsel %vm14138_vm8, %v14137_v47, %v14136_v57  ;;  %v14146_v18 = vrot.slane %v14119_v39, 1  ;;  %v18170_v47 = vld [vmem:[%s22267_s23 + $0x18] sm:$0xff]   ;;  %v18172_v39 = vld [vmem:[%s22267_s23 + $0x8] sm:$0xff]   ;;  %v18175_v57 = vld [vmem:[%s22268_s24 + $0x30] sm:$0xff]  }
0x2a53   : > { %v14140_v24 = vrot.slane %v14117_v52, 3  ;;  %v18173_v52 = vld [vmem:[%s22267_s23] sm:$0xff]  }
0x2a55   : > { %v14142_v46 = vsel %vm14141_vm9, %v14140_v24, %v14139_v38  ;;  %v18174_v24 = vld [vmem:[%s22268_s24 + $0x38] sm:$0xff]   ;;  %v18177_v38 = vld [vmem:[%s22268_s24 + $0x20] sm:$0xff]  }
0x2a56   : > { %v14145_v1 = vsel %vm14144_vm10, %v14143_v41, %v14142_v46  ;;  %17846 = vmatpush3.bf16.msra.mxu1 %v18174_v24  ;;  %v18176_v41 = vld [vmem:[%s22268_s24 + $0x28] sm:$0xff]   ;;  %v18179_v46 = vld [vmem:[%s22268_s24 + $0x10] sm:$0xff]  }
0x2a57   : > { %v14148_v12 = vsel %vm14147_vm11, %v14146_v18, %v14145_v1  ;;  %17847 = vmatprep.subr.bf16.mxu1 %v18646_v31  ;;  %v18178_v18 = vld [vmem:[%s22268_s24 + $0x18] sm:$0xff]   ;;  %v18180_v1 = vld [vmem:[%s22268_s24 + $0x8] sm:$0xff]  }
0x2a58   : > { %14150 = vadd.xlane.f32.xlu0 %v14148_v12 }
0x2a5a   : > { %17848 = vmatpush3.bf16.msra.mxu1 %v18175_v57 }
0x2a5b   : > { %17849 = vmatprep.subr.bf16.mxu1 %v18646_v31 }
0x2a5e   : > { %17850 = vmatpush3.bf16.msra.mxu1 %v18176_v41 }
0x2a5f   : > { %17851 = vmatprep.subr.bf16.mxu1 %v18646_v31 }
0x2a62   : > { %17852 = vmatpush3.bf16.msra.mxu1 %v18177_v38 }
0x2a63   : > { %17853 = vmatprep.subr.bf16.mxu1 %v18646_v31 }
0x2a66   : > { %17854 = vmatpush3.bf16.msra.mxu1 %v18178_v18 }
0x2a67   : > { %17855 = vmatprep.subr.bf16.mxu1 %v18646_v31 }
0x2a6a   : > { %17856 = vmatpush3.bf16.msra.mxu1 %v18179_v46 }
0x2a6b   : > { %17857 = vmatprep.subr.bf16.mxu1 %v18646_v31 }
0x2a6e   : > { %17858 = vmatpush3.bf16.msra.mxu1 %v18180_v1 }
0x2a6f   : > { %17859 = vmatprep.subr.bf16.mxu1 %v18646_v31 }
0x2ae1   : > { %v14151_v58 = vpop.xlane.xlu0 %14150 }
0x2ae2   : > { %v14152_v14 = vmul.f32 0.03125, %v14151_v58 }
0x2ae4   : > { %v14154_v16 = vrot.slane %v14152_v14, 1  ;;  %v14155_v27 = vrot.slane %v14152_v14, 2  ;;  %v14156_v55 = vrot.slane %v14152_v14, 3  ;;  %v14157_v50 = vrot.slane %v14152_v14, 4 }
0x2ae5   : > { %v14158_v59 = vrot.slane %v14152_v14, 5  ;;  %v14159_v10 = vrot.slane %v14152_v14, 6  ;;  %v14160_v5 = vrot.slane %v14152_v14, 7  ;;  %v14169_v48 = vsub.f32 %v14102_v11, %v14152_v14 }
0x2ae6   : > { %v14170_v40 = vsub.f32 %v14103_v4, %v14154_v16  ;;  %v14171_v25 = vsub.f32 %v14104_v60, %v14155_v27  ;;  %v14172_v35 = vsub.f32 %v14105_v51, %v14156_v55  ;;  %v14173_v9 = vsub.f32 %v14106_v23, %v14157_v50  ;;  %v15535_v27 = vld [vmem:[%s22265_s21] ss:$0 sm:$0xff] }
0x2ae7   : > { %v14174_v29 = vsub.f32 %v14107_v20, %v14158_v59  ;;  %v14175_v42 = vsub.f32 %v14108_v44, %v14159_v10  ;;  %v14176_v33 = vsub.f32 %v14109_v63, %v14160_v5  ;;  %v22066_v19 = vmul.f32 %v18901_v32, %v14169_v48  ;;  %v18167_v20 = vld [vmem:[%s22267_s23 + $0x30] sm:$0xff]  }
0x2ae8   : > { %v22069_v45 = vmul.f32 %v18901_v32, %v14170_v40  ;;  %v22072_v15 = vmul.f32 %v18901_v32, %v14171_v25  ;;  %v22075_v56 = vmul.f32 %v18901_v32, %v14172_v35  ;;  %v22078_v4 = vmul.f32 %v18901_v32, %v14173_v9  ;;  %17828 = vmatpush3.bf16.msra.mxu0 %v18167_v20 }
0x2ae9   : > { %v22081_v37 = vmul.f32 %v18901_v32, %v14174_v29  ;;  %v22084_v49 = vmul.f32 %v18901_v32, %v14175_v42  ;;  %v22087_v28 = vmul.f32 %v18901_v32, %v14176_v33  ;;  %v14185_v51 = vmul.f32 %v22066_v19, %v22066_v19  ;;  %17829 = vmatprep.subr.bf16.mxu0 %v18646_v31 }
0x2aea   : > { %v14186_v17 = vmul.f32 %v22069_v45, %v22069_v45  ;;  %v14187_v60 = vmul.f32 %v22072_v15, %v22072_v15  ;;  %v14188_v21 = vmul.f32 %v22075_v56, %v22075_v56  ;;  %v14189_v11 = vmul.f32 %v22078_v4, %v22078_v4 }
0x2aeb   : > { %v14190_v6 = vmul.f32 %v22081_v37, %v22081_v37  ;;  %v14191_v22 = vmul.f32 %v22084_v49, %v22084_v49  ;;  %v14192_v26 = vmul.f32 %v22087_v28, %v22087_v28 }
0x2aec   : > { %v14201_v32 = vrot.slane %v14186_v17, 7  ;;  %v14203_v8 = vrot.slane %v14187_v60, 6  ;;  %v14205_v54 = vrot.slane %v14188_v21, 5  ;;  %v14207_v23 = vrot.slane %v14189_v11, 4  ;;  %17830 = vmatpush3.bf16.msra.mxu0 %v18168_v0 }
0x2aed   : > { %v14209_v13 = vrot.slane %v14190_v6, 3  ;;  %v14211_v43 = vrot.slane %v14191_v22, 2  ;;  %v14213_v61 = vrot.slane %v14192_v26, 1  ;;  %17831 = vmatprep.subr.bf16.mxu0 %v18646_v31 }
0x2aee   : > { %v14202_v3 = vsel %vm14129_vm5, %v14201_v32, %v14185_v51 }
0x2aef   : > { %v14204_v62 = vsel %vm14132_vm6, %v14203_v8, %v14202_v3 }
0x2af0   : > { %v14206_v53 = vsel %vm14135_vm7, %v14205_v54, %v14204_v62  ;;  %17832 = vmatpush3.bf16.msra.mxu0 %v18169_v2 }
0x2af1   : > { %v14208_v44 = vsel %vm14138_vm8, %v14207_v23, %v14206_v53  ;;  %17833 = vmatprep.subr.bf16.mxu0 %v18646_v31 }
0x2af2   : > { %v14210_v7 = vsel %vm14141_vm9, %v14209_v13, %v14208_v44 }
0x2af3   : > { %v14212_v63 = vsel %vm14144_vm10, %v14211_v43, %v14210_v7 }
0x2af4   : > { %v14214_v34 = vsel %vm14147_vm11, %v14213_v61, %v14212_v63  ;;  %17834 = vmatpush3.bf16.msra.mxu0 %v18170_v47 }
0x2af5   : > { %14216 = vadd.xlane.f32.xlu1 %v14214_v34  ;;  %17835 = vmatprep.subr.bf16.mxu0 %v18646_v31 }
0x2af8   : > { %17836 = vmatpush3.bf16.msra.mxu0 %v18171_v36 }
0x2af9   : > { %17837 = vmatprep.subr.bf16.mxu0 %v18646_v31 }
0x2afc   : > { %17838 = vmatpush3.bf16.msra.mxu0 %v18172_v39 }
0x2afd   : > { %17839 = vmatprep.subr.bf16.mxu0 %v18646_v31  ;;  %v15536_v31 = vld [vmem:[%s22266_s22] ss:$0 sm:$0xff] }
0x2b00   : > { %17840 = vmatpush3.bf16.msra.mxu0 %v18173_v52 }
0x2b7e   : > { %v14217_v12 = vpop.xlane.xlu1 %14216 }
0x2b7f   : > { %v14218_v58 = vmul.f32 0.03125, %v14217_v12 }
0x2b81   : > { %v14219_v14 = vadd.f32 1e-05, %v14218_v58 }
0x2b83   : > { %18582 = vrsqrt.f32 %v14219_v14 }
0x2b90   : > { %v18583_v16 = vpop.eup %18582 }
0x2b91   : > { %v14222_v55 = vrot.slane %v18583_v16, 1  ;;  %v14223_v50 = vrot.slane %v18583_v16, 2  ;;  %v14224_v59 = vrot.slane %v18583_v16, 3  ;;  %v14225_v10 = vrot.slane %v18583_v16, 4 }
0x2b92   : > { %v14226_v5 = vrot.slane %v18583_v16, 5  ;;  %v14227_v48 = vrot.slane %v18583_v16, 6  ;;  %v14228_v40 = vrot.slane %v18583_v16, 7  ;;  %v14237_v25 = vmul.f32 %v18583_v16, %v22066_v19 }
0x2b93   : > { %v14238_v35 = vmul.f32 %v14222_v55, %v22069_v45  ;;  %v14239_v9 = vmul.f32 %v14223_v50, %v22072_v15  ;;  %v14240_v29 = vmul.f32 %v14224_v59, %v22075_v56  ;;  %v14241_v42 = vmul.f32 %v14225_v10, %v22078_v4 }
0x2b94   : > { %v14242_v33 = vmul.f32 %v14226_v5, %v22081_v37  ;;  %v14243_v17 = vmul.f32 %v14227_v48, %v22084_v49  ;;  %v14244_v60 = vmul.f32 %v14228_v40, %v22087_v28  ;;  %v14251_v21 = vmul.f32 %v15535_v27, %v14237_v25  ;;  %v15545_v48 = vld [vmem:[%s22325_s25] ss:$0 sm:$0xff]  ;;  %s18590_s25 = scalar_lea.vmem %s18589_s28, 256 }
0x2b95   : > { %v14252_v19 = vmul.f32 %v15535_v27, %v14238_v35  ;;  %v14253_v11 = vmul.f32 %v15535_v27, %v14239_v9  ;;  %v14254_v51 = vmul.f32 %v15535_v27, %v14240_v29  ;;  %v14255_v6 = vmul.f32 %v15535_v27, %v14241_v42  ;;  %p18592_p1 = scmp.lt.s32.totalorder %s18590_s25, %s18584_s27 }
0x2b96   : > { %v14256_v32 = vmul.f32 %v15535_v27, %v14242_v33  ;;  %v14257_v8 = vmul.f32 %v15535_v27, %v14243_v17  ;;  %v14258_v45 = vmul.f32 %v15535_v27, %v14244_v60  ;;  %v14265_v22 = vadd.f32 %v15536_v31, %v14251_v21  ;;  %v18181_v27 = vld [vmem:[%s22268_s24] sm:$0xff]  }
0x2b97   : > { %v14266_v15 = vadd.f32 %v15536_v31, %v14252_v19  ;;  %v14267_v26 = vadd.f32 %v15536_v31, %v14253_v11  ;;  %v14268_v56 = vadd.f32 %v15536_v31, %v14254_v51  ;;  %v14269_v3 = vadd.f32 %v15536_v31, %v14255_v6  ;;  %17860 = vmatpush3.bf16.msra.mxu1 %v18181_v27  ;;  %p18593_p2 = por %p18592_p1, %p18591_p0 }
0x2b98   : > { %v14270_v4 = vadd.f32 %v15536_v31, %v14256_v32  ;;  %v14271_v54 = vadd.f32 %v15536_v31, %v14257_v8  ;;  %v14272_v37 = vadd.f32 %v15536_v31, %v14258_v45  ;;  %v14273_v62 = vpack.c.bf16 %v14265_v22, %v14265_v22 }
0x2b99   : > { %v14274_v49 = vpack.c.bf16 %v14266_v15, %v14266_v15  ;;  %v14275_v23 = vpack.c.bf16 %v14267_v26, %v14267_v26  ;;  %v14276_v28 = vpack.c.bf16 %v14268_v56, %v14268_v56  ;;  %v14277_v53 = vpack.c.bf16 %v14269_v3, %v14269_v3  ;;  %p18594_p3 = pnand %p18593_p2, %p18587_p13 }
0x2b9a   : > { %v14278_v13 = vpack.c.bf16 %v14270_v4, %v14270_v4  ;;  %v14279_v44 = vpack.c.bf16 %v14271_v54, %v14271_v54  ;;  %v14280_v43 = vpack.c.bf16 %v14272_v37, %v14272_v37  ;;  %v14305_v30 = vunpack.c.l.b16 %v14273_v62 }
0x2b9b   : > { %v14306_v7 = vunpack.c.l.b16 %v14274_v49  ;;  %v14307_v61 = vunpack.c.l.b16 %v14275_v23  ;;  %v14308_v63 = vunpack.c.l.b16 %v14276_v28  ;;  %v14309_v34 = vunpack.c.l.b16 %v14277_v53 }
0x2b9c   : > { %v14310_v20 = vunpack.c.l.b16 %v14278_v13  ;;  %v14311_v47 = vunpack.c.l.b16 %v14279_v44  ;;  %v14312_v36 = vunpack.c.l.b16 %v14280_v43 }
0x2b9d   : > { %v14313_v0 = vrot.slane %v14306_v7, 7  ;;  %v14315_v2 = vrot.slane %v14307_v61, 6  ;;  %v14317_v52 = vrot.slane %v14308_v63, 5  ;;  %v14319_v57 = vrot.slane %v14309_v34, 4 }
0x2b9e   : > { %v14321_v38 = vrot.slane %v14310_v20, 3  ;;  %v14323_v46 = vrot.slane %v14311_v47, 2  ;;  %v14325_v12 = vrot.slane %v14312_v36, 1 }
0x2b9f   : > { %v14314_v39 = vsel %vm14129_vm5, %v14313_v0, %v14305_v30 }
0x2ba0   : > { %v14316_v24 = vsel %vm14132_vm6, %v14315_v2, %v14314_v39 }
0x2ba1   : > { %v14318_v41 = vsel %vm14135_vm7, %v14317_v52, %v14316_v24 }
0x2ba2   : > { %v14320_v18 = vsel %vm14138_vm8, %v14319_v57, %v14318_v41 }
0x2ba3   : > { %v14322_v1 = vsel %vm14141_vm9, %v14321_v38, %v14320_v18 }
0x2ba4   : > { %v14324_v58 = vsel %vm14144_vm10, %v14323_v46, %v14322_v1 }
0x2ba5   : > { %v14326_v14 = vsel %vm14147_vm11, %v14325_v12, %v14324_v58 }
0x2ba6   : > { %v14327_v16 = vpack.c.b16 %v14326_v14, %v14326_v14 }
0x2ba8   : > { %17842 = vmatmul.mubr.bf16.vlgmr.msra.gmra.mxu0 %v14327_v16 }
0x2c68   : > { %v14411_v55 = vpop.f32.mrf.mxu0 }
0x2c69   : > { %v14417_v50 = vpack.c.bf16 %v14411_v55, %v14411_v55 }
0x2c6a   : > { %v17843_v59 = vpop.f32.mrf.mxu0 }
0x2c6b   : > { %17862 = vmatmul.mubr.bf16.vlgmr.msra.gmra.mxu1 %v14417_v50 }
0x2c6c   : > { %v14414_v10 = vpop.f32.mrf.mxu0 }
0x2c6e   : > { %v17844_v5 = vpop.f32.mrf.mxu0 }
0x2d2b   : > { %v14523_v40 = vpop.f32.mrf.mxu1 }
0x2d2c   : > { %v14524_v25 = vadd.f32 %v15545_v48, %v14523_v40 }
0x2d2d   : > { %v17863_v31 = vpop.f32.mrf.mxu1 }
0x2d2e   : > { %14529 = vst [vmem:[%s787_s0] sm:$0xff] %v14524_v25 }
0x2d2f   : > { %v14526_v35 = vpop.f32.mrf.mxu1 }
0x2d30   : > { %18597 = shalt.err (!%p18594_p3)
}
0x2d31   : > { %s18598_s0 = scalar_lea.hbm %s22203_s11, 128  ;;  %s18602_s7 = scalar_lea.hbm %s22326_s10, 256 }
0x2d32   : > { %p18599_p4 = scmp.ne.s32.totalorder %s22203_s11, %s18598_s0  ;;  %p18603_p9 = scmp.lt.s32.totalorder %s22203_s11, %s22326_s10 }
0x2d33   : > { %p18604_p10 = scmp.lt.s32.totalorder %s18602_s7, %s18598_s0 }
0x2d34   : > { %p18600_p7 = pnand %p18599_p4, %p18822_p5 }
0x2d35   : > { %p18605_p11 = por %p18604_p10, %p18603_p9 }
0x2d36   : > { %p18601_p8 = pneg %p18600_p7 }
0x2d38   : > { %p18606_p12 = pnand %p18605_p11, %p18601_p8 }
0x2d3a   : > { %18609 = shalt.err (!%p18606_p12)
}
0x2d3b   : > { %17873 = dma.vmem_to_hbm [thread:$0]  (%p18822_p5), %s22205_s6, 128, %s22203_s11, %s14531_s9   ;;  %v17864_v9 = vpop.f32.mrf.mxu1 }
0x2d3c PF: > { %s22327_s27 = sld [smem:[#allocation7_spill]] }
0x2d3d   : > { %s22328_s28 = sld [smem:[#allocation5_spill]] }
0x2d42   : > { %p17879_p13 = scmp.ge.s32.totalorder %s22327_s27, 2 }
0x2d43   : > { %s14556_s5 = sand.u32 1, %s22328_s28  }
0x2d44   : > { %p17876_p0 = pnand %p17879_p13, %p18826_p6  ;;  %s14557_s1 = scalar_lea.sflag [#allocation3], %s14556_s5 }
0x2d46   : > { %p17877_p1 = pneg %p17876_p0 }
0x2d48   : > { %18627 = dma.done.wait (%p17877_p1), %s14557_s1, 128  }
0x2d49   : > { %18629 = vsyncadd (%p17877_p1), %s14557_s1, 4294967168  ;;  %s22330_s28 = sld [smem:[#allocation8_spill]]  ;;  %s22333_s27 = smov %s18636_s3 }
0x2d4a   : > { %s22331_s0 = sld [smem:[#allocation6_spill]] }
0x2d4b   : > { %s22332_s7 = sld [smem:[#allocation9_spill]] }
0x2d4f   : > { %p36_p2 = scmp.ge.s32.totalorder %s22330_s28, 4  }
0x2d50   : > { %s22334_s3 = smov %s22331_s0 }
0x2d51   :  { %38 = sbr.rel (!%p36_p2) target bundleno = 18 (0x12), region = 217 }
0x2d56   :  { %14562 = vsyncpa [#allocation3], 1 }
0x2d57   :  { %14564 = vsyncpa [#allocation3 + $0x1], 1 }

</bundles_post_ra>
